<compile_context>
chip_gen: v5e
topology: v5e:2x2
jax: 0.10.0
libtpu: 0.0.40
codegen_flags: <defaults>
</compile_context>

<pallas_src>
import jax
import jax.numpy as jnp
from jax.experimental import pallas as pl
from jax.experimental.pallas import tpu as pltpu

LANE = 128  # lane-dense width for the padded classifier output


# ----------------------------------------------------------------------------
# Fused forward kernel
# ----------------------------------------------------------------------------
def _fused_forward_kernel(xpad_ref, cw1_ref, cb1_ref, cw2_ref, cb2_ref,
                          w1_ref, b1_ref, w2_ref, b2_ref, w3_ref, b3_ref,
                          o_ref, s1_ref, s2_ref, s3_ref, s4_ref):
    N, HP, WP, CIN = xpad_ref.shape            # spatially padded NHWC input
    H, W = HP - 2, WP - 2
    C1 = cw1_ref.shape[-1]
    C2 = cw2_ref.shape[-1]
    HID = w1_ref.shape[-1]
    HH, WH = H // 2, W // 2                    # after pool1
    HQ, WQ = HH // 2, WH // 2                  # after pool2

    # ---- conv1: 3x3, stride 1, pad 1, + ReLU as 9 shifted-tap MXU dots -----
    # (im2col stays in VMEM; no 9x duplicated activation tensor in HBM.)
    acc = jnp.zeros((N * H * W, C1), jnp.float32)
    for dh in range(3):
        for dw in range(3):
            tap = xpad_ref[:, dh:dh + H, dw:dw + W, :]            # (N,H,W,CIN) f32
            tap = tap.reshape(N * H * W, CIN).astype(jnp.bfloat16)
            acc = acc + jnp.dot(tap, cw1_ref[dh * 3 + dw],
                                preferred_element_type=jnp.float32)
    s1_ref[...] = jnp.maximum(acc + cb1_ref[...], 0.0).reshape(N, H, W, C1)

    # ---- maxpool 2x2 via strided VMEM reads --------------------------------
    p00 = s1_ref[:, pl.ds(0, HH, 2), pl.ds(0, WH, 2), :]
    p01 = s1_ref[:, pl.ds(0, HH, 2), pl.ds(1, WH, 2), :]
    p10 = s1_ref[:, pl.ds(1, HH, 2), pl.ds(0, WH, 2), :]
    p11 = s1_ref[:, pl.ds(1, HH, 2), pl.ds(1, WH, 2), :]
    pool1 = jnp.maximum(jnp.maximum(p00, p01), jnp.maximum(p10, p11))

    # ---- zero-pad the pooled activations in VMEM for conv2 -----------------
    s2_ref[...] = jnp.zeros(s2_ref.shape, s2_ref.dtype)
    s2_ref[:, 1:HH + 1, 1:WH + 1, :] = pool1

    # ---- conv2: 3x3, stride 1, pad 1, + ReLU -------------------------------
    acc = jnp.zeros((N * HH * WH, C2), jnp.float32)
    for dh in range(3):
        for dw in range(3):
            tap = s2_ref[:, dh:dh + HH, dw:dw + WH, :]            # (N,HH,WH,C1) f32
            tap = tap.reshape(N * HH * WH, C1).astype(jnp.bfloat16)
            acc = acc + jnp.dot(tap, cw2_ref[dh * 3 + dw],
                                preferred_element_type=jnp.float32)
    s3_ref[...] = jnp.maximum(acc + cb2_ref[...], 0.0).reshape(N, HH, WH, C2)

    # ---- maxpool 2x2 --------------------------------------------------------
    q00 = s3_ref[:, pl.ds(0, HQ, 2), pl.ds(0, WQ, 2), :]
    q01 = s3_ref[:, pl.ds(0, HQ, 2), pl.ds(1, WQ, 2), :]
    q10 = s3_ref[:, pl.ds(1, HQ, 2), pl.ds(0, WQ, 2), :]
    q11 = s3_ref[:, pl.ds(1, HQ, 2), pl.ds(1, WQ, 2), :]
    s4_ref[...] = jnp.maximum(jnp.maximum(q00, q01), jnp.maximum(q10, q11))

    # ---- classifier (Dropout == identity in eval mode) ----------------------
    # Layer 1: the PyTorch channel-major flatten is folded into w1 (rows are
    # pre-permuted per spatial position at pack time), so we accumulate one
    # (N,C2)x(C2,HID) dot per pooled spatial position straight from NHWC data.
    acc = jnp.zeros((N, HID), jnp.float32)
    for hq in range(HQ):
        for wq in range(WQ):
            xc = s4_ref[:, hq, wq, :].astype(jnp.bfloat16)        # (N, C2)
            acc = acc + jnp.dot(xc, w1_ref[hq * WQ + wq],
                                preferred_element_type=jnp.float32)
    h = jnp.maximum(acc + b1_ref[...], 0.0)
    h = jnp.dot(h.astype(jnp.bfloat16), w2_ref[...],
                preferred_element_type=jnp.float32) + b2_ref[...]
    h = jnp.maximum(h, 0.0)
    # Lane-dense (N, 128) store; w3/b3 are zero-padded past num_classes.
    o_ref[...] = jnp.dot(h.astype(jnp.bfloat16), w3_ref[...],
                         preferred_element_type=jnp.float32) + b3_ref[...]


# ----------------------------------------------------------------------------
# Wrapper
# ----------------------------------------------------------------------------
def fine_tune_model_forward(x_nchw, kp, num_classes):
    """Mirrors FineTuneModel.forward: features -> flatten -> classifier."""
    N, CIN, H, W = x_nchw.shape
    # NCHW -> NHWC + spatial pad-1 (cheap one-time glue; input stays f32 so the
    # unaligned in-kernel tap slices operate on f32 tiles; MXU operands are
    # cast to bf16 inside the kernel).
    x = jnp.transpose(x_nchw, (0, 2, 3, 1)).astype(jnp.float32)
    xpad = jnp.pad(x, ((0, 0), (1, 1), (1, 1), (0, 0)))

    C1 = kp["cw1"].shape[-1]
    C2 = kp["cw2"].shape[-1]
    HH, WH = H // 2, W // 2
    HQ, WQ = HH // 2, WH // 2

    def full(shape):
        return pl.BlockSpec(tuple(shape), lambda i, _r=len(shape): (0,) * _r)

    out = pl.pallas_call(
        _fused_forward_kernel,
        out_shape=jax.ShapeDtypeStruct((N, LANE), jnp.float32),
        grid=(1,),
        in_specs=[
            full(xpad.shape),
            full(kp["cw1"].shape), full(kp["cb1"].shape),
            full(kp["cw2"].shape), full(kp["cb2"].shape),
            full(kp["w1"].shape), full(kp["b1"].shape),
            full(kp["w2"].shape), full(kp["b2"].shape),
            full(kp["w3"].shape), full(kp["b3"].shape),
        ],
        out_specs=full((N, LANE)),
        scratch_shapes=[
            pltpu.VMEM((N, H, W, C1), jnp.float32),           # conv1 output
            pltpu.VMEM((N, HH + 2, WH + 2, C1), jnp.float32),  # padded pool1
            pltpu.VMEM((N, HH, WH, C2), jnp.float32),          # conv2 output
            pltpu.VMEM((N, HQ, WQ, C2), jnp.float32),          # pool2
        ],
        # TODO(synk): at larger batch / real VGG sizes, tile M over a "parallel"
        # grid axis (v7x megacore) and K-tile the classifier with an f32 VMEM
        # accumulator sized for 64 MiB VMEM; at these toy sizes grid=(1,) is best.
        compiler_params=pltpu.CompilerParams(
            dimension_semantics=("arbitrary",)),
    )(xpad, kp["cw1"], kp["cb1"], kp["cw2"], kp["cb2"],
      kp["w1"], kp["b1"], kp["w2"], kp["b2"], kp["w3"], kp["b3"])
    return out[:, :num_classes]


# ----------------------------------------------------------------------------
# Parameters (PyTorch-convention master params + one-time kernel packing)
# ----------------------------------------------------------------------------
def init_params(key, cin, num_classes):
    ks = jax.random.split(key, 10)
    s = lambda fan_in: 1.0 / jnp.sqrt(fan_in)
    p = {}
    # frozen "features": conv(cin->8)+relu+pool, conv(8->16)+relu+pool
    p["cw1"] = jax.random.normal(ks[0], (3, 3, cin, 8), jnp.float32) * s(9 * cin)
    p["cb1"] = jax.random.normal(ks[1], (8,), jnp.float32) * 0.01
    p["cw2"] = jax.random.normal(ks[2], (3, 3, 8, 16), jnp.float32) * s(9 * 8)
    p["cb2"] = jax.random.normal(ks[3], (16,), jnp.float32) * 0.01
    # classifier (scaled-down Linear(25088,4096)/(4096,4096)/(4096,C)); w1 rows
    # are in PyTorch channel-major flatten order f = c*(4*4) + h*4 + w.
    F, HID = 16 * 4 * 4, 128
    p["w1"] = jax.random.normal(ks[4], (F, HID), jnp.float32) * s(F)
    p["b1"] = jax.random.normal(ks[5], (HID,), jnp.float32) * 0.01
    p["w2"] = jax.random.normal(ks[6], (HID, HID), jnp.float32) * s(HID)
    p["b2"] = jax.random.normal(ks[7], (HID,), jnp.float32) * 0.01
    p["w3"] = jax.random.normal(ks[8], (HID, num_classes), jnp.float32) * s(HID)
    p["b3"] = jax.random.normal(ks[9], (num_classes,), jnp.float32) * 0.01
    return p


def pack_params(p, num_classes):
    """One-time conversion to kernel layout: tap-major bf16 conv weights,
    flatten-permuted w1, lane-padded (128) w3/b3, f32 biases."""
    bf16 = jnp.bfloat16
    C2, HQ, WQ = p["cw2"].shape[-1], 4, 4
    HID = p["w2"].shape[0]
    kp = {}
    kp["cw1"] = p["cw1"].reshape(9, p["cw1"].shape[2], p["cw1"].shape[3]).astype(bf16)
    kp["cb1"] = p["cb1"].reshape(1, -1).astype(jnp.float32)
    kp["cw2"] = p["cw2"].reshape(9, p["cw2"].shape[2], p["cw2"].shape[3]).astype(bf16)
    kp["cb2"] = p["cb2"].reshape(1, -1).astype(jnp.float32)
    # w1 rows: f = c*(HQ*WQ) + hq*WQ + wq  ->  w1r[hq*WQ+wq, c, :]
    w1r = p["w1"].reshape(C2, HQ * WQ, HID).transpose(1, 0, 2)
    kp["w1"] = w1r.astype(bf16)
    kp["b1"] = p["b1"].reshape(1, -1).astype(jnp.float32)
    kp["w2"] = p["w2"].astype(bf16)
    kp["b2"] = p["b2"].reshape(1, -1).astype(jnp.float32)
    w3p = jnp.zeros((HID, LANE), jnp.float32).at[:, :num_classes].set(p["w3"])
    b3p = jnp.zeros((1, LANE), jnp.float32).at[0, :num_classes].set(p["b3"])
    kp["w3"] = w3p.astype(bf16)
    kp["b3"] = b3p
    return kp


# ----------------------------------------------------------------------------
# Pure-JAX reference (mirrors the kernel's bf16 MXU / f32 accumulate recipe)
# ----------------------------------------------------------------------------
def _reference_forward(x_nchw, p):
    f32, bf16 = jnp.float32, jnp.bfloat16
    x = jnp.transpose(x_nchw, (0, 2, 3, 1)).astype(f32)
    for w, b in ((p["cw1"], p["cb1"]), (p["cw2"], p["cb2"])):
        y = jax.lax.conv_general_dilated(
            x.astype(bf16), w.astype(bf16), (1, 1), "SAME",
            dimension_numbers=("NHWC", "HWIO", "NHWC"),
            preferred_element_type=f32)
        y = jnp.maximum(y + b, 0.0)
        n, hh, ww, c = y.shape
        x = y.reshape(n, hh // 2, 2, ww // 2, 2, c).max(axis=(2, 4))
    # PyTorch channel-major flatten: x.view(N, -1) on NCHW
    x = jnp.transpose(x, (0, 3, 1, 2)).reshape(x.shape[0], -1)
    mm = lambda a, w: jnp.dot(a.astype(bf16), w.astype(bf16),
                              preferred_element_type=f32)
    h = jnp.maximum(mm(x, p["w1"]) + p["b1"], 0.0)
    h = jnp.maximum(mm(h, p["w2"]) + p["b2"], 0.0)
    return mm(h, p["w3"]) + p["b3"]


if __name__ == "__main__":
    # TODO(synk): training-mode Dropout (random masking) not implemented; this
    #             is the eval-mode forward where Dropout == identity.
    key = jax.random.PRNGKey(0)
    k_x, k_p = jax.random.split(key)
    batch, cin, hw, num_classes = 2, 4, 16, 2
    x = jax.random.normal(k_x, (batch, cin, hw, hw), jnp.float32)   # NCHW like PyTorch
    params = init_params(k_p, cin, num_classes)
    kparams = pack_params(params, num_classes)

    out = jax.block_until_ready(fine_tune_model_forward(x, kparams, num_classes))
    ref = jax.block_until_ready(_reference_forward(x, params))

    assert out.shape == (batch, num_classes)
    assert jnp.allclose(out, ref, atol=2e-2, rtol=2e-2), (out, ref)
    print("KERNEL_OK")
</pallas_src>

<mosaic_0001>
module attributes {stable_mosaic.version = 11 : i64} {
  func.func @_fused_forward_kernel(%arg0: i32, %arg1: memref<2x18x18x4xf32, #tpu.memory_space<vmem>>, %arg2: memref<9x4x8xbf16, #tpu.memory_space<vmem>>, %arg3: memref<1x8xf32, #tpu.memory_space<vmem>>, %arg4: memref<9x8x16xbf16, #tpu.memory_space<vmem>>, %arg5: memref<1x16xf32, #tpu.memory_space<vmem>>, %arg6: memref<16x16x128xbf16, #tpu.memory_space<vmem>>, %arg7: memref<1x128xf32, #tpu.memory_space<vmem>>, %arg8: memref<128x128xbf16, #tpu.memory_space<vmem>>, %arg9: memref<1x128xf32, #tpu.memory_space<vmem>>, %arg10: memref<128x128xbf16, #tpu.memory_space<vmem>>, %arg11: memref<1x128xf32, #tpu.memory_space<vmem>>, %arg12: memref<2x128xf32, #tpu.memory_space<vmem>>, %arg13: memref<2x16x16x8xf32, #tpu.memory_space<vmem>>, %arg14: memref<2x10x10x8xf32, #tpu.memory_space<vmem>>, %arg15: memref<2x8x8x16xf32, #tpu.memory_space<vmem>>, %arg16: memref<2x4x4x16xf32, #tpu.memory_space<vmem>>) attributes {dimension_semantics = [#tpu.dimension_semantics<arbitrary>], iteration_bounds = array<i64: 1>, scalar_prefetch = 0 : i64, scratch_operands = 4 : i64, tpu.core_type = #tpu.core_type<tc>, window_params = [{pipeline_mode = #tpu.pipeline_mode<synchronous>, transform_indices = @transform_0, window_bounds = array<i64: 2, 18, 18, 4>}, {pipeline_mode = #tpu.pipeline_mode<synchronous>, transform_indices = @transform_1, window_bounds = array<i64: 9, 4, 8>}, {pipeline_mode = #tpu.pipeline_mode<synchronous>, transform_indices = @transform_2, window_bounds = array<i64: 1, 8>}, {pipeline_mode = #tpu.pipeline_mode<synchronous>, transform_indices = @transform_3, window_bounds = array<i64: 9, 8, 16>}, {pipeline_mode = #tpu.pipeline_mode<synchronous>, transform_indices = @transform_4, window_bounds = array<i64: 1, 16>}, {pipeline_mode = #tpu.pipeline_mode<synchronous>, transform_indices = @transform_5, window_bounds = array<i64: 16, 16, 128>}, {pipeline_mode = #tpu.pipeline_mode<synchronous>, transform_indices = @transform_6, window_bounds = array<i64: 1, 128>}, {pipeline_mode = #tpu.pipeline_mode<synchronous>, transform_indices = @transform_7, window_bounds = array<i64: 128, 128>}, {pipeline_mode = #tpu.pipeline_mode<synchronous>, transform_indices = @transform_8, window_bounds = array<i64: 1, 128>}, {pipeline_mode = #tpu.pipeline_mode<synchronous>, transform_indices = @transform_9, window_bounds = array<i64: 128, 128>}, {pipeline_mode = #tpu.pipeline_mode<synchronous>, transform_indices = @transform_10, window_bounds = array<i64: 1, 128>}, {pipeline_mode = #tpu.pipeline_mode<synchronous>, transform_indices = @transform_11, window_bounds = array<i64: 2, 128>}]} {
    %cst = arith.constant 0.000000e+00 : f32
    %0 = vector.broadcast %cst : f32 to vector<512x8xf32>
    %c0 = arith.constant 0 : index
    %c0_0 = arith.constant 0 : index
    %c0_1 = arith.constant 0 : index
    %c0_2 = arith.constant 0 : index
    %1 = vector.load %arg1[%c0, %c0_0, %c0_1, %c0_2] : memref<2x18x18x4xf32, #tpu.memory_space<vmem>>, vector<2x16x16x4xf32>
    %2 = vector.shape_cast %1 : vector<2x16x16x4xf32> to vector<512x4xf32>
    %3 = arith.truncf %2 : vector<512x4xf32> to vector<512x4xbf16>
    %c0_3 = arith.constant 0 : index
    %c0_4 = arith.constant 0 : index
    %c0_5 = arith.constant 0 : index
    %4 = vector.load %arg2[%c0_3, %c0_4, %c0_5] : memref<9x4x8xbf16, #tpu.memory_space<vmem>>, vector<1x4x8xbf16>
    %5 = vector.shape_cast %4 : vector<1x4x8xbf16> to vector<4x8xbf16>
    %cst_6 = arith.constant dense<0.000000e+00> : vector<512x8xf32>
    %6 = tpu.matmul %3, %5, %cst_6 {dimension_numbers = #tpu.dot_dimension_numbers<[1], [0], [0], [1], [0, 0, 1, 1], [], []>} : vector<512x4xbf16>, vector<4x8xbf16>, vector<512x8xf32> -> vector<512x8xf32>
    %7 = arith.addf %0, %6 : vector<512x8xf32>
    %c0_7 = arith.constant 0 : index
    %c0_8 = arith.constant 0 : index
    %c1 = arith.constant 1 : index
    %c0_9 = arith.constant 0 : index
    %8 = vector.load %arg1[%c0_7, %c0_8, %c1, %c0_9] : memref<2x18x18x4xf32, #tpu.memory_space<vmem>>, vector<2x16x16x4xf32>
    %9 = vector.shape_cast %8 : vector<2x16x16x4xf32> to vector<512x4xf32>
    %10 = arith.truncf %9 : vector<512x4xf32> to vector<512x4xbf16>
    %c1_10 = arith.constant 1 : index
    %c0_11 = arith.constant 0 : index
    %c0_12 = arith.constant 0 : index
    %11 = vector.load %arg2[%c1_10, %c0_11, %c0_12] : memref<9x4x8xbf16, #tpu.memory_space<vmem>>, vector<1x4x8xbf16>
    %12 = vector.shape_cast %11 : vector<1x4x8xbf16> to vector<4x8xbf16>
    %cst_13 = arith.constant dense<0.000000e+00> : vector<512x8xf32>
    %13 = tpu.matmul %10, %12, %cst_13 {dimension_numbers = #tpu.dot_dimension_numbers<[1], [0], [0], [1], [0, 0, 1, 1], [], []>} : vector<512x4xbf16>, vector<4x8xbf16>, vector<512x8xf32> -> vector<512x8xf32>
    %14 = arith.addf %7, %13 : vector<512x8xf32>
    %c0_14 = arith.constant 0 : index
    %c0_15 = arith.constant 0 : index
    %c2 = arith.constant 2 : index
    %c0_16 = arith.constant 0 : index
    %15 = vector.load %arg1[%c0_14, %c0_15, %c2, %c0_16] : memref<2x18x18x4xf32, #tpu.memory_space<vmem>>, vector<2x16x16x4xf32>
    %16 = vector.shape_cast %15 : vector<2x16x16x4xf32> to vector<512x4xf32>
    %17 = arith.truncf %16 : vector<512x4xf32> to vector<512x4xbf16>
    %c2_17 = arith.constant 2 : index
    %c0_18 = arith.constant 0 : index
    %c0_19 = arith.constant 0 : index
    %18 = vector.load %arg2[%c2_17, %c0_18, %c0_19] : memref<9x4x8xbf16, #tpu.memory_space<vmem>>, vector<1x4x8xbf16>
    %19 = vector.shape_cast %18 : vector<1x4x8xbf16> to vector<4x8xbf16>
    %cst_20 = arith.constant dense<0.000000e+00> : vector<512x8xf32>
    %20 = tpu.matmul %17, %19, %cst_20 {dimension_numbers = #tpu.dot_dimension_numbers<[1], [0], [0], [1], [0, 0, 1, 1], [], []>} : vector<512x4xbf16>, vector<4x8xbf16>, vector<512x8xf32> -> vector<512x8xf32>
    %21 = arith.addf %14, %20 : vector<512x8xf32>
    %c0_21 = arith.constant 0 : index
    %c1_22 = arith.constant 1 : index
    %c0_23 = arith.constant 0 : index
    %c0_24 = arith.constant 0 : index
    %22 = vector.load %arg1[%c0_21, %c1_22, %c0_23, %c0_24] : memref<2x18x18x4xf32, #tpu.memory_space<vmem>>, vector<2x16x16x4xf32>
    %23 = vector.shape_cast %22 : vector<2x16x16x4xf32> to vector<512x4xf32>
    %24 = arith.truncf %23 : vector<512x4xf32> to vector<512x4xbf16>
    %c3 = arith.constant 3 : index
    %c0_25 = arith.constant 0 : index
    %c0_26 = arith.constant 0 : index
    %25 = vector.load %arg2[%c3, %c0_25, %c0_26] : memref<9x4x8xbf16, #tpu.memory_space<vmem>>, vector<1x4x8xbf16>
    %26 = vector.shape_cast %25 : vector<1x4x8xbf16> to vector<4x8xbf16>
    %cst_27 = arith.constant dense<0.000000e+00> : vector<512x8xf32>
    %27 = tpu.matmul %24, %26, %cst_27 {dimension_numbers = #tpu.dot_dimension_numbers<[1], [0], [0], [1], [0, 0, 1, 1], [], []>} : vector<512x4xbf16>, vector<4x8xbf16>, vector<512x8xf32> -> vector<512x8xf32>
    %28 = arith.addf %21, %27 : vector<512x8xf32>
    %c0_28 = arith.constant 0 : index
    %c1_29 = arith.constant 1 : index
    %c1_30 = arith.constant 1 : index
    %c0_31 = arith.constant 0 : index
    %29 = vector.load %arg1[%c0_28, %c1_29, %c1_30, %c0_31] : memref<2x18x18x4xf32, #tpu.memory_space<vmem>>, vector<2x16x16x4xf32>
    %30 = vector.shape_cast %29 : vector<2x16x16x4xf32> to vector<512x4xf32>
    %31 = arith.truncf %30 : vector<512x4xf32> to vector<512x4xbf16>
    %c4 = arith.constant 4 : index
    %c0_32 = arith.constant 0 : index
    %c0_33 = arith.constant 0 : index
    %32 = vector.load %arg2[%c4, %c0_32, %c0_33] : memref<9x4x8xbf16, #tpu.memory_space<vmem>>, vector<1x4x8xbf16>
    %33 = vector.shape_cast %32 : vector<1x4x8xbf16> to vector<4x8xbf16>
    %cst_34 = arith.constant dense<0.000000e+00> : vector<512x8xf32>
    %34 = tpu.matmul %31, %33, %cst_34 {dimension_numbers = #tpu.dot_dimension_numbers<[1], [0], [0], [1], [0, 0, 1, 1], [], []>} : vector<512x4xbf16>, vector<4x8xbf16>, vector<512x8xf32> -> vector<512x8xf32>
    %35 = arith.addf %28, %34 : vector<512x8xf32>
    %c0_35 = arith.constant 0 : index
    %c1_36 = arith.constant 1 : index
    %c2_37 = arith.constant 2 : index
    %c0_38 = arith.constant 0 : index
    %36 = vector.load %arg1[%c0_35, %c1_36, %c2_37, %c0_38] : memref<2x18x18x4xf32, #tpu.memory_space<vmem>>, vector<2x16x16x4xf32>
    %37 = vector.shape_cast %36 : vector<2x16x16x4xf32> to vector<512x4xf32>
    %38 = arith.truncf %37 : vector<512x4xf32> to vector<512x4xbf16>
    %c5 = arith.constant 5 : index
    %c0_39 = arith.constant 0 : index
    %c0_40 = arith.constant 0 : index
    %39 = vector.load %arg2[%c5, %c0_39, %c0_40] : memref<9x4x8xbf16, #tpu.memory_space<vmem>>, vector<1x4x8xbf16>
    %40 = vector.shape_cast %39 : vector<1x4x8xbf16> to vector<4x8xbf16>
    %cst_41 = arith.constant dense<0.000000e+00> : vector<512x8xf32>
    %41 = tpu.matmul %38, %40, %cst_41 {dimension_numbers = #tpu.dot_dimension_numbers<[1], [0], [0], [1], [0, 0, 1, 1], [], []>} : vector<512x4xbf16>, vector<4x8xbf16>, vector<512x8xf32> -> vector<512x8xf32>
    %42 = arith.addf %35, %41 : vector<512x8xf32>
    %c0_42 = arith.constant 0 : index
    %c2_43 = arith.constant 2 : index
    %c0_44 = arith.constant 0 : index
    %c0_45 = arith.constant 0 : index
    %43 = vector.load %arg1[%c0_42, %c2_43, %c0_44, %c0_45] : memref<2x18x18x4xf32, #tpu.memory_space<vmem>>, vector<2x16x16x4xf32>
    %44 = vector.shape_cast %43 : vector<2x16x16x4xf32> to vector<512x4xf32>
    %45 = arith.truncf %44 : vector<512x4xf32> to vector<512x4xbf16>
    %c6 = arith.constant 6 : index
    %c0_46 = arith.constant 0 : index
    %c0_47 = arith.constant 0 : index
    %46 = vector.load %arg2[%c6, %c0_46, %c0_47] : memref<9x4x8xbf16, #tpu.memory_space<vmem>>, vector<1x4x8xbf16>
    %47 = vector.shape_cast %46 : vector<1x4x8xbf16> to vector<4x8xbf16>
    %cst_48 = arith.constant dense<0.000000e+00> : vector<512x8xf32>
    %48 = tpu.matmul %45, %47, %cst_48 {dimension_numbers = #tpu.dot_dimension_numbers<[1], [0], [0], [1], [0, 0, 1, 1], [], []>} : vector<512x4xbf16>, vector<4x8xbf16>, vector<512x8xf32> -> vector<512x8xf32>
    %49 = arith.addf %42, %48 : vector<512x8xf32>
    %c0_49 = arith.constant 0 : index
    %c2_50 = arith.constant 2 : index
    %c1_51 = arith.constant 1 : index
    %c0_52 = arith.constant 0 : index
    %50 = vector.load %arg1[%c0_49, %c2_50, %c1_51, %c0_52] : memref<2x18x18x4xf32, #tpu.memory_space<vmem>>, vector<2x16x16x4xf32>
    %51 = vector.shape_cast %50 : vector<2x16x16x4xf32> to vector<512x4xf32>
    %52 = arith.truncf %51 : vector<512x4xf32> to vector<512x4xbf16>
    %c7 = arith.constant 7 : index
    %c0_53 = arith.constant 0 : index
    %c0_54 = arith.constant 0 : index
    %53 = vector.load %arg2[%c7, %c0_53, %c0_54] : memref<9x4x8xbf16, #tpu.memory_space<vmem>>, vector<1x4x8xbf16>
    %54 = vector.shape_cast %53 : vector<1x4x8xbf16> to vector<4x8xbf16>
    %cst_55 = arith.constant dense<0.000000e+00> : vector<512x8xf32>
    %55 = tpu.matmul %52, %54, %cst_55 {dimension_numbers = #tpu.dot_dimension_numbers<[1], [0], [0], [1], [0, 0, 1, 1], [], []>} : vector<512x4xbf16>, vector<4x8xbf16>, vector<512x8xf32> -> vector<512x8xf32>
    %56 = arith.addf %49, %55 : vector<512x8xf32>
    %c0_56 = arith.constant 0 : index
    %c2_57 = arith.constant 2 : index
    %c2_58 = arith.constant 2 : index
    %c0_59 = arith.constant 0 : index
    %57 = vector.load %arg1[%c0_56, %c2_57, %c2_58, %c0_59] : memref<2x18x18x4xf32, #tpu.memory_space<vmem>>, vector<2x16x16x4xf32>
    %58 = vector.shape_cast %57 : vector<2x16x16x4xf32> to vector<512x4xf32>
    %59 = arith.truncf %58 : vector<512x4xf32> to vector<512x4xbf16>
    %c8 = arith.constant 8 : index
    %c0_60 = arith.constant 0 : index
    %c0_61 = arith.constant 0 : index
    %60 = vector.load %arg2[%c8, %c0_60, %c0_61] : memref<9x4x8xbf16, #tpu.memory_space<vmem>>, vector<1x4x8xbf16>
    %61 = vector.shape_cast %60 : vector<1x4x8xbf16> to vector<4x8xbf16>
    %cst_62 = arith.constant dense<0.000000e+00> : vector<512x8xf32>
    %62 = tpu.matmul %59, %61, %cst_62 {dimension_numbers = #tpu.dot_dimension_numbers<[1], [0], [0], [1], [0, 0, 1, 1], [], []>} : vector<512x4xbf16>, vector<4x8xbf16>, vector<512x8xf32> -> vector<512x8xf32>
    %63 = arith.addf %56, %62 : vector<512x8xf32>
    %c0_63 = arith.constant 0 : index
    %c0_64 = arith.constant 0 : index
    %64 = vector.load %arg3[%c0_63, %c0_64] : memref<1x8xf32, #tpu.memory_space<vmem>>, vector<1x8xf32>
    %65 = vector.broadcast %64 : vector<1x8xf32> to vector<512x8xf32>
    %66 = arith.addf %63, %65 : vector<512x8xf32>
    %cst_65 = arith.constant 0.000000e+00 : f32
    %67 = vector.broadcast %cst_65 : f32 to vector<512x8xf32>
    %68 = arith.maximumf %66, %67 : vector<512x8xf32>
    %69 = vector.shape_cast %68 : vector<512x8xf32> to vector<2x16x16x8xf32>
    %c0_66 = arith.constant 0 : index
    %c0_67 = arith.constant 0 : index
    %c0_68 = arith.constant 0 : index
    %c0_69 = arith.constant 0 : index
    %70 = vector.load %arg13[%c0_66, %c0_67, %c0_68, %c0_69] : memref<2x16x16x8xf32, #tpu.memory_space<vmem>>, vector<2x16x16x8xf32>
    tpu.vector_store %arg13[%c0_66, %c0_67, %c0_68, %c0_69], %69 {strides = array<i32>} : memref<2x16x16x8xf32, #tpu.memory_space<vmem>>, vector<2x16x16x8xf32>,
    %c0_70 = arith.constant 0 : index
    %c0_71 = arith.constant 0 : index
    %c0_72 = arith.constant 0 : index
    %c0_73 = arith.constant 0 : index
    %71 = tpu.strided_load %arg13[%c0_70, %c0_71, %c0_72, %c0_73] {strides = array<i32: 1, 2, 2, 1>} : memref<2x16x16x8xf32, #tpu.memory_space<vmem>>, vector<2x8x8x8xf32>
    %c0_74 = arith.constant 0 : index
    %c0_75 = arith.constant 0 : index
    %c1_76 = arith.constant 1 : index
    %c0_77 = arith.constant 0 : index
    %72 = tpu.strided_load %arg13[%c0_74, %c0_75, %c1_76, %c0_77] {strides = array<i32: 1, 2, 2, 1>} : memref<2x16x16x8xf32, #tpu.memory_space<vmem>>, vector<2x8x8x8xf32>
    %c0_78 = arith.constant 0 : index
    %c1_79 = arith.constant 1 : index
    %c0_80 = arith.constant 0 : index
    %c0_81 = arith.constant 0 : index
    %73 = tpu.strided_load %arg13[%c0_78, %c1_79, %c0_80, %c0_81] {strides = array<i32: 1, 2, 2, 1>} : memref<2x16x16x8xf32, #tpu.memory_space<vmem>>, vector<2x8x8x8xf32>
    %c0_82 = arith.constant 0 : index
    %c1_83 = arith.constant 1 : index
    %c1_84 = arith.constant 1 : index
    %c0_85 = arith.constant 0 : index
    %74 = tpu.strided_load %arg13[%c0_82, %c1_83, %c1_84, %c0_85] {strides = array<i32: 1, 2, 2, 1>} : memref<2x16x16x8xf32, #tpu.memory_space<vmem>>, vector<2x8x8x8xf32>
    %75 = arith.maximumf %71, %72 : vector<2x8x8x8xf32>
    %76 = arith.maximumf %73, %74 : vector<2x8x8x8xf32>
    %77 = arith.maximumf %75, %76 : vector<2x8x8x8xf32>
    %cst_86 = arith.constant 0.000000e+00 : f32
    %78 = vector.broadcast %cst_86 : f32 to vector<2x10x10x8xf32>
    %c0_87 = arith.constant 0 : index
    %c0_88 = arith.constant 0 : index
    %c0_89 = arith.constant 0 : index
    %c0_90 = arith.constant 0 : index
    %79 = vector.load %arg14[%c0_87, %c0_88, %c0_89, %c0_90] : memref<2x10x10x8xf32, #tpu.memory_space<vmem>>, vector<2x10x10x8xf32>
    tpu.vector_store %arg14[%c0_87, %c0_88, %c0_89, %c0_90], %78 {strides = array<i32>} : memref<2x10x10x8xf32, #tpu.memory_space<vmem>>, vector<2x10x10x8xf32>,
    %c0_91 = arith.constant 0 : index
    %c1_92 = arith.constant 1 : index
    %c1_93 = arith.constant 1 : index
    %c0_94 = arith.constant 0 : index
    %80 = vector.load %arg14[%c0_91, %c1_92, %c1_93, %c0_94] : memref<2x10x10x8xf32, #tpu.memory_space<vmem>>, vector<2x8x8x8xf32>
    tpu.vector_store %arg14[%c0_91, %c1_92, %c1_93, %c0_94], %77 {strides = array<i32>} : memref<2x10x10x8xf32, #tpu.memory_space<vmem>>, vector<2x8x8x8xf32>,
    %cst_95 = arith.constant 0.000000e+00 : f32
    %81 = vector.broadcast %cst_95 : f32 to vector<128x16xf32>
    %c0_96 = arith.constant 0 : index
    %c0_97 = arith.constant 0 : index
    %c0_98 = arith.constant 0 : index
    %c0_99 = arith.constant 0 : index
    %82 = vector.load %arg14[%c0_96, %c0_97, %c0_98, %c0_99] : memref<2x10x10x8xf32, #tpu.memory_space<vmem>>, vector<2x8x8x8xf32>
    %83 = vector.shape_cast %82 : vector<2x8x8x8xf32> to vector<128x8xf32>
    %84 = arith.truncf %83 : vector<128x8xf32> to vector<128x8xbf16>
    %c0_100 = arith.constant 0 : index
    %c0_101 = arith.constant 0 : index
    %c0_102 = arith.constant 0 : index
    %85 = vector.load %arg4[%c0_100, %c0_101, %c0_102] : memref<9x8x16xbf16, #tpu.memory_space<vmem>>, vector<1x8x16xbf16>
    %86 = vector.shape_cast %85 : vector<1x8x16xbf16> to vector<8x16xbf16>
    %cst_103 = arith.constant dense<0.000000e+00> : vector<128x16xf32>
    %87 = tpu.matmul %84, %86, %cst_103 {dimension_numbers = #tpu.dot_dimension_numbers<[1], [0], [0], [1], [0, 0, 1, 1], [], []>} : vector<128x8xbf16>, vector<8x16xbf16>, vector<128x16xf32> -> vector<128x16xf32>
    %88 = arith.addf %81, %87 : vector<128x16xf32>
    %c0_104 = arith.constant 0 : index
    %c0_105 = arith.constant 0 : index
    %c1_106 = arith.constant 1 : index
    %c0_107 = arith.constant 0 : index
    %89 = vector.load %arg14[%c0_104, %c0_105, %c1_106, %c0_107] : memref<2x10x10x8xf32, #tpu.memory_space<vmem>>, vector<2x8x8x8xf32>
    %90 = vector.shape_cast %89 : vector<2x8x8x8xf32> to vector<128x8xf32>
    %91 = arith.truncf %90 : vector<128x8xf32> to vector<128x8xbf16>
    %c1_108 = arith.constant 1 : index
    %c0_109 = arith.constant 0 : index
    %c0_110 = arith.constant 0 : index
    %92 = vector.load %arg4[%c1_108, %c0_109, %c0_110] : memref<9x8x16xbf16, #tpu.memory_space<vmem>>, vector<1x8x16xbf16>
    %93 = vector.shape_cast %92 : vector<1x8x16xbf16> to vector<8x16xbf16>
    %cst_111 = arith.constant dense<0.000000e+00> : vector<128x16xf32>
    %94 = tpu.matmul %91, %93, %cst_111 {dimension_numbers = #tpu.dot_dimension_numbers<[1], [0], [0], [1], [0, 0, 1, 1], [], []>} : vector<128x8xbf16>, vector<8x16xbf16>, vector<128x16xf32> -> vector<128x16xf32>
    %95 = arith.addf %88, %94 : vector<128x16xf32>
    %c0_112 = arith.constant 0 : index
    %c0_113 = arith.constant 0 : index
    %c2_114 = arith.constant 2 : index
    %c0_115 = arith.constant 0 : index
    %96 = vector.load %arg14[%c0_112, %c0_113, %c2_114, %c0_115] : memref<2x10x10x8xf32, #tpu.memory_space<vmem>>, vector<2x8x8x8xf32>
    %97 = vector.shape_cast %96 : vector<2x8x8x8xf32> to vector<128x8xf32>
    %98 = arith.truncf %97 : vector<128x8xf32> to vector<128x8xbf16>
    %c2_116 = arith.constant 2 : index
    %c0_117 = arith.constant 0 : index
    %c0_118 = arith.constant 0 : index
    %99 = vector.load %arg4[%c2_116, %c0_117, %c0_118] : memref<9x8x16xbf16, #tpu.memory_space<vmem>>, vector<1x8x16xbf16>
    %100 = vector.shape_cast %99 : vector<1x8x16xbf16> to vector<8x16xbf16>
    %cst_119 = arith.constant dense<0.000000e+00> : vector<128x16xf32>
    %101 = tpu.matmul %98, %100, %cst_119 {dimension_numbers = #tpu.dot_dimension_numbers<[1], [0], [0], [1], [0, 0, 1, 1], [], []>} : vector<128x8xbf16>, vector<8x16xbf16>, vector<128x16xf32> -> vector<128x16xf32>
    %102 = arith.addf %95, %101 : vector<128x16xf32>
    %c0_120 = arith.constant 0 : index
    %c1_121 = arith.constant 1 : index
    %c0_122 = arith.constant 0 : index
    %c0_123 = arith.constant 0 : index
    %103 = vector.load %arg14[%c0_120, %c1_121, %c0_122, %c0_123] : memref<2x10x10x8xf32, #tpu.memory_space<vmem>>, vector<2x8x8x8xf32>
    %104 = vector.shape_cast %103 : vector<2x8x8x8xf32> to vector<128x8xf32>
    %105 = arith.truncf %104 : vector<128x8xf32> to vector<128x8xbf16>
    %c3_124 = arith.constant 3 : index
    %c0_125 = arith.constant 0 : index
    %c0_126 = arith.constant 0 : index
    %106 = vector.load %arg4[%c3_124, %c0_125, %c0_126] : memref<9x8x16xbf16, #tpu.memory_space<vmem>>, vector<1x8x16xbf16>
    %107 = vector.shape_cast %106 : vector<1x8x16xbf16> to vector<8x16xbf16>
    %cst_127 = arith.constant dense<0.000000e+00> : vector<128x16xf32>
    %108 = tpu.matmul %105, %107, %cst_127 {dimension_numbers = #tpu.dot_dimension_numbers<[1], [0], [0], [1], [0, 0, 1, 1], [], []>} : vector<128x8xbf16>, vector<8x16xbf16>, vector<128x16xf32> -> vector<128x16xf32>
    %109 = arith.addf %102, %108 : vector<128x16xf32>
    %c0_128 = arith.constant 0 : index
    %c1_129 = arith.constant 1 : index
    %c1_130 = arith.constant 1 : index
    %c0_131 = arith.constant 0 : index
    %110 = vector.load %arg14[%c0_128, %c1_129, %c1_130, %c0_131] : memref<2x10x10x8xf32, #tpu.memory_space<vmem>>, vector<2x8x8x8xf32>
    %111 = vector.shape_cast %110 : vector<2x8x8x8xf32> to vector<128x8xf32>
    %112 = arith.truncf %111 : vector<128x8xf32> to vector<128x8xbf16>
    %c4_132 = arith.constant 4 : index
    %c0_133 = arith.constant 0 : index
    %c0_134 = arith.constant 0 : index
    %113 = vector.load %arg4[%c4_132, %c0_133, %c0_134] : memref<9x8x16xbf16, #tpu.memory_space<vmem>>, vector<1x8x16xbf16>
    %114 = vector.shape_cast %113 : vector<1x8x16xbf16> to vector<8x16xbf16>
    %cst_135 = arith.constant dense<0.000000e+00> : vector<128x16xf32>
    %115 = tpu.matmul %112, %114, %cst_135 {dimension_numbers = #tpu.dot_dimension_numbers<[1], [0], [0], [1], [0, 0, 1, 1], [], []>} : vector<128x8xbf16>, vector<8x16xbf16>, vector<128x16xf32> -> vector<128x16xf32>
    %116 = arith.addf %109, %115 : vector<128x16xf32>
    %c0_136 = arith.constant 0 : index
    %c1_137 = arith.constant 1 : index
    %c2_138 = arith.constant 2 : index
    %c0_139 = arith.constant 0 : index
    %117 = vector.load %arg14[%c0_136, %c1_137, %c2_138, %c0_139] : memref<2x10x10x8xf32, #tpu.memory_space<vmem>>, vector<2x8x8x8xf32>
    %118 = vector.shape_cast %117 : vector<2x8x8x8xf32> to vector<128x8xf32>
    %119 = arith.truncf %118 : vector<128x8xf32> to vector<128x8xbf16>
    %c5_140 = arith.constant 5 : index
    %c0_141 = arith.constant 0 : index
    %c0_142 = arith.constant 0 : index
    %120 = vector.load %arg4[%c5_140, %c0_141, %c0_142] : memref<9x8x16xbf16, #tpu.memory_space<vmem>>, vector<1x8x16xbf16>
    %121 = vector.shape_cast %120 : vector<1x8x16xbf16> to vector<8x16xbf16>
    %cst_143 = arith.constant dense<0.000000e+00> : vector<128x16xf32>
    %122 = tpu.matmul %119, %121, %cst_143 {dimension_numbers = #tpu.dot_dimension_numbers<[1], [0], [0], [1], [0, 0, 1, 1], [], []>} : vector<128x8xbf16>, vector<8x16xbf16>, vector<128x16xf32> -> vector<128x16xf32>
    %123 = arith.addf %116, %122 : vector<128x16xf32>
    %c0_144 = arith.constant 0 : index
    %c2_145 = arith.constant 2 : index
    %c0_146 = arith.constant 0 : index
    %c0_147 = arith.constant 0 : index
    %124 = vector.load %arg14[%c0_144, %c2_145, %c0_146, %c0_147] : memref<2x10x10x8xf32, #tpu.memory_space<vmem>>, vector<2x8x8x8xf32>
    %125 = vector.shape_cast %124 : vector<2x8x8x8xf32> to vector<128x8xf32>
    %126 = arith.truncf %125 : vector<128x8xf32> to vector<128x8xbf16>
    %c6_148 = arith.constant 6 : index
    %c0_149 = arith.constant 0 : index
    %c0_150 = arith.constant 0 : index
    %127 = vector.load %arg4[%c6_148, %c0_149, %c0_150] : memref<9x8x16xbf16, #tpu.memory_space<vmem>>, vector<1x8x16xbf16>
    %128 = vector.shape_cast %127 : vector<1x8x16xbf16> to vector<8x16xbf16>
    %cst_151 = arith.constant dense<0.000000e+00> : vector<128x16xf32>
    %129 = tpu.matmul %126, %128, %cst_151 {dimension_numbers = #tpu.dot_dimension_numbers<[1], [0], [0], [1], [0, 0, 1, 1], [], []>} : vector<128x8xbf16>, vector<8x16xbf16>, vector<128x16xf32> -> vector<128x16xf32>
    %130 = arith.addf %123, %129 : vector<128x16xf32>
    %c0_152 = arith.constant 0 : index
    %c2_153 = arith.constant 2 : index
    %c1_154 = arith.constant 1 : index
    %c0_155 = arith.constant 0 : index
    %131 = vector.load %arg14[%c0_152, %c2_153, %c1_154, %c0_155] : memref<2x10x10x8xf32, #tpu.memory_space<vmem>>, vector<2x8x8x8xf32>
    %132 = vector.shape_cast %131 : vector<2x8x8x8xf32> to vector<128x8xf32>
    %133 = arith.truncf %132 : vector<128x8xf32> to vector<128x8xbf16>
    %c7_156 = arith.constant 7 : index
    %c0_157 = arith.constant 0 : index
    %c0_158 = arith.constant 0 : index
    %134 = vector.load %arg4[%c7_156, %c0_157, %c0_158] : memref<9x8x16xbf16, #tpu.memory_space<vmem>>, vector<1x8x16xbf16>
    %135 = vector.shape_cast %134 : vector<1x8x16xbf16> to vector<8x16xbf16>
    %cst_159 = arith.constant dense<0.000000e+00> : vector<128x16xf32>
    %136 = tpu.matmul %133, %135, %cst_159 {dimension_numbers = #tpu.dot_dimension_numbers<[1], [0], [0], [1], [0, 0, 1, 1], [], []>} : vector<128x8xbf16>, vector<8x16xbf16>, vector<128x16xf32> -> vector<128x16xf32>
    %137 = arith.addf %130, %136 : vector<128x16xf32>
    %c0_160 = arith.constant 0 : index
    %c2_161 = arith.constant 2 : index
    %c2_162 = arith.constant 2 : index
    %c0_163 = arith.constant 0 : index
    %138 = vector.load %arg14[%c0_160, %c2_161, %c2_162, %c0_163] : memref<2x10x10x8xf32, #tpu.memory_space<vmem>>, vector<2x8x8x8xf32>
    %139 = vector.shape_cast %138 : vector<2x8x8x8xf32> to vector<128x8xf32>
    %140 = arith.truncf %139 : vector<128x8xf32> to vector<128x8xbf16>
    %c8_164 = arith.constant 8 : index
    %c0_165 = arith.constant 0 : index
    %c0_166 = arith.constant 0 : index
    %141 = vector.load %arg4[%c8_164, %c0_165, %c0_166] : memref<9x8x16xbf16, #tpu.memory_space<vmem>>, vector<1x8x16xbf16>
    %142 = vector.shape_cast %141 : vector<1x8x16xbf16> to vector<8x16xbf16>
    %cst_167 = arith.constant dense<0.000000e+00> : vector<128x16xf32>
    %143 = tpu.matmul %140, %142, %cst_167 {dimension_numbers = #tpu.dot_dimension_numbers<[1], [0], [0], [1], [0, 0, 1, 1], [], []>} : vector<128x8xbf16>, vector<8x16xbf16>, vector<128x16xf32> -> vector<128x16xf32>
    %144 = arith.addf %137, %143 : vector<128x16xf32>
    %c0_168 = arith.constant 0 : index
    %c0_169 = arith.constant 0 : index
    %145 = vector.load %arg5[%c0_168, %c0_169] : memref<1x16xf32, #tpu.memory_space<vmem>>, vector<1x16xf32>
    %146 = vector.broadcast %145 : vector<1x16xf32> to vector<128x16xf32>
    %147 = arith.addf %144, %146 : vector<128x16xf32>
    %cst_170 = arith.constant 0.000000e+00 : f32
    %148 = vector.broadcast %cst_170 : f32 to vector<128x16xf32>
    %149 = arith.maximumf %147, %148 : vector<128x16xf32>
    %150 = vector.shape_cast %149 : vector<128x16xf32> to vector<2x8x8x16xf32>
    %c0_171 = arith.constant 0 : index
    %c0_172 = arith.constant 0 : index
    %c0_173 = arith.constant 0 : index
    %c0_174 = arith.constant 0 : index
    %151 = vector.load %arg15[%c0_171, %c0_172, %c0_173, %c0_174] : memref<2x8x8x16xf32, #tpu.memory_space<vmem>>, vector<2x8x8x16xf32>
    tpu.vector_store %arg15[%c0_171, %c0_172, %c0_173, %c0_174], %150 {strides = array<i32>} : memref<2x8x8x16xf32, #tpu.memory_space<vmem>>, vector<2x8x8x16xf32>,
    %c0_175 = arith.constant 0 : index
    %c0_176 = arith.constant 0 : index
    %c0_177 = arith.constant 0 : index
    %c0_178 = arith.constant 0 : index
    %152 = tpu.strided_load %arg15[%c0_175, %c0_176, %c0_177, %c0_178] {strides = array<i32: 1, 2, 2, 1>} : memref<2x8x8x16xf32, #tpu.memory_space<vmem>>, vector<2x4x4x16xf32>
    %c0_179 = arith.constant 0 : index
    %c0_180 = arith.constant 0 : index
    %c1_181 = arith.constant 1 : index
    %c0_182 = arith.constant 0 : index
    %153 = tpu.strided_load %arg15[%c0_179, %c0_180, %c1_181, %c0_182] {strides = array<i32: 1, 2, 2, 1>} : memref<2x8x8x16xf32, #tpu.memory_space<vmem>>, vector<2x4x4x16xf32>
    %c0_183 = arith.constant 0 : index
    %c1_184 = arith.constant 1 : index
    %c0_185 = arith.constant 0 : index
    %c0_186 = arith.constant 0 : index
    %154 = tpu.strided_load %arg15[%c0_183, %c1_184, %c0_185, %c0_186] {strides = array<i32: 1, 2, 2, 1>} : memref<2x8x8x16xf32, #tpu.memory_space<vmem>>, vector<2x4x4x16xf32>
    %c0_187 = arith.constant 0 : index
    %c1_188 = arith.constant 1 : index
    %c1_189 = arith.constant 1 : index
    %c0_190 = arith.constant 0 : index
    %155 = tpu.strided_load %arg15[%c0_187, %c1_188, %c1_189, %c0_190] {strides = array<i32: 1, 2, 2, 1>} : memref<2x8x8x16xf32, #tpu.memory_space<vmem>>, vector<2x4x4x16xf32>
    %156 = arith.maximumf %152, %153 : vector<2x4x4x16xf32>
    %157 = arith.maximumf %154, %155 : vector<2x4x4x16xf32>
    %158 = arith.maximumf %156, %157 : vector<2x4x4x16xf32>
    %c0_191 = arith.constant 0 : index
    %c0_192 = arith.constant 0 : index
    %c0_193 = arith.constant 0 : index
    %c0_194 = arith.constant 0 : index
    %159 = vector.load %arg16[%c0_191, %c0_192, %c0_193, %c0_194] : memref<2x4x4x16xf32, #tpu.memory_space<vmem>>, vector<2x4x4x16xf32>
    tpu.vector_store %arg16[%c0_191, %c0_192, %c0_193, %c0_194], %158 {strides = array<i32>} : memref<2x4x4x16xf32, #tpu.memory_space<vmem>>, vector<2x4x4x16xf32>,
    %cst_195 = arith.constant 0.000000e+00 : f32
    %160 = vector.broadcast %cst_195 : f32 to vector<2x128xf32>
    %c0_196 = arith.constant 0 : index
    %c0_197 = arith.constant 0 : index
    %c0_198 = arith.constant 0 : index
    %c0_199 = arith.constant 0 : index
    %161 = vector.load %arg16[%c0_196, %c0_197, %c0_198, %c0_199] : memref<2x4x4x16xf32, #tpu.memory_space<vmem>>, vector<2x1x1x16xf32>
    %162 = vector.shape_cast %161 : vector<2x1x1x16xf32> to vector<2x16xf32>
    %163 = arith.truncf %162 : vector<2x16xf32> to vector<2x16xbf16>
    %c0_200 = arith.constant 0 : index
    %c0_201 = arith.constant 0 : index
    %c0_202 = arith.constant 0 : index
    %164 = vector.load %arg6[%c0_200, %c0_201, %c0_202] : memref<16x16x128xbf16, #tpu.memory_space<vmem>>, vector<1x16x128xbf16>
    %165 = vector.shape_cast %164 : vector<1x16x128xbf16> to vector<16x128xbf16>
    %cst_203 = arith.constant dense<0.000000e+00> : vector<2x128xf32>
    %166 = tpu.matmul %163, %165, %cst_203 {dimension_numbers = #tpu.dot_dimension_numbers<[1], [0], [0], [1], [0, 0, 1, 1], [], []>} : vector<2x16xbf16>, vector<16x128xbf16>, vector<2x128xf32> -> vector<2x128xf32>
    %167 = arith.addf %160, %166 : vector<2x128xf32>
    %c0_204 = arith.constant 0 : index
    %c0_205 = arith.constant 0 : index
    %c1_206 = arith.constant 1 : index
    %c0_207 = arith.constant 0 : index
    %168 = vector.load %arg16[%c0_204, %c0_205, %c1_206, %c0_207] : memref<2x4x4x16xf32, #tpu.memory_space<vmem>>, vector<2x1x1x16xf32>
    %169 = vector.shape_cast %168 : vector<2x1x1x16xf32> to vector<2x16xf32>
    %170 = arith.truncf %169 : vector<2x16xf32> to vector<2x16xbf16>
    %c1_208 = arith.constant 1 : index
    %c0_209 = arith.constant 0 : index
    %c0_210 = arith.constant 0 : index
    %171 = vector.load %arg6[%c1_208, %c0_209, %c0_210] : memref<16x16x128xbf16, #tpu.memory_space<vmem>>, vector<1x16x128xbf16>
    %172 = vector.shape_cast %171 : vector<1x16x128xbf16> to vector<16x128xbf16>
    %cst_211 = arith.constant dense<0.000000e+00> : vector<2x128xf32>
    %173 = tpu.matmul %170, %172, %cst_211 {dimension_numbers = #tpu.dot_dimension_numbers<[1], [0], [0], [1], [0, 0, 1, 1], [], []>} : vector<2x16xbf16>, vector<16x128xbf16>, vector<2x128xf32> -> vector<2x128xf32>
    %174 = arith.addf %167, %173 : vector<2x128xf32>
    %c0_212 = arith.constant 0 : index
    %c0_213 = arith.constant 0 : index
    %c2_214 = arith.constant 2 : index
    %c0_215 = arith.constant 0 : index
    %175 = vector.load %arg16[%c0_212, %c0_213, %c2_214, %c0_215] : memref<2x4x4x16xf32, #tpu.memory_space<vmem>>, vector<2x1x1x16xf32>
    %176 = vector.shape_cast %175 : vector<2x1x1x16xf32> to vector<2x16xf32>
    %177 = arith.truncf %176 : vector<2x16xf32> to vector<2x16xbf16>
    %c2_216 = arith.constant 2 : index
    %c0_217 = arith.constant 0 : index
    %c0_218 = arith.constant 0 : index
    %178 = vector.load %arg6[%c2_216, %c0_217, %c0_218] : memref<16x16x128xbf16, #tpu.memory_space<vmem>>, vector<1x16x128xbf16>
    %179 = vector.shape_cast %178 : vector<1x16x128xbf16> to vector<16x128xbf16>
    %cst_219 = arith.constant dense<0.000000e+00> : vector<2x128xf32>
    %180 = tpu.matmul %177, %179, %cst_219 {dimension_numbers = #tpu.dot_dimension_numbers<[1], [0], [0], [1], [0, 0, 1, 1], [], []>} : vector<2x16xbf16>, vector<16x128xbf16>, vector<2x128xf32> -> vector<2x128xf32>
    %181 = arith.addf %174, %180 : vector<2x128xf32>
    %c0_220 = arith.constant 0 : index
    %c0_221 = arith.constant 0 : index
    %c3_222 = arith.constant 3 : index
    %c0_223 = arith.constant 0 : index
    %182 = vector.load %arg16[%c0_220, %c0_221, %c3_222, %c0_223] : memref<2x4x4x16xf32, #tpu.memory_space<vmem>>, vector<2x1x1x16xf32>
    %183 = vector.shape_cast %182 : vector<2x1x1x16xf32> to vector<2x16xf32>
    %184 = arith.truncf %183 : vector<2x16xf32> to vector<2x16xbf16>
    %c3_224 = arith.constant 3 : index
    %c0_225 = arith.constant 0 : index
    %c0_226 = arith.constant 0 : index
    %185 = vector.load %arg6[%c3_224, %c0_225, %c0_226] : memref<16x16x128xbf16, #tpu.memory_space<vmem>>, vector<1x16x128xbf16>
    %186 = vector.shape_cast %185 : vector<1x16x128xbf16> to vector<16x128xbf16>
    %cst_227 = arith.constant dense<0.000000e+00> : vector<2x128xf32>
    %187 = tpu.matmul %184, %186, %cst_227 {dimension_numbers = #tpu.dot_dimension_numbers<[1], [0], [0], [1], [0, 0, 1, 1], [], []>} : vector<2x16xbf16>, vector<16x128xbf16>, vector<2x128xf32> -> vector<2x128xf32>
    %188 = arith.addf %181, %187 : vector<2x128xf32>
    %c0_228 = arith.constant 0 : index
    %c1_229 = arith.constant 1 : index
    %c0_230 = arith.constant 0 : index
    %c0_231 = arith.constant 0 : index
    %189 = vector.load %arg16[%c0_228, %c1_229, %c0_230, %c0_231] : memref<2x4x4x16xf32, #tpu.memory_space<vmem>>, vector<2x1x1x16xf32>
    %190 = vector.shape_cast %189 : vector<2x1x1x16xf32> to vector<2x16xf32>
    %191 = arith.truncf %190 : vector<2x16xf32> to vector<2x16xbf16>
    %c4_232 = arith.constant 4 : index
    %c0_233 = arith.constant 0 : index
    %c0_234 = arith.constant 0 : index
    %192 = vector.load %arg6[%c4_232, %c0_233, %c0_234] : memref<16x16x128xbf16, #tpu.memory_space<vmem>>, vector<1x16x128xbf16>
    %193 = vector.shape_cast %192 : vector<1x16x128xbf16> to vector<16x128xbf16>
    %cst_235 = arith.constant dense<0.000000e+00> : vector<2x128xf32>
    %194 = tpu.matmul %191, %193, %cst_235 {dimension_numbers = #tpu.dot_dimension_numbers<[1], [0], [0], [1], [0, 0, 1, 1], [], []>} : vector<2x16xbf16>, vector<16x128xbf16>, vector<2x128xf32> -> vector<2x128xf32>
    %195 = arith.addf %188, %194 : vector<2x128xf32>
    %c0_236 = arith.constant 0 : index
    %c1_237 = arith.constant 1 : index
    %c1_238 = arith.constant 1 : index
    %c0_239 = arith.constant 0 : index
    %196 = vector.load %arg16[%c0_236, %c1_237, %c1_238, %c0_239] : memref<2x4x4x16xf32, #tpu.memory_space<vmem>>, vector<2x1x1x16xf32>
    %197 = vector.shape_cast %196 : vector<2x1x1x16xf32> to vector<2x16xf32>
    %198 = arith.truncf %197 : vector<2x16xf32> to vector<2x16xbf16>
    %c5_240 = arith.constant 5 : index
    %c0_241 = arith.constant 0 : index
    %c0_242 = arith.constant 0 : index
    %199 = vector.load %arg6[%c5_240, %c0_241, %c0_242] : memref<16x16x128xbf16, #tpu.memory_space<vmem>>, vector<1x16x128xbf16>
    %200 = vector.shape_cast %199 : vector<1x16x128xbf16> to vector<16x128xbf16>
    %cst_243 = arith.constant dense<0.000000e+00> : vector<2x128xf32>
    %201 = tpu.matmul %198, %200, %cst_243 {dimension_numbers = #tpu.dot_dimension_numbers<[1], [0], [0], [1], [0, 0, 1, 1], [], []>} : vector<2x16xbf16>, vector<16x128xbf16>, vector<2x128xf32> -> vector<2x128xf32>
    %202 = arith.addf %195, %201 : vector<2x128xf32>
    %c0_244 = arith.constant 0 : index
    %c1_245 = arith.constant 1 : index
    %c2_246 = arith.constant 2 : index
    %c0_247 = arith.constant 0 : index
    %203 = vector.load %arg16[%c0_244, %c1_245, %c2_246, %c0_247] : memref<2x4x4x16xf32, #tpu.memory_space<vmem>>, vector<2x1x1x16xf32>
    %204 = vector.shape_cast %203 : vector<2x1x1x16xf32> to vector<2x16xf32>
    %205 = arith.truncf %204 : vector<2x16xf32> to vector<2x16xbf16>
    %c6_248 = arith.constant 6 : index
    %c0_249 = arith.constant 0 : index
    %c0_250 = arith.constant 0 : index
    %206 = vector.load %arg6[%c6_248, %c0_249, %c0_250] : memref<16x16x128xbf16, #tpu.memory_space<vmem>>, vector<1x16x128xbf16>
    %207 = vector.shape_cast %206 : vector<1x16x128xbf16> to vector<16x128xbf16>
    %cst_251 = arith.constant dense<0.000000e+00> : vector<2x128xf32>
    %208 = tpu.matmul %205, %207, %cst_251 {dimension_numbers = #tpu.dot_dimension_numbers<[1], [0], [0], [1], [0, 0, 1, 1], [], []>} : vector<2x16xbf16>, vector<16x128xbf16>, vector<2x128xf32> -> vector<2x128xf32>
    %209 = arith.addf %202, %208 : vector<2x128xf32>
    %c0_252 = arith.constant 0 : index
    %c1_253 = arith.constant 1 : index
    %c3_254 = arith.constant 3 : index
    %c0_255 = arith.constant 0 : index
    %210 = vector.load %arg16[%c0_252, %c1_253, %c3_254, %c0_255] : memref<2x4x4x16xf32, #tpu.memory_space<vmem>>, vector<2x1x1x16xf32>
    %211 = vector.shape_cast %210 : vector<2x1x1x16xf32> to vector<2x16xf32>
    %212 = arith.truncf %211 : vector<2x16xf32> to vector<2x16xbf16>
    %c7_256 = arith.constant 7 : index
    %c0_257 = arith.constant 0 : index
    %c0_258 = arith.constant 0 : index
    %213 = vector.load %arg6[%c7_256, %c0_257, %c0_258] : memref<16x16x128xbf16, #tpu.memory_space<vmem>>, vector<1x16x128xbf16>
    %214 = vector.shape_cast %213 : vector<1x16x128xbf16> to vector<16x128xbf16>
    %cst_259 = arith.constant dense<0.000000e+00> : vector<2x128xf32>
    %215 = tpu.matmul %212, %214, %cst_259 {dimension_numbers = #tpu.dot_dimension_numbers<[1], [0], [0], [1], [0, 0, 1, 1], [], []>} : vector<2x16xbf16>, vector<16x128xbf16>, vector<2x128xf32> -> vector<2x128xf32>
    %216 = arith.addf %209, %215 : vector<2x128xf32>
    %c0_260 = arith.constant 0 : index
    %c2_261 = arith.constant 2 : index
    %c0_262 = arith.constant 0 : index
    %c0_263 = arith.constant 0 : index
    %217 = vector.load %arg16[%c0_260, %c2_261, %c0_262, %c0_263] : memref<2x4x4x16xf32, #tpu.memory_space<vmem>>, vector<2x1x1x16xf32>
    %218 = vector.shape_cast %217 : vector<2x1x1x16xf32> to vector<2x16xf32>
    %219 = arith.truncf %218 : vector<2x16xf32> to vector<2x16xbf16>
    %c8_264 = arith.constant 8 : index
    %c0_265 = arith.constant 0 : index
    %c0_266 = arith.constant 0 : index
    %220 = vector.load %arg6[%c8_264, %c0_265, %c0_266] : memref<16x16x128xbf16, #tpu.memory_space<vmem>>, vector<1x16x128xbf16>
    %221 = vector.shape_cast %220 : vector<1x16x128xbf16> to vector<16x128xbf16>
    %cst_267 = arith.constant dense<0.000000e+00> : vector<2x128xf32>
    %222 = tpu.matmul %219, %221, %cst_267 {dimension_numbers = #tpu.dot_dimension_numbers<[1], [0], [0], [1], [0, 0, 1, 1], [], []>} : vector<2x16xbf16>, vector<16x128xbf16>, vector<2x128xf32> -> vector<2x128xf32>
    %223 = arith.addf %216, %222 : vector<2x128xf32>
    %c0_268 = arith.constant 0 : index
    %c2_269 = arith.constant 2 : index
    %c1_270 = arith.constant 1 : index
    %c0_271 = arith.constant 0 : index
    %224 = vector.load %arg16[%c0_268, %c2_269, %c1_270, %c0_271] : memref<2x4x4x16xf32, #tpu.memory_space<vmem>>, vector<2x1x1x16xf32>
    %225 = vector.shape_cast %224 : vector<2x1x1x16xf32> to vector<2x16xf32>
    %226 = arith.truncf %225 : vector<2x16xf32> to vector<2x16xbf16>
    %c9 = arith.constant 9 : index
    %c0_272 = arith.constant 0 : index
    %c0_273 = arith.constant 0 : index
    %227 = vector.load %arg6[%c9, %c0_272, %c0_273] : memref<16x16x128xbf16, #tpu.memory_space<vmem>>, vector<1x16x128xbf16>
    %228 = vector.shape_cast %227 : vector<1x16x128xbf16> to vector<16x128xbf16>
    %cst_274 = arith.constant dense<0.000000e+00> : vector<2x128xf32>
    %229 = tpu.matmul %226, %228, %cst_274 {dimension_numbers = #tpu.dot_dimension_numbers<[1], [0], [0], [1], [0, 0, 1, 1], [], []>} : vector<2x16xbf16>, vector<16x128xbf16>, vector<2x128xf32> -> vector<2x128xf32>
    %230 = arith.addf %223, %229 : vector<2x128xf32>
    %c0_275 = arith.constant 0 : index
    %c2_276 = arith.constant 2 : index
    %c2_277 = arith.constant 2 : index
    %c0_278 = arith.constant 0 : index
    %231 = vector.load %arg16[%c0_275, %c2_276, %c2_277, %c0_278] : memref<2x4x4x16xf32, #tpu.memory_space<vmem>>, vector<2x1x1x16xf32>
    %232 = vector.shape_cast %231 : vector<2x1x1x16xf32> to vector<2x16xf32>
    %233 = arith.truncf %232 : vector<2x16xf32> to vector<2x16xbf16>
    %c10 = arith.constant 10 : index
    %c0_279 = arith.constant 0 : index
    %c0_280 = arith.constant 0 : index
    %234 = vector.load %arg6[%c10, %c0_279, %c0_280] : memref<16x16x128xbf16, #tpu.memory_space<vmem>>, vector<1x16x128xbf16>
    %235 = vector.shape_cast %234 : vector<1x16x128xbf16> to vector<16x128xbf16>
    %cst_281 = arith.constant dense<0.000000e+00> : vector<2x128xf32>
    %236 = tpu.matmul %233, %235, %cst_281 {dimension_numbers = #tpu.dot_dimension_numbers<[1], [0], [0], [1], [0, 0, 1, 1], [], []>} : vector<2x16xbf16>, vector<16x128xbf16>, vector<2x128xf32> -> vector<2x128xf32>
    %237 = arith.addf %230, %236 : vector<2x128xf32>
    %c0_282 = arith.constant 0 : index
    %c2_283 = arith.constant 2 : index
    %c3_284 = arith.constant 3 : index
    %c0_285 = arith.constant 0 : index
    %238 = vector.load %arg16[%c0_282, %c2_283, %c3_284, %c0_285] : memref<2x4x4x16xf32, #tpu.memory_space<vmem>>, vector<2x1x1x16xf32>
    %239 = vector.shape_cast %238 : vector<2x1x1x16xf32> to vector<2x16xf32>
    %240 = arith.truncf %239 : vector<2x16xf32> to vector<2x16xbf16>
    %c11 = arith.constant 11 : index
    %c0_286 = arith.constant 0 : index
    %c0_287 = arith.constant 0 : index
    %241 = vector.load %arg6[%c11, %c0_286, %c0_287] : memref<16x16x128xbf16, #tpu.memory_space<vmem>>, vector<1x16x128xbf16>
    %242 = vector.shape_cast %241 : vector<1x16x128xbf16> to vector<16x128xbf16>
    %cst_288 = arith.constant dense<0.000000e+00> : vector<2x128xf32>
    %243 = tpu.matmul %240, %242, %cst_288 {dimension_numbers = #tpu.dot_dimension_numbers<[1], [0], [0], [1], [0, 0, 1, 1], [], []>} : vector<2x16xbf16>, vector<16x128xbf16>, vector<2x128xf32> -> vector<2x128xf32>
    %244 = arith.addf %237, %243 : vector<2x128xf32>
    %c0_289 = arith.constant 0 : index
    %c3_290 = arith.constant 3 : index
    %c0_291 = arith.constant 0 : index
    %c0_292 = arith.constant 0 : index
    %245 = vector.load %arg16[%c0_289, %c3_290, %c0_291, %c0_292] : memref<2x4x4x16xf32, #tpu.memory_space<vmem>>, vector<2x1x1x16xf32>
    %246 = vector.shape_cast %245 : vector<2x1x1x16xf32> to vector<2x16xf32>
    %247 = arith.truncf %246 : vector<2x16xf32> to vector<2x16xbf16>
    %c12 = arith.constant 12 : index
    %c0_293 = arith.constant 0 : index
    %c0_294 = arith.constant 0 : index
    %248 = vector.load %arg6[%c12, %c0_293, %c0_294] : memref<16x16x128xbf16, #tpu.memory_space<vmem>>, vector<1x16x128xbf16>
    %249 = vector.shape_cast %248 : vector<1x16x128xbf16> to vector<16x128xbf16>
    %cst_295 = arith.constant dense<0.000000e+00> : vector<2x128xf32>
    %250 = tpu.matmul %247, %249, %cst_295 {dimension_numbers = #tpu.dot_dimension_numbers<[1], [0], [0], [1], [0, 0, 1, 1], [], []>} : vector<2x16xbf16>, vector<16x128xbf16>, vector<2x128xf32> -> vector<2x128xf32>
    %251 = arith.addf %244, %250 : vector<2x128xf32>
    %c0_296 = arith.constant 0 : index
    %c3_297 = arith.constant 3 : index
    %c1_298 = arith.constant 1 : index
    %c0_299 = arith.constant 0 : index
    %252 = vector.load %arg16[%c0_296, %c3_297, %c1_298, %c0_299] : memref<2x4x4x16xf32, #tpu.memory_space<vmem>>, vector<2x1x1x16xf32>
    %253 = vector.shape_cast %252 : vector<2x1x1x16xf32> to vector<2x16xf32>
    %254 = arith.truncf %253 : vector<2x16xf32> to vector<2x16xbf16>
    %c13 = arith.constant 13 : index
    %c0_300 = arith.constant 0 : index
    %c0_301 = arith.constant 0 : index
    %255 = vector.load %arg6[%c13, %c0_300, %c0_301] : memref<16x16x128xbf16, #tpu.memory_space<vmem>>, vector<1x16x128xbf16>
    %256 = vector.shape_cast %255 : vector<1x16x128xbf16> to vector<16x128xbf16>
    %cst_302 = arith.constant dense<0.000000e+00> : vector<2x128xf32>
    %257 = tpu.matmul %254, %256, %cst_302 {dimension_numbers = #tpu.dot_dimension_numbers<[1], [0], [0], [1], [0, 0, 1, 1], [], []>} : vector<2x16xbf16>, vector<16x128xbf16>, vector<2x128xf32> -> vector<2x128xf32>
    %258 = arith.addf %251, %257 : vector<2x128xf32>
    %c0_303 = arith.constant 0 : index
    %c3_304 = arith.constant 3 : index
    %c2_305 = arith.constant 2 : index
    %c0_306 = arith.constant 0 : index
    %259 = vector.load %arg16[%c0_303, %c3_304, %c2_305, %c0_306] : memref<2x4x4x16xf32, #tpu.memory_space<vmem>>, vector<2x1x1x16xf32>
    %260 = vector.shape_cast %259 : vector<2x1x1x16xf32> to vector<2x16xf32>
    %261 = arith.truncf %260 : vector<2x16xf32> to vector<2x16xbf16>
    %c14 = arith.constant 14 : index
    %c0_307 = arith.constant 0 : index
    %c0_308 = arith.constant 0 : index
    %262 = vector.load %arg6[%c14, %c0_307, %c0_308] : memref<16x16x128xbf16, #tpu.memory_space<vmem>>, vector<1x16x128xbf16>
    %263 = vector.shape_cast %262 : vector<1x16x128xbf16> to vector<16x128xbf16>
    %cst_309 = arith.constant dense<0.000000e+00> : vector<2x128xf32>
    %264 = tpu.matmul %261, %263, %cst_309 {dimension_numbers = #tpu.dot_dimension_numbers<[1], [0], [0], [1], [0, 0, 1, 1], [], []>} : vector<2x16xbf16>, vector<16x128xbf16>, vector<2x128xf32> -> vector<2x128xf32>
    %265 = arith.addf %258, %264 : vector<2x128xf32>
    %c0_310 = arith.constant 0 : index
    %c3_311 = arith.constant 3 : index
    %c3_312 = arith.constant 3 : index
    %c0_313 = arith.constant 0 : index
    %266 = vector.load %arg16[%c0_310, %c3_311, %c3_312, %c0_313] : memref<2x4x4x16xf32, #tpu.memory_space<vmem>>, vector<2x1x1x16xf32>
    %267 = vector.shape_cast %266 : vector<2x1x1x16xf32> to vector<2x16xf32>
    %268 = arith.truncf %267 : vector<2x16xf32> to vector<2x16xbf16>
    %c15 = arith.constant 15 : index
    %c0_314 = arith.constant 0 : index
    %c0_315 = arith.constant 0 : index
    %269 = vector.load %arg6[%c15, %c0_314, %c0_315] : memref<16x16x128xbf16, #tpu.memory_space<vmem>>, vector<1x16x128xbf16>
    %270 = vector.shape_cast %269 : vector<1x16x128xbf16> to vector<16x128xbf16>
    %cst_316 = arith.constant dense<0.000000e+00> : vector<2x128xf32>
    %271 = tpu.matmul %268, %270, %cst_316 {dimension_numbers = #tpu.dot_dimension_numbers<[1], [0], [0], [1], [0, 0, 1, 1], [], []>} : vector<2x16xbf16>, vector<16x128xbf16>, vector<2x128xf32> -> vector<2x128xf32>
    %272 = arith.addf %265, %271 : vector<2x128xf32>
    %c0_317 = arith.constant 0 : index
    %c0_318 = arith.constant 0 : index
    %273 = vector.load %arg7[%c0_317, %c0_318] : memref<1x128xf32, #tpu.memory_space<vmem>>, vector<1x128xf32>
    %274 = vector.broadcast %273 : vector<1x128xf32> to vector<2x128xf32>
    %275 = arith.addf %272, %274 : vector<2x128xf32>
    %cst_319 = arith.constant 0.000000e+00 : f32
    %276 = vector.broadcast %cst_319 : f32 to vector<2x128xf32>
    %277 = arith.maximumf %275, %276 : vector<2x128xf32>
    %278 = arith.truncf %277 : vector<2x128xf32> to vector<2x128xbf16>
    %c0_320 = arith.constant 0 : index
    %c0_321 = arith.constant 0 : index
    %279 = vector.load %arg8[%c0_320, %c0_321] : memref<128x128xbf16, #tpu.memory_space<vmem>>, vector<128x128xbf16>
    %cst_322 = arith.constant dense<0.000000e+00> : vector<2x128xf32>
    %280 = tpu.matmul %278, %279, %cst_322 {dimension_numbers = #tpu.dot_dimension_numbers<[1], [0], [0], [1], [0, 0, 1, 1], [], []>} : vector<2x128xbf16>, vector<128x128xbf16>, vector<2x128xf32> -> vector<2x128xf32>
    %c0_323 = arith.constant 0 : index
    %c0_324 = arith.constant 0 : index
    %281 = vector.load %arg9[%c0_323, %c0_324] : memref<1x128xf32, #tpu.memory_space<vmem>>, vector<1x128xf32>
    %282 = vector.broadcast %281 : vector<1x128xf32> to vector<2x128xf32>
    %283 = arith.addf %280, %282 : vector<2x128xf32>
    %cst_325 = arith.constant 0.000000e+00 : f32
    %284 = vector.broadcast %cst_325 : f32 to vector<2x128xf32>
    %285 = arith.maximumf %283, %284 : vector<2x128xf32>
    %286 = arith.truncf %285 : vector<2x128xf32> to vector<2x128xbf16>
    %c0_326 = arith.constant 0 : index
    %c0_327 = arith.constant 0 : index
    %287 = vector.load %arg10[%c0_326, %c0_327] : memref<128x128xbf16, #tpu.memory_space<vmem>>, vector<128x128xbf16>
    %cst_328 = arith.constant dense<0.000000e+00> : vector<2x128xf32>
    %288 = tpu.matmul %286, %287, %cst_328 {dimension_numbers = #tpu.dot_dimension_numbers<[1], [0], [0], [1], [0, 0, 1, 1], [], []>} : vector<2x128xbf16>, vector<128x128xbf16>, vector<2x128xf32> -> vector<2x128xf32>
    %c0_329 = arith.constant 0 : index
    %c0_330 = arith.constant 0 : index
    %289 = vector.load %arg11[%c0_329, %c0_330] : memref<1x128xf32, #tpu.memory_space<vmem>>, vector<1x128xf32>
    %290 = vector.broadcast %289 : vector<1x128xf32> to vector<2x128xf32>
    %291 = arith.addf %288, %290 : vector<2x128xf32>
    %c0_331 = arith.constant 0 : index
    %c0_332 = arith.constant 0 : index
    %292 = vector.load %arg12[%c0_331, %c0_332] : memref<2x128xf32, #tpu.memory_space<vmem>>, vector<2x128xf32>
    tpu.vector_store %arg12[%c0_331, %c0_332], %291 {strides = array<i32>} : memref<2x128xf32, #tpu.memory_space<vmem>>, vector<2x128xf32>,
    return
  }
  func.func @transform_0(%arg0: i32) -> (i32, i32, i32, i32) {
    %c0_i32 = arith.constant 0 : i32
    %c0_i32_0 = arith.constant 0 : i32
    %c0_i32_1 = arith.constant 0 : i32
    %c0_i32_2 = arith.constant 0 : i32
    %c0_i32_3 = arith.constant 0 : i32
    return %c0_i32, %c0_i32_0, %c0_i32_1, %c0_i32_2 : i32, i32, i32, i32
  }
  func.func @transform_1(%arg0: i32) -> (i32, i32, i32) {
    %c0_i32 = arith.constant 0 : i32
    %c0_i32_0 = arith.constant 0 : i32
    %c0_i32_1 = arith.constant 0 : i32
    %c0_i32_2 = arith.constant 0 : i32
    return %c0_i32, %c0_i32_0, %c0_i32_1 : i32, i32, i32
  }
  func.func @transform_2(%arg0: i32) -> (i32, i32) {
    %c0_i32 = arith.constant 0 : i32
    %c0_i32_0 = arith.constant 0 : i32
    %c0_i32_1 = arith.constant 0 : i32
    return %c0_i32, %c0_i32_0 : i32, i32
  }
  func.func @transform_3(%arg0: i32) -> (i32, i32, i32) {
    %c0_i32 = arith.constant 0 : i32
    %c0_i32_0 = arith.constant 0 : i32
    %c0_i32_1 = arith.constant 0 : i32
    %c0_i32_2 = arith.constant 0 : i32
    return %c0_i32, %c0_i32_0, %c0_i32_1 : i32, i32, i32
  }
  func.func @transform_4(%arg0: i32) -> (i32, i32) {
    %c0_i32 = arith.constant 0 : i32
    %c0_i32_0 = arith.constant 0 : i32
    %c0_i32_1 = arith.constant 0 : i32
    return %c0_i32, %c0_i32_0 : i32, i32
  }
  func.func @transform_5(%arg0: i32) -> (i32, i32, i32) {
    %c0_i32 = arith.constant 0 : i32
    %c0_i32_0 = arith.constant 0 : i32
    %c0_i32_1 = arith.constant 0 : i32
    %c0_i32_2 = arith.constant 0 : i32
    return %c0_i32, %c0_i32_0, %c0_i32_1 : i32, i32, i32
  }
  func.func @transform_6(%arg0: i32) -> (i32, i32) {
    %c0_i32 = arith.constant 0 : i32
    %c0_i32_0 = arith.constant 0 : i32
    %c0_i32_1 = arith.constant 0 : i32
    return %c0_i32, %c0_i32_0 : i32, i32
  }
  func.func @transform_7(%arg0: i32) -> (i32, i32) {
    %c0_i32 = arith.constant 0 : i32
    %c0_i32_0 = arith.constant 0 : i32
    %c0_i32_1 = arith.constant 0 : i32
    return %c0_i32, %c0_i32_0 : i32, i32
  }
  func.func @transform_8(%arg0: i32) -> (i32, i32) {
    %c0_i32 = arith.constant 0 : i32
    %c0_i32_0 = arith.constant 0 : i32
    %c0_i32_1 = arith.constant 0 : i32
    return %c0_i32, %c0_i32_0 : i32, i32
  }
  func.func @transform_9(%arg0: i32) -> (i32, i32) {
    %c0_i32 = arith.constant 0 : i32
    %c0_i32_0 = arith.constant 0 : i32
    %c0_i32_1 = arith.constant 0 : i32
    return %c0_i32, %c0_i32_0 : i32, i32
  }
  func.func @transform_10(%arg0: i32) -> (i32, i32) {
    %c0_i32 = arith.constant 0 : i32
    %c0_i32_0 = arith.constant 0 : i32
    %c0_i32_1 = arith.constant 0 : i32
    return %c0_i32, %c0_i32_0 : i32, i32
  }
  func.func @transform_11(%arg0: i32) -> (i32, i32) {
    %c0_i32 = arith.constant 0 : i32
    %c0_i32_0 = arith.constant 0 : i32
    %c0_i32_1 = arith.constant 0 : i32
    return %c0_i32, %c0_i32_0 : i32, i32
  }
}

</mosaic_0001>

<bundles_post_ra>
// kernel: tpu_custom_call.1
= control target key start
LH: loop header
LB: loop body
LE: loop exit
PB: predicated region body
PF: predicated region fallthrough
CT: control target
= control target key end

     0   :  { %vm332_vm0 = vcmask 1041408   ;;  %vm235_vm1 = vcmask 31744   ;;  %s10490_s0 = inlined_call_operand.vmem [shape: f32[2,18,18,4], index: 0, kind: input, shape index: {}]   ;;  %s10491_s1 = inlined_call_operand.vmem [shape: bf16[9,4,8], index: 1, kind: input, shape index: {}]   ;;  %s10492_s2 = inlined_call_operand.vmem [shape: f32[1,8], index: 2, kind: input, shape index: {}]   ;;  %s10493_s3 = inlined_call_operand.vmem [shape: bf16[9,8,16], index: 3, kind: input, shape index: {}]   ;;  %s10494_s4 = inlined_call_operand.vmem [shape: f32[1,16], index: 4, kind: input, shape index: {}]   ;;  %s10495_s5 = inlined_call_operand.vmem [shape: bf16[16,16,128], index: 5, kind: input, shape index: {}]   ;;  %s10496_s6 = inlined_call_operand.vmem [shape: f32[1,128], index: 6, kind: input, shape index: {}]   ;;  %s10497_s7 = inlined_call_operand.vmem [shape: bf16[128,128], index: 7, kind: input, shape index: {}]   ;;  %s10498_s8 = inlined_call_operand.vmem [shape: f32[1,128], index: 8, kind: input, shape index: {}]   ;;  %s10499_s9 = inlined_call_operand.vmem [shape: bf16[128,128], index: 9, kind: input, shape index: {}]   ;;  %s10500_s10 = inlined_call_operand.vmem [shape: f32[1,128], index: 10, kind: input, shape index: {}]   ;;  %s10501_s11 = inlined_call_operand.hbm [shape: f32[2,128], index: 11, kind: output, shape index: {}]  }
   0x1   :  { %v6222_v0 = vld [vmem:[%s10491_s1 + $0x2] sm:$0x3]  ;;  %v138_v2 = vld [vmem:[%s10490_s0 + $0x9] sm:$0xff]  ;;  %v199_v5 = vld [vmem:[%s10490_s0 + $0x319] sm:$0xff] }
   0x2   :  { %v137_v1 = vld [vmem:[%s10490_s0 + $0x1] sm:$0xff]  ;;  %v334_v3 = vsel %vm332_vm0, %v6222_v0, 0  ;;  %v774_v15 = vld [vmem:[%s10490_s0 + $0xa] sm:$0xff]  ;;  %v6320_v17 = vld [vmem:[%s10490_s0 + $0x18] sm:$0xff] }
   0x3   :  { %v201_v4 = vpack.c.bf16 %v138_v2, %v137_v1  ;;  %v200_v6 = vld [vmem:[%s10490_s0 + $0x321] sm:$0xff]  ;;  %343 = vmatpush.bf16.msra.mxu0 %v334_v3  ;;  %7188 = vmatpush.bf16.msra.mxu1 %v334_v3 }
   0x4   :  { %v6481_v7 = vld [vmem:[%s10491_s1 + $0x8] sm:$0x3]  ;;  %v232_v8 = vpack.c.bf16 %v200_v6, %v199_v5  ;;  %v6287_v10 = vld [vmem:[%s10491_s1 + $0x4] sm:$0x3]  ;;  %v6384_v11 = vld [vmem:[%s10491_s1 + $0x6] sm:$0x3] }
   0x5   :  { %v1829_v9 = vsel %vm332_vm0, %v6481_v7, 0  ;;  %v773_v12 = vld [vmem:[%s10490_s0 + $0x2] sm:$0xff]  ;;  %v968_v13 = vsel %vm332_vm0, %v6287_v10, 0  ;;  %v1399_v14 = vsel %vm332_vm0, %v6384_v11, 0  ;;  %v136_v16 = vld [vmem:[%s10491_s1] sm:$0x3] }
   0x6   :  { %977 = vmatpush.bf16.msra.mxu2 %v968_v13  ;;  %1408 = vmatpush.bf16.msra.mxu3 %v1399_v14  ;;  %v837_v18 = vpack.c.bf16 %v774_v15, %v773_v12  ;;  %v602_v19 = vsel %vm332_vm0, %v136_v16, 0  ;;  %v6321_v20 = vld [vmem:[%s10490_s0 + $0x20] sm:$0xff] }
   0x7   :  { %1838 = vmatpush.bf16.msrb.mxu0 %v1829_v9  ;;  %6254 = vmatmul.msk.bf16.vlgmr.msra.gmra.mxu1 %vm235_vm1, %v232_v8  ;;  %v1268_v21 = vpack.c.bf16 %v6321_v20, %v6320_v17 }
   0x8   :  { %6223 = vmatmul.msk.bf16.vlgmr.msra.gmra.mxu0 %vm235_vm1, %v201_v4  ;;  %611 = vmatpush.bf16.msrb.mxu1 %v602_v19 }
   0x9   :  { %6288 = vmatmul.msk.bf16.vlgmr.msra.gmra.mxu2 %vm235_vm1, %v837_v18  ;;  %6385 = vmatmul.msk.bf16.vlgmr.msra.gmra.mxu3 %vm235_vm1, %v1268_v21 }
   0xa   :  { %16 = vsyncpa [#allocation7], 0  ;;  %v139_v22 = vld [vmem:[%s10490_s0 + $0x19] sm:$0xff]  ;;  %v140_v23 = vld [vmem:[%s10490_s0 + $0x21] sm:$0xff]  ;;  %vm4290_vm2 = vcmask 1043456   ;;  %vm3917_vm3 = vcmask 64512  }
   0xb   :  { %v40_v24 = vld [vmem:[%s10490_s0] sm:$0xff]  ;;  %v41_v25 = vld [vmem:[%s10490_s0 + $0x8] sm:$0xff]  ;;  %v6322_v28 = vld [vmem:[%s10490_s0 + $0x30] sm:$0xff]  ;;  %v202_v30 = vpack.c.bf16 %v140_v23, %v139_v22  ;;  %vm4158_vm4 = vcmask 58368   ;;  %vm5282_vm5 = vcmask 130048   ;;  %vm5386_vm6 = vcmask 125952  }
   0xc   :  { %v775_v26 = vld [vmem:[%s10490_s0 + $0x1a] sm:$0xff]  ;;  %v776_v27 = vld [vmem:[%s10490_s0 + $0x22] sm:$0xff]  ;;  %v104_v31 = vpack.c.bf16 %v41_v25, %v40_v24  ;;  %v141_v34 = vld [vmem:[%s10490_s0 + $0x31] sm:$0xff]  ;;  %vm5413_vm7 = vcmask 1041409   ;;  %s7233_s23 = smov [#allocation6]  }
   0xd   :  { %v6323_v29 = vld [vmem:[%s10490_s0 + $0x38] sm:$0xff]  ;;  %v838_v32 = vpack.c.bf16 %v776_v27, %v775_v26  ;;  %v6324_v38 = vld [vmem:[%s10490_s0 + $0x48] sm:$0xff]  ;;  %v6325_v39 = vld [vmem:[%s10490_s0 + $0x50] sm:$0xff]  ;;  %s6165_s24 = sshll.u32 %s7233_s23, 4  ;;  %s6166_s24 = int_to_ptr.vmem [resolvable:$true] %s6165_s24 }
   0xe   :  { %v1269_v33 = vpack.c.bf16 %v6323_v29, %v6322_v28  ;;  %v142_v35 = vld [vmem:[%s10490_s0 + $0x39] sm:$0xff]  ;;  %v1270_v42 = vpack.c.bf16 %v6325_v39, %v6324_v38  ;;  %v143_v43 = vld [vmem:[%s10490_s0 + $0x49] sm:$0xff]  ;;  %v144_v44 = vld [vmem:[%s10490_s0 + $0x51] sm:$0xff] }
   0xf   :  { %v777_v36 = vld [vmem:[%s10490_s0 + $0x32] sm:$0xff]  ;;  %v778_v37 = vld [vmem:[%s10490_s0 + $0x3a] sm:$0xff]  ;;  %v203_v40 = vpack.c.bf16 %v142_v35, %v141_v34  ;;  %v779_v45 = vld [vmem:[%s10490_s0 + $0x4a] sm:$0xff]  ;;  %v204_v49 = vpack.c.bf16 %v144_v44, %v143_v43 }
  0x10   :  { %v839_v41 = vpack.c.bf16 %v778_v37, %v777_v36  ;;  %v780_v46 = vld [vmem:[%s10490_s0 + $0x52] sm:$0xff]  ;;  %v6326_v47 = vld [vmem:[%s10490_s0 + $0x60] sm:$0xff]  ;;  %v6327_v48 = vld [vmem:[%s10490_s0 + $0x68] sm:$0xff] }
  0x11   :  { %v840_v50 = vpack.c.bf16 %v780_v46, %v779_v45  ;;  %v1271_v51 = vpack.c.bf16 %v6327_v48, %v6326_v47  ;;  %v145_v52 = vld [vmem:[%s10490_s0 + $0x61] sm:$0xff]  ;;  %v146_v53 = vld [vmem:[%s10490_s0 + $0x69] sm:$0xff]  ;;  %v6328_v56 = vld [vmem:[%s10490_s0 + $0x78] sm:$0xff] }
  0x12   :  { %v781_v54 = vld [vmem:[%s10490_s0 + $0x62] sm:$0xff]  ;;  %v782_v55 = vld [vmem:[%s10490_s0 + $0x6a] sm:$0xff]  ;;  %v205_v58 = vpack.c.bf16 %v146_v53, %v145_v52  ;;  %v147_v61 = vld [vmem:[%s10490_s0 + $0x79] sm:$0xff] }
  0x13   :  { %v6329_v57 = vld [vmem:[%s10490_s0 + $0x80] sm:$0xff]  ;;  %v841_v59 = vpack.c.bf16 %v782_v55, %v781_v54  ;;  %v6330_v1 = vld [vmem:[%s10490_s0 + $0x90] sm:$0xff]  ;;  %v6331_v2 = vld [vmem:[%s10490_s0 + $0x98] sm:$0xff] }
  0x14   :  { %v1272_v60 = vpack.c.bf16 %v6329_v57, %v6328_v56  ;;  %v148_v62 = vld [vmem:[%s10490_s0 + $0x81] sm:$0xff]  ;;  %v1273_v5 = vpack.c.bf16 %v6331_v2, %v6330_v1  ;;  %v149_v6 = vld [vmem:[%s10490_s0 + $0x91] sm:$0xff]  ;;  %v150_v7 = vld [vmem:[%s10490_s0 + $0x99] sm:$0xff] }
  0x15   :  { %v783_v63 = vld [vmem:[%s10490_s0 + $0x7a] sm:$0xff]  ;;  %v784_v0 = vld [vmem:[%s10490_s0 + $0x82] sm:$0xff]  ;;  %v206_v3 = vpack.c.bf16 %v148_v62, %v147_v61  ;;  %v785_v8 = vld [vmem:[%s10490_s0 + $0x92] sm:$0xff]  ;;  %v207_v12 = vpack.c.bf16 %v150_v7, %v149_v6 }
  0x16   :  { %v842_v4 = vpack.c.bf16 %v784_v0, %v783_v63  ;;  %v786_v9 = vld [vmem:[%s10490_s0 + $0x9a] sm:$0xff]  ;;  %v6332_v10 = vld [vmem:[%s10490_s0 + $0xa8] sm:$0xff]  ;;  %v6333_v11 = vld [vmem:[%s10490_s0 + $0xb0] sm:$0xff] }
  0x17   :  { %6255 = vmatmul.msk.bf16.vlgmr.msrb.gmra.mxu1 %vm235_vm1, %v104_v31  ;;  %v843_v13 = vpack.c.bf16 %v786_v9, %v785_v8  ;;  %v1274_v14 = vpack.c.bf16 %v6333_v11, %v6332_v10  ;;  %v151_v15 = vld [vmem:[%s10490_s0 + $0xa9] sm:$0xff]  ;;  %v152_v16 = vld [vmem:[%s10490_s0 + $0xb1] sm:$0xff]  ;;  %v6334_v19 = vld [vmem:[%s10490_s0 + $0xc0] sm:$0xff] }
  0x18   :  { %6224 = vmatmul.msk.bf16.gmra.mxu0 %vm235_vm1, %v202_v30  ;;  %v787_v17 = vld [vmem:[%s10490_s0 + $0xaa] sm:$0xff]  ;;  %v788_v18 = vld [vmem:[%s10490_s0 + $0xb2] sm:$0xff]  ;;  %v153_v24 = vld [vmem:[%s10490_s0 + $0xc1] sm:$0xff] }
  0x19   :  { %6289 = vmatmul.msk.bf16.gmra.mxu2 %vm235_vm1, %v838_v32  ;;  %6386 = vmatmul.msk.bf16.gmra.mxu3 %vm235_vm1, %v1269_v33  ;;  %v6335_v20 = vld [vmem:[%s10490_s0 + $0xc8] sm:$0xff]  ;;  %v844_v22 = vpack.c.bf16 %v788_v18, %v787_v17  ;;  %v6336_v28 = vld [vmem:[%s10490_s0 + $0xd8] sm:$0xff]  ;;  %v6337_v29 = vld [vmem:[%s10490_s0 + $0xe0] sm:$0xff] }
  0x1a   :  { %v1275_v23 = vpack.c.bf16 %v6335_v20, %v6334_v19  ;;  %v154_v25 = vld [vmem:[%s10490_s0 + $0xc9] sm:$0xff]  ;;  %v1276_v34 = vpack.c.bf16 %v6337_v29, %v6336_v28  ;;  %v155_v39 = vld [vmem:[%s10490_s0 + $0xd9] sm:$0xff]  ;;  %v157_v61 = vld [vmem:[%s10490_s0 + $0xf1] sm:$0xff] }
  0x1b   :  { %v789_v26 = vld [vmem:[%s10490_s0 + $0xc2] sm:$0xff]  ;;  %v790_v27 = vld [vmem:[%s10490_s0 + $0xca] sm:$0xff]  ;;  %v209_v30 = vpack.c.bf16 %v154_v25, %v153_v24  ;;  %v6339_v44 = vld [vmem:[%s10490_s0 + $0xf8] sm:$0xff] }
  0x1c   :  { %v6338_v43 = vld [vmem:[%s10490_s0 + $0xf0] sm:$0xff]  ;;  %v158_v62 = vld [vmem:[%s10490_s0 + $0xf9] sm:$0xff]  ;;  %v6340_v2 = vld [vmem:[%s10490_s0 + $0x108] sm:$0xff] }
  0x1d   :  { %v1277_v52 = vpack.c.bf16 %v6339_v44, %v6338_v43  ;;  %v793_v0 = vld [vmem:[%s10490_s0 + $0xf2] sm:$0xff]  ;;  %v794_v1 = vld [vmem:[%s10490_s0 + $0xfa] sm:$0xff]  ;;  %v159_v20 = vld [vmem:[%s10490_s0 + $0x109] sm:$0xff] }
  0x1e   :  { %v847_v10 = vpack.c.bf16 %v794_v1, %v793_v0  ;;  %v796_v24 = vld [vmem:[%s10490_s0 + $0x112] sm:$0xff]  ;;  %v6342_v25 = vld [vmem:[%s10490_s0 + $0x120] sm:$0xff] }
  0x27   :  { %6256 = vmatmul.msk.bf16.gmra.mxu1 %vm235_vm1, %v1268_v21  ;;  %v208_v21 = vpack.c.bf16 %v152_v16, %v151_v15 }
  0x28   :  { %6225 = vmatmul.msk.bf16.gmra.mxu0 %vm235_vm1, %v203_v40  ;;  %v156_v40 = vld [vmem:[%s10490_s0 + $0xe1] sm:$0xff] }
  0x29   :  { %6290 = vmatmul.msk.bf16.gmra.mxu2 %vm235_vm1, %v839_v41  ;;  %6387 = vmatmul.msk.bf16.gmra.mxu3 %vm235_vm1, %v1270_v42  ;;  %v791_v41 = vld [vmem:[%s10490_s0 + $0xda] sm:$0xff]  ;;  %v210_v45 = vpack.c.bf16 %v156_v40, %v155_v39 }
  0x37   :  { %6257 = vmatmul.msk.bf16.gmra.mxu1 %vm235_vm1, %v1269_v33  ;;  %v845_v33 = vpack.c.bf16 %v790_v27, %v789_v26  ;;  %v6343_v26 = vld [vmem:[%s10490_s0 + $0x128] sm:$0xff] }
  0x38   :  { %6226 = vmatmul.msk.bf16.gmra.mxu0 %vm235_vm1, %v204_v49 }
  0x39   :  { %6291 = vmatmul.msk.bf16.gmra.mxu2 %vm235_vm1, %v840_v50  ;;  %6388 = vmatmul.msk.bf16.gmra.mxu3 %vm235_vm1, %v1271_v51 }
  0x47   :  { %6258 = vmatmul.msk.bf16.gmra.mxu1 %vm235_vm1, %v1270_v42  ;;  %v792_v42 = vld [vmem:[%s10490_s0 + $0xe2] sm:$0xff] }
  0x48   :  { %6227 = vmatmul.msk.bf16.gmra.mxu0 %vm235_vm1, %v205_v58 }
  0x49   :  { %6292 = vmatmul.msk.bf16.gmra.mxu2 %vm235_vm1, %v841_v59  ;;  %6389 = vmatmul.msk.bf16.gmra.mxu3 %vm235_vm1, %v1272_v60 }
  0x57   :  { %6259 = vmatmul.msk.bf16.gmra.mxu1 %vm235_vm1, %v1271_v51  ;;  %v846_v51 = vpack.c.bf16 %v792_v42, %v791_v41 }
  0x58   :  { %6228 = vmatmul.msk.bf16.gmra.mxu0 %vm235_vm1, %v206_v3  ;;  %v6341_v3 = vld [vmem:[%s10490_s0 + $0x110] sm:$0xff] }
  0x59   :  { %6293 = vmatmul.msk.bf16.gmra.mxu2 %vm235_vm1, %v842_v4  ;;  %6390 = vmatmul.msk.bf16.gmra.mxu3 %vm235_vm1, %v1273_v5  ;;  %v211_v4 = vpack.c.bf16 %v158_v62, %v157_v61  ;;  %v1278_v11 = vpack.c.bf16 %v6341_v3, %v6340_v2 }
  0x67   :  { %6260 = vmatmul.msk.bf16.gmra.mxu1 %vm235_vm1, %v1272_v60 }
  0x68   :  { %6229 = vmatmul.msk.bf16.gmra.mxu0 %vm235_vm1, %v207_v12 }
  0x69   :  { %6294 = vmatmul.msk.bf16.gmra.mxu2 %vm235_vm1, %v843_v13  ;;  %6391 = vmatmul.msk.bf16.gmra.mxu3 %vm235_vm1, %v1274_v14 }
  0x77   :  { %6261 = vmatmul.msk.bf16.gmra.mxu1 %vm235_vm1, %v1273_v5 }
  0x78   :  { %6230 = vmatmul.msk.bf16.gmra.mxu0 %vm235_vm1, %v208_v21  ;;  %v160_v21 = vld [vmem:[%s10490_s0 + $0x111] sm:$0xff] }
  0x79   :  { %6295 = vmatmul.msk.bf16.gmra.mxu2 %vm235_vm1, %v844_v22  ;;  %6392 = vmatmul.msk.bf16.gmra.mxu3 %vm235_vm1, %v1275_v23  ;;  %v212_v27 = vpack.c.bf16 %v160_v21, %v159_v20 }
  0x84   :  { %v7520_v32 = vpop.f32.mrf.mxu1 }
  0x85   :  { %v345_v31 = vpop.f32.mrf.mxu0 }
  0x87   :  { %6262 = vmatmul.msk.bf16.gmra.mxu1 %vm235_vm1, %v1274_v14 }
  0x88   :  { %6231 = vmatmul.msk.bf16.gmra.mxu0 %vm235_vm1, %v209_v30 }
  0x89   :  { %6296 = vmatmul.msk.bf16.gmra.mxu2 %vm235_vm1, %v845_v33  ;;  %6393 = vmatmul.msk.bf16.gmra.mxu3 %vm235_vm1, %v1276_v34 }
  0x8c   :  { %v7526_v36 = vpop.f32.mrf.mxu1  ;;  %v979_v37 = vpop.f32.mrf.mxu2 }
  0x8d   :  { %v347_v35 = vpop.f32.mrf.mxu0  ;;  %v1410_v38 = vpop.f32.mrf.mxu3 }
  0x94   :  { %v613_v47 = vpop.f32.mrf.mxu1  ;;  %v981_v49 = vpop.f32.mrf.mxu2 }
  0x95   :  { %v350_v46 = vpop.f32.mrf.mxu0  ;;  %v614_v48 = vadd.f32 %v613_v47, %v345_v31  ;;  %v1412_v50 = vpop.f32.mrf.mxu3 }
  0x97   :  { %v1139_v53 = vadd.f32 %v979_v37, %v614_v48  ;;  %6263 = vmatmul.msk.bf16.gmra.mxu1 %vm235_vm1, %v1275_v23  ;;  %v795_v23 = vld [vmem:[%s10490_s0 + $0x10a] sm:$0xff]  ;;  %v797_v48 = vld [vmem:[%s10490_s0 + $0x122] sm:$0xff] }
  0x98   :  { %6232 = vmatmul.msk.bf16.gmra.mxu0 %vm235_vm1, %v210_v45  ;;  %v161_v45 = vld [vmem:[%s10490_s0 + $0x121] sm:$0xff] }
  0x99   :  { %v7548_v54 = vadd.f32 %v1410_v38, %v1139_v53  ;;  %6297 = vmatmul.msk.bf16.gmra.mxu2 %vm235_vm1, %v846_v51  ;;  %6394 = vmatmul.msk.bf16.gmra.mxu3 %vm235_vm1, %v1277_v52  ;;  %v6345_v51 = vld [vmem:[%s10490_s0 + $0x140] sm:$0xff] }
  0x9c   :  { %v615_v56 = vpop.f32.mrf.mxu1  ;;  %v984_v58 = vpop.f32.mrf.mxu2 }
  0x9d   :  { %v352_v55 = vpop.f32.mrf.mxu0  ;;  %v616_v57 = vadd.f32 %v615_v56, %v347_v35  ;;  %v1415_v59 = vpop.f32.mrf.mxu3  ;;  %v1279_v35 = vpack.c.bf16 %v6343_v26, %v6342_v25 }
  0x9f   :  { %v1140_v60 = vadd.f32 %v981_v49, %v616_v57  ;;  %v798_v49 = vld [vmem:[%s10490_s0 + $0x12a] sm:$0xff] }
  0xa1   :  { %v7558_v63 = vadd.f32 %v1412_v50, %v1140_v60  ;;  %v6344_v50 = vld [vmem:[%s10490_s0 + $0x138] sm:$0xff] }
  0xa2   :  { %v1280_v60 = vpack.c.bf16 %v6345_v51, %v6344_v50 }
  0xa4   :  { %v618_v6 = vpop.f32.mrf.mxu1  ;;  %v986_v8 = vpop.f32.mrf.mxu2 }
  0xa5   :  { %v355_v5 = vpop.f32.mrf.mxu0  ;;  %v619_v7 = vadd.f32 %v618_v6, %v350_v46  ;;  %v1417_v9 = vpop.f32.mrf.mxu3  ;;  %v162_v46 = vld [vmem:[%s10490_s0 + $0x129] sm:$0xff]  ;;  %v163_v6 = vld [vmem:[%s10490_s0 + $0x139] sm:$0xff] }
  0xa7   :  { %v1141_v12 = vadd.f32 %v984_v58, %v619_v7  ;;  %6264 = vmatmul.msk.bf16.gmra.mxu1 %vm235_vm1, %v1276_v34  ;;  %v848_v34 = vpack.c.bf16 %v796_v24, %v795_v23  ;;  %v164_v7 = vld [vmem:[%s10490_s0 + $0x141] sm:$0xff] }
  0xa8   :  { %6233 = vmatmul.msk.bf16.gmra.mxu0 %vm235_vm1, %v211_v4 }
  0xa9   :  { %v7574_v13 = vadd.f32 %v1415_v59, %v1141_v12  ;;  %6298 = vmatmul.msk.bf16.gmra.mxu2 %vm235_vm1, %v847_v10  ;;  %6395 = vmatmul.msk.bf16.gmra.mxu3 %vm235_vm1, %v1278_v11  ;;  %v849_v59 = vpack.c.bf16 %v798_v49, %v797_v48  ;;  %v800_v10 = vld [vmem:[%s10490_s0 + $0x142] sm:$0xff]  ;;  %v6347_v12 = vld [vmem:[%s10490_s0 + $0x158] sm:$0xff] }
  0xac   :  { %v620_v15 = vpop.f32.mrf.mxu1  ;;  %v989_v17 = vpop.f32.mrf.mxu2 }
  0xad   :  { %v357_v14 = vpop.f32.mrf.mxu0  ;;  %v621_v16 = vadd.f32 %v620_v15, %v352_v55  ;;  %v1420_v18 = vpop.f32.mrf.mxu3 }
  0xaf   :  { %v1142_v19 = vadd.f32 %v986_v8, %v621_v16 }
  0xb1   :  { %v7584_v22 = vadd.f32 %v1417_v9, %v1142_v19  ;;  %v799_v9 = vld [vmem:[%s10490_s0 + $0x13a] sm:$0xff] }
  0xb2   :  { %v850_v20 = vpack.c.bf16 %v800_v10, %v799_v9 }
  0xb4   :  { %v623_v29 = vpop.f32.mrf.mxu1  ;;  %v991_v31 = vpop.f32.mrf.mxu2 }
  0xb5   :  { %v360_v28 = vpop.f32.mrf.mxu0  ;;  %v624_v30 = vadd.f32 %v623_v29, %v355_v5  ;;  %v1422_v33 = vpop.f32.mrf.mxu3 }
  0xb7   :  { %v1143_v37 = vadd.f32 %v989_v17, %v624_v30  ;;  %6265 = vmatmul.msk.bf16.gmra.mxu1 %vm235_vm1, %v1277_v52  ;;  %v213_v52 = vpack.c.bf16 %v162_v46, %v161_v45 }
  0xb8   :  { %6234 = vmatmul.msk.bf16.gmra.mxu0 %vm235_vm1, %v212_v27 }
  0xb9   :  { %v7600_v38 = vadd.f32 %v1420_v18, %v1143_v37  ;;  %6299 = vmatmul.msk.bf16.gmra.mxu2 %vm235_vm1, %v848_v34  ;;  %6396 = vmatmul.msk.bf16.gmra.mxu3 %vm235_vm1, %v1279_v35  ;;  %v802_v37 = vld [vmem:[%s10490_s0 + $0x15a] sm:$0xff] }
  0xbc   :  { %v625_v40 = vpop.f32.mrf.mxu1  ;;  %v994_v42 = vpop.f32.mrf.mxu2 }
  0xbd   :  { %v362_v39 = vpop.f32.mrf.mxu0  ;;  %v626_v41 = vadd.f32 %v625_v40, %v357_v14  ;;  %v1425_v43 = vpop.f32.mrf.mxu3  ;;  %v214_v14 = vpack.c.bf16 %v164_v7, %v163_v6  ;;  %v6349_v40 = vld [vmem:[%s10490_s0 + $0x170] sm:$0xff] }
  0xbf   :  { %v1144_v44 = vadd.f32 %v991_v31, %v626_v41  ;;  %v165_v31 = vld [vmem:[%s10490_s0 + $0x151] sm:$0xff] }
  0xc1   :  { %v7610_v47 = vadd.f32 %v1422_v33, %v1144_v44  ;;  %v166_v33 = vld [vmem:[%s10490_s0 + $0x159] sm:$0xff] }
  0xc2   :  { %v215_v41 = vpack.c.bf16 %v166_v33, %v165_v31 }
  0xc4   :  { %v628_v55 = vpop.f32.mrf.mxu1  ;;  %v996_v57 = vpop.f32.mrf.mxu2 }
  0xc5   :  { %v365_v53 = vpop.f32.mrf.mxu0  ;;  %v629_v56 = vadd.f32 %v628_v55, %v360_v28  ;;  %v1427_v58 = vpop.f32.mrf.mxu3 }
  0xc7   :  { %v1145_v61 = vadd.f32 %v994_v42, %v629_v56  ;;  %6266 = vmatmul.msk.bf16.gmra.mxu1 %vm235_vm1, %v1278_v11  ;;  %v6346_v11 = vld [vmem:[%s10490_s0 + $0x150] sm:$0xff] }
  0xc8   :  { %6235 = vmatmul.msk.bf16.gmra.mxu0 %vm235_vm1, %v213_v52  ;;  %v1281_v21 = vpack.c.bf16 %v6347_v12, %v6346_v11 }
  0xc9   :  { %v7626_v62 = vadd.f32 %v1425_v43, %v1145_v61  ;;  %6300 = vmatmul.msk.bf16.gmra.mxu2 %vm235_vm1, %v849_v59  ;;  %6397 = vmatmul.msk.bf16.gmra.mxu3 %vm235_vm1, %v1280_v60  ;;  %v167_v59 = vld [vmem:[%s10490_s0 + $0x169] sm:$0xff] }
  0xcc   :  { %v630_v1 = vpop.f32.mrf.mxu1  ;;  %v999_v3 = vpop.f32.mrf.mxu2 }
  0xcd   :  { %v367_v0 = vpop.f32.mrf.mxu0  ;;  %v631_v2 = vadd.f32 %v630_v1, %v362_v39  ;;  %v1430_v4 = vpop.f32.mrf.mxu3  ;;  %v6348_v39 = vld [vmem:[%s10490_s0 + $0x168] sm:$0xff]  ;;  %v804_v1 = vld [vmem:[%s10490_s0 + $0x172] sm:$0xff] }
  0xce   :  { %v1282_v49 = vpack.c.bf16 %v6349_v40, %v6348_v39 }
  0xcf   :  { %v1146_v5 = vadd.f32 %v996_v57, %v631_v2  ;;  %v6350_v2 = vld [vmem:[%s10490_s0 + $0x180] sm:$0xff] }
  0xd1   :  { %v7636_v8 = vadd.f32 %v1427_v58, %v1146_v5 }
  0xd4   :  { %v633_v16 = vpop.f32.mrf.mxu1  ;;  %v1001_v18 = vpop.f32.mrf.mxu2 }
  0xd5   :  { %v370_v15 = vpop.f32.mrf.mxu0  ;;  %v634_v17 = vadd.f32 %v633_v16, %v365_v53  ;;  %v1432_v19 = vpop.f32.mrf.mxu3 }
  0xd7   :  { %v1147_v23 = vadd.f32 %v999_v3, %v634_v17  ;;  %6267 = vmatmul.msk.bf16.gmra.mxu1 %vm235_vm1, %v1279_v35  ;;  %v801_v35 = vld [vmem:[%s10490_s0 + $0x152] sm:$0xff]  ;;  %v6351_v3 = vld [vmem:[%s10490_s0 + $0x188] sm:$0xff] }
  0xd8   :  { %6236 = vmatmul.msk.bf16.gmra.mxu0 %vm235_vm1, %v214_v14  ;;  %v851_v48 = vpack.c.bf16 %v802_v37, %v801_v35  ;;  %v1283_v12 = vpack.c.bf16 %v6351_v3, %v6350_v2 }
  0xd9   :  { %v7652_v24 = vadd.f32 %v1430_v4, %v1147_v23  ;;  %6301 = vmatmul.msk.bf16.gmra.mxu2 %vm235_vm1, %v850_v20  ;;  %6398 = vmatmul.msk.bf16.gmra.mxu3 %vm235_vm1, %v1281_v21 }
  0xdc   :  { %v635_v26 = vpop.f32.mrf.mxu1  ;;  %v1004_v28 = vpop.f32.mrf.mxu2 }
  0xdd   :  { %v372_v25 = vpop.f32.mrf.mxu0  ;;  %v636_v27 = vadd.f32 %v635_v26, %v367_v0  ;;  %v1435_v29 = vpop.f32.mrf.mxu3  ;;  %v803_v0 = vld [vmem:[%s10490_s0 + $0x16a] sm:$0xff] }
  0xde   :  { %v852_v11 = vpack.c.bf16 %v804_v1, %v803_v0  ;;  %v6354_v0 = vld [vmem:[%s10490_s0 + $0x1e0] sm:$0xff]  ;;  %v6355_v1 = vld [vmem:[%s10490_s0 + $0x1e8] sm:$0xff] }
  0xdf   :  { %v1148_v30 = vadd.f32 %v1001_v18, %v636_v27  ;;  %v805_v27 = vld [vmem:[%s10490_s0 + $0x1b2] sm:$0xff] }
  0xe1   :  { %v7662_v34 = vadd.f32 %v1432_v19, %v1148_v30  ;;  %v6353_v30 = vld [vmem:[%s10490_s0 + $0x1d0] sm:$0xff] }
  0xe4   :  { %v638_v43 = vpop.f32.mrf.mxu1  ;;  %v1006_v45 = vpop.f32.mrf.mxu2 }
  0xe5   :  { %v375_v42 = vpop.f32.mrf.mxu0  ;;  %v639_v44 = vadd.f32 %v638_v43, %v370_v15  ;;  %v1437_v46 = vpop.f32.mrf.mxu3 }
  0xe7   :  { %v1149_v50 = vadd.f32 %v1004_v28, %v639_v44  ;;  %6268 = vmatmul.msk.bf16.gmra.mxu1 %vm235_vm1, %v1280_v60  ;;  %v168_v60 = vld [vmem:[%s10490_s0 + $0x171] sm:$0xff]  ;;  %v806_v28 = vld [vmem:[%s10490_s0 + $0x1ba] sm:$0xff] }
  0xe8   :  { %6237 = vmatmul.msk.bf16.gmra.mxu0 %vm235_vm1, %v215_v41  ;;  %v216_v4 = vpack.c.bf16 %v168_v60, %v167_v59  ;;  %v853_v41 = vpack.c.bf16 %v806_v28, %v805_v27  ;;  %v807_v59 = vld [vmem:[%s10490_s0 + $0x1ca] sm:$0xff]  ;;  %v808_v60 = vld [vmem:[%s10490_s0 + $0x1d2] sm:$0xff]  ;;  %v809_v28 = vld [vmem:[%s10490_s0 + $0x1e2] sm:$0xff] }
  0xe9   :  { %v7678_v51 = vadd.f32 %v1435_v29, %v1149_v50  ;;  %6302 = vmatmul.msk.bf16.gmra.mxu2 %vm235_vm1, %v851_v48  ;;  %6399 = vmatmul.msk.bf16.gmra.mxu3 %vm235_vm1, %v1282_v49  ;;  %v6352_v29 = vld [vmem:[%s10490_s0 + $0x1c8] sm:$0xff] }
  0xec   :  { %v640_v53 = vpop.f32.mrf.mxu1  ;;  %v1009_v56 = vpop.f32.mrf.mxu2 }
  0xed   :  { %v377_v52 = vpop.f32.mrf.mxu0  ;;  %v641_v55 = vadd.f32 %v640_v53, %v372_v25  ;;  %v1440_v57 = vpop.f32.mrf.mxu3  ;;  %v169_v25 = vld [vmem:[%s10490_s0 + $0x1b1] sm:$0xff] }
  0xef   :  { %v1150_v58 = vadd.f32 %v1006_v45, %v641_v55  ;;  %v171_v55 = vld [vmem:[%s10490_s0 + $0x1c9] sm:$0xff] }
  0xf1   :  { %v7688_v61 = vadd.f32 %v1437_v46, %v1150_v58 }
  0xf4   :  { %v643_v6 = vpop.f32.mrf.mxu1  ;;  %v1011_v9 = vpop.f32.mrf.mxu2 }
  0xf5   :  { %v380_v5 = vpop.f32.mrf.mxu0  ;;  %v644_v7 = vadd.f32 %v643_v6, %v375_v42  ;;  %v1442_v10 = vpop.f32.mrf.mxu3  ;;  %v1284_v42 = vpack.c.bf16 %v6353_v30, %v6352_v29  ;;  %v810_v29 = vld [vmem:[%s10490_s0 + $0x1ea] sm:$0xff]  ;;  %v6356_v30 = vld [vmem:[%s10490_s0 + $0x1f8] sm:$0xff] }
  0xf7   :  { %v1151_v14 = vadd.f32 %v1009_v56, %v644_v7  ;;  %6269 = vmatmul.msk.bf16.gmra.mxu1 %vm235_vm1, %v1281_v21  ;;  %v170_v21 = vld [vmem:[%s10490_s0 + $0x1b9] sm:$0xff]  ;;  %v72_v56 = vld [vmem:[%s10490_s0 + $0x1b0] sm:$0xff] }
  0xf8   :  { %6238 = vmatmul.msk.bf16.gmra.mxu0 %vm235_vm1, %v216_v4  ;;  %v217_v31 = vpack.c.bf16 %v170_v21, %v169_v25  ;;  %v173_v25 = vld [vmem:[%s10490_s0 + $0x1e1] sm:$0xff]  ;;  %v174_v21 = vld [vmem:[%s10490_s0 + $0x1e9] sm:$0xff] }
  0xf9   :  { %v7704_v15 = vadd.f32 %v1440_v57, %v1151_v14  ;;  %6303 = vmatmul.msk.bf16.gmra.mxu2 %vm235_vm1, %v852_v11  ;;  %6400 = vmatmul.msk.bf16.gmra.mxu3 %vm235_vm1, %v1283_v12  ;;  %v73_v57 = vld [vmem:[%s10490_s0 + $0x1b8] sm:$0xff]  ;;  %v1285_v11 = vpack.c.bf16 %v6355_v1, %v6354_v0  ;;  %v812_v0 = vld [vmem:[%s10490_s0 + $0x202] sm:$0xff]  ;;  %v6358_v1 = vld [vmem:[%s10490_s0 + $0x210] sm:$0xff] }
  0xfa   :  { %v120_v3 = vpack.c.bf16 %v73_v57, %v72_v56  ;;  %v175_v57 = vld [vmem:[%s10490_s0 + $0x1f9] sm:$0xff] }
  0xfc   :  { %v645_v17 = vpop.f32.mrf.mxu1  ;;  %v1014_v19 = vpop.f32.mrf.mxu2 }
  0xfd   :  { %v382_v16 = vpop.f32.mrf.mxu0  ;;  %v646_v18 = vadd.f32 %v645_v17, %v377_v52  ;;  %v1445_v20 = vpop.f32.mrf.mxu3 }
  0xff   :  { %v1152_v23 = vadd.f32 %v1011_v9, %v646_v18 }
 0x101   :  { %v7714_v26 = vadd.f32 %v1442_v10, %v1152_v23  ;;  %v854_v10 = vpack.c.bf16 %v808_v60, %v807_v59  ;;  %v811_v60 = vld [vmem:[%s10490_s0 + $0x1fa] sm:$0xff] }
 0x104   :  { %v648_v35 = vpop.f32.mrf.mxu1  ;;  %v1016_v39 = vpop.f32.mrf.mxu2 }
 0x105   :  { %v385_v33 = vpop.f32.mrf.mxu0  ;;  %v649_v37 = vadd.f32 %v648_v35, %v380_v5  ;;  %v1447_v40 = vpop.f32.mrf.mxu3 }
 0x107   :  { %v1153_v43 = vadd.f32 %v1014_v19, %v649_v37  ;;  %6270 = vmatmul.msk.bf16.gmra.mxu1 %vm235_vm1, %v1282_v49  ;;  %v172_v49 = vld [vmem:[%s10490_s0 + $0x1d1] sm:$0xff] }
 0x108   :  { %6239 = vmatmul.msk.bf16.gmra.mxu0 %vm235_vm1, %v217_v31  ;;  %v218_v2 = vpack.c.bf16 %v172_v49, %v171_v55  ;;  %v6357_v31 = vld [vmem:[%s10490_s0 + $0x200] sm:$0xff] }
 0x109   :  { %v7730_v44 = vadd.f32 %v1445_v20, %v1153_v43  ;;  %6304 = vmatmul.msk.bf16.gmra.mxu2 %vm235_vm1, %v853_v41  ;;  %6401 = vmatmul.msk.bf16.gmra.mxu3 %vm235_vm1, %v1284_v42  ;;  %v855_v43 = vpack.c.bf16 %v810_v29, %v809_v28  ;;  %v177_v28 = vld [vmem:[%s10490_s0 + $0x211] sm:$0xff] }
 0x10c   :  { %v650_v46 = vpop.f32.mrf.mxu1  ;;  %v1019_v50 = vpop.f32.mrf.mxu2 }
 0x10d   :  { %v387_v45 = vpop.f32.mrf.mxu0  ;;  %v651_v48 = vadd.f32 %v650_v46, %v382_v16  ;;  %v1450_v52 = vpop.f32.mrf.mxu3 }
 0x10f   :  { %v1154_v53 = vadd.f32 %v1016_v39, %v651_v48 }
 0x111   :  { %v7746_v58 = vadd.f32 %v1447_v40, %v1154_v53 }
 0x114   :  { %v653_v5 = vpop.f32.mrf.mxu1  ;;  %v1021_v7 = vpop.f32.mrf.mxu2 }
 0x115   :  { %v390_v4 = vpop.f32.mrf.mxu0  ;;  %v654_v6 = vadd.f32 %v653_v5, %v385_v33  ;;  %v1452_v9 = vpop.f32.mrf.mxu3  ;;  %v219_v33 = vpack.c.bf16 %v174_v21, %v173_v25 }
 0x117   :  { %v1155_v12 = vadd.f32 %v1019_v50, %v654_v6  ;;  %6271 = vmatmul.msk.bf16.gmra.mxu1 %vm235_vm1, %v120_v3 }
 0x118   :  { %6240 = vmatmul.msk.bf16.gmra.mxu0 %vm235_vm1, %v218_v2  ;;  %v6359_v2 = vld [vmem:[%s10490_s0 + $0x218] sm:$0xff] }
 0x119   :  { %v7762_v14 = vadd.f32 %v1450_v52, %v1155_v12  ;;  %6305 = vmatmul.msk.bf16.gmra.mxu2 %vm235_vm1, %v854_v10  ;;  %6402 = vmatmul.msk.bf16.gmra.mxu3 %vm235_vm1, %v1285_v11  ;;  %v856_v10 = vpack.c.bf16 %v812_v0, %v811_v60  ;;  %v1287_v12 = vpack.c.bf16 %v6359_v2, %v6358_v1  ;;  %v179_v1 = vld [vmem:[%s10490_s0 + $0x229] sm:$0xff] }
 0x11c   :  { %v655_v17 = vpop.f32.mrf.mxu1  ;;  %v1024_v19 = vpop.f32.mrf.mxu2 }
 0x11d   :  { %v392_v16 = vpop.f32.mrf.mxu0  ;;  %v656_v18 = vadd.f32 %v655_v17, %v387_v45  ;;  %v1455_v20 = vpop.f32.mrf.mxu3  ;;  %v1286_v45 = vpack.c.bf16 %v6357_v31, %v6356_v30  ;;  %v813_v30 = vld [vmem:[%s10490_s0 + $0x212] sm:$0xff]  ;;  %v814_v31 = vld [vmem:[%s10490_s0 + $0x21a] sm:$0xff] }
 0x11f   :  { %v1156_v23 = vadd.f32 %v1021_v7, %v656_v18 }
 0x121   :  { %v7772_v27 = vadd.f32 %v1452_v9, %v1156_v23 }
 0x124   :  { %v658_v37 = vpop.f32.mrf.mxu1  ;;  %v1026_v40 = vpop.f32.mrf.mxu2 }
 0x125   :  { %v395_v35 = vpop.f32.mrf.mxu0  ;;  %v659_v39 = vadd.f32 %v658_v37, %v390_v4  ;;  %v1457_v41 = vpop.f32.mrf.mxu3 }
 0x127   :  { %v1157_v46 = vadd.f32 %v1024_v19, %v659_v39  ;;  %6272 = vmatmul.msk.bf16.gmra.mxu1 %vm235_vm1, %v1284_v42  ;;  %v176_v42 = vld [vmem:[%s10490_s0 + $0x201] sm:$0xff] }
 0x128   :  { %6241 = vmatmul.msk.bf16.gmra.mxu0 %vm235_vm1, %v219_v33  ;;  %v220_v3 = vpack.c.bf16 %v176_v42, %v175_v57  ;;  %v6360_v33 = vld [vmem:[%s10490_s0 + $0x228] sm:$0xff] }
 0x129   :  { %v7788_v48 = vadd.f32 %v1455_v20, %v1157_v46  ;;  %6306 = vmatmul.msk.bf16.gmra.mxu2 %vm235_vm1, %v855_v43  ;;  %6403 = vmatmul.msk.bf16.gmra.mxu3 %vm235_vm1, %v1286_v45 }
 0x12c   :  { %v660_v52 = vpop.f32.mrf.mxu1  ;;  %v1029_v55 = vpop.f32.mrf.mxu2 }
 0x12d   :  { %v397_v50 = vpop.f32.mrf.mxu0  ;;  %v661_v53 = vadd.f32 %v660_v52, %v392_v16  ;;  %v1460_v49 = vpop.f32.mrf.mxu3 }
 0x12f   :  { %v1158_v56 = vadd.f32 %v1026_v40, %v661_v53 }
 0x131   :  { %v7798_v59 = vadd.f32 %v1457_v41, %v1158_v56 }
 0x134   :  { %v663_v5 = vpop.f32.mrf.mxu1  ;;  %v1031_v7 = vpop.f32.mrf.mxu2 }
 0x135   :  { %v400_v4 = vpop.f32.mrf.mxu0  ;;  %v664_v6 = vadd.f32 %v663_v5, %v395_v35  ;;  %v1462_v9 = vpop.f32.mrf.mxu3  ;;  %v6361_v35 = vld [vmem:[%s10490_s0 + $0x230] sm:$0xff]  ;;  %v6362_v5 = vld [vmem:[%s10490_s0 + $0x240] sm:$0xff] }
 0x136   :  { %v1288_v52 = vpack.c.bf16 %v6361_v35, %v6360_v33 }
 0x137   :  { %v1159_v16 = vadd.f32 %v1029_v55, %v664_v6  ;;  %6273 = vmatmul.msk.bf16.gmra.mxu1 %vm235_vm1, %v1285_v11  ;;  %v178_v11 = vld [vmem:[%s10490_s0 + $0x219] sm:$0xff]  ;;  %v6363_v6 = vld [vmem:[%s10490_s0 + $0x248] sm:$0xff] }
 0x138   :  { %6242 = vmatmul.msk.bf16.gmra.mxu0 %vm235_vm1, %v220_v3  ;;  %v221_v37 = vpack.c.bf16 %v178_v11, %v177_v28  ;;  %v815_v3 = vld [vmem:[%s10490_s0 + $0x22a] sm:$0xff] }
 0x139   :  { %v7814_v17 = vadd.f32 %v1460_v49, %v1159_v16  ;;  %6307 = vmatmul.msk.bf16.gmra.mxu2 %vm235_vm1, %v856_v10  ;;  %6404 = vmatmul.msk.bf16.gmra.mxu3 %vm235_vm1, %v1287_v12 }
 0x13c   :  { %v665_v19 = vpop.f32.mrf.mxu1  ;;  %v1034_v23 = vpop.f32.mrf.mxu2 }
 0x13d   :  { %v402_v18 = vpop.f32.mrf.mxu0  ;;  %v666_v20 = vadd.f32 %v665_v19, %v397_v50  ;;  %v1465_v25 = vpop.f32.mrf.mxu3  ;;  %v857_v50 = vpack.c.bf16 %v814_v31, %v813_v30 }
 0x13f   :  { %v1160_v21 = vadd.f32 %v1031_v7, %v666_v20 }
 0x141   :  { %v7824_v29 = vadd.f32 %v1462_v9, %v1160_v21 }
 0x144   :  { %v668_v40 = vpop.f32.mrf.mxu1  ;;  %v1036_v43 = vpop.f32.mrf.mxu2 }
 0x145   :  { %v405_v39 = vpop.f32.mrf.mxu0  ;;  %v669_v41 = vadd.f32 %v668_v40, %v400_v4  ;;  %v1467_v46 = vpop.f32.mrf.mxu3  ;;  %v816_v4 = vld [vmem:[%s10490_s0 + $0x232] sm:$0xff]  ;;  %v817_v40 = vld [vmem:[%s10490_s0 + $0x242] sm:$0xff] }
 0x146   :  { %v858_v20 = vpack.c.bf16 %v816_v4, %v815_v3 }
 0x147   :  { %v1161_v53 = vadd.f32 %v1034_v23, %v669_v41  ;;  %6274 = vmatmul.msk.bf16.gmra.mxu1 %vm235_vm1, %v1286_v45  ;;  %v180_v45 = vld [vmem:[%s10490_s0 + $0x231] sm:$0xff]  ;;  %v1289_v23 = vpack.c.bf16 %v6363_v6, %v6362_v5 }
 0x148   :  { %6243 = vmatmul.msk.bf16.gmra.mxu0 %vm235_vm1, %v221_v37  ;;  %v222_v7 = vpack.c.bf16 %v180_v45, %v179_v1  ;;  %v181_v37 = vld [vmem:[%s10490_s0 + $0x241] sm:$0xff]  ;;  %v818_v41 = vld [vmem:[%s10490_s0 + $0x24a] sm:$0xff] }
 0x149   :  { %v7840_v55 = vadd.f32 %v1465_v25, %v1161_v53  ;;  %6308 = vmatmul.msk.bf16.gmra.mxu2 %vm235_vm1, %v857_v50  ;;  %6405 = vmatmul.msk.bf16.gmra.mxu3 %vm235_vm1, %v1288_v52 }
 0x14c   :  { %v670_v56 = vpop.f32.mrf.mxu1  ;;  %v1039_v42 = vpop.f32.mrf.mxu2 }
 0x14d   :  { %v407_v49 = vpop.f32.mrf.mxu0  ;;  %v671_v57 = vadd.f32 %v670_v56, %v402_v18  ;;  %v1470_v60 = vpop.f32.mrf.mxu3 }
 0x14f   :  { %v1162_v0 = vadd.f32 %v1036_v43, %v671_v57  ;;  %v6364_v43 = vld [vmem:[%s10490_s0 + $0x258] sm:$0xff] }
 0x151   :  { %v7850_v2 = vadd.f32 %v1467_v46, %v1162_v0  ;;  %v6365_v46 = vld [vmem:[%s10490_s0 + $0x260] sm:$0xff] }
 0x152   :  { %v1290_v0 = vpack.c.bf16 %v6365_v46, %v6364_v43 }
 0x154   :  { %v673_v10 = vpop.f32.mrf.mxu1  ;;  %v1041_v18 = vpop.f32.mrf.mxu2 }
 0x155   :  { %v410_v9 = vpop.f32.mrf.mxu0  ;;  %v674_v16 = vadd.f32 %v673_v10, %v405_v39  ;;  %v1472_v19 = vpop.f32.mrf.mxu3  ;;  %v183_v10 = vld [vmem:[%s10490_s0 + $0x259] sm:$0xff] }
 0x157   :  { %v1163_v25 = vadd.f32 %v1039_v42, %v674_v16  ;;  %6275 = vmatmul.msk.bf16.gmra.mxu1 %vm235_vm1, %v1287_v12  ;;  %v182_v12 = vld [vmem:[%s10490_s0 + $0x249] sm:$0xff] }
 0x158   :  { %6244 = vmatmul.msk.bf16.gmra.mxu0 %vm235_vm1, %v222_v7  ;;  %v223_v50 = vpack.c.bf16 %v182_v12, %v181_v37 }
 0x159   :  { %v7866_v21 = vadd.f32 %v1470_v60, %v1163_v25  ;;  %6309 = vmatmul.msk.bf16.gmra.mxu2 %vm235_vm1, %v858_v20  ;;  %6406 = vmatmul.msk.bf16.gmra.mxu3 %vm235_vm1, %v1289_v23  ;;  %v859_v60 = vpack.c.bf16 %v818_v41, %v817_v40  ;;  %v6366_v20 = vld [vmem:[%s10490_s0 + $0x270] sm:$0xff]  ;;  %v6367_v25 = vld [vmem:[%s10490_s0 + $0x278] sm:$0xff] }
 0x15a   :  { %v1291_v12 = vpack.c.bf16 %v6367_v25, %v6366_v20 }
 0x15c   :  { %v675_v11 = vpop.f32.mrf.mxu1  ;;  %v1044_v31 = vpop.f32.mrf.mxu2 }
 0x15d   :  { %v412_v28 = vpop.f32.mrf.mxu0  ;;  %v676_v30 = vadd.f32 %v675_v11, %v407_v49  ;;  %v1475_v33 = vpop.f32.mrf.mxu3 }
 0x15f   :  { %v1164_v35 = vadd.f32 %v1041_v18, %v676_v30  ;;  %v819_v18 = vld [vmem:[%s10490_s0 + $0x25a] sm:$0xff] }
 0x161   :  { %v7876_v39 = vadd.f32 %v1472_v19, %v1164_v35  ;;  %v820_v19 = vld [vmem:[%s10490_s0 + $0x262] sm:$0xff] }
 0x162   :  { %v860_v37 = vpack.c.bf16 %v820_v19, %v819_v18 }
 0x164   :  { %v678_v49 = vpop.f32.mrf.mxu1  ;;  %v1046_v57 = vpop.f32.mrf.mxu2 }
 0x165   :  { %v415_v53 = vpop.f32.mrf.mxu0  ;;  %v679_v56 = vadd.f32 %v678_v49, %v410_v9  ;;  %v1477_v42 = vpop.f32.mrf.mxu3 }
 0x167   :  { %v1165_v1 = vadd.f32 %v1044_v31, %v679_v56  ;;  %6276 = vmatmul.msk.bf16.gmra.mxu1 %vm235_vm1, %v1288_v52  ;;  %v184_v52 = vld [vmem:[%s10490_s0 + $0x261] sm:$0xff] }
 0x168   :  { %6245 = vmatmul.msk.bf16.gmra.mxu0 %vm235_vm1, %v223_v50 }
 0x169   :  { %v7892_v45 = vadd.f32 %v1475_v33, %v1165_v1  ;;  %6310 = vmatmul.msk.bf16.gmra.mxu2 %vm235_vm1, %v859_v60  ;;  %6407 = vmatmul.msk.bf16.gmra.mxu3 %vm235_vm1, %v1290_v0  ;;  %v821_v60 = vld [vmem:[%s10490_s0 + $0x272] sm:$0xff]  ;;  %v822_v1 = vld [vmem:[%s10490_s0 + $0x27a] sm:$0xff] }
 0x16a   :  { %v861_v18 = vpack.c.bf16 %v822_v1, %v821_v60 }
 0x16c   :  { %v680_v4 = vpop.f32.mrf.mxu1  ;;  %v1049_v6 = vpop.f32.mrf.mxu2 }
 0x16d   :  { %v417_v3 = vpop.f32.mrf.mxu0  ;;  %v681_v5 = vadd.f32 %v680_v4, %v412_v28  ;;  %v1480_v7 = vpop.f32.mrf.mxu3  ;;  %v224_v28 = vpack.c.bf16 %v184_v52, %v183_v10  ;;  %v6369_v4 = vld [vmem:[%s10490_s0 + $0x290] sm:$0xff] }
 0x16f   :  { %v1166_v9 = vadd.f32 %v1046_v57, %v681_v5  ;;  %v185_v57 = vld [vmem:[%s10490_s0 + $0x271] sm:$0xff] }
 0x171   :  { %v7902_v16 = vadd.f32 %v1477_v42, %v1166_v9 }
 0x174   :  { %v683_v30 = vpop.f32.mrf.mxu1  ;;  %v1051_v33 = vpop.f32.mrf.mxu2 }
 0x175   :  { %v420_v11 = vpop.f32.mrf.mxu0  ;;  %v684_v31 = vadd.f32 %v683_v30, %v415_v53  ;;  %v1482_v35 = vpop.f32.mrf.mxu3 }
 0x177   :  { %v1167_v40 = vadd.f32 %v1049_v6, %v684_v31  ;;  %6277 = vmatmul.msk.bf16.gmra.mxu1 %vm235_vm1, %v1289_v23  ;;  %v186_v23 = vld [vmem:[%s10490_s0 + $0x279] sm:$0xff] }
 0x178   :  { %6246 = vmatmul.msk.bf16.gmra.mxu0 %vm235_vm1, %v224_v28  ;;  %v225_v5 = vpack.c.bf16 %v186_v23, %v185_v57 }
 0x179   :  { %v7918_v41 = vadd.f32 %v1480_v7, %v1167_v40  ;;  %6311 = vmatmul.msk.bf16.gmra.mxu2 %vm235_vm1, %v860_v37  ;;  %6408 = vmatmul.msk.bf16.gmra.mxu3 %vm235_vm1, %v1291_v12  ;;  %v187_v37 = vld [vmem:[%s10490_s0 + $0x289] sm:$0xff] }
 0x17c   :  { %v685_v46 = vpop.f32.mrf.mxu1  ;;  %v1054_v49 = vpop.f32.mrf.mxu2 }
 0x17d   :  { %v422_v43 = vpop.f32.mrf.mxu0  ;;  %v686_v50 = vadd.f32 %v685_v46, %v417_v3  ;;  %v1485_v53 = vpop.f32.mrf.mxu3  ;;  %v6368_v3 = vld [vmem:[%s10490_s0 + $0x288] sm:$0xff] }
 0x17e   :  { %v1292_v19 = vpack.c.bf16 %v6369_v4, %v6368_v3  ;;  %v823_v46 = vld [vmem:[%s10490_s0 + $0x28a] sm:$0xff] }
 0x17f   :  { %v1168_v56 = vadd.f32 %v1051_v33, %v686_v50  ;;  %v6370_v50 = vld [vmem:[%s10490_s0 + $0x2a0] sm:$0xff] }
 0x181   :  { %v7928_v42 = vadd.f32 %v1482_v35, %v1168_v56 }
 0x184   :  { %v688_v7 = vpop.f32.mrf.mxu1  ;;  %v1056_v10 = vpop.f32.mrf.mxu2 }
 0x185   :  { %v425_v6 = vpop.f32.mrf.mxu0  ;;  %v689_v9 = vadd.f32 %v688_v7, %v420_v11  ;;  %v1487_v52 = vpop.f32.mrf.mxu3 }
 0x187   :  { %v1169_v20 = vadd.f32 %v1054_v49, %v689_v9  ;;  %6278 = vmatmul.msk.bf16.gmra.mxu1 %vm235_vm1, %v1290_v0  ;;  %v188_v0 = vld [vmem:[%s10490_s0 + $0x291] sm:$0xff]  ;;  %v6371_v49 = vld [vmem:[%s10490_s0 + $0x2a8] sm:$0xff] }
 0x188   :  { %6247 = vmatmul.msk.bf16.gmra.mxu0 %vm235_vm1, %v225_v5  ;;  %v1293_v4 = vpack.c.bf16 %v6371_v49, %v6370_v50 }
 0x189   :  { %v7944_v25 = vadd.f32 %v1485_v53, %v1169_v20  ;;  %6312 = vmatmul.msk.bf16.gmra.mxu2 %vm235_vm1, %v861_v18  ;;  %6409 = vmatmul.msk.bf16.gmra.mxu3 %vm235_vm1, %v1292_v19  ;;  %v226_v53 = vpack.c.bf16 %v188_v0, %v187_v37 }
 0x18c   :  { %v690_v30 = vpop.f32.mrf.mxu1  ;;  %v1059_v33 = vpop.f32.mrf.mxu2 }
 0x18d   :  { %v427_v28 = vpop.f32.mrf.mxu0  ;;  %v691_v31 = vadd.f32 %v690_v30, %v422_v43  ;;  %v1490_v11 = vpop.f32.mrf.mxu3  ;;  %v824_v43 = vld [vmem:[%s10490_s0 + $0x292] sm:$0xff]  ;;  %v189_v30 = vld [vmem:[%s10490_s0 + $0x2a1] sm:$0xff] }
 0x18e   :  { %v862_v3 = vpack.c.bf16 %v824_v43, %v823_v46 }
 0x18f   :  { %v1170_v35 = vadd.f32 %v1056_v10, %v691_v31 }
 0x191   :  { %v7954_v40 = vadd.f32 %v1487_v52, %v1170_v35  ;;  %v6373_v35 = vld [vmem:[%s10490_s0 + $0x2c0] sm:$0xff] }
 0x194   :  { %v693_v57 = vpop.f32.mrf.mxu1  ;;  %v1061_v60 = vpop.f32.mrf.mxu2 }
 0x195   :  { %v430_v56 = vpop.f32.mrf.mxu0  ;;  %v694_v23 = vadd.f32 %v693_v57, %v425_v6  ;;  %v1492_v1 = vpop.f32.mrf.mxu3 }
 0x197   :  { %v1171_v5 = vadd.f32 %v1059_v33, %v694_v23  ;;  %6279 = vmatmul.msk.bf16.gmra.mxu1 %vm235_vm1, %v1291_v12  ;;  %v190_v12 = vld [vmem:[%s10490_s0 + $0x2a9] sm:$0xff] }
 0x198   :  { %6248 = vmatmul.msk.bf16.gmra.mxu0 %vm235_vm1, %v226_v53  ;;  %v825_v33 = vld [vmem:[%s10490_s0 + $0x2a2] sm:$0xff]  ;;  %v227_v37 = vpack.c.bf16 %v190_v12, %v189_v30  ;;  %v6374_v30 = vld [vmem:[%s10490_s0 + $0x2d0] sm:$0xff]  ;;  %v6375_v12 = vld [vmem:[%s10490_s0 + $0x2d8] sm:$0xff] }
 0x199   :  { %v7970_v7 = vadd.f32 %v1490_v11, %v1171_v5  ;;  %6313 = vmatmul.msk.bf16.gmra.mxu2 %vm235_vm1, %v862_v3  ;;  %6410 = vmatmul.msk.bf16.gmra.mxu3 %vm235_vm1, %v1293_v4  ;;  %v6372_v11 = vld [vmem:[%s10490_s0 + $0x2b8] sm:$0xff] }
 0x19a   :  { %v1294_v57 = vpack.c.bf16 %v6373_v35, %v6372_v11 }
 0x19c   :  { %v695_v10 = vpop.f32.mrf.mxu1  ;;  %v1064_v18 = vpop.f32.mrf.mxu2 }
 0x19d   :  { %v432_v9 = vpop.f32.mrf.mxu0  ;;  %v696_v52 = vadd.f32 %v695_v10, %v427_v28  ;;  %v1495_v6 = vpop.f32.mrf.mxu3  ;;  %v826_v28 = vld [vmem:[%s10490_s0 + $0x2aa] sm:$0xff] }
 0x19e   :  { %v863_v53 = vpack.c.bf16 %v826_v28, %v825_v33 }
 0x19f   :  { %v1172_v20 = vadd.f32 %v1061_v60, %v696_v52 }
 0x1a1   :  { %v7980_v31 = vadd.f32 %v1492_v1, %v1172_v20  ;;  %v827_v20 = vld [vmem:[%s10490_s0 + $0x2ba] sm:$0xff] }
 0x1a4   :  { %v698_v46 = vpop.f32.mrf.mxu1  ;;  %v1066_v50 = vpop.f32.mrf.mxu2 }
 0x1a5   :  { %v435_v0 = vpop.f32.mrf.mxu0  ;;  %v699_v43 = vadd.f32 %v698_v46, %v430_v56  ;;  %v1497_v49 = vpop.f32.mrf.mxu3 }
 0x1a7   :  { %v1173_v23 = vadd.f32 %v1064_v18, %v699_v43  ;;  %6280 = vmatmul.msk.bf16.gmra.mxu1 %vm235_vm1, %v1292_v19  ;;  %v191_v18 = vld [vmem:[%s10490_s0 + $0x2b9] sm:$0xff]  ;;  %v192_v19 = vld [vmem:[%s10490_s0 + $0x2c1] sm:$0xff] }
 0x1a8   :  { %6249 = vmatmul.msk.bf16.gmra.mxu0 %vm235_vm1, %v227_v37  ;;  %v228_v33 = vpack.c.bf16 %v192_v19, %v191_v18  ;;  %v829_v19 = vld [vmem:[%s10490_s0 + $0x2d2] sm:$0xff] }
 0x1a9   :  { %v7996_v60 = vadd.f32 %v1495_v6, %v1173_v23  ;;  %6314 = vmatmul.msk.bf16.gmra.mxu2 %vm235_vm1, %v863_v53  ;;  %6411 = vmatmul.msk.bf16.gmra.mxu3 %vm235_vm1, %v1294_v57 }
 0x1ac   :  { %v700_v3 = vpop.f32.mrf.mxu1  ;;  %v1069_v10 = vpop.f32.mrf.mxu2 }
 0x1ad   :  { %v437_v1 = vpop.f32.mrf.mxu0  ;;  %v701_v5 = vadd.f32 %v700_v3, %v432_v9  ;;  %v1500_v56 = vpop.f32.mrf.mxu3  ;;  %v828_v9 = vld [vmem:[%s10490_s0 + $0x2c2] sm:$0xff] }
 0x1ae   :  { %v864_v43 = vpack.c.bf16 %v828_v9, %v827_v20  ;;  %v6376_v20 = vld [vmem:[%s10490_s0 + $0x2e8] sm:$0xff]  ;;  %v6377_v9 = vld [vmem:[%s10490_s0 + $0x2f0] sm:$0xff] }
 0x1af   :  { %v1174_v52 = vadd.f32 %v1066_v50, %v701_v5  ;;  %v8020_v50 = vpack.c.bf16 %v6375_v12, %v6374_v30 }
 0x1b1   :  { %v8006_v6 = vadd.f32 %v1497_v49, %v1174_v52 }
 0x1b4   :  { %v703_v11 = vpop.f32.mrf.mxu1  ;;  %v1071_v37 = vpop.f32.mrf.mxu2 }
 0x1b5   :  { %v440_v28 = vpop.f32.mrf.mxu0  ;;  %v704_v35 = vadd.f32 %v703_v11, %v435_v0  ;;  %v1502_v46 = vpop.f32.mrf.mxu3 }
 0x1b7   :  { %v1175_v49 = vadd.f32 %v1069_v10, %v704_v35  ;;  %6281 = vmatmul.msk.bf16.gmra.mxu1 %vm235_vm1, %v1293_v4  ;;  %v193_v10 = vld [vmem:[%s10490_s0 + $0x2d1] sm:$0xff]  ;;  %v194_v4 = vld [vmem:[%s10490_s0 + $0x2d9] sm:$0xff] }
 0x1b8   :  { %6250 = vmatmul.msk.bf16.gmra.mxu0 %vm235_vm1, %v228_v33  ;;  %v229_v30 = vpack.c.bf16 %v194_v4, %v193_v10 }
 0x1b9   :  { %v8024_v53 = vadd.f32 %v1500_v56, %v1175_v49  ;;  %6315 = vmatmul.msk.bf16.gmra.mxu2 %vm235_vm1, %v864_v43  ;;  %6412 = vmatmul.msk.bf16.gmra.mxu3 %vm235_vm1, %v8020_v50  ;;  %v8049_v43 = vpack.c.bf16 %v6377_v9, %v6376_v20 }
 0x1bc   :  { %v705_v3 = vpop.f32.mrf.mxu1  ;;  %v1074_v5 = vpop.f32.mrf.mxu2 }
 0x1bd   :  { %v442_v23 = vpop.f32.mrf.mxu0  ;;  %v706_v0 = vadd.f32 %v705_v3, %v437_v1  ;;  %v1505_v52 = vpop.f32.mrf.mxu3  ;;  %v830_v1 = vld [vmem:[%s10490_s0 + $0x2da] sm:$0xff] }
 0x1bf   :  { %v1176_v18 = vadd.f32 %v1071_v37, %v706_v0 }
 0x1c1   :  { %v8035_v56 = vadd.f32 %v1502_v46, %v1176_v18  ;;  %v865_v46 = vpack.c.bf16 %v830_v1, %v829_v19 }
 0x1c4   :  { %v708_v33 = vpop.f32.mrf.mxu1  ;;  %v1076_v35 = vpop.f32.mrf.mxu2 }
 0x1c5   :  { %v445_v12 = vpop.f32.mrf.mxu0  ;;  %v709_v11 = vadd.f32 %v708_v33, %v440_v28  ;;  %v1507_v37 = vpop.f32.mrf.mxu3  ;;  %v6578_v33 = vld [vmem:[%s10491_s1 + $0xa] sm:$0x3] }
 0x1c7   :  { %v1177_v49 = vadd.f32 %v1074_v5, %v709_v11  ;;  %6282 = vmatmul.msk.bf16.gmra.mxu1 %vm235_vm1, %v1294_v57  ;;  %v6675_v5 = vld [vmem:[%s10491_s1 + $0xc] sm:$0x3]  ;;  %v6772_v57 = vld [vmem:[%s10491_s1 + $0xe] sm:$0x3]  ;;  %v832_v11 = vld [vmem:[%s10490_s0 + $0x2f2] sm:$0xff] }
 0x1c8   :  { %6251 = vmatmul.msk.bf16.gmra.mxu0 %vm235_vm1, %v229_v30  ;;  %v2690_v19 = vsel %vm332_vm0, %v6675_v5, 0  ;;  %v3120_v20 = vsel %vm332_vm0, %v6772_v57, 0  ;;  %v831_v30 = vld [vmem:[%s10490_s0 + $0x2ea] sm:$0xff] }
 0x1c9   :  { %v8053_v3 = vadd.f32 %v1505_v52, %v1177_v49  ;;  %6316 = vmatmul.msk.bf16.gmra.mxu2 %vm235_vm1, %v865_v46  ;;  %6413 = vmatmul.msk.bf16.gmra.mxu3 %vm235_vm1, %v8049_v43  ;;  %v195_v52 = vld [vmem:[%s10490_s0 + $0x2e9] sm:$0xff]  ;;  %v2259_v46 = vsel %vm332_vm0, %v6578_v33, 0  ;;  %v866_v57 = vpack.c.bf16 %v832_v11, %v831_v30 }
 0x1ca   :  { %2699 = vmatpush.bf16.msrb.mxu2 %v2690_v19  ;;  %3129 = vmatpush.bf16.msrb.mxu3 %v3120_v20 }
 0x1cb   :  { %10513 = vst [vmem:[#allocation9_spill] sm:$0xff] %v8053_v3  ;;  %2268 = vmatpush.bf16.msra.mxu1 %v2259_v46  ;;  %v6869_v3 = vld [vmem:[%s10491_s1 + $0x10] sm:$0x3]  ;;  %v6381_v46 = vld [vmem:[%s10490_s0 + $0x320] sm:$0xff] }
 0x1cc   :  { %v710_v18 = vpop.f32.mrf.mxu1  ;;  %v1079_v10 = vpop.f32.mrf.mxu2 }
 0x1cd   :  { %v447_v0 = vpop.f32.mrf.mxu0  ;;  %v711_v28 = vadd.f32 %v710_v18, %v442_v23  ;;  %v1510_v4 = vpop.f32.mrf.mxu3  ;;  %v196_v23 = vld [vmem:[%s10490_s0 + $0x2f1] sm:$0xff] }
 0x1ce   :  { %v230_v49 = vpack.c.bf16 %v196_v23, %v195_v52  ;;  %v3550_v52 = vsel %vm332_vm0, %v6869_v3, 0  ;;  %v198_v3 = vld [vmem:[%s10490_s0 + $0x309] sm:$0xff] }
 0x1cf   :  { %v1178_v1 = vadd.f32 %v1076_v35, %v711_v28  ;;  %v6378_v35 = vld [vmem:[%s10490_s0 + $0x300] sm:$0xff]  ;;  %3559 = vmatpush.bf16.msra.mxu0 %v3550_v52 }
 0x1d1   :  { %v8072_v9 = vadd.f32 %v1507_v37, %v1178_v1  ;;  %v6379_v37 = vld [vmem:[%s10490_s0 + $0x308] sm:$0xff] }
 0x1d2   :  { %v1297_v20 = vpack.c.bf16 %v6379_v37, %v6378_v35  ;;  %v6380_v37 = vld [vmem:[%s10490_s0 + $0x318] sm:$0xff] }
 0x1d3   :  { %10514 = vst [vmem:[#allocation10_spill] sm:$0xff] %v8072_v9 }
 0x1d4   :  { %v713_v28 = vpop.f32.mrf.mxu1  ;;  %v1081_v19 = vpop.f32.mrf.mxu2 }
 0x1d5   :  { %v450_v18 = vpop.f32.mrf.mxu0  ;;  %v714_v5 = vadd.f32 %v713_v28, %v445_v12  ;;  %v1512_v1 = vpop.f32.mrf.mxu3 }
 0x1d7   :  { %v1179_v9 = vadd.f32 %v1079_v10, %v714_v5  ;;  %6283 = vmatmul.msk.bf16.gmra.mxu1 %vm235_vm1, %v8020_v50  ;;  %v197_v50 = vld [vmem:[%s10490_s0 + $0x301] sm:$0xff] }
 0x1d8   :  { %6252 = vmatmul.msk.bf16.gmra.mxu0 %vm235_vm1, %v230_v49  ;;  %v231_v49 = vpack.c.bf16 %v198_v3, %v197_v50 }
 0x1d9   :  { %v8097_v23 = vadd.f32 %v1510_v4, %v1179_v9  ;;  %6317 = vmatmul.msk.bf16.gmra.mxu2 %vm235_vm1, %v866_v57  ;;  %6414 = vmatmul.msk.bf16.gmra.mxu3 %vm235_vm1, %v1297_v20  ;;  %v833_v9 = vld [vmem:[%s10490_s0 + $0x302] sm:$0xff] }
 0x1db   :  { %10515 = vst [vmem:[#allocation11_spill] sm:$0xff] %v8097_v23 }
 0x1dc   :  { %v715_v10 = vpop.f32.mrf.mxu1  ;;  %v1084_v33 = vpop.f32.mrf.mxu2 }
 0x1dd   :  { %v452_v12 = vpop.f32.mrf.mxu0  ;;  %v716_v30 = vadd.f32 %v715_v10, %v447_v0  ;;  %v1515_v11 = vpop.f32.mrf.mxu3  ;;  %v834_v0 = vld [vmem:[%s10490_s0 + $0x30a] sm:$0xff]  ;;  %v1298_v10 = vpack.c.bf16 %v6381_v46, %v6380_v37 }
 0x1de   :  { %v867_v52 = vpack.c.bf16 %v834_v0, %v833_v9  ;;  %v835_v9 = vld [vmem:[%s10490_s0 + $0x31a] sm:$0xff] }
 0x1df   :  { %v1180_v35 = vadd.f32 %v1081_v19, %v716_v30  ;;  %v6383_v0 = vld [vmem:[%s10490_s0 + $0x338] sm:$0xff] }
 0x1e1   :  { %v8107_v4 = vadd.f32 %v1512_v1, %v1180_v35 }
 0x1e3   :  { %10516 = vst [vmem:[#allocation12_spill] sm:$0xff] %v8107_v4 }
 0x1e4   :  { %v718_v5 = vpop.f32.mrf.mxu1  ;;  %v1086_v1 = vpop.f32.mrf.mxu2 }
 0x1e5   :  { %v455_v28 = vpop.f32.mrf.mxu0  ;;  %v719_v19 = vadd.f32 %v718_v5, %v450_v18  ;;  %v1517_v57 = vpop.f32.mrf.mxu3 }
 0x1e7   :  { %v1181_v30 = vadd.f32 %v1084_v33, %v719_v19  ;;  %6284 = vmatmul.msk.bf16.gmra.mxu1 %vm235_vm1, %v8049_v43  ;;  %v6417_v33 = vld [vmem:[%s10490_s0 + $0x19] sm:$0xff]  ;;  %v6418_v43 = vld [vmem:[%s10490_s0 + $0x21] sm:$0xff] }
 0x1e8   :  { %6253 = vmatmul.msk.bf16.gmra.mxu0 %vm235_vm1, %v231_v49  ;;  %v1698_v37 = vpack.c.bf16 %v6418_v43, %v6417_v33 }
 0x1e9   :  { %v8124_v35 = vadd.f32 %v1515_v11, %v1181_v30  ;;  %6318 = vmatmul.msk.bf16.gmra.mxu2 %vm235_vm1, %v867_v52  ;;  %6415 = vmatmul.msk.bf16.gmra.mxu3 %vm235_vm1, %v1298_v10 }
 0x1eb   :  { %10517 = vst [vmem:[#allocation13_spill] sm:$0xff] %v8124_v35 }
 0x1ec   :  { %v720_v3 = vpop.f32.mrf.mxu1  ;;  %v1089_v18 = vpop.f32.mrf.mxu2 }
 0x1ed   :  { %v457_v50 = vpop.f32.mrf.mxu0  ;;  %v721_v4 = vadd.f32 %v720_v3, %v452_v12  ;;  %v1520_v5 = vpop.f32.mrf.mxu3  ;;  %v836_v12 = vld [vmem:[%s10490_s0 + $0x322] sm:$0xff] }
 0x1ef   :  { %v1182_v23 = vadd.f32 %v1086_v1, %v721_v4  ;;  %v6382_v4 = vld [vmem:[%s10490_s0 + $0x330] sm:$0xff] }
 0x1f0   :  { %v1299_v52 = vpack.c.bf16 %v6383_v0, %v6382_v4 }
 0x1f1   :  { %v8134_v11 = vadd.f32 %v1517_v57, %v1182_v23  ;;  %v868_v57 = vpack.c.bf16 %v836_v12, %v835_v9  ;;  %v6611_v9 = vld [vmem:[%s10490_s0 + $0x30] sm:$0xff] }
 0x1f3   :  { %10518 = vst [vmem:[#allocation14_spill] sm:$0xff] %v8134_v11 }
 0x1f4   :  { %v723_v23 = vpop.f32.mrf.mxu1  ;;  %v1091_v19 = vpop.f32.mrf.mxu2 }
 0x1f5   :  { %v460_v46 = vpop.f32.mrf.mxu0  ;;  %v724_v49 = vadd.f32 %v723_v23, %v455_v28  ;;  %v1522_v1 = vpop.f32.mrf.mxu3 }
 0x1f7   :  { %v1183_v30 = vadd.f32 %v1089_v18, %v724_v49  ;;  %6285 = vmatmul.msk.bf16.gmra.mxu1 %vm235_vm1, %v1297_v20  ;;  %v6419_v18 = vld [vmem:[%s10490_s0 + $0x31] sm:$0xff]  ;;  %v6420_v20 = vld [vmem:[%s10490_s0 + $0x39] sm:$0xff] }
 0x1f8   :  { %6482 = vmatmul.msk.bf16.vlgmr.msrb.gmra.mxu0 %vm235_vm1, %v1698_v37  ;;  %v1699_v12 = vpack.c.bf16 %v6420_v20, %v6419_v18  ;;  %v6515_v20 = vld [vmem:[%s10490_s0 + $0x22] sm:$0xff] }
 0x1f9   :  { %v8150_v3 = vadd.f32 %v1520_v5, %v1183_v30  ;;  %6319 = vmatmul.msk.bf16.gmra.mxu2 %vm235_vm1, %v868_v57  ;;  %6416 = vmatmul.msk.bf16.gmra.mxu3 %vm235_vm1, %v1299_v52 }
 0x1fc   :  { %v725_v33 = vpop.f32.mrf.mxu1  ;;  %v1094_v35 = vpop.f32.mrf.mxu2 }
 0x1fd   :  { %v462_v11 = vpop.f32.mrf.mxu0  ;;  %v726_v43 = vadd.f32 %v725_v33, %v457_v50  ;;  %v1525_v28 = vpop.f32.mrf.mxu3  ;;  %v6612_v50 = vld [vmem:[%s10490_s0 + $0x38] sm:$0xff] }
 0x1fe   :  { %v2559_v57 = vpack.c.bf16 %v6612_v50, %v6611_v9  ;;  %v6613_v9 = vld [vmem:[%s10490_s0 + $0x48] sm:$0xff]  ;;  %v6614_v50 = vld [vmem:[%s10490_s0 + $0x50] sm:$0xff] }
 0x1ff   :  { %v1184_v23 = vadd.f32 %v1091_v19, %v726_v43 }
 0x201   :  { %v8160_v5 = vadd.f32 %v1522_v1, %v1184_v23 }
 0x204   :  { %v728_v0 = vpop.f32.mrf.mxu1  ;;  %v1096_v49 = vpop.f32.mrf.mxu2 }
 0x205   :  { %v465_v4 = vpop.f32.mrf.mxu0  ;;  %v729_v37 = vadd.f32 %v728_v0, %v460_v46  ;;  %v1527_v19 = vpop.f32.mrf.mxu3 }
 0x207   :  { %v1185_v52 = vadd.f32 %v1094_v35, %v729_v37  ;;  %6286 = vmatmul.msk.bf16.gmra.mxu1 %vm235_vm1, %v1298_v10  ;;  %v6421_v35 = vld [vmem:[%s10490_s0 + $0x49] sm:$0xff]  ;;  %v6422_v10 = vld [vmem:[%s10490_s0 + $0x51] sm:$0xff] }
 0x208   :  { %6483 = vmatmul.msk.bf16.gmra.mxu0 %vm235_vm1, %v1699_v12 }
 0x209   :  { %v8170_v1 = vadd.f32 %v1525_v28, %v1185_v52  ;;  %6676 = vmatmul.msk.bf16.vlgmr.msrb.gmra.mxu2 %vm235_vm1, %v2559_v57  ;;  %6773 = vmatmul.msk.bf16.vlgmr.msrb.gmra.mxu3 %vm235_vm1, %v1699_v12  ;;  %v6514_v28 = vld [vmem:[%s10490_s0 + $0x1a] sm:$0xff]  ;;  %v1700_v12 = vpack.c.bf16 %v6422_v10, %v6421_v35 }
 0x20a   :  { %v2128_v0 = vpack.c.bf16 %v6515_v20, %v6514_v28 }
 0x20b   :  { %10519 = vst [vmem:[#allocation15_spill] sm:$0xff] %v8170_v1 }
 0x20c   :  { %v730_v33 = vpop.f32.mrf.mxu1  ;;  %v1099_v23 = vpop.f32.mrf.mxu2 }
 0x20d   :  { %v467_v30 = vpop.f32.mrf.mxu0  ;;  %v731_v43 = vadd.f32 %v730_v33, %v462_v11  ;;  %v1530_v18 = vpop.f32.mrf.mxu3 }
 0x20f   :  { %v1186_v46 = vadd.f32 %v1096_v49, %v731_v43  ;;  %v2560_v43 = vpack.c.bf16 %v6614_v50, %v6613_v9  ;;  %v6424_v9 = vld [vmem:[%s10490_s0 + $0x69] sm:$0xff]  ;;  %v6615_v50 = vld [vmem:[%s10490_s0 + $0x60] sm:$0xff] }
 0x211   :  { %v8186_v11 = vadd.f32 %v1527_v19, %v1186_v46 }
 0x213   :  { %10520 = vst [vmem:[#allocation16_spill] sm:$0xff] %v8186_v11 }
 0x214   :  { %v733_v49 = vpop.f32.mrf.mxu1  ;;  %v1101_v52 = vpop.f32.mrf.mxu2 }
 0x215   :  { %v470_v37 = vpop.f32.mrf.mxu0  ;;  %v734_v57 = vadd.f32 %v733_v49, %v465_v4  ;;  %v1532_v33 = vpop.f32.mrf.mxu3 }
 0x217   :  { %v1187_v1 = vadd.f32 %v1099_v23, %v734_v57  ;;  %6579 = vmatmul.msk.bf16.vlgmr.msra.gmra.mxu1 %vm235_vm1, %v2128_v0  ;;  %v6423_v23 = vld [vmem:[%s10490_s0 + $0x61] sm:$0xff] }
 0x218   :  { %6484 = vmatmul.msk.bf16.gmra.mxu0 %vm235_vm1, %v1700_v12  ;;  %v1701_v0 = vpack.c.bf16 %v6424_v9, %v6423_v23 }
 0x219   :  { %v8196_v19 = vadd.f32 %v1530_v18, %v1187_v1  ;;  %6677 = vmatmul.msk.bf16.gmra.mxu2 %vm235_vm1, %v2560_v43  ;;  %6774 = vmatmul.msk.bf16.gmra.mxu3 %vm235_vm1, %v1700_v12  ;;  %v6516_v1 = vld [vmem:[%s10490_s0 + $0x32] sm:$0xff]  ;;  %v6517_v18 = vld [vmem:[%s10490_s0 + $0x3a] sm:$0xff]  ;;  %v6616_v12 = vld [vmem:[%s10490_s0 + $0x68] sm:$0xff] }
 0x21a   :  { %v2129_v49 = vpack.c.bf16 %v6517_v18, %v6516_v1 }
 0x21b   :  { %10521 = vst [vmem:[#allocation17_spill] sm:$0xff] %v8196_v19  ;;  %v2561_v19 = vpack.c.bf16 %v6616_v12, %v6615_v50  ;;  %v6426_v50 = vld [vmem:[%s10490_s0 + $0x81] sm:$0xff] }
 0x21c   :  { %v735_v35 = vpop.f32.mrf.mxu1  ;;  %v1104_v28 = vpop.f32.mrf.mxu2  ;;  %v6618_v12 = vld [vmem:[%s10490_s0 + $0x80] sm:$0xff] }
 0x21d   :  { %v472_v46 = vpop.f32.mrf.mxu0  ;;  %v736_v10 = vadd.f32 %v735_v35, %v467_v30  ;;  %v1535_v20 = vpop.f32.mrf.mxu3 }
 0x21f   :  { %v1188_v4 = vadd.f32 %v1101_v52, %v736_v10 }
 0x221   :  { %v8212_v30 = vadd.f32 %v1532_v33, %v1188_v4 }
 0x223   :  { %10522 = vst [vmem:[#allocation18_spill] sm:$0xff] %v8212_v30 }
 0x224   :  { %v738_v52 = vpop.f32.mrf.mxu1  ;;  %v1106_v35 = vpop.f32.mrf.mxu2 }
 0x225   :  { %v475_v57 = vpop.f32.mrf.mxu0  ;;  %v739_v43 = vadd.f32 %v738_v52, %v470_v37  ;;  %v1537_v10 = vpop.f32.mrf.mxu3 }
 0x227   :  { %v1189_v11 = vadd.f32 %v1104_v28, %v739_v43  ;;  %6580 = vmatmul.msk.bf16.gmra.mxu1 %vm235_vm1, %v2129_v49  ;;  %v6425_v28 = vld [vmem:[%s10490_s0 + $0x79] sm:$0xff] }
 0x228   :  { %6485 = vmatmul.msk.bf16.gmra.mxu0 %vm235_vm1, %v1701_v0 }
 0x229   :  { %v8222_v33 = vadd.f32 %v1535_v20, %v1189_v11  ;;  %6678 = vmatmul.msk.bf16.gmra.mxu2 %vm235_vm1, %v2561_v19  ;;  %6775 = vmatmul.msk.bf16.gmra.mxu3 %vm235_vm1, %v1701_v0  ;;  %v6518_v11 = vld [vmem:[%s10490_s0 + $0x4a] sm:$0xff]  ;;  %v6519_v19 = vld [vmem:[%s10490_s0 + $0x52] sm:$0xff]  ;;  %v1702_v0 = vpack.c.bf16 %v6426_v50, %v6425_v28 }
 0x22a   :  { %v6617_v20 = vld [vmem:[%s10490_s0 + $0x78] sm:$0xff]  ;;  %v2130_v49 = vpack.c.bf16 %v6519_v19, %v6518_v11 }
 0x22b   :  { %10523 = vst [vmem:[#allocation19_spill] sm:$0xff] %v8222_v33  ;;  %v2562_v33 = vpack.c.bf16 %v6618_v12, %v6617_v20  ;;  %v6428_v20 = vld [vmem:[%s10490_s0 + $0x99] sm:$0xff] }
 0x22c   :  { %v740_v23 = vpop.f32.mrf.mxu1  ;;  %v1109_v1 = vpop.f32.mrf.mxu2  ;;  %v6620_v12 = vld [vmem:[%s10490_s0 + $0x98] sm:$0xff] }
 0x22d   :  { %v477_v4 = vpop.f32.mrf.mxu0  ;;  %v741_v9 = vadd.f32 %v740_v23, %v472_v46  ;;  %v1540_v18 = vpop.f32.mrf.mxu3 }
 0x22f   :  { %v1190_v37 = vadd.f32 %v1106_v35, %v741_v9 }
 0x231   :  { %v8238_v46 = vadd.f32 %v1537_v10, %v1190_v37 }
 0x233   :  { %10524 = vst [vmem:[#allocation20_spill] sm:$0xff] %v8238_v46 }
 0x234   :  { %v743_v43 = vpop.f32.mrf.mxu1  ;;  %v1111_v23 = vpop.f32.mrf.mxu2 }
 0x235   :  { %v480_v52 = vpop.f32.mrf.mxu0  ;;  %v744_v35 = vadd.f32 %v743_v43, %v475_v57  ;;  %v1542_v9 = vpop.f32.mrf.mxu3 }
 0x237   :  { %v1191_v30 = vadd.f32 %v1109_v1, %v744_v35  ;;  %6581 = vmatmul.msk.bf16.gmra.mxu1 %vm235_vm1, %v2130_v49  ;;  %v6427_v1 = vld [vmem:[%s10490_s0 + $0x91] sm:$0xff] }
 0x238   :  { %6486 = vmatmul.msk.bf16.gmra.mxu0 %vm235_vm1, %v1702_v0 }
 0x239   :  { %v8248_v10 = vadd.f32 %v1540_v18, %v1191_v30  ;;  %6679 = vmatmul.msk.bf16.gmra.mxu2 %vm235_vm1, %v2562_v33  ;;  %6776 = vmatmul.msk.bf16.gmra.mxu3 %vm235_vm1, %v1702_v0  ;;  %v6520_v30 = vld [vmem:[%s10490_s0 + $0x62] sm:$0xff]  ;;  %v6521_v33 = vld [vmem:[%s10490_s0 + $0x6a] sm:$0xff]  ;;  %v1703_v0 = vpack.c.bf16 %v6428_v20, %v6427_v1 }
 0x23a   :  { %v6619_v18 = vld [vmem:[%s10490_s0 + $0x90] sm:$0xff]  ;;  %v2131_v49 = vpack.c.bf16 %v6521_v33, %v6520_v30 }
 0x23b   :  { %10525 = vst [vmem:[#allocation21_spill] sm:$0xff] %v8248_v10  ;;  %v2563_v10 = vpack.c.bf16 %v6620_v12, %v6619_v18  ;;  %v6430_v18 = vld [vmem:[%s10490_s0 + $0xb1] sm:$0xff] }
 0x23c   :  { %v745_v28 = vpop.f32.mrf.mxu1  ;;  %v1114_v11 = vpop.f32.mrf.mxu2  ;;  %v6622_v12 = vld [vmem:[%s10490_s0 + $0xb0] sm:$0xff] }
 0x23d   :  { %v482_v37 = vpop.f32.mrf.mxu0  ;;  %v746_v50 = vadd.f32 %v745_v28, %v477_v4  ;;  %v1545_v19 = vpop.f32.mrf.mxu3 }
 0x23f   :  { %v1192_v57 = vadd.f32 %v1111_v23, %v746_v50 }
 0x241   :  { %v8264_v4 = vadd.f32 %v1542_v9, %v1192_v57 }
 0x243   :  { %10526 = vst [vmem:[#allocation22_spill] sm:$0xff] %v8264_v4 }
 0x244   :  { %v748_v35 = vpop.f32.mrf.mxu1  ;;  %v1116_v28 = vpop.f32.mrf.mxu2 }
 0x245   :  { %v485_v43 = vpop.f32.mrf.mxu0  ;;  %v749_v23 = vadd.f32 %v748_v35, %v480_v52  ;;  %v1547_v50 = vpop.f32.mrf.mxu3 }
 0x247   :  { %v1193_v46 = vadd.f32 %v1114_v11, %v749_v23  ;;  %6582 = vmatmul.msk.bf16.gmra.mxu1 %vm235_vm1, %v2131_v49  ;;  %v6429_v11 = vld [vmem:[%s10490_s0 + $0xa9] sm:$0xff] }
 0x248   :  { %6487 = vmatmul.msk.bf16.gmra.mxu0 %vm235_vm1, %v1703_v0 }
 0x249   :  { %v8274_v9 = vadd.f32 %v1545_v19, %v1193_v46  ;;  %6680 = vmatmul.msk.bf16.gmra.mxu2 %vm235_vm1, %v2563_v10  ;;  %6777 = vmatmul.msk.bf16.gmra.mxu3 %vm235_vm1, %v1703_v0  ;;  %v6522_v46 = vld [vmem:[%s10490_s0 + $0x7a] sm:$0xff]  ;;  %v6523_v10 = vld [vmem:[%s10490_s0 + $0x82] sm:$0xff]  ;;  %v1704_v0 = vpack.c.bf16 %v6430_v18, %v6429_v11 }
 0x24a   :  { %v6621_v19 = vld [vmem:[%s10490_s0 + $0xa8] sm:$0xff]  ;;  %v2132_v49 = vpack.c.bf16 %v6523_v10, %v6522_v46 }
 0x24b   :  { %10527 = vst [vmem:[#allocation23_spill] sm:$0xff] %v8274_v9  ;;  %v2564_v9 = vpack.c.bf16 %v6622_v12, %v6621_v19  ;;  %v6432_v19 = vld [vmem:[%s10490_s0 + $0xc9] sm:$0xff] }
 0x24c   :  { %v750_v1 = vpop.f32.mrf.mxu1  ;;  %v1119_v30 = vpop.f32.mrf.mxu2  ;;  %v6624_v12 = vld [vmem:[%s10490_s0 + $0xc8] sm:$0xff] }
 0x24d   :  { %v487_v57 = vpop.f32.mrf.mxu0  ;;  %v751_v20 = vadd.f32 %v750_v1, %v482_v37  ;;  %v1550_v33 = vpop.f32.mrf.mxu3 }
 0x24f   :  { %v1194_v52 = vadd.f32 %v1116_v28, %v751_v20 }
 0x251   :  { %v8290_v37 = vadd.f32 %v1547_v50, %v1194_v52 }
 0x253   :  { %10528 = vst [vmem:[#allocation24_spill] sm:$0xff] %v8290_v37 }
 0x254   :  { %v753_v23 = vpop.f32.mrf.mxu1  ;;  %v1121_v1 = vpop.f32.mrf.mxu2 }
 0x255   :  { %v490_v35 = vpop.f32.mrf.mxu0  ;;  %v754_v28 = vadd.f32 %v753_v23, %v485_v43  ;;  %v1552_v20 = vpop.f32.mrf.mxu3 }
 0x257   :  { %v1195_v4 = vadd.f32 %v1119_v30, %v754_v28  ;;  %6583 = vmatmul.msk.bf16.gmra.mxu1 %vm235_vm1, %v2132_v49  ;;  %v6431_v30 = vld [vmem:[%s10490_s0 + $0xc1] sm:$0xff] }
 0x258   :  { %6488 = vmatmul.msk.bf16.gmra.mxu0 %vm235_vm1, %v1704_v0 }
 0x259   :  { %v8300_v50 = vadd.f32 %v1550_v33, %v1195_v4  ;;  %6681 = vmatmul.msk.bf16.gmra.mxu2 %vm235_vm1, %v2564_v9  ;;  %6778 = vmatmul.msk.bf16.gmra.mxu3 %vm235_vm1, %v1704_v0  ;;  %v6524_v4 = vld [vmem:[%s10490_s0 + $0x92] sm:$0xff]  ;;  %v6525_v9 = vld [vmem:[%s10490_s0 + $0x9a] sm:$0xff]  ;;  %v1705_v0 = vpack.c.bf16 %v6432_v19, %v6431_v30 }
 0x25a   :  { %v6623_v33 = vld [vmem:[%s10490_s0 + $0xc0] sm:$0xff]  ;;  %v2133_v49 = vpack.c.bf16 %v6525_v9, %v6524_v4 }
 0x25b   :  { %10529 = vst [vmem:[#allocation25_spill] sm:$0xff] %v8300_v50  ;;  %v2565_v50 = vpack.c.bf16 %v6624_v12, %v6623_v33  ;;  %v6434_v33 = vld [vmem:[%s10490_s0 + $0xe1] sm:$0xff] }
 0x25c   :  { %v755_v11 = vpop.f32.mrf.mxu1  ;;  %v1124_v46 = vpop.f32.mrf.mxu2  ;;  %v6626_v12 = vld [vmem:[%s10490_s0 + $0xe0] sm:$0xff] }
 0x25d   :  { %v492_v52 = vpop.f32.mrf.mxu0  ;;  %v756_v18 = vadd.f32 %v755_v11, %v487_v57  ;;  %v1555_v10 = vpop.f32.mrf.mxu3 }
 0x25f   :  { %v1196_v43 = vadd.f32 %v1121_v1, %v756_v18 }
 0x261   :  { %v8316_v57 = vadd.f32 %v1552_v20, %v1196_v43 }
 0x263   :  { %10530 = vst [vmem:[#allocation26_spill] sm:$0xff] %v8316_v57 }
 0x264   :  { %v758_v28 = vpop.f32.mrf.mxu1  ;;  %v1126_v11 = vpop.f32.mrf.mxu2 }
 0x265   :  { %v495_v23 = vpop.f32.mrf.mxu0  ;;  %v759_v1 = vadd.f32 %v758_v28, %v490_v35  ;;  %v1557_v18 = vpop.f32.mrf.mxu3 }
 0x267   :  { %v1197_v37 = vadd.f32 %v1124_v46, %v759_v1  ;;  %6584 = vmatmul.msk.bf16.gmra.mxu1 %vm235_vm1, %v2133_v49  ;;  %v6433_v46 = vld [vmem:[%s10490_s0 + $0xd9] sm:$0xff] }
 0x268   :  { %6489 = vmatmul.msk.bf16.gmra.mxu0 %vm235_vm1, %v1705_v0 }
 0x269   :  { %v8326_v20 = vadd.f32 %v1555_v10, %v1197_v37  ;;  %6682 = vmatmul.msk.bf16.gmra.mxu2 %vm235_vm1, %v2565_v50  ;;  %6779 = vmatmul.msk.bf16.gmra.mxu3 %vm235_vm1, %v1705_v0  ;;  %v6526_v37 = vld [vmem:[%s10490_s0 + $0xaa] sm:$0xff]  ;;  %v6527_v50 = vld [vmem:[%s10490_s0 + $0xb2] sm:$0xff]  ;;  %v1706_v0 = vpack.c.bf16 %v6434_v33, %v6433_v46 }
 0x26a   :  { %v6625_v10 = vld [vmem:[%s10490_s0 + $0xd8] sm:$0xff]  ;;  %v2134_v49 = vpack.c.bf16 %v6527_v50, %v6526_v37 }
 0x26b   :  { %10531 = vst [vmem:[#allocation27_spill] sm:$0xff] %v8326_v20  ;;  %v2566_v57 = vpack.c.bf16 %v6626_v12, %v6625_v10  ;;  %v6627_v10 = vld [vmem:[%s10490_s0 + $0xf0] sm:$0xff]  ;;  %v6628_v12 = vld [vmem:[%s10490_s0 + $0xf8] sm:$0xff] }
 0x26c   :  { %v760_v30 = vpop.f32.mrf.mxu1  ;;  %v1129_v4 = vpop.f32.mrf.mxu2 }
 0x26d   :  { %v497_v43 = vpop.f32.mrf.mxu0  ;;  %v761_v19 = vadd.f32 %v760_v30, %v492_v52  ;;  %v1560_v9 = vpop.f32.mrf.mxu3 }
 0x26f   :  { %v1198_v35 = vadd.f32 %v1126_v11, %v761_v19 }
 0x271   :  { %v8342_v52 = vadd.f32 %v1557_v18, %v1198_v35 }
 0x274   :  { %v763_v28 = vpop.f32.mrf.mxu1  ;;  %v1131_v19 = vpop.f32.mrf.mxu2 }
 0x275   :  { %v1840_v1 = vpop.f32.mrf.mxu0  ;;  %v764_v11 = vadd.f32 %v763_v28, %v495_v23  ;;  %v1562_v20 = vpop.f32.mrf.mxu3 }
 0x276   :  { %v2000_v30 = vadd.f32 %v1840_v1, %v7548_v54 }
 0x277   :  { %v1199_v18 = vadd.f32 %v1129_v4, %v764_v11  ;;  %6585 = vmatmul.msk.bf16.gmra.mxu1 %vm235_vm1, %v2134_v49  ;;  %v6435_v4 = vld [vmem:[%s10490_s0 + $0xf1] sm:$0xff] }
 0x278   :  { %6490 = vmatmul.msk.bf16.gmra.mxu0 %vm235_vm1, %v1706_v0 }
 0x279   :  { %v8353_v35 = vadd.f32 %v1560_v9, %v1199_v18  ;;  %6683 = vmatmul.msk.bf16.gmra.mxu2 %vm235_vm1, %v2566_v57  ;;  %6780 = vmatmul.msk.bf16.gmra.mxu3 %vm235_vm1, %v1706_v0  ;;  %v6436_v9 = vld [vmem:[%s10490_s0 + $0xf9] sm:$0xff]  ;;  %v6528_v57 = vld [vmem:[%s10490_s0 + $0xc2] sm:$0xff] }
 0x27a   :  { %v1707_v0 = vpack.c.bf16 %v6436_v9, %v6435_v4 }
 0x27c   :  { %v765_v46 = vpop.f32.mrf.mxu1  ;;  %v1134_v54 = vpop.f32.mrf.mxu2 }
 0x27d   :  { %v1842_v33 = vpop.f32.mrf.mxu0  ;;  %v766_v37 = vadd.f32 %v765_v46, %v497_v43  ;;  %v1565_v50 = vpop.f32.mrf.mxu3  ;;  %v6529_v43 = vld [vmem:[%s10490_s0 + $0xca] sm:$0xff] }
 0x27e   :  { %v2001_v23 = vadd.f32 %v1842_v33, %v7558_v63  ;;  %v2135_v49 = vpack.c.bf16 %v6529_v43, %v6528_v57 }
 0x27f   :  { %v1200_v28 = vadd.f32 %v1131_v19, %v766_v37 }
 0x281   :  { %v8370_v63 = vadd.f32 %v1562_v20, %v1200_v28  ;;  %v2567_v20 = vpack.c.bf16 %v6628_v12, %v6627_v10  ;;  %v6530_v12 = vld [vmem:[%s10490_s0 + $0xda] sm:$0xff] }
 0x284   :  { %v768_v1 = vpop.f32.mrf.mxu1  ;;  %v1136_v46 = vpop.f32.mrf.mxu2 }
 0x285   :  { %v1845_v11 = vpop.f32.mrf.mxu0  ;;  %v769_v19 = vadd.f32 %v768_v1, %v7520_v32  ;;  %v1567_v33 = vpop.f32.mrf.mxu3 }
 0x286   :  { %v2002_v18 = vadd.f32 %v1845_v11, %v7574_v13 }
 0x287   :  { %v1201_v37 = vadd.f32 %v1134_v54, %v769_v19  ;;  %6586 = vmatmul.msk.bf16.gmra.mxu1 %vm235_vm1, %v2135_v49  ;;  %v6437_v54 = vld [vmem:[%s10490_s0 + $0x109] sm:$0xff] }
 0x288   :  { %6491 = vmatmul.msk.bf16.gmra.mxu0 %vm235_vm1, %v1707_v0  ;;  %v6630_v49 = vld [vmem:[%s10490_s0 + $0x110] sm:$0xff] }
 0x289   :  { %v8382_v28 = vadd.f32 %v1565_v50, %v1201_v37  ;;  %6684 = vmatmul.msk.bf16.gmra.mxu2 %vm235_vm1, %v2567_v20  ;;  %6781 = vmatmul.msk.bf16.gmra.mxu3 %vm235_vm1, %v1707_v0  ;;  %v6438_v50 = vld [vmem:[%s10490_s0 + $0x111] sm:$0xff]  ;;  %v6629_v0 = vld [vmem:[%s10490_s0 + $0x108] sm:$0xff] }
 0x28a   :  { %v1708_v1 = vpack.c.bf16 %v6438_v50, %v6437_v54 }
 0x28c   :  { %v770_v4 = vpop.f32.mrf.mxu1  ;;  %v2701_v57 = vpop.f32.mrf.mxu2 }
 0x28d   :  { %v1847_v9 = vpop.f32.mrf.mxu0  ;;  %v771_v32 = vadd.f32 %v770_v4, %v7526_v36  ;;  %v3131_v43 = vpop.f32.mrf.mxu3  ;;  %v6531_v36 = vld [vmem:[%s10490_s0 + $0xe2] sm:$0xff] }
 0x28e   :  { %v2003_v13 = vadd.f32 %v1847_v9, %v7584_v22  ;;  %v2136_v11 = vpack.c.bf16 %v6531_v36, %v6530_v12 }
 0x28f   :  { %v1202_v10 = vadd.f32 %v1136_v46, %v771_v32  ;;  %v2568_v32 = vpack.c.bf16 %v6630_v49, %v6629_v0  ;;  %v6532_v0 = vld [vmem:[%s10490_s0 + $0xf2] sm:$0xff]  ;;  %v6631_v49 = vld [vmem:[%s10490_s0 + $0x120] sm:$0xff] }
 0x291   :  { %v8400_v22 = vadd.f32 %v1567_v33, %v1202_v10 }
 0x294   :  { %v2270_v46 = vpop.f32.mrf.mxu1  ;;  %v2703_v4 = vpop.f32.mrf.mxu2 }
 0x295   :  { %v1850_v19 = vpop.f32.mrf.mxu0  ;;  %v2430_v37 = vadd.f32 %v2270_v46, %v2000_v30  ;;  %v3133_v9 = vpop.f32.mrf.mxu3 }
 0x296   :  { %v2004_v20 = vadd.f32 %v1850_v19, %v7600_v38 }
 0x297   :  { %v2861_v33 = vadd.f32 %v2701_v57, %v2430_v37  ;;  %6587 = vmatmul.msk.bf16.gmra.mxu1 %vm235_vm1, %v2136_v11  ;;  %v6439_v57 = vld [vmem:[%s10490_s0 + $0x121] sm:$0xff] }
 0x298   :  { %6492 = vmatmul.msk.bf16.gmra.mxu0 %vm235_vm1, %v1708_v1 }
 0x299   :  { %v8411_v10 = vadd.f32 %v3131_v43, %v2861_v33  ;;  %6685 = vmatmul.msk.bf16.gmra.mxu2 %vm235_vm1, %v2568_v32  ;;  %6782 = vmatmul.msk.bf16.gmra.mxu3 %vm235_vm1, %v1708_v1  ;;  %v6440_v43 = vld [vmem:[%s10490_s0 + $0x129] sm:$0xff] }
 0x29a   :  { %v6632_v1 = vld [vmem:[%s10490_s0 + $0x128] sm:$0xff]  ;;  %v1709_v11 = vpack.c.bf16 %v6440_v43, %v6439_v57 }
 0x29c   :  { %v2272_v50 = vpop.f32.mrf.mxu1  ;;  %v2706_v30 = vpop.f32.mrf.mxu2 }
 0x29d   :  { %v1852_v54 = vpop.f32.mrf.mxu0  ;;  %v2431_v38 = vadd.f32 %v2272_v50, %v2001_v23  ;;  %v3136_v36 = vpop.f32.mrf.mxu3 }
 0x29e   :  { %v2005_v12 = vadd.f32 %v1852_v54, %v7610_v47  ;;  %v6533_v47 = vld [vmem:[%s10490_s0 + $0xfa] sm:$0xff] }
 0x29f   :  { %v2862_v19 = vadd.f32 %v2703_v4, %v2431_v38  ;;  %v2137_v46 = vpack.c.bf16 %v6533_v47, %v6532_v0  ;;  %v2569_v38 = vpack.c.bf16 %v6632_v1, %v6631_v49  ;;  %v6534_v49 = vld [vmem:[%s10490_s0 + $0x10a] sm:$0xff]  ;;  %v6633_v1 = vld [vmem:[%s10490_s0 + $0x138] sm:$0xff] }
 0x2a1   :  { %v8428_v23 = vadd.f32 %v3133_v9, %v2862_v19 }
 0x2a4   :  { %v2275_v4 = vpop.f32.mrf.mxu1  ;;  %v2708_v54 = vpop.f32.mrf.mxu2 }
 0x2a5   :  { %v1855_v37 = vpop.f32.mrf.mxu0  ;;  %v2432_v33 = vadd.f32 %v2275_v4, %v2002_v18  ;;  %v3138_v50 = vpop.f32.mrf.mxu3 }
 0x2a6   :  { %v2006_v32 = vadd.f32 %v1855_v37, %v7626_v62 }
 0x2a7   :  { %v2863_v9 = vadd.f32 %v2706_v30, %v2432_v33  ;;  %6588 = vmatmul.msk.bf16.gmra.mxu1 %vm235_vm1, %v2137_v46  ;;  %v6441_v30 = vld [vmem:[%s10490_s0 + $0x139] sm:$0xff] }
 0x2a8   :  { %6493 = vmatmul.msk.bf16.gmra.mxu0 %vm235_vm1, %v1709_v11 }
 0x2a9   :  { %v8439_v19 = vadd.f32 %v3136_v36, %v2863_v9  ;;  %6686 = vmatmul.msk.bf16.gmra.mxu2 %vm235_vm1, %v2569_v38  ;;  %6783 = vmatmul.msk.bf16.gmra.mxu3 %vm235_vm1, %v1709_v11  ;;  %v6442_v36 = vld [vmem:[%s10490_s0 + $0x141] sm:$0xff] }
 0x2aa   :  { %v6634_v11 = vld [vmem:[%s10490_s0 + $0x140] sm:$0xff]  ;;  %v1710_v46 = vpack.c.bf16 %v6442_v36, %v6441_v30 }
 0x2ac   :  { %v2277_v43 = vpop.f32.mrf.mxu1  ;;  %v2711_v18 = vpop.f32.mrf.mxu2 }
 0x2ad   :  { %v1857_v57 = vpop.f32.mrf.mxu0  ;;  %v2433_v62 = vadd.f32 %v2277_v43, %v2003_v13  ;;  %v3141_v47 = vpop.f32.mrf.mxu3 }
 0x2ae   :  { %v2007_v0 = vadd.f32 %v1857_v57, %v7636_v8  ;;  %v6535_v8 = vld [vmem:[%s10490_s0 + $0x112] sm:$0xff] }
 0x2af   :  { %v2864_v37 = vadd.f32 %v2708_v54, %v2433_v62  ;;  %v2138_v4 = vpack.c.bf16 %v6535_v8, %v6534_v49  ;;  %v2570_v62 = vpack.c.bf16 %v6634_v11, %v6633_v1  ;;  %v6536_v1 = vld [vmem:[%s10490_s0 + $0x122] sm:$0xff]  ;;  %v6635_v11 = vld [vmem:[%s10490_s0 + $0x150] sm:$0xff] }
 0x2b1   :  { %v8456_v13 = vadd.f32 %v3138_v50, %v2864_v37 }
 0x2b4   :  { %v2280_v54 = vpop.f32.mrf.mxu1  ;;  %v2713_v57 = vpop.f32.mrf.mxu2 }
 0x2b5   :  { %v1860_v33 = vpop.f32.mrf.mxu0  ;;  %v2434_v9 = vadd.f32 %v2280_v54, %v2004_v20  ;;  %v3143_v43 = vpop.f32.mrf.mxu3 }
 0x2b6   :  { %v2008_v38 = vadd.f32 %v1860_v33, %v7652_v24 }
 0x2b7   :  { %v2865_v50 = vadd.f32 %v2711_v18, %v2434_v9  ;;  %6589 = vmatmul.msk.bf16.gmra.mxu1 %vm235_vm1, %v2138_v4  ;;  %v6443_v18 = vld [vmem:[%s10490_s0 + $0x151] sm:$0xff] }
 0x2b8   :  { %6494 = vmatmul.msk.bf16.gmra.mxu0 %vm235_vm1, %v1710_v46 }
 0x2b9   :  { %v8467_v37 = vadd.f32 %v3141_v47, %v2865_v50  ;;  %6687 = vmatmul.msk.bf16.gmra.mxu2 %vm235_vm1, %v2570_v62  ;;  %6784 = vmatmul.msk.bf16.gmra.mxu3 %vm235_vm1, %v1710_v46  ;;  %v6444_v47 = vld [vmem:[%s10490_s0 + $0x159] sm:$0xff] }
 0x2ba   :  { %v6636_v46 = vld [vmem:[%s10490_s0 + $0x158] sm:$0xff]  ;;  %v1711_v4 = vpack.c.bf16 %v6444_v47, %v6443_v18 }
 0x2bc   :  { %v2282_v36 = vpop.f32.mrf.mxu1  ;;  %v2716_v20 = vpop.f32.mrf.mxu2 }
 0x2bd   :  { %v1862_v30 = vpop.f32.mrf.mxu0  ;;  %v2435_v24 = vadd.f32 %v2282_v36, %v2005_v12  ;;  %v3146_v8 = vpop.f32.mrf.mxu3 }
 0x2be   :  { %v2009_v49 = vadd.f32 %v1862_v30, %v7662_v34  ;;  %v6537_v34 = vld [vmem:[%s10490_s0 + $0x12a] sm:$0xff] }
 0x2bf   :  { %v2866_v33 = vadd.f32 %v2713_v57, %v2435_v24  ;;  %v2139_v54 = vpack.c.bf16 %v6537_v34, %v6536_v1  ;;  %v2571_v24 = vpack.c.bf16 %v6636_v46, %v6635_v11  ;;  %v6538_v11 = vld [vmem:[%s10490_s0 + $0x13a] sm:$0xff]  ;;  %v6637_v46 = vld [vmem:[%s10490_s0 + $0x168] sm:$0xff] }
 0x2c1   :  { %v8484_v12 = vadd.f32 %v3143_v43, %v2866_v33 }
 0x2c4   :  { %v2285_v57 = vpop.f32.mrf.mxu1  ;;  %v2718_v30 = vpop.f32.mrf.mxu2 }
 0x2c5   :  { %v1865_v9 = vpop.f32.mrf.mxu0  ;;  %v2436_v50 = vadd.f32 %v2285_v57, %v2006_v32  ;;  %v3148_v36 = vpop.f32.mrf.mxu3 }
 0x2c6   :  { %v2010_v62 = vadd.f32 %v1865_v9, %v7678_v51 }
 0x2c7   :  { %v2867_v43 = vadd.f32 %v2716_v20, %v2436_v50  ;;  %6590 = vmatmul.msk.bf16.gmra.mxu1 %vm235_vm1, %v2139_v54  ;;  %v6445_v20 = vld [vmem:[%s10490_s0 + $0x169] sm:$0xff] }
 0x2c8   :  { %6495 = vmatmul.msk.bf16.gmra.mxu0 %vm235_vm1, %v1711_v4 }
 0x2c9   :  { %v8495_v33 = vadd.f32 %v3146_v8, %v2867_v43  ;;  %6688 = vmatmul.msk.bf16.gmra.mxu2 %vm235_vm1, %v2571_v24  ;;  %6785 = vmatmul.msk.bf16.gmra.mxu3 %vm235_vm1, %v1711_v4  ;;  %v6446_v8 = vld [vmem:[%s10490_s0 + $0x171] sm:$0xff] }
 0x2ca   :  { %v6638_v4 = vld [vmem:[%s10490_s0 + $0x170] sm:$0xff]  ;;  %v1712_v54 = vpack.c.bf16 %v6446_v8, %v6445_v20 }
 0x2cc   :  { %v2287_v47 = vpop.f32.mrf.mxu1  ;;  %v2721_v32 = vpop.f32.mrf.mxu2 }
 0x2cd   :  { %v1867_v18 = vpop.f32.mrf.mxu0  ;;  %v2437_v51 = vadd.f32 %v2287_v47, %v2007_v0  ;;  %v3151_v34 = vpop.f32.mrf.mxu3 }
 0x2ce   :  { %v2011_v1 = vadd.f32 %v1867_v18, %v7688_v61  ;;  %v6539_v61 = vld [vmem:[%s10490_s0 + $0x142] sm:$0xff] }
 0x2cf   :  { %v2868_v9 = vadd.f32 %v2718_v30, %v2437_v51  ;;  %v2140_v57 = vpack.c.bf16 %v6539_v61, %v6538_v11  ;;  %v2572_v51 = vpack.c.bf16 %v6638_v4, %v6637_v46  ;;  %v6540_v46 = vld [vmem:[%s10490_s0 + $0x152] sm:$0xff]  ;;  %v6639_v4 = vld [vmem:[%s10490_s0 + $0x180] sm:$0xff] }
 0x2d1   :  { %v8512_v0 = vadd.f32 %v3148_v36, %v2868_v9 }
 0x2d4   :  { %v2290_v30 = vpop.f32.mrf.mxu1  ;;  %v2723_v18 = vpop.f32.mrf.mxu2 }
 0x2d5   :  { %v1870_v50 = vpop.f32.mrf.mxu0  ;;  %v2438_v43 = vadd.f32 %v2290_v30, %v2008_v38  ;;  %v3153_v47 = vpop.f32.mrf.mxu3 }
 0x2d6   :  { %v2012_v24 = vadd.f32 %v1870_v50, %v7704_v15 }
 0x2d7   :  { %v2869_v36 = vadd.f32 %v2721_v32, %v2438_v43  ;;  %6591 = vmatmul.msk.bf16.gmra.mxu1 %vm235_vm1, %v2140_v57  ;;  %v6447_v32 = vld [vmem:[%s10490_s0 + $0x181] sm:$0xff] }
 0x2d8   :  { %6496 = vmatmul.msk.bf16.gmra.mxu0 %vm235_vm1, %v1712_v54 }
 0x2d9   :  { %v8523_v9 = vadd.f32 %v3151_v34, %v2869_v36  ;;  %6689 = vmatmul.msk.bf16.gmra.mxu2 %vm235_vm1, %v2572_v51  ;;  %6786 = vmatmul.msk.bf16.gmra.mxu3 %vm235_vm1, %v1712_v54  ;;  %v6448_v34 = vld [vmem:[%s10490_s0 + $0x189] sm:$0xff] }
 0x2da   :  { %v6640_v54 = vld [vmem:[%s10490_s0 + $0x188] sm:$0xff]  ;;  %v1713_v57 = vpack.c.bf16 %v6448_v34, %v6447_v32 }
 0x2dc   :  { %v2292_v8 = vpop.f32.mrf.mxu1  ;;  %v2726_v38 = vpop.f32.mrf.mxu2 }
 0x2dd   :  { %v1872_v20 = vpop.f32.mrf.mxu0  ;;  %v2439_v15 = vadd.f32 %v2292_v8, %v2009_v49  ;;  %v3156_v61 = vpop.f32.mrf.mxu3 }
 0x2de   :  { %v2013_v11 = vadd.f32 %v1872_v20, %v7714_v26  ;;  %v6541_v26 = vld [vmem:[%s10490_s0 + $0x15a] sm:$0xff] }
 0x2df   :  { %v2870_v50 = vadd.f32 %v2723_v18, %v2439_v15  ;;  %v2141_v30 = vpack.c.bf16 %v6541_v26, %v6540_v46  ;;  %v2573_v15 = vpack.c.bf16 %v6640_v54, %v6639_v4  ;;  %v6542_v4 = vld [vmem:[%s10490_s0 + $0x16a] sm:$0xff]  ;;  %v6641_v54 = vld [vmem:[%s10490_s0 + $0x198] sm:$0xff] }
 0x2e1   :  { %v8540_v49 = vadd.f32 %v3153_v47, %v2870_v50 }
 0x2e3   :  { %10532 = vst [vmem:[#allocation28_spill] sm:$0xff] %v8540_v49 }
 0x2e4   :  { %v2295_v18 = vpop.f32.mrf.mxu1  ;;  %v2728_v20 = vpop.f32.mrf.mxu2 }
 0x2e5   :  { %v1875_v43 = vpop.f32.mrf.mxu0  ;;  %v2440_v36 = vadd.f32 %v2295_v18, %v2010_v62  ;;  %v3158_v8 = vpop.f32.mrf.mxu3  ;;  %v6739_v18 = vld [vmem:[%s10490_s0 + $0x1a1] sm:$0xff] }
 0x2e6   :  { %v2014_v51 = vadd.f32 %v1875_v43, %v7730_v44 }
 0x2e7   :  { %v2871_v47 = vadd.f32 %v2726_v38, %v2440_v36  ;;  %6592 = vmatmul.msk.bf16.gmra.mxu1 %vm235_vm1, %v2141_v30  ;;  %v6449_v38 = vld [vmem:[%s10490_s0 + $0x1c9] sm:$0xff]  ;;  %v6738_v30 = vld [vmem:[%s10490_s0 + $0x199] sm:$0xff] }
 0x2e8   :  { %6497 = vmatmul.msk.bf16.gmra.mxu0 %vm235_vm1, %v1713_v57 }
 0x2e9   :  { %v8551_v50 = vadd.f32 %v3156_v61, %v2871_v47  ;;  %6690 = vmatmul.msk.bf16.gmra.mxu2 %vm235_vm1, %v2573_v15  ;;  %6787 = vmatmul.msk.bf16.gmra.mxu3 %vm235_vm1, %v1713_v57  ;;  %v6450_v61 = vld [vmem:[%s10490_s0 + $0x1d1] sm:$0xff]  ;;  %v6642_v57 = vld [vmem:[%s10490_s0 + $0x1a0] sm:$0xff] }
 0x2ea   :  { %v1714_v36 = vpack.c.bf16 %v6450_v61, %v6449_v38 }
 0x2eb   :  { %10533 = vst [vmem:[#allocation29_spill] sm:$0xff] %v8551_v50 }
 0x2ec   :  { %v2297_v34 = vpop.f32.mrf.mxu1  ;;  %v2731_v62 = vpop.f32.mrf.mxu2 }
 0x2ed   :  { %v1877_v32 = vpop.f32.mrf.mxu0  ;;  %v2441_v44 = vadd.f32 %v2297_v34, %v2011_v1  ;;  %v3161_v26 = vpop.f32.mrf.mxu3 }
 0x2ee   :  { %v2015_v46 = vadd.f32 %v1877_v32, %v7746_v58  ;;  %v6543_v58 = vld [vmem:[%s10490_s0 + $0x172] sm:$0xff] }
 0x2ef   :  { %v2872_v43 = vadd.f32 %v2728_v20, %v2441_v44  ;;  %v2142_v20 = vpack.c.bf16 %v6543_v58, %v6542_v4 }
 0x2f1   :  { %v8568_v1 = vadd.f32 %v3158_v8, %v2872_v43  ;;  %v2574_v43 = vpack.c.bf16 %v6642_v57, %v6641_v54  ;;  %v6644_v57 = vld [vmem:[%s10490_s0 + $0x1e8] sm:$0xff] }
 0x2f3   :  { %10534 = vst [vmem:[#allocation30_spill] sm:$0xff] %v8568_v1  ;;  %v3004_v1 = vpack.c.bf16 %v6739_v18, %v6738_v30 }
 0x2f4   :  { %v2300_v15 = vpop.f32.mrf.mxu1  ;;  %v2733_v34 = vpop.f32.mrf.mxu2 }
 0x2f5   :  { %v1880_v8 = vpop.f32.mrf.mxu0  ;;  %v2442_v32 = vadd.f32 %v2300_v15, %v2012_v24  ;;  %v3163_v44 = vpop.f32.mrf.mxu3 }
 0x2f6   :  { %v2016_v47 = vadd.f32 %v1880_v8, %v7762_v14 }
 0x2f7   :  { %v2873_v50 = vadd.f32 %v2731_v62, %v2442_v32  ;;  %6593 = vmatmul.msk.bf16.gmra.mxu1 %vm235_vm1, %v2142_v20  ;;  %v6451_v62 = vld [vmem:[%s10490_s0 + $0x1e1] sm:$0xff] }
 0x2f8   :  { %6498 = vmatmul.msk.bf16.gmra.mxu0 %vm235_vm1, %v1714_v36 }
 0x2f9   :  { %v8585_v49 = vadd.f32 %v3161_v26, %v2873_v50  ;;  %6691 = vmatmul.msk.bf16.gmra.mxu2 %vm235_vm1, %v2574_v43  ;;  %6788 = vmatmul.msk.bf16.gmra.mxu3 %vm235_vm1, %v3004_v1  ;;  %v6452_v50 = vld [vmem:[%s10490_s0 + $0x1e9] sm:$0xff]  ;;  %v6643_v1 = vld [vmem:[%s10490_s0 + $0x1e0] sm:$0xff] }
 0x2fa   :  { %v6544_v26 = vld [vmem:[%s10490_s0 + $0x182] sm:$0xff]  ;;  %v1715_v30 = vpack.c.bf16 %v6452_v50, %v6451_v62  ;;  %v2575_v43 = vpack.c.bf16 %v6644_v57, %v6643_v1 }
 0x2fb   :  { %v6646_v1 = vld [vmem:[%s10490_s0 + $0x200] sm:$0xff] }
 0x2fc   :  { %v2302_v61 = vpop.f32.mrf.mxu1  ;;  %v2736_v4 = vpop.f32.mrf.mxu2 }
 0x2fd   :  { %v1882_v38 = vpop.f32.mrf.mxu0  ;;  %v2443_v24 = vadd.f32 %v2302_v61, %v2013_v11  ;;  %v3166_v58 = vpop.f32.mrf.mxu3 }
 0x2fe   :  { %v2017_v14 = vadd.f32 %v1882_v38, %v7772_v27  ;;  %v6545_v27 = vld [vmem:[%s10490_s0 + $0x18a] sm:$0xff] }
 0x2ff   :  { %v2874_v54 = vadd.f32 %v2733_v34, %v2443_v24  ;;  %v2143_v18 = vpack.c.bf16 %v6545_v27, %v6544_v26  ;;  %v6546_v26 = vld [vmem:[%s10490_s0 + $0x1ca] sm:$0xff]  ;;  %v6645_v27 = vld [vmem:[%s10490_s0 + $0x1f8] sm:$0xff] }
 0x301   :  { %v8602_v11 = vadd.f32 %v3163_v44, %v2874_v54 }
 0x304   :  { %v2305_v20 = vpop.f32.mrf.mxu1  ;;  %v2738_v32 = vpop.f32.mrf.mxu2 }
 0x305   :  { %v1885_v36 = vpop.f32.mrf.mxu0  ;;  %v2444_v15 = vadd.f32 %v2305_v20, %v2014_v51  ;;  %v3168_v34 = vpop.f32.mrf.mxu3 }
 0x306   :  { %v2018_v8 = vadd.f32 %v1885_v36, %v7788_v48 }
 0x307   :  { %v2875_v44 = vadd.f32 %v2736_v4, %v2444_v15  ;;  %6594 = vmatmul.msk.bf16.gmra.mxu1 %vm235_vm1, %v2143_v18  ;;  %v6453_v4 = vld [vmem:[%s10490_s0 + $0x1f9] sm:$0xff] }
 0x308   :  { %6499 = vmatmul.msk.bf16.gmra.mxu0 %vm235_vm1, %v1715_v30 }
 0x309   :  { %v8613_v38 = vadd.f32 %v3166_v58, %v2875_v44  ;;  %6692 = vmatmul.msk.bf16.gmra.mxu2 %vm235_vm1, %v2575_v43  ;;  %6789 = vmatmul.msk.bf16.gmra.mxu3 %vm235_vm1, %v1715_v30  ;;  %v6454_v58 = vld [vmem:[%s10490_s0 + $0x201] sm:$0xff]  ;;  %v2576_v44 = vpack.c.bf16 %v6646_v1, %v6645_v27  ;;  %v6648_v27 = vld [vmem:[%s10490_s0 + $0x218] sm:$0xff] }
 0x30a   :  { %v1716_v57 = vpack.c.bf16 %v6454_v58, %v6453_v4 }
 0x30c   :  { %v2307_v24 = vpop.f32.mrf.mxu1  ;;  %v2741_v51 = vpop.f32.mrf.mxu2 }
 0x30d   :  { %v1887_v61 = vpop.f32.mrf.mxu0  ;;  %v2445_v48 = vadd.f32 %v2307_v24, %v2015_v46  ;;  %v3171_v62 = vpop.f32.mrf.mxu3 }
 0x30e   :  { %v2019_v54 = vadd.f32 %v1887_v61, %v7798_v59  ;;  %v6547_v59 = vld [vmem:[%s10490_s0 + $0x1d2] sm:$0xff] }
 0x30f   :  { %v2876_v50 = vadd.f32 %v2738_v32, %v2445_v48  ;;  %v2144_v30 = vpack.c.bf16 %v6547_v59, %v6546_v26  ;;  %v6548_v26 = vld [vmem:[%s10490_s0 + $0x1e2] sm:$0xff]  ;;  %v6647_v59 = vld [vmem:[%s10490_s0 + $0x210] sm:$0xff] }
 0x311   :  { %v8630_v46 = vadd.f32 %v3168_v34, %v2876_v50 }
 0x314   :  { %v2310_v36 = vpop.f32.mrf.mxu1  ;;  %v2743_v32 = vpop.f32.mrf.mxu2 }
 0x315   :  { %v1890_v18 = vpop.f32.mrf.mxu0  ;;  %v2446_v15 = vadd.f32 %v2310_v36, %v2016_v47  ;;  %v3173_v43 = vpop.f32.mrf.mxu3 }
 0x316   :  { %v2020_v20 = vadd.f32 %v1890_v18, %v7814_v17 }
 0x317   :  { %v2877_v34 = vadd.f32 %v2741_v51, %v2446_v15  ;;  %6595 = vmatmul.msk.bf16.gmra.mxu1 %vm235_vm1, %v2144_v30  ;;  %v6455_v51 = vld [vmem:[%s10490_s0 + $0x211] sm:$0xff] }
 0x318   :  { %6500 = vmatmul.msk.bf16.gmra.mxu0 %vm235_vm1, %v1716_v57 }
 0x319   :  { %v8641_v61 = vadd.f32 %v3171_v62, %v2877_v34  ;;  %6693 = vmatmul.msk.bf16.gmra.mxu2 %vm235_vm1, %v2576_v44  ;;  %6790 = vmatmul.msk.bf16.gmra.mxu3 %vm235_vm1, %v1716_v57  ;;  %v6456_v62 = vld [vmem:[%s10490_s0 + $0x219] sm:$0xff]  ;;  %v2577_v34 = vpack.c.bf16 %v6648_v27, %v6647_v59  ;;  %v6650_v59 = vld [vmem:[%s10490_s0 + $0x230] sm:$0xff] }
 0x31a   :  { %v1717_v1 = vpack.c.bf16 %v6456_v62, %v6455_v51 }
 0x31c   :  { %v2312_v48 = vpop.f32.mrf.mxu1  ;;  %v2746_v47 = vpop.f32.mrf.mxu2 }
 0x31d   :  { %v1892_v24 = vpop.f32.mrf.mxu0  ;;  %v2447_v17 = vadd.f32 %v2312_v48, %v2017_v14  ;;  %v3176_v4 = vpop.f32.mrf.mxu3 }
 0x31e   :  { %v2021_v50 = vadd.f32 %v1892_v24, %v7824_v29  ;;  %v6549_v29 = vld [vmem:[%s10490_s0 + $0x1ea] sm:$0xff] }
 0x31f   :  { %v2878_v58 = vadd.f32 %v2743_v32, %v2447_v17  ;;  %v2145_v57 = vpack.c.bf16 %v6549_v29, %v6548_v26  ;;  %v6550_v26 = vld [vmem:[%s10490_s0 + $0x1fa] sm:$0xff]  ;;  %v6649_v29 = vld [vmem:[%s10490_s0 + $0x228] sm:$0xff] }
 0x321   :  { %v8658_v14 = vadd.f32 %v3173_v43, %v2878_v58 }
 0x324   :  { %v2315_v18 = vpop.f32.mrf.mxu1  ;;  %v2748_v32 = vpop.f32.mrf.mxu2 }
 0x325   :  { %v1895_v30 = vpop.f32.mrf.mxu0  ;;  %v2448_v15 = vadd.f32 %v2315_v18, %v2018_v8  ;;  %v3178_v44 = vpop.f32.mrf.mxu3 }
 0x326   :  { %v2022_v36 = vadd.f32 %v1895_v30, %v7840_v55 }
 0x327   :  { %v2879_v43 = vadd.f32 %v2746_v47, %v2448_v15  ;;  %6596 = vmatmul.msk.bf16.gmra.mxu1 %vm235_vm1, %v2145_v57  ;;  %v6457_v47 = vld [vmem:[%s10490_s0 + $0x229] sm:$0xff] }
 0x328   :  { %6501 = vmatmul.msk.bf16.gmra.mxu0 %vm235_vm1, %v1717_v1 }
 0x329   :  { %v8669_v24 = vadd.f32 %v3176_v4, %v2879_v43  ;;  %6694 = vmatmul.msk.bf16.gmra.mxu2 %vm235_vm1, %v2577_v34  ;;  %6791 = vmatmul.msk.bf16.gmra.mxu3 %vm235_vm1, %v1717_v1  ;;  %v6458_v4 = vld [vmem:[%s10490_s0 + $0x231] sm:$0xff]  ;;  %v2578_v43 = vpack.c.bf16 %v6650_v59, %v6649_v29  ;;  %v6652_v29 = vld [vmem:[%s10490_s0 + $0x248] sm:$0xff] }
 0x32a   :  { %v1718_v27 = vpack.c.bf16 %v6458_v4, %v6457_v47 }
 0x32c   :  { %v2317_v17 = vpop.f32.mrf.mxu1  ;;  %v2751_v8 = vpop.f32.mrf.mxu2 }
 0x32d   :  { %v1897_v48 = vpop.f32.mrf.mxu0  ;;  %v2449_v55 = vadd.f32 %v2317_v17, %v2019_v54  ;;  %v3181_v51 = vpop.f32.mrf.mxu3 }
 0x32e   :  { %v2023_v58 = vadd.f32 %v1897_v48, %v7850_v2  ;;  %v6551_v2 = vld [vmem:[%s10490_s0 + $0x202] sm:$0xff] }
 0x32f   :  { %v2880_v62 = vadd.f32 %v2748_v32, %v2449_v55  ;;  %v2146_v1 = vpack.c.bf16 %v6551_v2, %v6550_v26  ;;  %v6552_v26 = vld [vmem:[%s10490_s0 + $0x212] sm:$0xff]  ;;  %v6651_v2 = vld [vmem:[%s10490_s0 + $0x240] sm:$0xff] }
 0x331   :  { %v8686_v54 = vadd.f32 %v3178_v44, %v2880_v62 }
 0x334   :  { %v2320_v30 = vpop.f32.mrf.mxu1  ;;  %v2753_v32 = vpop.f32.mrf.mxu2 }
 0x335   :  { %v1900_v57 = vpop.f32.mrf.mxu0  ;;  %v2450_v15 = vadd.f32 %v2320_v30, %v2020_v20  ;;  %v3183_v34 = vpop.f32.mrf.mxu3 }
 0x336   :  { %v2024_v18 = vadd.f32 %v1900_v57, %v7866_v21 }
 0x337   :  { %v2881_v44 = vadd.f32 %v2751_v8, %v2450_v15  ;;  %6597 = vmatmul.msk.bf16.gmra.mxu1 %vm235_vm1, %v2146_v1  ;;  %v6459_v8 = vld [vmem:[%s10490_s0 + $0x241] sm:$0xff] }
 0x338   :  { %6502 = vmatmul.msk.bf16.gmra.mxu0 %vm235_vm1, %v1718_v27 }
 0x339   :  { %v8697_v48 = vadd.f32 %v3181_v51, %v2881_v44  ;;  %6695 = vmatmul.msk.bf16.gmra.mxu2 %vm235_vm1, %v2578_v43  ;;  %6792 = vmatmul.msk.bf16.gmra.mxu3 %vm235_vm1, %v1718_v27  ;;  %v6460_v51 = vld [vmem:[%s10490_s0 + $0x249] sm:$0xff]  ;;  %v2579_v44 = vpack.c.bf16 %v6652_v29, %v6651_v2  ;;  %v6654_v2 = vld [vmem:[%s10490_s0 + $0x260] sm:$0xff] }
 0x33a   :  { %v1719_v59 = vpack.c.bf16 %v6460_v51, %v6459_v8 }
 0x33c   :  { %v2322_v55 = vpop.f32.mrf.mxu1  ;;  %v2756_v20 = vpop.f32.mrf.mxu2 }
 0x33d   :  { %v1902_v17 = vpop.f32.mrf.mxu0  ;;  %v2451_v21 = vadd.f32 %v2322_v55, %v2021_v50  ;;  %v3186_v47 = vpop.f32.mrf.mxu3 }
 0x33e   :  { %v2025_v62 = vadd.f32 %v1902_v17, %v7876_v39  ;;  %v6553_v39 = vld [vmem:[%s10490_s0 + $0x21a] sm:$0xff] }
 0x33f   :  { %v2882_v4 = vadd.f32 %v2753_v32, %v2451_v21  ;;  %v2147_v27 = vpack.c.bf16 %v6553_v39, %v6552_v26  ;;  %v6554_v26 = vld [vmem:[%s10490_s0 + $0x22a] sm:$0xff]  ;;  %v6653_v39 = vld [vmem:[%s10490_s0 + $0x258] sm:$0xff] }
 0x341   :  { %v8714_v50 = vadd.f32 %v3183_v34, %v2882_v4 }
 0x344   :  { %v2325_v57 = vpop.f32.mrf.mxu1  ;;  %v2758_v32 = vpop.f32.mrf.mxu2 }
 0x345   :  { %v1905_v1 = vpop.f32.mrf.mxu0  ;;  %v2452_v15 = vadd.f32 %v2325_v57, %v2022_v36  ;;  %v3188_v43 = vpop.f32.mrf.mxu3 }
 0x346   :  { %v2026_v30 = vadd.f32 %v1905_v1, %v7892_v45 }
 0x347   :  { %v2883_v34 = vadd.f32 %v2756_v20, %v2452_v15  ;;  %6598 = vmatmul.msk.bf16.gmra.mxu1 %vm235_vm1, %v2147_v27  ;;  %v6461_v20 = vld [vmem:[%s10490_s0 + $0x259] sm:$0xff] }
 0x348   :  { %6503 = vmatmul.msk.bf16.gmra.mxu0 %vm235_vm1, %v1719_v59 }
 0x349   :  { %v8725_v17 = vadd.f32 %v3186_v47, %v2883_v34  ;;  %6696 = vmatmul.msk.bf16.gmra.mxu2 %vm235_vm1, %v2579_v44  ;;  %6793 = vmatmul.msk.bf16.gmra.mxu3 %vm235_vm1, %v1719_v59  ;;  %v6462_v47 = vld [vmem:[%s10490_s0 + $0x261] sm:$0xff]  ;;  %v2580_v34 = vpack.c.bf16 %v6654_v2, %v6653_v39  ;;  %v6656_v39 = vld [vmem:[%s10490_s0 + $0x278] sm:$0xff] }
 0x34a   :  { %v1720_v29 = vpack.c.bf16 %v6462_v47, %v6461_v20 }
 0x34c   :  { %v2327_v21 = vpop.f32.mrf.mxu1  ;;  %v2761_v36 = vpop.f32.mrf.mxu2 }
 0x34d   :  { %v1907_v55 = vpop.f32.mrf.mxu0  ;;  %v2453_v45 = vadd.f32 %v2327_v21, %v2023_v58  ;;  %v3191_v8 = vpop.f32.mrf.mxu3 }
 0x34e   :  { %v2027_v4 = vadd.f32 %v1907_v55, %v7902_v16  ;;  %v6555_v16 = vld [vmem:[%s10490_s0 + $0x232] sm:$0xff] }
 0x34f   :  { %v2884_v51 = vadd.f32 %v2758_v32, %v2453_v45  ;;  %v2148_v59 = vpack.c.bf16 %v6555_v16, %v6554_v26  ;;  %v6556_v26 = vld [vmem:[%s10490_s0 + $0x242] sm:$0xff]  ;;  %v6655_v16 = vld [vmem:[%s10490_s0 + $0x270] sm:$0xff] }
 0x351   :  { %v8742_v58 = vadd.f32 %v3188_v43, %v2884_v51 }
 0x354   :  { %v2330_v1 = vpop.f32.mrf.mxu1  ;;  %v2763_v32 = vpop.f32.mrf.mxu2 }
 0x355   :  { %v1910_v27 = vpop.f32.mrf.mxu0  ;;  %v2454_v15 = vadd.f32 %v2330_v1, %v2024_v18  ;;  %v3193_v44 = vpop.f32.mrf.mxu3 }
 0x356   :  { %v2028_v57 = vadd.f32 %v1910_v27, %v7918_v41 }
 0x357   :  { %v2885_v43 = vadd.f32 %v2761_v36, %v2454_v15  ;;  %6599 = vmatmul.msk.bf16.gmra.mxu1 %vm235_vm1, %v2148_v59  ;;  %v6463_v36 = vld [vmem:[%s10490_s0 + $0x271] sm:$0xff] }
 0x358   :  { %6504 = vmatmul.msk.bf16.gmra.mxu0 %vm235_vm1, %v1720_v29 }
 0x359   :  { %v8753_v55 = vadd.f32 %v3191_v8, %v2885_v43  ;;  %6697 = vmatmul.msk.bf16.gmra.mxu2 %vm235_vm1, %v2580_v34  ;;  %6794 = vmatmul.msk.bf16.gmra.mxu3 %vm235_vm1, %v1720_v29  ;;  %v6464_v8 = vld [vmem:[%s10490_s0 + $0x279] sm:$0xff]  ;;  %v2581_v43 = vpack.c.bf16 %v6656_v39, %v6655_v16  ;;  %v6658_v16 = vld [vmem:[%s10490_s0 + $0x290] sm:$0xff] }
 0x35a   :  { %v1721_v2 = vpack.c.bf16 %v6464_v8, %v6463_v36 }
 0x35c   :  { %v2332_v45 = vpop.f32.mrf.mxu1  ;;  %v2766_v18 = vpop.f32.mrf.mxu2 }
 0x35d   :  { %v1912_v21 = vpop.f32.mrf.mxu0  ;;  %v2455_v41 = vadd.f32 %v2332_v45, %v2025_v62  ;;  %v3196_v20 = vpop.f32.mrf.mxu3 }
 0x35e   :  { %v2029_v51 = vadd.f32 %v1912_v21, %v7928_v42  ;;  %v6557_v42 = vld [vmem:[%s10490_s0 + $0x24a] sm:$0xff] }
 0x35f   :  { %v2886_v47 = vadd.f32 %v2763_v32, %v2455_v41  ;;  %v2149_v29 = vpack.c.bf16 %v6557_v42, %v6556_v26  ;;  %v6558_v26 = vld [vmem:[%s10490_s0 + $0x25a] sm:$0xff]  ;;  %v6657_v42 = vld [vmem:[%s10490_s0 + $0x288] sm:$0xff] }
 0x361   :  { %v8770_v62 = vadd.f32 %v3193_v44, %v2886_v47 }
 0x364   :  { %v2335_v27 = vpop.f32.mrf.mxu1  ;;  %v2768_v32 = vpop.f32.mrf.mxu2 }
 0x365   :  { %v1915_v59 = vpop.f32.mrf.mxu0  ;;  %v2456_v15 = vadd.f32 %v2335_v27, %v2026_v30  ;;  %v3198_v34 = vpop.f32.mrf.mxu3 }
 0x366   :  { %v2030_v1 = vadd.f32 %v1915_v59, %v7944_v25 }
 0x367   :  { %v2887_v44 = vadd.f32 %v2766_v18, %v2456_v15  ;;  %6600 = vmatmul.msk.bf16.gmra.mxu1 %vm235_vm1, %v2149_v29  ;;  %v6465_v18 = vld [vmem:[%s10490_s0 + $0x289] sm:$0xff] }
 0x368   :  { %6505 = vmatmul.msk.bf16.gmra.mxu0 %vm235_vm1, %v1721_v2 }
 0x369   :  { %v8781_v21 = vadd.f32 %v3196_v20, %v2887_v44  ;;  %6698 = vmatmul.msk.bf16.gmra.mxu2 %vm235_vm1, %v2581_v43  ;;  %6795 = vmatmul.msk.bf16.gmra.mxu3 %vm235_vm1, %v1721_v2  ;;  %v6466_v20 = vld [vmem:[%s10490_s0 + $0x291] sm:$0xff]  ;;  %v2582_v44 = vpack.c.bf16 %v6658_v16, %v6657_v42  ;;  %v6660_v42 = vld [vmem:[%s10490_s0 + $0x2a8] sm:$0xff] }
 0x36a   :  { %v1722_v39 = vpack.c.bf16 %v6466_v20, %v6465_v18 }
 0x36c   :  { %v2337_v41 = vpop.f32.mrf.mxu1  ;;  %v2771_v30 = vpop.f32.mrf.mxu2 }
 0x36d   :  { %v1917_v45 = vpop.f32.mrf.mxu0  ;;  %v2457_v25 = vadd.f32 %v2337_v41, %v2027_v4  ;;  %v3201_v36 = vpop.f32.mrf.mxu3 }
 0x36e   :  { %v2031_v47 = vadd.f32 %v1917_v45, %v7954_v40  ;;  %v6559_v40 = vld [vmem:[%s10490_s0 + $0x262] sm:$0xff] }
 0x36f   :  { %v2888_v8 = vadd.f32 %v2768_v32, %v2457_v25  ;;  %v2150_v2 = vpack.c.bf16 %v6559_v40, %v6558_v26  ;;  %v6560_v26 = vld [vmem:[%s10490_s0 + $0x272] sm:$0xff]  ;;  %v6659_v40 = vld [vmem:[%s10490_s0 + $0x2a0] sm:$0xff] }
 0x371   :  { %v8798_v4 = vadd.f32 %v3198_v34, %v2888_v8 }
 0x374   :  { %v2340_v59 = vpop.f32.mrf.mxu1  ;;  %v2773_v32 = vpop.f32.mrf.mxu2 }
 0x375   :  { %v1920_v29 = vpop.f32.mrf.mxu0  ;;  %v2458_v15 = vadd.f32 %v2340_v59, %v2028_v57  ;;  %v3203_v43 = vpop.f32.mrf.mxu3 }
 0x376   :  { %v2032_v27 = vadd.f32 %v1920_v29, %v7970_v7 }
 0x377   :  { %v2889_v34 = vadd.f32 %v2771_v30, %v2458_v15  ;;  %6601 = vmatmul.msk.bf16.gmra.mxu1 %vm235_vm1, %v2150_v2  ;;  %v6467_v30 = vld [vmem:[%s10490_s0 + $0x2a1] sm:$0xff] }
 0x378   :  { %6506 = vmatmul.msk.bf16.gmra.mxu0 %vm235_vm1, %v1722_v39 }
 0x379   :  { %v8809_v45 = vadd.f32 %v3201_v36, %v2889_v34  ;;  %6699 = vmatmul.msk.bf16.gmra.mxu2 %vm235_vm1, %v2582_v44  ;;  %6796 = vmatmul.msk.bf16.gmra.mxu3 %vm235_vm1, %v1722_v39  ;;  %v6468_v36 = vld [vmem:[%s10490_s0 + $0x2a9] sm:$0xff]  ;;  %v2583_v34 = vpack.c.bf16 %v6660_v42, %v6659_v40  ;;  %v6662_v40 = vld [vmem:[%s10490_s0 + $0x2c0] sm:$0xff] }
 0x37a   :  { %v1723_v16 = vpack.c.bf16 %v6468_v36, %v6467_v30 }
 0x37c   :  { %v2342_v25 = vpop.f32.mrf.mxu1  ;;  %v2776_v57 = vpop.f32.mrf.mxu2 }
 0x37d   :  { %v1922_v41 = vpop.f32.mrf.mxu0  ;;  %v2459_v7 = vadd.f32 %v2342_v25, %v2029_v51  ;;  %v3206_v18 = vpop.f32.mrf.mxu3 }
 0x37e   :  { %v2033_v8 = vadd.f32 %v1922_v41, %v7980_v31  ;;  %v6561_v31 = vld [vmem:[%s10490_s0 + $0x27a] sm:$0xff] }
 0x37f   :  { %v2890_v20 = vadd.f32 %v2773_v32, %v2459_v7  ;;  %v2151_v39 = vpack.c.bf16 %v6561_v31, %v6560_v26  ;;  %v6562_v26 = vld [vmem:[%s10490_s0 + $0x28a] sm:$0xff]  ;;  %v6661_v31 = vld [vmem:[%s10490_s0 + $0x2b8] sm:$0xff] }
 0x381   :  { %v8826_v51 = vadd.f32 %v3203_v43, %v2890_v20 }
 0x384   :  { %v2345_v29 = vpop.f32.mrf.mxu1  ;;  %v2778_v32 = vpop.f32.mrf.mxu2 }
 0x385   :  { %v1925_v2 = vpop.f32.mrf.mxu0  ;;  %v2460_v15 = vadd.f32 %v2345_v29, %v2030_v1  ;;  %v3208_v44 = vpop.f32.mrf.mxu3 }
 0x386   :  { %v2034_v59 = vadd.f32 %v1925_v2, %v7996_v60 }
 0x387   :  { %v2891_v43 = vadd.f32 %v2776_v57, %v2460_v15  ;;  %6602 = vmatmul.msk.bf16.gmra.mxu1 %vm235_vm1, %v2151_v39  ;;  %v6469_v57 = vld [vmem:[%s10490_s0 + $0x2b9] sm:$0xff] }
 0x388   :  { %6507 = vmatmul.msk.bf16.gmra.mxu0 %vm235_vm1, %v1723_v16 }
 0x389   :  { %v8837_v41 = vadd.f32 %v3206_v18, %v2891_v43  ;;  %6700 = vmatmul.msk.bf16.gmra.mxu2 %vm235_vm1, %v2583_v34  ;;  %6797 = vmatmul.msk.bf16.gmra.mxu3 %vm235_vm1, %v1723_v16  ;;  %v6470_v18 = vld [vmem:[%s10490_s0 + $0x2c1] sm:$0xff]  ;;  %v2584_v43 = vpack.c.bf16 %v6662_v40, %v6661_v31  ;;  %v6664_v31 = vld [vmem:[%s10490_s0 + $0x2d8] sm:$0xff] }
 0x38a   :  { %v1724_v42 = vpack.c.bf16 %v6470_v18, %v6469_v57 }
 0x38c   :  { %v2347_v7 = vpop.f32.mrf.mxu1  ;;  %v2781_v1 = vpop.f32.mrf.mxu2 }
 0x38d   :  { %v1927_v25 = vpop.f32.mrf.mxu0  ;;  %v2461_v60 = vadd.f32 %v2347_v7, %v2031_v47  ;;  %v3211_v30 = vpop.f32.mrf.mxu3 }
 0x38e   :  { %v2035_v20 = vadd.f32 %v1927_v25, %v8006_v6  ;;  %v6563_v6 = vld [vmem:[%s10490_s0 + $0x292] sm:$0xff] }
 0x38f   :  { %v2892_v36 = vadd.f32 %v2778_v32, %v2461_v60  ;;  %v2152_v16 = vpack.c.bf16 %v6563_v6, %v6562_v26  ;;  %v6564_v26 = vld [vmem:[%s10490_s0 + $0x2a2] sm:$0xff]  ;;  %v6663_v6 = vld [vmem:[%s10490_s0 + $0x2d0] sm:$0xff] }
 0x391   :  { %v8854_v47 = vadd.f32 %v3208_v44, %v2892_v36 }
 0x394   :  { %v2350_v2 = vpop.f32.mrf.mxu1  ;;  %v2783_v32 = vpop.f32.mrf.mxu2 }
 0x395   :  { %v1930_v39 = vpop.f32.mrf.mxu0  ;;  %v2462_v15 = vadd.f32 %v2350_v2, %v2032_v27  ;;  %v3213_v34 = vpop.f32.mrf.mxu3  ;;  %v10535_v2 = vld [vmem:[#allocation9_spill] sm:$0xff] }
 0x396   :  { %v2036_v29 = vadd.f32 %v1930_v39, %v8024_v53 }
 0x397   :  { %v2893_v44 = vadd.f32 %v2781_v1, %v2462_v15  ;;  %6603 = vmatmul.msk.bf16.gmra.mxu1 %vm235_vm1, %v2152_v16  ;;  %v6471_v1 = vld [vmem:[%s10490_s0 + $0x2d1] sm:$0xff] }
 0x398   :  { %6508 = vmatmul.msk.bf16.gmra.mxu0 %vm235_vm1, %v1724_v42 }
 0x399   :  { %v8865_v25 = vadd.f32 %v3211_v30, %v2893_v44  ;;  %6701 = vmatmul.msk.bf16.gmra.mxu2 %vm235_vm1, %v2584_v43  ;;  %6798 = vmatmul.msk.bf16.gmra.mxu3 %vm235_vm1, %v1724_v42  ;;  %v6472_v30 = vld [vmem:[%s10490_s0 + $0x2d9] sm:$0xff] }
 0x39a   :  { %v1725_v40 = vpack.c.bf16 %v6472_v30, %v6471_v1  ;;  %v10536_v1 = vld [vmem:[#allocation10_spill] sm:$0xff] }
 0x39c   :  { %v2352_v60 = vpop.f32.mrf.mxu1  ;;  %v2786_v27 = vpop.f32.mrf.mxu2 }
 0x39d   :  { %v1932_v7 = vpop.f32.mrf.mxu0  ;;  %v2463_v53 = vadd.f32 %v2352_v60, %v2033_v8  ;;  %v3216_v57 = vpop.f32.mrf.mxu3 }
 0x39e   :  { %v2037_v36 = vadd.f32 %v1932_v7, %v8035_v56  ;;  %v6565_v56 = vld [vmem:[%s10490_s0 + $0x2aa] sm:$0xff]  ;;  %v2585_v7 = vpack.c.bf16 %v6664_v31, %v6663_v6  ;;  %v6566_v6 = vld [vmem:[%s10490_s0 + $0x2ba] sm:$0xff]  ;;  %v6567_v31 = vld [vmem:[%s10490_s0 + $0x2c2] sm:$0xff] }
 0x39f   :  { %v2894_v18 = vadd.f32 %v2783_v32, %v2463_v53  ;;  %v2153_v42 = vpack.c.bf16 %v6565_v56, %v6564_v26 }
 0x3a1   :  { %v8882_v8 = vadd.f32 %v3213_v34, %v2894_v18 }
 0x3a4   :  { %v2355_v39 = vpop.f32.mrf.mxu1  ;;  %v2788_v43 = vpop.f32.mrf.mxu2 }
 0x3a5   :  { %v1935_v16 = vpop.f32.mrf.mxu0  ;;  %v2464_v32 = vadd.f32 %v2355_v39, %v2034_v59  ;;  %v3218_v44 = vpop.f32.mrf.mxu3 }
 0x3a6   :  { %v2038_v15 = vadd.f32 %v1935_v16, %v10535_v2  ;;  %v2154_v2 = vpack.c.bf16 %v6567_v31, %v6566_v6  ;;  %v10538_v6 = vld [vmem:[#allocation12_spill] sm:$0xff] }
 0x3a7   :  { %v2895_v34 = vadd.f32 %v2786_v27, %v2464_v32  ;;  %6604 = vmatmul.msk.bf16.gmra.mxu1 %vm235_vm1, %v2153_v42  ;;  %v6473_v27 = vld [vmem:[%s10490_s0 + $0x2e9] sm:$0xff] }
 0x3a8   :  { %6509 = vmatmul.msk.bf16.gmra.mxu0 %vm235_vm1, %v1725_v40  ;;  %v6666_v42 = vld [vmem:[%s10490_s0 + $0x2f0] sm:$0xff] }
 0x3a9   :  { %v8893_v60 = vadd.f32 %v3216_v57, %v2895_v34  ;;  %6702 = vmatmul.msk.bf16.gmra.mxu2 %vm235_vm1, %v2585_v7  ;;  %6799 = vmatmul.msk.bf16.gmra.mxu3 %vm235_vm1, %v1725_v40  ;;  %v6474_v57 = vld [vmem:[%s10490_s0 + $0x2f1] sm:$0xff]  ;;  %v6665_v40 = vld [vmem:[%s10490_s0 + $0x2e8] sm:$0xff] }
 0x3aa   :  { %v1726_v39 = vpack.c.bf16 %v6474_v57, %v6473_v27  ;;  %v10537_v7 = vld [vmem:[#allocation11_spill] sm:$0xff] }
 0x3ac   :  { %v2357_v18 = vpop.f32.mrf.mxu1  ;;  %v2791_v59 = vpop.f32.mrf.mxu2 }
 0x3ad   :  { %v1937_v53 = vpop.f32.mrf.mxu0  ;;  %v2465_v26 = vadd.f32 %v2357_v18, %v2035_v20  ;;  %v3221_v56 = vpop.f32.mrf.mxu3 }
 0x3ae   :  { %v2039_v30 = vadd.f32 %v1937_v53, %v10536_v1 }
 0x3af   :  { %v2896_v16 = vadd.f32 %v2788_v43, %v2465_v26  ;;  %v2586_v26 = vpack.c.bf16 %v6666_v42, %v6665_v40  ;;  %v6568_v42 = vld [vmem:[%s10490_s0 + $0x2d2] sm:$0xff] }
 0x3b1   :  { %v8910_v20 = vadd.f32 %v3218_v44, %v2896_v16 }
 0x3b4   :  { %v2360_v43 = vpop.f32.mrf.mxu1  ;;  %v2793_v18 = vpop.f32.mrf.mxu2 }
 0x3b5   :  { %v1940_v32 = vpop.f32.mrf.mxu0  ;;  %v2466_v53 = vadd.f32 %v2360_v43, %v2036_v29  ;;  %v3223_v1 = vpop.f32.mrf.mxu3 }
 0x3b6   :  { %v2040_v34 = vadd.f32 %v1940_v32, %v10537_v7  ;;  %v6668_v7 = vld [vmem:[%s10490_s0 + $0x308] sm:$0xff] }
 0x3b7   :  { %v2897_v44 = vadd.f32 %v2791_v59, %v2466_v53  ;;  %6605 = vmatmul.msk.bf16.gmra.mxu1 %vm235_vm1, %v2154_v2  ;;  %v6475_v59 = vld [vmem:[%s10490_s0 + $0x301] sm:$0xff] }
 0x3b8   :  { %6510 = vmatmul.msk.bf16.gmra.mxu0 %vm235_vm1, %v1726_v39  ;;  %v6667_v2 = vld [vmem:[%s10490_s0 + $0x300] sm:$0xff] }
 0x3b9   :  { %v8921_v16 = vadd.f32 %v3221_v56, %v2897_v44  ;;  %6703 = vmatmul.msk.bf16.gmra.mxu2 %vm235_vm1, %v2586_v26  ;;  %6800 = vmatmul.msk.bf16.gmra.mxu3 %vm235_vm1, %v1726_v39  ;;  %v6476_v56 = vld [vmem:[%s10490_s0 + $0x309] sm:$0xff]  ;;  %v6569_v39 = vld [vmem:[%s10490_s0 + $0x2da] sm:$0xff] }
 0x3ba   :  { %v1727_v53 = vpack.c.bf16 %v6476_v56, %v6475_v59 }
 0x3bc   :  { %v2362_v57 = vpop.f32.mrf.mxu1  ;;  %v2796_v32 = vpop.f32.mrf.mxu2 }
 0x3bd   :  { %v1942_v27 = vpop.f32.mrf.mxu0  ;;  %v2467_v29 = vadd.f32 %v2362_v57, %v2037_v36  ;;  %v3226_v43 = vpop.f32.mrf.mxu3 }
 0x3be   :  { %v8926_v31 = vadd.f32 %v1942_v27, %v10538_v6  ;;  %v10541_v27 = vld [vmem:[#allocation13_spill] sm:$0xff] }
 0x3bf   :  { %v2898_v40 = vadd.f32 %v2793_v18, %v2467_v29  ;;  %v2155_v18 = vpack.c.bf16 %v6569_v39, %v6568_v42  ;;  %v10543_v42 = vld [vmem:[#allocation14_spill] sm:$0xff] }
 0x3c0   :  { %10539 = vst [vmem:[#allocation9_spill] sm:$0xff] %v8926_v31 }
 0x3c1   :  { %v8940_v36 = vadd.f32 %v3223_v1, %v2898_v40  ;;  %v2587_v1 = vpack.c.bf16 %v6668_v7, %v6667_v2  ;;  %v6570_v7 = vld [vmem:[%s10490_s0 + $0x2ea] sm:$0xff] }
 0x3c3   :  { %10540 = vst [vmem:[#allocation10_spill] sm:$0xff] %v8940_v36 }
 0x3c4   :  { %v2365_v44 = vpop.f32.mrf.mxu1  ;;  %v2798_v29 = vpop.f32.mrf.mxu2 }
 0x3c5   :  { %v1945_v26 = vpop.f32.mrf.mxu0  ;;  %v2468_v6 = vadd.f32 %v2365_v44, %v2038_v15  ;;  %v3228_v31 = vpop.f32.mrf.mxu3 }
 0x3c6   :  { %v8949_v57 = vadd.f32 %v1945_v26, %v10541_v27  ;;  %v6670_v27 = vld [vmem:[%s10490_s0 + $0x320] sm:$0xff] }
 0x3c7   :  { %v2899_v40 = vadd.f32 %v2796_v32, %v2468_v6  ;;  %6606 = vmatmul.msk.bf16.gmra.mxu1 %vm235_vm1, %v2155_v18  ;;  %v6477_v32 = vld [vmem:[%s10490_s0 + $0x319] sm:$0xff] }
 0x3c8   :  { %6511 = vmatmul.msk.bf16.gmra.mxu0 %vm235_vm1, %v1727_v53  ;;  %v6669_v18 = vld [vmem:[%s10490_s0 + $0x318] sm:$0xff] }
 0x3c9   :  { %v8953_v36 = vadd.f32 %v3226_v43, %v2899_v40  ;;  %6704 = vmatmul.msk.bf16.gmra.mxu2 %vm235_vm1, %v2587_v1  ;;  %6801 = vmatmul.msk.bf16.gmra.mxu3 %vm235_vm1, %v1727_v53  ;;  %v6478_v43 = vld [vmem:[%s10490_s0 + $0x321] sm:$0xff]  ;;  %v6571_v53 = vld [vmem:[%s10490_s0 + $0x2f2] sm:$0xff] }
 0x3ca   :  { %v1728_v6 = vpack.c.bf16 %v6478_v43, %v6477_v32 }
 0x3cb   :  { %10542 = vst [vmem:[#allocation11_spill] sm:$0xff] %v8953_v36 }
 0x3cc   :  { %v2367_v56 = vpop.f32.mrf.mxu1  ;;  %v2801_v26 = vpop.f32.mrf.mxu2 }
 0x3cd   :  { %v1947_v59 = vpop.f32.mrf.mxu0  ;;  %v2469_v15 = vadd.f32 %v2367_v56, %v2039_v30  ;;  %v3231_v44 = vpop.f32.mrf.mxu3 }
 0x3ce   :  { %v8958_v39 = vadd.f32 %v1947_v59, %v10543_v42 }
 0x3cf   :  { %v2900_v2 = vadd.f32 %v2798_v29, %v2469_v15  ;;  %v2156_v29 = vpack.c.bf16 %v6571_v53, %v6570_v7  ;;  %v2588_v15 = vpack.c.bf16 %v6670_v27, %v6669_v18  ;;  %v6902_v27 = vld [vmem:[%s10493_s3 + $0x4] sm:$0xf] }
 0x3d0   :  { %10544 = vst [vmem:[#allocation12_spill] sm:$0xff] %v8958_v39 }
 0x3d1   :  { %v8972_v30 = vadd.f32 %v3228_v31, %v2900_v2 }
 0x3d3   :  { %10545 = vst [vmem:[#allocation13_spill] sm:$0xff] %v8972_v30 }
 0x3d4   :  { %v2370_v40 = vpop.f32.mrf.mxu1  ;;  %v8983_v42 = vpop.f32.mrf.mxu2 }
 0x3d5   :  { %v1950_v1 = vpop.f32.mrf.mxu0  ;;  %v2470_v56 = vadd.f32 %v2370_v40, %v2040_v34  ;;  %10546 = vst [vmem:[#allocation14_spill] sm:$0xff] %v8983_v42  ;;  %v8985_v31 = vpop.f32.mrf.mxu3  ;;  %v6919_v34 = vld [vmem:[%s10493_s3 + $0x8] sm:$0xf] }
 0x3d6   :  { %v8981_v59 = vadd.f32 %v1950_v1, %v8150_v3  ;;  %10547 = vst [vmem:[#allocation31_spill] sm:$0xff] %v8985_v31  ;;  %v4239_v3 = vld [vmem:[%s10493_s3] sm:$0xf]  ;;  %v4470_v32 = vsel %vm4290_vm2, %v6919_v34, 0  ;;  %v6573_v40 = vld [vmem:[%s10490_s0 + $0x30a] sm:$0xff] }
 0x3d7   :  { %v2901_v2 = vadd.f32 %v2801_v26, %v2470_v56  ;;  %6607 = vmatmul.msk.bf16.gmra.mxu1 %vm235_vm1, %v2156_v29  ;;  %v4368_v26 = vsel %vm4290_vm2, %v4239_v3, 0  ;;  %4479 = vmatpush.bf16.msra.mxu3 %v4470_v32  ;;  %v6479_v29 = vld [vmem:[%s10490_s0 + $0x331] sm:$0xff]  ;;  %v6480_v1 = vld [vmem:[%s10490_s0 + $0x339] sm:$0xff] }
 0x3d8   :  { %6512 = vmatmul.msk.bf16.gmra.mxu0 %vm235_vm1, %v1728_v6  ;;  %4377 = vmatpush.bf16.msra.mxu2 %v4368_v26  ;;  %v6671_v56 = vld [vmem:[%s10490_s0 + $0x330] sm:$0xff] }
 0x3d9   :  { %v8989_v39 = vadd.f32 %v3231_v44, %v2901_v2  ;;  %6705 = vmatmul.msk.bf16.gmra.mxu2 %vm235_vm1, %v2588_v15  ;;  %6802 = vmatmul.msk.bf16.gmra.mxu3 %vm235_vm1, %v1728_v6  ;;  %v4292_v6 = vsel %vm4290_vm2, %v6902_v27, 0  ;;  %v6672_v15 = vld [vmem:[%s10490_s0 + $0x338] sm:$0xff]  ;;  %v1729_v2 = vpack.c.bf16 %v6480_v1, %v6479_v29 }
 0x3da   :  { %4301 = vmatpush.bf16.msrb.mxu1 %v4292_v6  ;;  %v10551_v32 = vld [vmem:[#allocation15_spill] sm:$0xff]  ;;  %v2589_v31 = vpack.c.bf16 %v6672_v15, %v6671_v56  ;;  %v6673_v56 = vld [vmem:[%s10490_s0 + $0x348] sm:$0xff] }
 0x3db   :  { %10548 = vst [vmem:[#allocation32_spill] sm:$0xff] %v8989_v39  ;;  %v6674_v15 = vld [vmem:[%s10490_s0 + $0x350] sm:$0xff] }
 0x3dc   :  { %v9001_v43 = vpop.f32.mrf.mxu1  ;;  %v2806_v53 = vpop.f32.mrf.mxu2 }
 0x3dd   :  { %v1952_v44 = vpop.f32.mrf.mxu0  ;;  %10549 = vst [vmem:[#allocation33_spill] sm:$0xff] %v9001_v43  ;;  %v3236_v18 = vpop.f32.mrf.mxu3 }
 0x3de   :  { %v9004_v7 = vadd.f32 %v1952_v44, %v8160_v5  ;;  %v6572_v5 = vld [vmem:[%s10490_s0 + $0x302] sm:$0xff] }
 0x3df   :  { %v2157_v3 = vpack.c.bf16 %v6573_v40, %v6572_v5 }
 0x3e0   :  { %10550 = vst [vmem:[#allocation34_spill] sm:$0xff] %v9004_v7 }
 0x3e4   :  { %v2375_v26 = vpop.f32.mrf.mxu1  ;;  %v9030_v6 = vpop.f32.mrf.mxu2 }
 0x3e5   :  { %v1955_v34 = vpop.f32.mrf.mxu0  ;;  %v2472_v27 = vadd.f32 %v2375_v26, %v8949_v57  ;;  %10552 = vst [vmem:[#allocation15_spill] sm:$0xff] %v9030_v6  ;;  %v9032_v7 = vpop.f32.mrf.mxu3  ;;  %v10556_v57 = vld [vmem:[#allocation16_spill] sm:$0xff] }
 0x3e6   :  { %v2046_v44 = vadd.f32 %v1955_v34, %v10551_v32  ;;  %10553 = vst [vmem:[#allocation35_spill] sm:$0xff] %v9032_v7 }
 0x3e7   :  { %v2903_v42 = vadd.f32 %v2806_v53, %v2472_v27  ;;  %6608 = vmatmul.msk.bf16.gmra.mxu1 %vm235_vm1, %v2157_v3  ;;  %v6574_v53 = vld [vmem:[%s10490_s0 + $0x31a] sm:$0xff]  ;;  %v6771_v3 = vld [vmem:[%s10490_s0 + $0x351] sm:$0xff] }
 0x3e8   :  { %6513 = vmatmul.msk.bf16.gmra.mxu0 %vm235_vm1, %v1729_v2 }
 0x3e9   :  { %v9036_v39 = vadd.f32 %v3236_v18, %v2903_v42  ;;  %6706 = vmatmul.msk.bf16.gmra.mxu2 %vm235_vm1, %v2589_v31  ;;  %6803 = vmatmul.msk.bf16.gmra.mxu3 %vm235_vm1, %v1729_v2  ;;  %v6575_v42 = vld [vmem:[%s10490_s0 + $0x322] sm:$0xff]  ;;  %v6805_v31 = vld [vmem:[%s10490_s0 + $0x32] sm:$0xff]  ;;  %v6806_v18 = vld [vmem:[%s10490_s0 + $0x3a] sm:$0xff] }
 0x3ea   :  { %v6770_v2 = vld [vmem:[%s10490_s0 + $0x349] sm:$0xff]  ;;  %v2158_v26 = vpack.c.bf16 %v6575_v42, %v6574_v53  ;;  %v3419_v32 = vpack.c.bf16 %v6806_v18, %v6805_v31 }
 0x3eb   :  { %10554 = vst [vmem:[#allocation36_spill] sm:$0xff] %v9036_v39  ;;  %v2590_v39 = vpack.c.bf16 %v6674_v15, %v6673_v56 }
 0x3ec   :  { %v9040_v1 = vpop.f32.mrf.mxu1  ;;  %v2811_v40 = vpop.f32.mrf.mxu2 }
 0x3ed   :  { %v1957_v29 = vpop.f32.mrf.mxu0  ;;  %10555 = vst [vmem:[#allocation37_spill] sm:$0xff] %v9040_v1  ;;  %v3241_v34 = vpop.f32.mrf.mxu3  ;;  %v3020_v1 = vpack.c.bf16 %v6771_v3, %v6770_v2  ;;  %v10560_v3 = vld [vmem:[#allocation19_spill] sm:$0xff] }
 0x3ee   :  { %v9043_v5 = vadd.f32 %v1957_v29, %v10556_v57  ;;  %v10558_v57 = vld [vmem:[#allocation17_spill] sm:$0xff] }
 0x3f0   :  { %10557 = vst [vmem:[#allocation16_spill] sm:$0xff] %v9043_v5 }
 0x3f4   :  { %v2380_v29 = vpop.f32.mrf.mxu1  ;;  %v9071_v6 = vpop.f32.mrf.mxu2 }
 0x3f5   :  { %v1960_v27 = vpop.f32.mrf.mxu0  ;;  %v2474_v7 = vadd.f32 %v2380_v29, %v8981_v59  ;;  %v9075_v30 = vpop.f32.mrf.mxu3  ;;  %v10559_v59 = vld [vmem:[#allocation18_spill] sm:$0xff] }
 0x3f6   :  { %v2048_v5 = vadd.f32 %v1960_v27, %v10558_v57 }
 0x3f7   :  { %v2905_v43 = vadd.f32 %v2811_v40, %v2474_v7  ;;  %6609 = vmatmul.msk.bf16.gmra.mxu1 %vm235_vm1, %v2158_v26  ;;  %v6576_v7 = vld [vmem:[%s10490_s0 + $0x332] sm:$0xff] }
 0x3f8   :  { %6870 = vmatmul.msk.bf16.vlgmr.msra.gmra.mxu0 %vm235_vm1, %v3419_v32 }
 0x3f9   :  { %v9077_v36 = vadd.f32 %v3241_v34, %v2905_v43  ;;  %6707 = vmatmul.msk.bf16.gmra.mxu2 %vm235_vm1, %v2590_v39  ;;  %6804 = vmatmul.msk.bf16.gmra.mxu3 %vm235_vm1, %v3020_v1  ;;  %v6577_v43 = vld [vmem:[%s10490_s0 + $0x33a] sm:$0xff]  ;;  %v6807_v39 = vld [vmem:[%s10490_s0 + $0x4a] sm:$0xff]  ;;  %v6808_v1 = vld [vmem:[%s10490_s0 + $0x52] sm:$0xff] }
 0x3fa   :  { %v2159_v34 = vpack.c.bf16 %v6577_v43, %v6576_v7  ;;  %v3420_v56 = vpack.c.bf16 %v6808_v1, %v6807_v39  ;;  %v10562_v43 = vld [vmem:[#allocation20_spill] sm:$0xff] }
 0x3fc   :  { %v9081_v42 = vpop.f32.mrf.mxu1  ;;  %v2816_v18 = vpop.f32.mrf.mxu2 }
 0x3fd   :  { %v1962_v53 = vpop.f32.mrf.mxu0  ;;  %v3246_v40 = vpop.f32.mrf.mxu3 }
 0x3fe   :  { %v9084_v31 = vadd.f32 %v1962_v53, %v10559_v59 }
 0x404   :  { %v2385_v2 = vpop.f32.mrf.mxu1  ;;  %v9105_v57 = vpop.f32.mrf.mxu2 }
 0x405   :  { %v1965_v15 = vpop.f32.mrf.mxu0  ;;  %v2476_v32 = vadd.f32 %v2385_v2, %v2046_v44  ;;  %v9107_v53 = vpop.f32.mrf.mxu3  ;;  %v6809_v44 = vld [vmem:[%s10490_s0 + $0x62] sm:$0xff] }
 0x406   :  { %v9099_v26 = vadd.f32 %v1965_v15, %v10560_v3  ;;  %v10564_v15 = vld [vmem:[#allocation21_spill] sm:$0xff] }
 0x407   :  { %v2907_v27 = vadd.f32 %v2816_v18, %v2476_v32  ;;  %6610 = vmatmul.msk.bf16.gmra.mxu1 %vm235_vm1, %v2159_v34  ;;  %v6810_v18 = vld [vmem:[%s10490_s0 + $0x6a] sm:$0xff] }
 0x408   :  { %10561 = vst [vmem:[#allocation17_spill] sm:$0xff] %v9099_v26  ;;  %6871 = vmatmul.msk.bf16.gmra.mxu0 %vm235_vm1, %v3420_v56 }
 0x409   :  { %v9103_v29 = vadd.f32 %v3246_v40, %v2907_v27  ;;  %v3421_v40 = vpack.c.bf16 %v6810_v18, %v6809_v44  ;;  %v6811_v44 = vld [vmem:[%s10490_s0 + $0x7a] sm:$0xff]  ;;  %v6812_v18 = vld [vmem:[%s10490_s0 + $0x82] sm:$0xff] }
 0x40c   :  { %v9109_v7 = vpop.f32.mrf.mxu1  ;;  %v2821_v1 = vpop.f32.mrf.mxu2 }
 0x40d   :  { %v1967_v59 = vpop.f32.mrf.mxu0  ;;  %v3251_v32 = vpop.f32.mrf.mxu3 }
 0x40e   :  { %v9112_v39 = vadd.f32 %v1967_v59, %v10562_v43 }
 0x410   :  { %10563 = vst [vmem:[#allocation18_spill] sm:$0xff] %v9112_v39  ;;  %v10565_v39 = vld [vmem:[#allocation22_spill] sm:$0xff] }
 0x414   :  { %v2390_v56 = vpop.f32.mrf.mxu1 }
 0x415   :  { %v1970_v34 = vpop.f32.mrf.mxu0  ;;  %v2478_v3 = vadd.f32 %v2390_v56, %v2048_v5  ;;  %v10567_v56 = vld [vmem:[#allocation23_spill] sm:$0xff] }
 0x416   :  { %v9121_v2 = vadd.f32 %v1970_v34, %v10564_v15  ;;  %v3422_v34 = vpack.c.bf16 %v6812_v18, %v6811_v44  ;;  %v10569_v15 = vld [vmem:[#allocation24_spill] sm:$0xff]  ;;  %v10571_v44 = vld [vmem:[#allocation25_spill] sm:$0xff] }
 0x417   :  { %v2909_v27 = vadd.f32 %v2821_v1, %v2478_v3 }
 0x418   :  { %6872 = vmatmul.msk.bf16.gmra.mxu0 %vm235_vm1, %v3421_v40 }
 0x419   :  { %v9124_v59 = vadd.f32 %v3251_v32, %v2909_v27  ;;  %v6814_v32 = vld [vmem:[%s10490_s0 + $0x9a] sm:$0xff] }
 0x41d   :  { %v1972_v43 = vpop.f32.mrf.mxu0 }
 0x41e   :  { %v9127_v26 = vadd.f32 %v1972_v43, %v10565_v39  ;;  %v6813_v39 = vld [vmem:[%s10490_s0 + $0x92] sm:$0xff] }
 0x41f   :  { %v3423_v27 = vpack.c.bf16 %v6814_v32, %v6813_v39  ;;  %v10575_v32 = vld [vmem:[#allocation27_spill] sm:$0xff] }
 0x420   :  { %10566 = vst [vmem:[#allocation19_spill] sm:$0xff] %v9127_v26 }
 0x425   :  { %v1975_v5 = vpop.f32.mrf.mxu0 }
 0x426   :  { %v9136_v1 = vadd.f32 %v1975_v5, %v10567_v56  ;;  %v10573_v5 = vld [vmem:[#allocation26_spill] sm:$0xff] }
 0x428   :  { %10568 = vst [vmem:[#allocation20_spill] sm:$0xff] %v9136_v1  ;;  %6873 = vmatmul.msk.bf16.gmra.mxu0 %vm235_vm1, %v3422_v34 }
 0x42d   :  { %v1977_v40 = vpop.f32.mrf.mxu0 }
 0x42e   :  { %v9140_v3 = vadd.f32 %v1977_v40, %v10569_v15  ;;  %v6815_v40 = vld [vmem:[%s10490_s0 + $0xaa] sm:$0xff]  ;;  %v6816_v15 = vld [vmem:[%s10490_s0 + $0xb2] sm:$0xff] }
 0x430   :  { %10570 = vst [vmem:[#allocation21_spill] sm:$0xff] %v9140_v3  ;;  %v3424_v3 = vpack.c.bf16 %v6816_v15, %v6815_v40 }
 0x435   :  { %v1980_v43 = vpop.f32.mrf.mxu0 }
 0x436   :  { %v9149_v18 = vadd.f32 %v1980_v43, %v10571_v44  ;;  %v6817_v44 = vld [vmem:[%s10490_s0 + $0xc2] sm:$0xff] }
 0x438   :  { %10572 = vst [vmem:[#allocation22_spill] sm:$0xff] %v9149_v18  ;;  %6874 = vmatmul.msk.bf16.gmra.mxu0 %vm235_vm1, %v3423_v27 }
 0x43d   :  { %v1982_v34 = vpop.f32.mrf.mxu0 }
 0x43e   :  { %v9153_v56 = vadd.f32 %v1982_v34, %v10573_v5  ;;  %v6818_v34 = vld [vmem:[%s10490_s0 + $0xca] sm:$0xff] }
 0x43f   :  { %v3425_v5 = vpack.c.bf16 %v6818_v34, %v6817_v44 }
 0x440   :  { %10574 = vst [vmem:[#allocation23_spill] sm:$0xff] %v9153_v56 }
 0x445   :  { %v1985_v39 = vpop.f32.mrf.mxu0 }
 0x446   :  { %v9162_v1 = vadd.f32 %v1985_v39, %v10575_v32  ;;  %v6820_v32 = vld [vmem:[%s10490_s0 + $0xe2] sm:$0xff] }
 0x448   :  { %10576 = vst [vmem:[#allocation24_spill] sm:$0xff] %v9162_v1  ;;  %6875 = vmatmul.msk.bf16.gmra.mxu0 %vm235_vm1, %v3424_v3 }
 0x44d   :  { %v1987_v27 = vpop.f32.mrf.mxu0 }
 0x44e   :  { %v9166_v43 = vadd.f32 %v1987_v27, %v8342_v52  ;;  %v6819_v52 = vld [vmem:[%s10490_s0 + $0xda] sm:$0xff] }
 0x44f   :  { %v3426_v27 = vpack.c.bf16 %v6820_v32, %v6819_v52 }
 0x450   :  { %10577 = vst [vmem:[#allocation25_spill] sm:$0xff] %v9166_v43 }
 0x455   :  { %v1990_v40 = vpop.f32.mrf.mxu0 }
 0x456   :  { %v9175_v15 = vadd.f32 %v1990_v40, %v8353_v35  ;;  %v6822_v40 = vld [vmem:[%s10490_s0 + $0xfa] sm:$0xff] }
 0x458   :  { %10578 = vst [vmem:[#allocation26_spill] sm:$0xff] %v9175_v15  ;;  %6876 = vmatmul.msk.bf16.gmra.mxu0 %vm235_vm1, %v3425_v5 }
 0x45d   :  { %v1992_v3 = vpop.f32.mrf.mxu0 }
 0x45e   :  { %v9179_v39 = vadd.f32 %v1992_v3, %v8370_v63  ;;  %v6821_v63 = vld [vmem:[%s10490_s0 + $0xf2] sm:$0xff]  ;;  %v9203_v3 = vld [vmem:[%s10492_s2] ss:$0 sm:$0xff] }
 0x460   :  { %10579 = vst [vmem:[#allocation27_spill] sm:$0xff] %v9179_v39 }
 0x465   :  { %v1995_v44 = vpop.f32.mrf.mxu0 }
 0x466   :  { %v9188_v34 = vadd.f32 %v1995_v44, %v8382_v28  ;;  %v3427_v28 = vpack.c.bf16 %v6822_v40, %v6821_v63  ;;  %v6824_v40 = vld [vmem:[%s10490_s0 + $0x112] sm:$0xff] }
 0x468   :  { %10580 = vst [vmem:[#allocation38_spill] sm:$0xff] %v9188_v34  ;;  %6877 = vmatmul.msk.bf16.gmra.mxu0 %vm235_vm1, %v3426_v27 }
 0x46d   :  { %v1997_v35 = vpop.f32.mrf.mxu0 }
 0x46e   :  { %v9192_v5 = vadd.f32 %v1997_v35, %v8400_v22 }
 0x470   :  { %10581 = vst [vmem:[#allocation39_spill] sm:$0xff] %v9192_v5  ;;  %v7232_v5 = vmov 0.0  }
 0x471   :  { %4160 = vst.msk [vmem:[#allocation3 + $0x10] sm:$0xff] %vm3917_vm3, %v7232_v5 }
 0x472   :  { %4161 = vst.msk [vmem:[#allocation3 + $0x18] sm:$0x3] %vm4158_vm4, %v7232_v5 }
 0x473   :  { %4157 = vst.msk [vmem:[#allocation3] sm:$0xff] %vm3917_vm3, %v7232_v5 }
 0x474   :  { %4159 = vst.msk [vmem:[#allocation3 + $0x8] sm:$0x3] %vm4158_vm4, %v7232_v5 }
 0x475   :  { %v3561_v52 = vpop.f32.mrf.mxu0  ;;  %4162 = vst.msk [vmem:[#allocation3 + $0x20] sm:$0xff] %vm3917_vm3, %v7232_v5 }
 0x476   :  { %v3721_v32 = vadd.f32 %v3561_v52, %v8411_v10  ;;  %v6823_v10 = vld [vmem:[%s10490_s0 + $0x10a] sm:$0xff]  ;;  %4163 = vst.msk [vmem:[#allocation3 + $0x28] sm:$0x3] %vm4158_vm4, %v7232_v5 }
 0x477   :  { %4164 = vst.msk [vmem:[#allocation3 + $0x30] sm:$0xff] %vm3917_vm3, %v7232_v5 }
 0x478   :  { %v3789_v22 = vadd.f32 %v9203_v3, %v3721_v32  ;;  %6878 = vmatmul.msk.bf16.gmra.mxu0 %vm235_vm1, %v3427_v28  ;;  %v3428_v28 = vpack.c.bf16 %v6824_v40, %v6823_v10  ;;  %4165 = vst.msk [vmem:[#allocation3 + $0x38] sm:$0x3] %vm4158_vm4, %v7232_v5 }
 0x479   :  { %4166 = vst.msk [vmem:[#allocation3 + $0x40] sm:$0xff] %vm3917_vm3, %v7232_v5 }
 0x47a   :  { %v3853_v27 = vmax.f32 %v3789_v22, 0.0  ;;  %4167 = vst.msk [vmem:[#allocation3 + $0x48] sm:$0x3] %vm4158_vm4, %v7232_v5  ;;  %v4215_v34 = vld [vmem:[#allocation3] sm:$0xff] }
 0x47b   :  { %4168 = vst.msk [vmem:[#allocation3 + $0x50] sm:$0xff] %vm3917_vm3, %v7232_v5 }
 0x47c   :  { %3918 = vst.msk [vmem:[#allocation2] sm:$0xff] %vm3917_vm3, %v3853_v27 }
 0x47d   :  { %v3563_v44 = vpop.f32.mrf.mxu0  ;;  %4169 = vst.msk [vmem:[#allocation3 + $0x58] sm:$0x3] %vm4158_vm4, %v7232_v5 }
 0x47e   :  { %v3722_v35 = vadd.f32 %v3563_v44, %v8428_v23  ;;  %4170 = vst.msk [vmem:[#allocation3 + $0x60] sm:$0xff] %vm3917_vm3, %v7232_v5 }
 0x47f   :  { %4171 = vst.msk [vmem:[#allocation3 + $0x68] sm:$0x3] %vm4158_vm4, %v7232_v5 }
 0x480   :  { %v3790_v63 = vadd.f32 %v9203_v3, %v3722_v35  ;;  %4172 = vst.msk [vmem:[#allocation3 + $0x70] sm:$0xff] %vm3917_vm3, %v7232_v5 }
 0x481   :  { %4173 = vst.msk [vmem:[#allocation3 + $0x78] sm:$0x3] %vm4158_vm4, %v7232_v5 }
 0x482   :  { %v3854_v23 = vmax.f32 %v3790_v63, 0.0  ;;  %4174 = vst.msk [vmem:[#allocation3 + $0x80] sm:$0xff] %vm3917_vm3, %v7232_v5  ;;  %v6825_v63 = vld [vmem:[%s10490_s0 + $0x122] sm:$0xff] }
 0x483   :  { %4175 = vst.msk [vmem:[#allocation3 + $0x88] sm:$0x3] %vm4158_vm4, %v7232_v5 }
 0x484   :  { %3919 = vst.msk [vmem:[#allocation2 + $0x8] sm:$0xff] %vm3917_vm3, %v3854_v23 }
 0x485   :  { %v3566_v52 = vpop.f32.mrf.mxu0  ;;  %4176 = vst.msk [vmem:[#allocation3 + $0x90] sm:$0xff] %vm3917_vm3, %v7232_v5 }
 0x486   :  { %v3723_v32 = vadd.f32 %v3566_v52, %v8439_v19  ;;  %4177 = vst.msk [vmem:[#allocation3 + $0x98] sm:$0x3] %vm4158_vm4, %v7232_v5  ;;  %v9280_v52 = vpop.f32.mrf.mxu2 }
 0x487   :  { %4178 = vst.msk [vmem:[#allocation3 + $0xa0] sm:$0xff] %vm3917_vm3, %v7232_v5 }
 0x488   :  { %v3791_v22 = vadd.f32 %v9203_v3, %v3723_v32  ;;  %6879 = vmatmul.msk.bf16.gmra.mxu0 %vm235_vm1, %v3428_v28  ;;  %4179 = vst.msk [vmem:[#allocation3 + $0xa8] sm:$0x3] %vm4158_vm4, %v7232_v5  ;;  %v9275_v28 = vpop.f32.mrf.mxu1 }
 0x489   :  { %4180 = vst.msk [vmem:[#allocation3 + $0xb0] sm:$0xff] %vm3917_vm3, %v7232_v5 }
 0x48a   :  { %v3855_v27 = vmax.f32 %v3791_v22, 0.0  ;;  %4181 = vst.msk [vmem:[#allocation3 + $0xb8] sm:$0x3] %vm4158_vm4, %v7232_v5 }
 0x48b   :  { %v3982_v32 = vld [vmem:[#allocation2] ss:$2 sm:$0xff]  ;;  %v4014_v22 = vld [vmem:[#allocation2 + $0x1] ss:$2 sm:$0xff]  ;;  %4182 = vst.msk [vmem:[#allocation3 + $0xc0] sm:$0xff] %vm3917_vm3, %v7232_v5 }
 0x48c   :  { %3920 = vst.msk [vmem:[#allocation2 + $0x10] sm:$0xff] %vm3917_vm3, %v3855_v27  ;;  %v9286_v27 = vpop.f32.mrf.mxu3 }
 0x48d   :  { %v3568_v19 = vpop.f32.mrf.mxu0  ;;  %4183 = vst.msk [vmem:[#allocation3 + $0xc8] sm:$0x3] %vm4158_vm4, %v7232_v5 }
 0x48e   :  { %v3724_v44 = vadd.f32 %v3568_v19, %v8456_v13  ;;  %v6826_v13 = vld [vmem:[%s10490_s0 + $0x12a] sm:$0xff]  ;;  %4184 = vst.msk [vmem:[#allocation3 + $0xd0] sm:$0xff] %vm3917_vm3, %v7232_v5 }
 0x48f   :  { %v3429_v40 = vpack.c.bf16 %v6826_v13, %v6825_v63  ;;  %4185 = vst.msk [vmem:[#allocation3 + $0xd8] sm:$0x3] %vm4158_vm4, %v7232_v5 }
 0x490   :  { %v3792_v35 = vadd.f32 %v9203_v3, %v3724_v44  ;;  %4186 = vst.msk [vmem:[#allocation3 + $0xe0] sm:$0xff] %vm3917_vm3, %v7232_v5 }
 0x491   :  { %4187 = vst.msk [vmem:[#allocation3 + $0xe8] sm:$0x3] %vm4158_vm4, %v7232_v5 }
 0x492   :  { %v3856_v10 = vmax.f32 %v3792_v35, 0.0  ;;  %v4109_v35 = vmax.f32 %v3982_v32, %v4014_v22  ;;  %4188 = vst.msk [vmem:[#allocation3 + $0xf0] sm:$0xff] %vm3917_vm3, %v7232_v5  ;;  %v6827_v22 = vld [vmem:[%s10490_s0 + $0x13a] sm:$0xff] }
 0x493   :  { %4189 = vst.msk [vmem:[#allocation3 + $0xf8] sm:$0x3] %vm4158_vm4, %v7232_v5 }
 0x494   :  { %3921 = vst.msk [vmem:[#allocation2 + $0x18] sm:$0xff] %vm3917_vm3, %v3856_v10 }
 0x495   :  { %v3571_v23 = vpop.f32.mrf.mxu0  ;;  %4190 = vst.msk [vmem:[#allocation3 + $0x100] sm:$0xff] %vm3917_vm3, %v7232_v5 }
 0x496   :  { %4191 = vst.msk [vmem:[#allocation3 + $0x108] sm:$0x3] %vm4158_vm4, %v7232_v5 }
 0x497   :  { %4192 = vst.msk [vmem:[#allocation3 + $0x110] sm:$0xff] %vm3917_vm3, %v7232_v5 }
 0x498   :  { %6880 = vmatmul.msk.bf16.gmra.mxu0 %vm235_vm1, %v3429_v40  ;;  %v3725_v40 = vadd.f32 %v3571_v23, %v8467_v37  ;;  %v9313_v37 = vpop.f32.mrf.mxu2  ;;  %4193 = vst.msk [vmem:[#allocation3 + $0x118] sm:$0x3] %vm4158_vm4, %v7232_v5 }
 0x499   :  { %4194 = vst.msk [vmem:[#allocation3 + $0x120] sm:$0xff] %vm3917_vm3, %v7232_v5 }
 0x49a   :  { %4195 = vst.msk [vmem:[#allocation3 + $0x128] sm:$0x3] %vm4158_vm4, %v7232_v5 }
 0x49b   :  { %v4046_v19 = vld [vmem:[#allocation2 + $0x10] ss:$2 sm:$0xff]  ;;  %v4078_v44 = vld [vmem:[#allocation2 + $0x11] ss:$2 sm:$0xff]  ;;  %4196 = vst.msk [vmem:[#allocation3 + $0x130] sm:$0xff] %vm3917_vm3, %v7232_v5 }
 0x49c   :  { %v4125_v63 = vmax.f32 %v4046_v19, %v4078_v44  ;;  %v6828_v19 = vld [vmem:[%s10490_s0 + $0x142] sm:$0xff]  ;;  %v9309_v44 = vpop.f32.mrf.mxu1  ;;  %4197 = vst.msk [vmem:[#allocation3 + $0x138] sm:$0x3] %vm4158_vm4, %v7232_v5 }
 0x49d   :  { %v3573_v13 = vpop.f32.mrf.mxu0 }
 0x49e   :  { %v4141_v10 = vmax.f32 %v4109_v35, %v4125_v63  ;;  %v3726_v32 = vadd.f32 %v3573_v13, %v8484_v12  ;;  %v3793_v12 = vadd.f32 %v9203_v3, %v3725_v40  ;;  %v3430_v35 = vpack.c.bf16 %v6828_v19, %v6827_v22  ;;  %v9321_v63 = vpop.f32.mrf.mxu3  ;;  %v4419_v40 = vld [vmem:[#allocation3 + $0x2] sm:$0xff] }
 0x4a0   :  { %4199 = vst.msk [vmem:[#allocation3 + $0x11] sm:$0xff] %vm3917_vm3, %v4141_v10  ;;  %v3794_v23 = vadd.f32 %v9203_v3, %v3726_v32  ;;  %v4240_v10 = vld [vmem:[#allocation3 + $0x1] sm:$0xff]  ;;  %v3857_v15 = vmax.f32 %v3793_v12, 0.0 }
 0x4a2   :  { %v3858_v43 = vmax.f32 %v3794_v23, 0.0  ;;  %3922 = vst.msk [vmem:[#allocation2 + $0x20] sm:$0xff] %vm3917_vm3, %v3857_v15  ;;  %v6830_v15 = vld [vmem:[%s10490_s0 + $0x15a] sm:$0xff] }
 0x4a4   :  { %3923 = vst.msk [vmem:[#allocation2 + $0x28] sm:$0xff] %vm3917_vm3, %v3858_v43 }
 0x4a5   :  { %v3576_v13 = vpop.f32.mrf.mxu0 }
 0x4a6   :  { %v3727_v39 = vadd.f32 %v3576_v13, %v8495_v33 }
 0x4a7   :  { %v4241_v32 = vld [vmem:[#allocation3 + $0x11] sm:$0xff] }
 0x4a8   :  { %v4216_v22 = vld [vmem:[#allocation3 + $0x10] sm:$0xff]  ;;  %v3795_v1 = vadd.f32 %v9203_v3, %v3727_v39  ;;  %6881 = vmatmul.msk.bf16.gmra.mxu0 %vm235_vm1, %v3430_v35  ;;  %v4256_v56 = vpack.c.bf16 %v4241_v32, %v4240_v10  ;;  %v9342_v39 = vpop.f32.mrf.mxu1 }
 0x4a9   :  { %v4420_v19 = vld [vmem:[#allocation3 + $0x12] sm:$0xff]  ;;  %v4231_v18 = vpack.c.bf16 %v4216_v22, %v4215_v34  ;;  %v9345_v34 = vpop.f32.mrf.mxu2 }
 0x4aa   :  { %v4435_v33 = vpack.c.bf16 %v4420_v19, %v4419_v40  ;;  %v3859_v12 = vmax.f32 %v3795_v1, 0.0  ;;  %6903 = vmatmul.msk.bf16.vlgmr.msrb.gmra.mxu1 %vm3917_vm3, %v4256_v56  ;;  %v9349_v1 = vpop.f32.mrf.mxu3 }
 0x4ab   :  { %6911 = vmatmul.msk.bf16.vlgmr.msra.gmra.mxu2 %vm3917_vm3, %v4231_v18  ;;  %v6829_v18 = vld [vmem:[%s10490_s0 + $0x152] sm:$0xff]  ;;  %v3984_v19 = vld [vmem:[#allocation2 + $0x20] ss:$2 sm:$0xff] }
 0x4ac   :  { %6920 = vmatmul.msk.bf16.vlgmr.msra.gmra.mxu3 %vm3917_vm3, %v4435_v33  ;;  %3924 = vst.msk [vmem:[#allocation2 + $0x30] sm:$0xff] %vm3917_vm3, %v3859_v12  ;;  %v3431_v35 = vpack.c.bf16 %v6830_v15, %v6829_v18  ;;  %v4016_v33 = vld [vmem:[#allocation2 + $0x21] ss:$2 sm:$0xff] }
 0x4ad   :  { %v3578_v23 = vpop.f32.mrf.mxu0 }
 0x4ae   :  { %v3728_v5 = vadd.f32 %v3578_v23, %v8512_v0 }
 0x4b0   :  { %v3796_v56 = vadd.f32 %v9203_v3, %v3728_v5  ;;  %v9359_v10 = vpop.f32.mrf.mxu1 }
 0x4b1   :  { %10582 = vst [vmem:[#allocation40_spill] sm:$0xff] %v9359_v10  ;;  %v9362_v40 = vpop.f32.mrf.mxu2 }
 0x4b2   :  { %v3860_v43 = vmax.f32 %v3796_v56, 0.0  ;;  %10583 = vst [vmem:[#allocation41_spill] sm:$0xff] %v9362_v40  ;;  %v9366_v22 = vpop.f32.mrf.mxu3  ;;  %v4110_v56 = vmax.f32 %v3984_v19, %v4016_v33  ;;  %v6832_v19 = vld [vmem:[%s10490_s0 + $0x172] sm:$0xff] }
 0x4b3   :  { %10584 = vst [vmem:[#allocation42_spill] sm:$0xff] %v9366_v22 }
 0x4b4   :  { %3925 = vst.msk [vmem:[#allocation2 + $0x38] sm:$0xff] %vm3917_vm3, %v3860_v43 }
 0x4b5   :  { %v3581_v13 = vpop.f32.mrf.mxu0 }
 0x4b6   :  { %v3729_v0 = vadd.f32 %v3581_v13, %v8523_v9  ;;  %v10585_v9 = vld [vmem:[#allocation28_spill] sm:$0xff] }
 0x4b8   :  { %v3797_v32 = vadd.f32 %v9203_v3, %v3729_v0  ;;  %6882 = vmatmul.msk.bf16.gmra.mxu0 %vm235_vm1, %v3431_v35  ;;  %v9370_v26 = vpop.f32.mrf.mxu1 }
 0x4b9   :  { %10586 = vst [vmem:[#allocation28_spill] sm:$0xff] %v9370_v26  ;;  %v9374_v0 = vpop.f32.mrf.mxu2 }
 0x4ba   :  { %v3861_v12 = vmax.f32 %v3797_v32, 0.0  ;;  %10587 = vst [vmem:[#allocation43_spill] sm:$0xff] %v9374_v0  ;;  %v6831_v32 = vld [vmem:[%s10490_s0 + $0x16a] sm:$0xff] }
 0x4bb   :  { %v4048_v23 = vld [vmem:[#allocation2 + $0x30] ss:$2 sm:$0xff]  ;;  %v4080_v5 = vld [vmem:[#allocation2 + $0x31] ss:$2 sm:$0xff] }
 0x4bc   :  { %v4126_v18 = vmax.f32 %v4048_v23, %v4080_v5  ;;  %3926 = vst.msk [vmem:[#allocation2 + $0x40] sm:$0xff] %vm3917_vm3, %v3861_v12  ;;  %v9382_v12 = vpop.f32.mrf.mxu3  ;;  %v3432_v23 = vpack.c.bf16 %v6832_v19, %v6831_v32  ;;  %v10593_v0 = vld [vmem:[#allocation30_spill] sm:$0xff]  ;;  %v6833_v19 = vld [vmem:[%s10490_s0 + $0x182] sm:$0xff] }
 0x4bd   :  { %v3583_v15 = vpop.f32.mrf.mxu0  ;;  %10588 = vst [vmem:[#allocation44_spill] sm:$0xff] %v9382_v12 }
 0x4be   :  { %v4142_v43 = vmax.f32 %v4110_v56, %v4126_v18  ;;  %v3730_v13 = vadd.f32 %v3583_v15, %v10585_v9  ;;  %v10589_v56 = vld [vmem:[#allocation29_spill] sm:$0xff] }
 0x4c0   :  { %4200 = vst.msk [vmem:[#allocation3 + $0x21] sm:$0xff] %vm3917_vm3, %v4142_v43  ;;  %v3798_v35 = vadd.f32 %v9203_v3, %v3730_v13  ;;  %v9388_v43 = vpop.f32.mrf.mxu1 }
 0x4c1   :  { %10590 = vst [vmem:[#allocation29_spill] sm:$0xff] %v9388_v43  ;;  %v9390_v13 = vpop.f32.mrf.mxu2 }
 0x4c2   :  { %v3862_v33 = vmax.f32 %v3798_v35, 0.0  ;;  %10591 = vst [vmem:[#allocation45_spill] sm:$0xff] %v9390_v13 }
 0x4c4   :  { %3927 = vst.msk [vmem:[#allocation2 + $0x48] sm:$0xff] %vm3917_vm3, %v3862_v33  ;;  %v9393_v35 = vpop.f32.mrf.mxu3 }
 0x4c5   :  { %v3586_v5 = vpop.f32.mrf.mxu0  ;;  %10592 = vst [vmem:[#allocation46_spill] sm:$0xff] %v9393_v35 }
 0x4c6   :  { %v3731_v18 = vadd.f32 %v3586_v5, %v10589_v56 }
 0x4c8   :  { %v3799_v15 = vadd.f32 %v9203_v3, %v3731_v18  ;;  %6883 = vmatmul.msk.bf16.gmra.mxu0 %vm235_vm1, %v3432_v23  ;;  %v6834_v23 = vld [vmem:[%s10490_s0 + $0x18a] sm:$0xff]  ;;  %v9403_v56 = vpop.f32.mrf.mxu1 }
 0x4c9   :  { %10594 = vst [vmem:[#allocation30_spill] sm:$0xff] %v9403_v56  ;;  %v3433_v18 = vpack.c.bf16 %v6834_v23, %v6833_v19 }
 0x4ca   :  { %v3863_v9 = vmax.f32 %v3799_v15, 0.0  ;;  %v9406_v15 = vpop.f32.mrf.mxu2 }
 0x4cb   :  { %10595 = vst [vmem:[#allocation47_spill] sm:$0xff] %v9406_v15  ;;  %v3986_v35 = vld [vmem:[#allocation2 + $0x40] ss:$2 sm:$0xff]  ;;  %v4018_v13 = vld [vmem:[#allocation2 + $0x41] ss:$2 sm:$0xff] }
 0x4cc   :  { %3928 = vst.msk [vmem:[#allocation2 + $0x50] sm:$0xff] %vm3917_vm3, %v3863_v9  ;;  %v4111_v56 = vmax.f32 %v3986_v35, %v4018_v13  ;;  %v4242_v35 = vld [vmem:[#allocation3 + $0x21] sm:$0xff] }
 0x4cd   :  { %v3588_v12 = vpop.f32.mrf.mxu0 }
 0x4ce   :  { %v3732_v33 = vadd.f32 %v3588_v12, %v10593_v0  ;;  %v9409_v12 = vpop.f32.mrf.mxu3 }
 0x4cf   :  { %10596 = vst [vmem:[#allocation48_spill] sm:$0xff] %v9409_v12 }
 0x4d0   :  { %v3800_v32 = vadd.f32 %v9203_v3, %v3732_v33  ;;  %v9414_v23 = vpop.f32.mrf.mxu1 }
 0x4d1   :  { %10597 = vst [vmem:[#allocation49_spill] sm:$0xff] %v9414_v23 }
 0x4d2   :  { %v3864_v5 = vmax.f32 %v3800_v32, 0.0 }
 0x4d4   :  { %3929 = vst.msk [vmem:[#allocation2 + $0x58] sm:$0xff] %vm3917_vm3, %v3864_v5 }
 0x4d5   :  { %v3591_v9 = vpop.f32.mrf.mxu0 }
 0x4d6   :  { %v3733_v0 = vadd.f32 %v3591_v9, %v8585_v49  ;;  %v9417_v9 = vpop.f32.mrf.mxu2 }
 0x4d7   :  { %10598 = vst [vmem:[#allocation50_spill] sm:$0xff] %v9417_v9 }
 0x4d8   :  { %v3801_v33 = vadd.f32 %v9203_v3, %v3733_v0  ;;  %6884 = vmatmul.msk.bf16.gmra.mxu0 %vm235_vm1, %v3433_v18  ;;  %v9421_v0 = vpop.f32.mrf.mxu3  ;;  %v9437_v12 = vpop.f32.mrf.mxu1 }
 0x4d9   :  { %10599 = vst [vmem:[#allocation51_spill] sm:$0xff] %v9421_v0 }
 0x4da   :  { %v3865_v43 = vmax.f32 %v3801_v33, 0.0  ;;  %v4421_v33 = vld [vmem:[#allocation3 + $0x22] sm:$0xff]  ;;  %10603 = vst [vmem:[#allocation55_spill] sm:$0xff] %v9437_v12 }
 0x4db   :  { %v4050_v32 = vld [vmem:[#allocation2 + $0x50] ss:$2 sm:$0xff]  ;;  %v4082_v26 = vld [vmem:[#allocation2 + $0x51] ss:$2 sm:$0xff] }
 0x4dc   :  { %v4127_v22 = vmax.f32 %v4050_v32, %v4082_v26  ;;  %3930 = vst.msk [vmem:[#allocation2 + $0x60] sm:$0xff] %vm3917_vm3, %v3865_v43  ;;  %v6835_v26 = vld [vmem:[%s10490_s0 + $0x19a] sm:$0xff]  ;;  %v6836_v43 = vld [vmem:[%s10490_s0 + $0x1a2] sm:$0xff] }
 0x4dd   :  { %v3593_v19 = vpop.f32.mrf.mxu0 }
 0x4de   :  { %v4143_v5 = vmax.f32 %v4111_v56, %v4127_v22  ;;  %v3734_v49 = vadd.f32 %v3593_v19, %v8602_v11  ;;  %v3434_v11 = vpack.c.bf16 %v6836_v43, %v6835_v26  ;;  %v4217_v56 = vld [vmem:[#allocation3 + $0x20] sm:$0xff]  ;;  %v9447_v40 = vpop.f32.mrf.mxu2 }
 0x4df   :  { %v9431_v19 = vld [vmem:[#allocation3 + $0x20] sm:$0xff] }
 0x4e0   :  { %4201 = vst.msk [vmem:[#allocation3 + $0x31] sm:$0xff] %vm3917_vm3, %v4143_v5  ;;  %v3802_v18 = vadd.f32 %v9203_v3, %v3734_v49  ;;  %v9433_v5 = vld [vmem:[#allocation3 + $0x21] sm:$0xff] }
 0x4e1   :  { %10600 = vst [vmem:[#allocation52_spill] sm:$0xff] %v9431_v19  ;;  %v9435_v49 = vld [vmem:[#allocation3 + $0x22] sm:$0xff] }
 0x4e2   :  { %v3866_v13 = vmax.f32 %v3802_v18, 0.0  ;;  %10601 = vst [vmem:[#allocation53_spill] sm:$0xff] %v9433_v5 }
 0x4e3   :  { %10602 = vst [vmem:[#allocation54_spill] sm:$0xff] %v9435_v49 }
 0x4e4   :  { %3931 = vst.msk [vmem:[#allocation2 + $0x68] sm:$0xff] %vm3917_vm3, %v3866_v13 }
 0x4e5   :  { %v3596_v22 = vpop.f32.mrf.mxu0 }
 0x4e6   :  { %v3735_v32 = vadd.f32 %v3596_v22, %v8613_v38 }
 0x4e7   :  { %v4243_v0 = vld [vmem:[#allocation3 + $0x31] sm:$0xff] }
 0x4e8   :  { %v4218_v9 = vld [vmem:[#allocation3 + $0x30] sm:$0xff]  ;;  %v3803_v18 = vadd.f32 %v9203_v3, %v3735_v32  ;;  %6885 = vmatmul.msk.bf16.gmra.mxu0 %vm235_vm1, %v3434_v11  ;;  %v4257_v26 = vpack.c.bf16 %v4243_v0, %v4242_v35 }
 0x4e9   :  { %v4422_v23 = vld [vmem:[#allocation3 + $0x32] sm:$0xff]  ;;  %v4232_v43 = vpack.c.bf16 %v4218_v9, %v4217_v56  ;;  %v6838_v32 = vld [vmem:[%s10490_s0 + $0x1ea] sm:$0xff] }
 0x4ea   :  { %v4436_v13 = vpack.c.bf16 %v4422_v23, %v4421_v33  ;;  %v9441_v15 = vld [vmem:[#allocation3 + $0x30] sm:$0xff]  ;;  %v3867_v0 = vmax.f32 %v3803_v18, 0.0  ;;  %6904 = vmatmul.msk.bf16.gmra.mxu1 %vm3917_vm3, %v4257_v26  ;;  %v9457_v23 = vpop.f32.mrf.mxu3  ;;  %v6837_v33 = vld [vmem:[%s10490_s0 + $0x1e2] sm:$0xff]  ;;  %v9469_v18 = vpop.f32.mrf.mxu1 }
 0x4eb   :  { %10604 = vst [vmem:[#allocation56_spill] sm:$0xff] %v9441_v15  ;;  %v9443_v38 = vld [vmem:[#allocation3 + $0x31] sm:$0xff]  ;;  %6912 = vmatmul.msk.bf16.gmra.mxu2 %vm3917_vm3, %v4232_v43  ;;  %v9471_v43 = vpop.f32.mrf.mxu2  ;;  %v3988_v11 = vld [vmem:[#allocation2 + $0x60] ss:$2 sm:$0xff]  ;;  %v4020_v12 = vld [vmem:[#allocation2 + $0x61] ss:$2 sm:$0xff] }
 0x4ec   :  { %10605 = vst [vmem:[#allocation57_spill] sm:$0xff] %v9443_v38  ;;  %v9445_v22 = vld [vmem:[#allocation3 + $0x32] sm:$0xff]  ;;  %6921 = vmatmul.msk.bf16.gmra.mxu3 %vm3917_vm3, %v4436_v13  ;;  %v3435_v13 = vpack.c.bf16 %v6838_v32, %v6837_v33  ;;  %v4112_v5 = vmax.f32 %v3988_v11, %v4020_v12 }
 0x4ed   :  { %10606 = vst [vmem:[#allocation58_spill] sm:$0xff] %v9445_v22  ;;  %v3598_v9 = vpop.f32.mrf.mxu0 }
 0x4ee   :  { %3932 = vst.msk [vmem:[#allocation2 + $0x70] sm:$0xff] %vm3917_vm3, %v3867_v0  ;;  %v3736_v35 = vadd.f32 %v3598_v9, %v8630_v46 }
 0x4f0   :  { %v3804_v56 = vadd.f32 %v9203_v3, %v3736_v35 }
 0x4f2   :  { %v3868_v26 = vmax.f32 %v3804_v56, 0.0  ;;  %v9474_v0 = vpop.f32.mrf.mxu3  ;;  %v9479_v56 = vpop.f32.mrf.mxu1 }
 0x4f3   :  { %v9482_v33 = vpop.f32.mrf.mxu2 }
 0x4f4   :  { %3933 = vst.msk [vmem:[#allocation2 + $0x78] sm:$0xff] %vm3917_vm3, %v3868_v26 }
 0x4f5   :  { %v3601_v46 = vpop.f32.mrf.mxu0 }
 0x4f6   :  { %v3737_v9 = vadd.f32 %v3601_v46, %v8641_v61 }
 0x4f8   :  { %v3805_v35 = vadd.f32 %v9203_v3, %v3737_v9  ;;  %6886 = vmatmul.msk.bf16.gmra.mxu0 %vm235_vm1, %v3435_v13  ;;  %v6839_v9 = vld [vmem:[%s10490_s0 + $0x1fa] sm:$0xff] }
 0x4fa   :  { %v3869_v10 = vmax.f32 %v3805_v35, 0.0  ;;  %v9485_v46 = vpop.f32.mrf.mxu3 }
 0x4fb   :  { %v4052_v49 = vld [vmem:[#allocation2 + $0x70] ss:$2 sm:$0xff]  ;;  %v4084_v22 = vld [vmem:[#allocation2 + $0x71] ss:$2 sm:$0xff] }
 0x4fc   :  { %v4128_v38 = vmax.f32 %v4052_v49, %v4084_v22  ;;  %3934 = vst.msk [vmem:[#allocation2 + $0x80] sm:$0xff] %vm3917_vm3, %v3869_v10  ;;  %v6840_v10 = vld [vmem:[%s10490_s0 + $0x202] sm:$0xff]  ;;  %v9499_v22 = vpop.f32.mrf.mxu2 }
 0x4fd   :  { %v3603_v32 = vpop.f32.mrf.mxu0 }
 0x4fe   :  { %v4144_v26 = vmax.f32 %v4112_v5, %v4128_v38  ;;  %v3738_v61 = vadd.f32 %v3603_v32, %v8658_v14  ;;  %v3436_v5 = vpack.c.bf16 %v6840_v10, %v6839_v9  ;;  %v9496_v14 = vpop.f32.mrf.mxu1 }
 0x500   :  { %4202 = vst.msk [vmem:[#allocation3 + $0x41] sm:$0xff] %vm3917_vm3, %v4144_v26  ;;  %v3806_v13 = vadd.f32 %v9203_v3, %v3738_v61 }
 0x502   :  { %v3870_v12 = vmax.f32 %v3806_v13, 0.0  ;;  %v9503_v35 = vpop.f32.mrf.mxu3 }
 0x503   :  { %10607 = vst [vmem:[#allocation59_spill] sm:$0xff] %v9503_v35 }
 0x504   :  { %3935 = vst.msk [vmem:[#allocation2 + $0x88] sm:$0xff] %vm3917_vm3, %v3870_v12  ;;  %v9510_v10 = vpop.f32.mrf.mxu2  ;;  %v6842_v12 = vld [vmem:[%s10490_s0 + $0x21a] sm:$0xff] }
 0x505   :  { %v3606_v49 = vpop.f32.mrf.mxu0  ;;  %10609 = vst [vmem:[#allocation61_spill] sm:$0xff] %v9510_v10 }
 0x506   :  { %v3739_v38 = vadd.f32 %v3606_v49, %v8669_v24  ;;  %v9507_v13 = vpop.f32.mrf.mxu1  ;;  %v6841_v24 = vld [vmem:[%s10490_s0 + $0x212] sm:$0xff] }
 0x507   :  { %10608 = vst [vmem:[#allocation60_spill] sm:$0xff] %v9507_v13 }
 0x508   :  { %v3807_v11 = vadd.f32 %v9203_v3, %v3739_v38  ;;  %6887 = vmatmul.msk.bf16.gmra.mxu0 %vm235_vm1, %v3436_v5 }
 0x50a   :  { %v3871_v32 = vmax.f32 %v3807_v11, 0.0  ;;  %v9518_v49 = vpop.f32.mrf.mxu3 }
 0x50b   :  { %10610 = vst [vmem:[#allocation62_spill] sm:$0xff] %v9518_v49 }
 0x50c   :  { %3936 = vst.msk [vmem:[#allocation2 + $0x90] sm:$0xff] %vm3917_vm3, %v3871_v32  ;;  %v9526_v10 = vpop.f32.mrf.mxu2 }
 0x50d   :  { %v3608_v26 = vpop.f32.mrf.mxu0 }
 0x50e   :  { %v3740_v61 = vadd.f32 %v3608_v26, %v8686_v54  ;;  %v3437_v54 = vpack.c.bf16 %v6842_v12, %v6841_v24  ;;  %v3990_v26 = vld [vmem:[#allocation2 + $0x80] ss:$2 sm:$0xff]  ;;  %v9524_v19 = vpop.f32.mrf.mxu1 }
 0x510   :  { %v3808_v9 = vadd.f32 %v9203_v3, %v3740_v61  ;;  %v4022_v61 = vld [vmem:[#allocation2 + $0x81] ss:$2 sm:$0xff] }
 0x511   :  { %v4113_v49 = vmax.f32 %v3990_v26, %v4022_v61  ;;  %v4244_v26 = vld [vmem:[#allocation3 + $0x41] sm:$0xff] }
 0x512   :  { %v3872_v5 = vmax.f32 %v3808_v9, 0.0  ;;  %v9529_v24 = vpop.f32.mrf.mxu3  ;;  %v4219_v61 = vld [vmem:[#allocation3 + $0x40] sm:$0xff] }
 0x513   :  { %10611 = vst [vmem:[#allocation63_spill] sm:$0xff] %v9529_v24 }
 0x514   :  { %3937 = vst.msk [vmem:[#allocation2 + $0x98] sm:$0xff] %vm3917_vm3, %v3872_v5 }
 0x515   :  { %v3611_v38 = vpop.f32.mrf.mxu0 }
 0x516   :  { %v3741_v11 = vadd.f32 %v3611_v38, %v8697_v48  ;;  %v6843_v38 = vld [vmem:[%s10490_s0 + $0x22a] sm:$0xff] }
 0x518   :  { %v3809_v32 = vadd.f32 %v9203_v3, %v3741_v11  ;;  %6888 = vmatmul.msk.bf16.gmra.mxu0 %vm235_vm1, %v3437_v54 }
 0x51a   :  { %v3873_v15 = vmax.f32 %v3809_v32, 0.0 }
 0x51b   :  { %v4054_v9 = vld [vmem:[#allocation2 + $0x90] ss:$2 sm:$0xff]  ;;  %v4086_v13 = vld [vmem:[#allocation2 + $0x91] ss:$2 sm:$0xff] }
 0x51c   :  { %v4129_v35 = vmax.f32 %v4054_v9, %v4086_v13  ;;  %3938 = vst.msk [vmem:[#allocation2 + $0xa0] sm:$0xff] %vm3917_vm3, %v3873_v15  ;;  %v6844_v13 = vld [vmem:[%s10490_s0 + $0x232] sm:$0xff]  ;;  %v9540_v15 = vpop.f32.mrf.mxu1  ;;  %v4423_v9 = vld [vmem:[#allocation3 + $0x42] sm:$0xff] }
 0x51d   :  { %v3613_v48 = vpop.f32.mrf.mxu0  ;;  %10612 = vst [vmem:[#allocation64_spill] sm:$0xff] %v9540_v15 }
 0x51e   :  { %v4145_v12 = vmax.f32 %v4113_v49, %v4129_v35  ;;  %v3742_v5 = vadd.f32 %v3613_v48, %v8714_v50  ;;  %v3438_v35 = vpack.c.bf16 %v6844_v13, %v6843_v38  ;;  %v9543_v49 = vpop.f32.mrf.mxu2  ;;  %v9546_v48 = vpop.f32.mrf.mxu3 }
 0x51f   :  { %10613 = vst [vmem:[#allocation65_spill] sm:$0xff] %v9543_v49 }
 0x520   :  { %4203 = vst.msk [vmem:[#allocation3 + $0x51] sm:$0xff] %vm3917_vm3, %v4145_v12  ;;  %v3810_v54 = vadd.f32 %v9203_v3, %v3742_v5 }
 0x521   :  { %10614 = vst [vmem:[#allocation66_spill] sm:$0xff] %v9546_v48 }
 0x522   :  { %v3874_v11 = vmax.f32 %v3810_v54, 0.0 }
 0x524   :  { %3939 = vst.msk [vmem:[#allocation2 + $0xa8] sm:$0xff] %vm3917_vm3, %v3874_v11 }
 0x525   :  { %v3616_v50 = vpop.f32.mrf.mxu0 }
 0x526   :  { %v3743_v32 = vadd.f32 %v3616_v50, %v8725_v17 }
 0x527   :  { %v4245_v12 = vld [vmem:[#allocation3 + $0x51] sm:$0xff]  ;;  %v4303_v50 = vpop.f32.mrf.mxu1 }
 0x528   :  { %v9548_v5 = vld [vmem:[#allocation3 + $0x50] sm:$0xff]  ;;  %v3811_v54 = vadd.f32 %v9203_v3, %v3743_v32  ;;  %6889 = vmatmul.msk.bf16.gmra.mxu0 %vm235_vm1, %v3438_v35  ;;  %v4258_v38 = vpack.c.bf16 %v4245_v12, %v4244_v26 }
 0x529   :  { %v9550_v24 = vld [vmem:[#allocation3 + $0x52] sm:$0xff]  ;;  %v4233_v13 = vpack.c.bf16 %v9548_v5, %v4219_v61 }
 0x52a   :  { %v4437_v11 = vpack.c.bf16 %v9550_v24, %v4423_v9  ;;  %v3875_v17 = vmax.f32 %v3811_v54, 0.0  ;;  %6905 = vmatmul.msk.bf16.gmra.mxu1 %vm3917_vm3, %v4258_v38  ;;  %v6845_v9 = vld [vmem:[%s10490_s0 + $0x242] sm:$0xff]  ;;  %v6846_v54 = vld [vmem:[%s10490_s0 + $0x24a] sm:$0xff] }
 0x52b   :  { %6913 = vmatmul.msk.bf16.gmra.mxu2 %vm3917_vm3, %v4233_v13  ;;  %v3439_v13 = vpack.c.bf16 %v6846_v54, %v6845_v9  ;;  %v6847_v54 = vld [vmem:[%s10490_s0 + $0x25a] sm:$0xff] }
 0x52c   :  { %6922 = vmatmul.msk.bf16.gmra.mxu3 %vm3917_vm3, %v4437_v11  ;;  %3940 = vst.msk [vmem:[#allocation2 + $0xb0] sm:$0xff] %vm3917_vm3, %v3875_v17  ;;  %v4024_v17 = vld [vmem:[#allocation2 + $0xa1] ss:$2 sm:$0xff] }
 0x52d   :  { %v3618_v48 = vpop.f32.mrf.mxu0 }
 0x52e   :  { %v4379_v49 = vpop.f32.mrf.mxu2  ;;  %v3744_v32 = vadd.f32 %v3618_v48, %v8742_v58  ;;  %v3992_v48 = vld [vmem:[#allocation2 + $0xa0] ss:$2 sm:$0xff] }
 0x52f   :  { %v4380_v35 = vadd.f32 %v4379_v49, %v4303_v50  ;;  %v4481_v26 = vpop.f32.mrf.mxu3 }
 0x530   :  { %v3812_v61 = vadd.f32 %v9203_v3, %v3744_v32 }
 0x531   :  { %v9562_v12 = vadd.f32 %v4481_v26, %v4380_v35  ;;  %v4114_v26 = vmax.f32 %v3992_v48, %v4024_v17 }
 0x532   :  { %v3876_v38 = vmax.f32 %v3812_v61, 0.0 }
 0x533   :  { %10615 = vst [vmem:[#allocation67_spill] sm:$0xff] %v9562_v12 }
 0x534   :  { %3941 = vst.msk [vmem:[#allocation2 + $0xb8] sm:$0xff] %vm3917_vm3, %v3876_v38  ;;  %v6848_v38 = vld [vmem:[%s10490_s0 + $0x262] sm:$0xff] }
 0x535   :  { %v3621_v11 = vpop.f32.mrf.mxu0 }
 0x536   :  { %v3745_v58 = vadd.f32 %v3621_v11, %v8753_v55  ;;  %v3440_v11 = vpack.c.bf16 %v6848_v38, %v6847_v54 }
 0x538   :  { %v3813_v49 = vadd.f32 %v9203_v3, %v3745_v58  ;;  %6890 = vmatmul.msk.bf16.gmra.mxu0 %vm235_vm1, %v3439_v13 }
 0x53a   :  { %v3877_v50 = vmax.f32 %v3813_v49, 0.0 }
 0x53b   :  { %v4056_v32 = vld [vmem:[#allocation2 + $0xb0] ss:$2 sm:$0xff]  ;;  %v4088_v35 = vld [vmem:[#allocation2 + $0xb1] ss:$2 sm:$0xff] }
 0x53c   :  { %v4130_v12 = vmax.f32 %v4056_v32, %v4088_v35  ;;  %3942 = vst.msk [vmem:[#allocation2 + $0xc0] sm:$0xff] %vm3917_vm3, %v3877_v50 }
 0x53d   :  { %v3623_v61 = vpop.f32.mrf.mxu0 }
 0x53e   :  { %v4146_v15 = vmax.f32 %v4114_v26, %v4130_v12  ;;  %v3746_v9 = vadd.f32 %v3623_v61, %v8770_v62  ;;  %v6849_v26 = vld [vmem:[%s10490_s0 + $0x272] sm:$0xff]  ;;  %v6850_v61 = vld [vmem:[%s10490_s0 + $0x27a] sm:$0xff] }
 0x540   :  { %4204 = vst.msk [vmem:[#allocation3 + $0x61] sm:$0xff] %vm3917_vm3, %v4146_v15  ;;  %v3814_v55 = vadd.f32 %v9203_v3, %v3746_v9 }
 0x542   :  { %v3878_v13 = vmax.f32 %v3814_v55, 0.0  ;;  %v3441_v55 = vpack.c.bf16 %v6850_v61, %v6849_v26  ;;  %v6851_v61 = vld [vmem:[%s10490_s0 + $0x28a] sm:$0xff] }
 0x544   :  { %3943 = vst.msk [vmem:[#allocation2 + $0xc8] sm:$0xff] %vm3917_vm3, %v3878_v13 }
 0x545   :  { %v3626_v58 = vpop.f32.mrf.mxu0 }
 0x546   :  { %v3747_v12 = vadd.f32 %v3626_v58, %v8781_v21 }
 0x547   :  { %v9586_v62 = vld [vmem:[#allocation3 + $0x60] sm:$0xff] }
 0x548   :  { %v9588_v15 = vld [vmem:[#allocation3 + $0x62] sm:$0xff]  ;;  %v3815_v49 = vadd.f32 %v9203_v3, %v3747_v12  ;;  %6891 = vmatmul.msk.bf16.gmra.mxu0 %vm235_vm1, %v3440_v11 }
 0x54a   :  { %v3879_v50 = vmax.f32 %v3815_v49, 0.0 }
 0x54b   :  { %v4026_v11 = vld [vmem:[#allocation2 + $0xc1] ss:$2 sm:$0xff] }
 0x54c   :  { %3944 = vst.msk [vmem:[#allocation2 + $0xd0] sm:$0xff] %vm3917_vm3, %v3879_v50 }
 0x54d   :  { %v3628_v32 = vpop.f32.mrf.mxu0 }
 0x54e   :  { %v3748_v21 = vadd.f32 %v3628_v32, %v8798_v4  ;;  %v3994_v4 = vld [vmem:[#allocation2 + $0xc0] ss:$2 sm:$0xff] }
 0x54f   :  { %v4115_v50 = vmax.f32 %v3994_v4, %v4026_v11  ;;  %v9625_v11 = vld [vmem:[#allocation3 + $0x61] sm:$0xff] }
 0x550   :  { %v3816_v35 = vadd.f32 %v9203_v3, %v3748_v21 }
 0x552   :  { %v3880_v9 = vmax.f32 %v3816_v35, 0.0 }
 0x554   :  { %3945 = vst.msk [vmem:[#allocation2 + $0xd8] sm:$0xff] %vm3917_vm3, %v3880_v9  ;;  %v6852_v9 = vld [vmem:[%s10490_s0 + $0x292] sm:$0xff] }
 0x555   :  { %v3631_v54 = vpop.f32.mrf.mxu0 }
 0x556   :  { %v3749_v38 = vadd.f32 %v3631_v54, %v8809_v45  ;;  %v9619_v54 = vpop.f32.mrf.mxu1 }
 0x557   :  { %10616 = vst [vmem:[#allocation68_spill] sm:$0xff] %v9619_v54 }
 0x558   :  { %v3817_v13 = vadd.f32 %v9203_v3, %v3749_v38  ;;  %6892 = vmatmul.msk.bf16.gmra.mxu0 %vm235_vm1, %v3441_v55  ;;  %v3442_v38 = vpack.c.bf16 %v6852_v9, %v6851_v61 }
 0x55a   :  { %v3881_v58 = vmax.f32 %v3817_v13, 0.0  ;;  %v9622_v13 = vpop.f32.mrf.mxu2 }
 0x55b   :  { %v4058_v12 = vld [vmem:[#allocation2 + $0xd0] ss:$2 sm:$0xff]  ;;  %v4090_v49 = vld [vmem:[#allocation2 + $0xd1] ss:$2 sm:$0xff]  ;;  %10617 = vst [vmem:[#allocation69_spill] sm:$0xff] %v9622_v13 }
 0x55c   :  { %v4131_v32 = vmax.f32 %v4058_v12, %v4090_v49  ;;  %3946 = vst.msk [vmem:[#allocation2 + $0xe0] sm:$0xff] %vm3917_vm3, %v3881_v58  ;;  %v9627_v58 = vpop.f32.mrf.mxu3  ;;  %v10631_v13 = vld [vmem:[#allocation31_spill] sm:$0xff] }
 0x55d   :  { %v3633_v21 = vpop.f32.mrf.mxu0  ;;  %10618 = vst [vmem:[#allocation70_spill] sm:$0xff] %v9627_v58 }
 0x55e   :  { %v4147_v35 = vmax.f32 %v4115_v50, %v4131_v32  ;;  %v3750_v26 = vadd.f32 %v3633_v21, %v8826_v51 }
 0x560   :  { %4205 = vst.msk [vmem:[#allocation3 + $0x71] sm:$0xff] %vm3917_vm3, %v4147_v35  ;;  %v3818_v45 = vadd.f32 %v9203_v3, %v3750_v26 }
 0x562   :  { %v3882_v55 = vmax.f32 %v3818_v45, 0.0 }
 0x564   :  { %3947 = vst.msk [vmem:[#allocation2 + $0xe8] sm:$0xff] %vm3917_vm3, %v3882_v55 }
 0x565   :  { %v3636_v51 = vpop.f32.mrf.mxu0 }
 0x566   :  { %v3751_v4 = vadd.f32 %v3636_v51, %v8837_v41 }
 0x567   :  { %v9629_v12 = vld [vmem:[#allocation3 + $0x71] sm:$0xff]  ;;  %v4308_v45 = vpop.f32.mrf.mxu1 }
 0x568   :  { %v9631_v49 = vld [vmem:[#allocation3 + $0x70] sm:$0xff]  ;;  %v3819_v32 = vadd.f32 %v9203_v3, %v3751_v4  ;;  %6893 = vmatmul.msk.bf16.gmra.mxu0 %vm235_vm1, %v3442_v38  ;;  %v4259_v21 = vpack.c.bf16 %v9629_v12, %v9625_v11 }
 0x569   :  { %v9633_v50 = vld [vmem:[#allocation3 + $0x72] sm:$0xff]  ;;  %v4234_v41 = vpack.c.bf16 %v9631_v49, %v9586_v62 }
 0x56a   :  { %v4438_v35 = vpack.c.bf16 %v9633_v50, %v9588_v15  ;;  %v3883_v26 = vmax.f32 %v3819_v32, 0.0  ;;  %6906 = vmatmul.msk.bf16.gmra.mxu1 %vm3917_vm3, %v4259_v21  ;;  %v6853_v32 = vld [vmem:[%s10490_s0 + $0x2a2] sm:$0xff]  ;;  %v6854_v21 = vld [vmem:[%s10490_s0 + $0x2aa] sm:$0xff] }
 0x56b   :  { %6914 = vmatmul.msk.bf16.gmra.mxu2 %vm3917_vm3, %v4234_v41 }
 0x56c   :  { %6923 = vmatmul.msk.bf16.gmra.mxu3 %vm3917_vm3, %v4438_v35  ;;  %3948 = vst.msk [vmem:[#allocation2 + $0xf0] sm:$0xff] %vm3917_vm3, %v3883_v26  ;;  %v3443_v35 = vpack.c.bf16 %v6854_v21, %v6853_v32  ;;  %v6855_v21 = vld [vmem:[%s10490_s0 + $0x2ba] sm:$0xff] }
 0x56d   :  { %v3638_v61 = vpop.f32.mrf.mxu0 }
 0x56e   :  { %v4384_v9 = vpop.f32.mrf.mxu2  ;;  %v3752_v55 = vadd.f32 %v3638_v61, %v8854_v47  ;;  %v3996_v61 = vld [vmem:[#allocation2 + $0xe0] ss:$2 sm:$0xff] }
 0x56f   :  { %v4385_v38 = vadd.f32 %v4384_v9, %v4308_v45  ;;  %v4486_v51 = vpop.f32.mrf.mxu3  ;;  %v4028_v9 = vld [vmem:[#allocation2 + $0xe1] ss:$2 sm:$0xff] }
 0x570   :  { %v3820_v4 = vadd.f32 %v9203_v3, %v3752_v55  ;;  %v4116_v48 = vmax.f32 %v3996_v61, %v4028_v9  ;;  %v6857_v9 = vld [vmem:[%s10490_s0 + $0x2d2] sm:$0xff] }
 0x571   :  { %v9649_v17 = vadd.f32 %v4486_v51, %v4385_v38 }
 0x572   :  { %v3884_v41 = vmax.f32 %v3820_v4, 0.0 }
 0x573   :  { %10619 = vst [vmem:[#allocation71_spill] sm:$0xff] %v9649_v17 }
 0x574   :  { %3949 = vst.msk [vmem:[#allocation2 + $0xf8] sm:$0xff] %vm3917_vm3, %v3884_v41  ;;  %v6856_v41 = vld [vmem:[%s10490_s0 + $0x2c2] sm:$0xff] }
 0x575   :  { %v3641_v26 = vpop.f32.mrf.mxu0 }
 0x576   :  { %v3753_v47 = vadd.f32 %v3641_v26, %v8865_v25  ;;  %v3444_v26 = vpack.c.bf16 %v6856_v41, %v6855_v21 }
 0x578   :  { %v3821_v45 = vadd.f32 %v9203_v3, %v3753_v47  ;;  %6894 = vmatmul.msk.bf16.gmra.mxu0 %vm235_vm1, %v3443_v35 }
 0x57a   :  { %v3885_v55 = vmax.f32 %v3821_v45, 0.0 }
 0x57b   :  { %v4060_v38 = vld [vmem:[#allocation2 + $0xf0] ss:$2 sm:$0xff]  ;;  %v4092_v51 = vld [vmem:[#allocation2 + $0xf1] ss:$2 sm:$0xff] }
 0x57c   :  { %v4132_v17 = vmax.f32 %v4060_v38, %v4092_v51  ;;  %3950 = vst.msk [vmem:[#allocation2 + $0x100] sm:$0xff] %vm3917_vm3, %v3885_v55 }
 0x57d   :  { %v3643_v4 = vpop.f32.mrf.mxu0 }
 0x57e   :  { %v4148_v58 = vmax.f32 %v4116_v48, %v4132_v17  ;;  %v3754_v32 = vadd.f32 %v3643_v4, %v8882_v8 }
 0x580   :  { %4206 = vst.msk [vmem:[#allocation3 + $0x81] sm:$0xff] %vm3917_vm3, %v4148_v58  ;;  %v3822_v25 = vadd.f32 %v9203_v3, %v3754_v32 }
 0x582   :  { %v3886_v35 = vmax.f32 %v3822_v25, 0.0 }
 0x584   :  { %3951 = vst.msk [vmem:[#allocation2 + $0x108] sm:$0xff] %vm3917_vm3, %v3886_v35 }
 0x585   :  { %v3646_v47 = vpop.f32.mrf.mxu0 }
 0x586   :  { %v3755_v48 = vadd.f32 %v3646_v47, %v8893_v60  ;;  %v6858_v60 = vld [vmem:[%s10490_s0 + $0x2da] sm:$0xff] }
 0x587   :  { %v3445_v38 = vpack.c.bf16 %v6858_v60, %v6857_v9  ;;  %v9698_v60 = vpop.f32.mrf.mxu1 }
 0x588   :  { %v3823_v8 = vadd.f32 %v9203_v3, %v3755_v48  ;;  %6895 = vmatmul.msk.bf16.gmra.mxu0 %vm235_vm1, %v3444_v26 }
 0x58a   :  { %v3887_v17 = vmax.f32 %v3823_v8, 0.0 }
 0x58b   :  { %v4030_v25 = vld [vmem:[#allocation2 + $0x101] ss:$2 sm:$0xff] }
 0x58c   :  { %3952 = vst.msk [vmem:[#allocation2 + $0x110] sm:$0xff] %vm3917_vm3, %v3887_v17  ;;  %v10620_v17 = vld [vmem:[#allocation10_spill] sm:$0xff] }
 0x58d   :  { %v3648_v58 = vpop.f32.mrf.mxu0  ;;  %10621 = vst [vmem:[#allocation10_spill] sm:$0xff] %v9698_v60 }
 0x58e   :  { %v3756_v45 = vadd.f32 %v3648_v58, %v8910_v20  ;;  %v3998_v20 = vld [vmem:[#allocation2 + $0x100] ss:$2 sm:$0xff] }
 0x58f   :  { %v4117_v26 = vmax.f32 %v3998_v20, %v4030_v25  ;;  %v4427_v20 = vld [vmem:[#allocation3 + $0xa2] sm:$0xff]  ;;  %v10623_v25 = vld [vmem:[#allocation11_spill] sm:$0xff] }
 0x590   :  { %v3824_v61 = vadd.f32 %v9203_v3, %v3756_v45  ;;  %v6859_v45 = vld [vmem:[%s10490_s0 + $0x2ea] sm:$0xff] }
 0x592   :  { %v3888_v55 = vmax.f32 %v3824_v61, 0.0  ;;  %v6860_v61 = vld [vmem:[%s10490_s0 + $0x2f2] sm:$0xff] }
 0x594   :  { %3953 = vst.msk [vmem:[#allocation2 + $0x118] sm:$0xff] %vm3917_vm3, %v3888_v55  ;;  %v3446_v55 = vpack.c.bf16 %v6860_v61, %v6859_v45 }
 0x595   :  { %v3651_v51 = vpop.f32.mrf.mxu0 }
 0x596   :  { %v3757_v4 = vadd.f32 %v3651_v51, %v8921_v16 }
 0x598   :  { %v3825_v32 = vadd.f32 %v9203_v3, %v3757_v4  ;;  %6896 = vmatmul.msk.bf16.gmra.mxu0 %vm235_vm1, %v3445_v38  ;;  %v9701_v38 = vpop.f32.mrf.mxu2  ;;  %v4248_v4 = vld [vmem:[#allocation3 + $0xa1] sm:$0xff] }
 0x599   :  { %10622 = vst [vmem:[#allocation72_spill] sm:$0xff] %v9701_v38 }
 0x59a   :  { %v3889_v21 = vmax.f32 %v3825_v32, 0.0  ;;  %v4223_v32 = vld [vmem:[#allocation3 + $0xa0] sm:$0xff] }
 0x59b   :  { %v4062_v41 = vld [vmem:[#allocation2 + $0x110] ss:$2 sm:$0xff]  ;;  %v4094_v35 = vld [vmem:[#allocation2 + $0x111] ss:$2 sm:$0xff] }
 0x59c   :  { %v4133_v47 = vmax.f32 %v4062_v41, %v4094_v35  ;;  %3954 = vst.msk [vmem:[#allocation2 + $0x120] sm:$0xff] %vm3917_vm3, %v3889_v21  ;;  %v9704_v41 = vpop.f32.mrf.mxu3 }
 0x59d   :  { %v3653_v48 = vpop.f32.mrf.mxu0  ;;  %10624 = vst [vmem:[#allocation11_spill] sm:$0xff] %v9704_v41 }
 0x59e   :  { %v4149_v8 = vmax.f32 %v4117_v26, %v4133_v47  ;;  %v3758_v58 = vadd.f32 %v3653_v48, %v10620_v17 }
 0x5a0   :  { %4207 = vst.msk [vmem:[#allocation3 + $0xb1] sm:$0xff] %vm3917_vm3, %v4149_v8  ;;  %v3826_v16 = vadd.f32 %v9203_v3, %v3758_v58 }
 0x5a2   :  { %v3890_v9 = vmax.f32 %v3826_v16, 0.0 }
 0x5a4   :  { %3955 = vst.msk [vmem:[#allocation2 + $0x128] sm:$0xff] %vm3917_vm3, %v3890_v9  ;;  %v10625_v9 = vld [vmem:[#allocation13_spill] sm:$0xff] }
 0x5a5   :  { %v3656_v51 = vpop.f32.mrf.mxu0 }
 0x5a6   :  { %v3759_v21 = vadd.f32 %v3656_v51, %v10623_v25 }
 0x5a7   :  { %v9706_v35 = vld [vmem:[#allocation3 + $0xb1] sm:$0xff]  ;;  %v4313_v45 = vpop.f32.mrf.mxu1 }
 0x5a8   :  { %v9708_v26 = vld [vmem:[#allocation3 + $0xb0] sm:$0xff]  ;;  %v3827_v48 = vadd.f32 %v9203_v3, %v3759_v21  ;;  %6897 = vmatmul.msk.bf16.gmra.mxu0 %vm235_vm1, %v3446_v55  ;;  %v4260_v8 = vpack.c.bf16 %v9706_v35, %v4248_v4  ;;  %v6861_v21 = vld [vmem:[%s10490_s0 + $0x302] sm:$0xff] }
 0x5a9   :  { %v9710_v47 = vld [vmem:[#allocation3 + $0xb2] sm:$0xff]  ;;  %v4235_v17 = vpack.c.bf16 %v9708_v26, %v4223_v32  ;;  %v9725_v32 = vld [vmem:[%s10492_s2] ss:$0 sm:$0xff] }
 0x5aa   :  { %v4439_v58 = vpack.c.bf16 %v9710_v47, %v4427_v20  ;;  %v3891_v16 = vmax.f32 %v3827_v48, 0.0  ;;  %6907 = vmatmul.msk.bf16.gmra.mxu1 %vm3917_vm3, %v4260_v8  ;;  %v6862_v48 = vld [vmem:[%s10490_s0 + $0x30a] sm:$0xff] }
 0x5ab   :  { %6915 = vmatmul.msk.bf16.gmra.mxu2 %vm3917_vm3, %v4235_v17  ;;  %v10627_v17 = vld [vmem:[#allocation9_spill] sm:$0xff] }
 0x5ac   :  { %6924 = vmatmul.msk.bf16.gmra.mxu3 %vm3917_vm3, %v4439_v58  ;;  %3956 = vst.msk [vmem:[#allocation2 + $0x130] sm:$0xff] %vm3917_vm3, %v3891_v16  ;;  %v10628_v58 = vld [vmem:[#allocation33_spill] sm:$0xff] }
 0x5ad   :  { %v3658_v61 = vpop.f32.mrf.mxu0  ;;  %v2471_v16 = vadd.f32 %v10628_v58, %v10627_v17  ;;  %v4032_v41 = vld [vmem:[#allocation2 + $0x121] ss:$2 sm:$0xff] }
 0x5ae   :  { %v4389_v3 = vpop.f32.mrf.mxu2  ;;  %v3760_v55 = vadd.f32 %v3658_v61, %v10625_v9 }
 0x5af   :  { %v4390_v51 = vadd.f32 %v4389_v3, %v4313_v45  ;;  %v4491_v4 = vpop.f32.mrf.mxu3  ;;  %v3447_v45 = vpack.c.bf16 %v6862_v48, %v6861_v21  ;;  %v10629_v3 = vld [vmem:[#allocation32_spill] sm:$0xff] }
 0x5b0   :  { %v3828_v20 = vadd.f32 %v9725_v32, %v3760_v55  ;;  %v10630_v55 = vld [vmem:[#allocation14_spill] sm:$0xff] }
 0x5b1   :  { %v9728_v25 = vadd.f32 %v4491_v4, %v4390_v51  ;;  %v2902_v51 = vadd.f32 %v10630_v55, %v2471_v16  ;;  %v10635_v55 = vld [vmem:[#allocation15_spill] sm:$0xff] }
 0x5b2   :  { %v3892_v8 = vmax.f32 %v3828_v20, 0.0 }
 0x5b3   :  { %10626 = vst [vmem:[#allocation13_spill] sm:$0xff] %v9728_v25  ;;  %v4000_v25 = vld [vmem:[#allocation2 + $0x120] ss:$2 sm:$0xff]  ;;  %v3332_v54 = vadd.f32 %v10631_v13, %v2902_v51 }
 0x5b4   :  { %3957 = vst.msk [vmem:[#allocation2 + $0x138] sm:$0xff] %vm3917_vm3, %v3892_v8  ;;  %v4118_v17 = vmax.f32 %v4000_v25, %v4032_v41  ;;  %v10632_v41 = vld [vmem:[#allocation12_spill] sm:$0xff] }
 0x5b5   :  { %v3661_v61 = vpop.f32.mrf.mxu0 }
 0x5b6   :  { %v3761_v9 = vadd.f32 %v3661_v61, %v10629_v3  ;;  %v6864_v61 = vld [vmem:[%s10490_s0 + $0x322] sm:$0xff]  ;;  %v10634_v3 = vld [vmem:[#allocation36_spill] sm:$0xff] }
 0x5b8   :  { %v3829_v4 = vadd.f32 %v9725_v32, %v3761_v9  ;;  %6898 = vmatmul.msk.bf16.gmra.mxu0 %vm235_vm1, %v3447_v45  ;;  %v6863_v45 = vld [vmem:[%s10490_s0 + $0x31a] sm:$0xff] }
 0x5ba   :  { %v3893_v38 = vmax.f32 %v3829_v4, 0.0 }
 0x5bb   :  { %v4064_v60 = vld [vmem:[#allocation2 + $0x130] ss:$2 sm:$0xff]  ;;  %v4096_v20 = vld [vmem:[#allocation2 + $0x131] ss:$2 sm:$0xff] }
 0x5bc   :  { %v4134_v58 = vmax.f32 %v4064_v60, %v4096_v20  ;;  %3958 = vst.msk [vmem:[#allocation2 + $0x140] sm:$0xff] %vm3917_vm3, %v3893_v38  ;;  %v10633_v60 = vld [vmem:[#allocation37_spill] sm:$0xff]  ;;  %v3448_v38 = vpack.c.bf16 %v6864_v61, %v6863_v45  ;;  %v10636_v45 = vld [vmem:[#allocation35_spill] sm:$0xff] }
 0x5bd   :  { %v3663_v21 = vpop.f32.mrf.mxu0  ;;  %v2473_v25 = vadd.f32 %v10633_v60, %v10632_v41 }
 0x5be   :  { %v4150_v48 = vmax.f32 %v4118_v17, %v4134_v58  ;;  %v3762_v8 = vadd.f32 %v3663_v21, %v3332_v54 }
 0x5bf   :  { %v2904_v51 = vadd.f32 %v10635_v55, %v2473_v25  ;;  %v6865_v25 = vld [vmem:[%s10490_s0 + $0x332] sm:$0xff] }
 0x5c0   :  { %4208 = vst.msk [vmem:[#allocation3 + $0xc1] sm:$0xff] %vm3917_vm3, %v4150_v48  ;;  %v3830_v16 = vadd.f32 %v9725_v32, %v3762_v8 }
 0x5c1   :  { %v3334_v61 = vadd.f32 %v10636_v45, %v2904_v51 }
 0x5c2   :  { %v3894_v13 = vmax.f32 %v3830_v16, 0.0 }
 0x5c4   :  { %3959 = vst.msk [vmem:[#allocation2 + $0x148] sm:$0xff] %vm3917_vm3, %v3894_v13 }
 0x5c5   :  { %v3666_v54 = vpop.f32.mrf.mxu0 }
 0x5c6   :  { %v3763_v9 = vadd.f32 %v3666_v54, %v10634_v3  ;;  %v10637_v3 = vld [vmem:[#allocation34_spill] sm:$0xff] }
 0x5c7   :  { %v9758_v4 = vld [vmem:[#allocation3 + $0xc1] sm:$0xff] }
 0x5c8   :  { %v9760_v20 = vld [vmem:[#allocation3 + $0xc0] sm:$0xff]  ;;  %v3831_v58 = vadd.f32 %v9725_v32, %v3763_v9  ;;  %6899 = vmatmul.msk.bf16.gmra.mxu0 %vm235_vm1, %v3448_v38  ;;  %v2475_v9 = vadd.f32 %v9081_v42, %v10637_v3 }
 0x5c9   :  { %v9762_v17 = vld [vmem:[#allocation3 + $0xc2] sm:$0xff]  ;;  %v6866_v38 = vld [vmem:[%s10490_s0 + $0x33a] sm:$0xff] }
 0x5ca   :  { %v3895_v16 = vmax.f32 %v3831_v58, 0.0  ;;  %v3449_v55 = vpack.c.bf16 %v6866_v38, %v6865_v25 }
 0x5cc   :  { %3960 = vst.msk [vmem:[#allocation2 + $0x150] sm:$0xff] %vm3917_vm3, %v3895_v16  ;;  %v2906_v16 = vadd.f32 %v9071_v6, %v2475_v9  ;;  %v6946_v9 = vld [vmem:[%s10493_s3 + $0x14] sm:$0xf] }
 0x5cd   :  { %v3668_v13 = vpop.f32.mrf.mxu0 }
 0x5ce   :  { %v3764_v41 = vadd.f32 %v3668_v13, %v3334_v61  ;;  %v4002_v61 = vld [vmem:[#allocation2 + $0x140] ss:$2 sm:$0xff]  ;;  %v4034_v13 = vld [vmem:[#allocation2 + $0x141] ss:$2 sm:$0xff]  ;;  %v3336_v48 = vadd.f32 %v9075_v30, %v2906_v16 }
 0x5cf   :  { %v4119_v42 = vmax.f32 %v4002_v61, %v4034_v13  ;;  %v6867_v30 = vld [vmem:[%s10490_s0 + $0x34a] sm:$0xff]  ;;  %v9811_v13 = vpop.f32.mrf.mxu2 }
 0x5d0   :  { %v3832_v60 = vadd.f32 %v9725_v32, %v3764_v41 }
 0x5d2   :  { %v3896_v54 = vmax.f32 %v3832_v60, 0.0 }
 0x5d4   :  { %3961 = vst.msk [vmem:[#allocation2 + $0x158] sm:$0xff] %vm3917_vm3, %v3896_v54  ;;  %v6937_v54 = vld [vmem:[%s10493_s3 + $0x10] sm:$0xf] }
 0x5d5   :  { %v3671_v51 = vpop.f32.mrf.mxu0 }
 0x5d6   :  { %v3765_v58 = vadd.f32 %v3671_v51, %v9077_v36 }
 0x5d8   :  { %v3833_v45 = vadd.f32 %v9725_v32, %v3765_v58  ;;  %6900 = vmatmul.msk.bf16.gmra.mxu0 %vm235_vm1, %v3449_v55  ;;  %v4824_v55 = vsel %vm4290_vm2, %v6946_v9, 0  ;;  %v10638_v58 = vld [vmem:[#allocation16_spill] sm:$0xff] }
 0x5d9   :  { %4833 = vmatpush.bf16.msrb.mxu3 %v4824_v55  ;;  %v2477_v16 = vadd.f32 %v9109_v7, %v10638_v58 }
 0x5da   :  { %v3897_v41 = vmax.f32 %v3833_v45, 0.0  ;;  %v9808_v45 = vpop.f32.mrf.mxu1 }
 0x5db   :  { %v4066_v8 = vld [vmem:[#allocation2 + $0x150] ss:$2 sm:$0xff]  ;;  %v4098_v60 = vld [vmem:[#allocation2 + $0x151] ss:$2 sm:$0xff] }
 0x5dc   :  { %v4135_v3 = vmax.f32 %v4066_v8, %v4098_v60  ;;  %3962 = vst.msk [vmem:[#allocation2 + $0x160] sm:$0xff] %vm3917_vm3, %v3897_v41  ;;  %v4706_v8 = vsel %vm4290_vm2, %v6937_v54, 0 }
 0x5dd   :  { %v3673_v25 = vpop.f32.mrf.mxu0  ;;  %4715 = vmatpush.bf16.msrb.mxu2 %v4706_v8 }
 0x5de   :  { %v4151_v38 = vmax.f32 %v4119_v42, %v4135_v3  ;;  %v3766_v36 = vadd.f32 %v3673_v25, %v3336_v48  ;;  %v6868_v48 = vld [vmem:[%s10490_s0 + $0x352] sm:$0xff]  ;;  %v2908_v42 = vadd.f32 %v9105_v57, %v2477_v16  ;;  %v9815_v3 = vpop.f32.mrf.mxu3 }
 0x5df   :  { %v3450_v61 = vpack.c.bf16 %v6868_v48, %v6867_v30  ;;  %v6928_v48 = vld [vmem:[%s10493_s3 + $0xc] sm:$0xf] }
 0x5e0   :  { %4209 = vst.msk [vmem:[#allocation3 + $0xd1] sm:$0xff] %vm3917_vm3, %v4151_v38  ;;  %v3834_v6 = vadd.f32 %v9725_v32, %v3766_v36  ;;  %v3338_v9 = vadd.f32 %v9107_v53, %v2908_v42  ;;  %v2479_v42 = vadd.f32 %v9275_v28, %v9084_v31 }
 0x5e2   :  { %v3898_v51 = vmax.f32 %v3834_v6, 0.0  ;;  %v2910_v21 = vadd.f32 %v9280_v52, %v2479_v42 }
 0x5e4   :  { %3963 = vst.msk [vmem:[#allocation2 + $0x168] sm:$0xff] %vm3917_vm3, %v3898_v51  ;;  %v4588_v51 = vsel %vm4290_vm2, %v6928_v48, 0 }
 0x5e5   :  { %v3676_v41 = vpop.f32.mrf.mxu0  ;;  %4597 = vmatpush.bf16.msra.mxu1 %v4588_v51 }
 0x5e6   :  { %v3767_v60 = vadd.f32 %v3676_v41, %v9103_v29 }
 0x5e7   :  { %v9817_v25 = vld [vmem:[#allocation3 + $0xd1] sm:$0xff]  ;;  %v4318_v30 = vpop.f32.mrf.mxu1 }
 0x5e8   :  { %v9819_v38 = vld [vmem:[#allocation3 + $0xd0] sm:$0xff]  ;;  %v3835_v7 = vadd.f32 %v9725_v32, %v3767_v60  ;;  %6901 = vmatmul.msk.bf16.gmra.mxu0 %vm235_vm1, %v3450_v61  ;;  %v9827_v6 = vpack.c.bf16 %v9817_v25, %v9758_v4 }
 0x5e9   :  { %v9821_v36 = vld [vmem:[#allocation3 + $0xd2] sm:$0xff]  ;;  %v9831_v29 = vpack.c.bf16 %v9819_v38, %v9760_v20 }
 0x5ea   :  { %10639 = vst [vmem:[#allocation9_spill] sm:$0xff] %v9827_v6  ;;  %v9835_v57 = vpack.c.bf16 %v9821_v36, %v9762_v17  ;;  %v3899_v54 = vmax.f32 %v3835_v7, 0.0  ;;  %6908 = vmatmul.msk.bf16.gmra.mxu1 %vm3917_vm3, %v9827_v6  ;;  %v10666_v6 = vld [vmem:[#allocation55_spill] sm:$0xff] }
 0x5eb   :  { %6916 = vmatmul.msk.bf16.gmra.mxu2 %vm3917_vm3, %v9831_v29  ;;  %v4036_v48 = vld [vmem:[#allocation2 + $0x161] ss:$2 sm:$0xff] }
 0x5ec   :  { %10640 = vst [vmem:[#allocation33_spill] sm:$0xff] %v9835_v57  ;;  %6925 = vmatmul.msk.bf16.gmra.mxu3 %vm3917_vm3, %v9835_v57  ;;  %v10664_v57 = vld [vmem:[#allocation51_spill] sm:$0xff] }
 0x5ed   :  { %3964 = vst.msk [vmem:[#allocation2 + $0x170] sm:$0xff] %vm3917_vm3, %v3899_v54  ;;  %v3678_v8 = vpop.f32.mrf.mxu0 }
 0x5ee   :  { %v4394_v55 = vpop.f32.mrf.mxu2  ;;  %v3768_v58 = vadd.f32 %v3678_v8, %v3338_v9 }
 0x5ef   :  { %v4395_v16 = vadd.f32 %v4394_v55, %v4318_v30  ;;  %v4496_v61 = vpop.f32.mrf.mxu3  ;;  %v4004_v30 = vld [vmem:[#allocation2 + $0x160] ss:$2 sm:$0xff] }
 0x5f0   :  { %v3836_v41 = vadd.f32 %v9725_v32, %v3768_v58  ;;  %v3340_v58 = vadd.f32 %v9286_v27, %v2910_v21  ;;  %v4120_v31 = vmax.f32 %v4004_v30, %v4036_v48 }
 0x5f1   :  { %v9850_v60 = vadd.f32 %v4496_v61, %v4395_v16  ;;  %v10641_v16 = vld [vmem:[#allocation17_spill] sm:$0xff] }
 0x5f2   :  { %v3900_v53 = vmax.f32 %v3836_v41, 0.0  ;;  %v2480_v61 = vadd.f32 %v9309_v44, %v10641_v16  ;;  %v10643_v16 = vld [vmem:[#allocation40_spill] sm:$0xff] }
 0x5f4   :  { %3965 = vst.msk [vmem:[#allocation2 + $0x178] sm:$0xff] %vm3917_vm3, %v3900_v53  ;;  %v2911_v52 = vadd.f32 %v9313_v37, %v2480_v61  ;;  %v2482_v61 = vadd.f32 %v10643_v16, %v9121_v2 }
 0x5f5   :  { %v3681_v7 = vpop.f32.mrf.mxu0 }
 0x5f6   :  { %v3769_v54 = vadd.f32 %v3681_v7, %v9124_v59  ;;  %v3341_v21 = vadd.f32 %v9321_v63, %v2911_v52 }
 0x5f8   :  { %v3837_v9 = vadd.f32 %v9725_v32, %v3769_v54  ;;  %v10642_v54 = vld [vmem:[#allocation18_spill] sm:$0xff] }
 0x5f9   :  { %v2481_v27 = vadd.f32 %v9342_v39, %v10642_v54  ;;  %v10646_v54 = vld [vmem:[#allocation19_spill] sm:$0xff]  ;;  %v10654_v39 = vld [vmem:[#allocation30_spill] sm:$0xff] }
 0x5fa   :  { %v3901_v8 = vmax.f32 %v3837_v9, 0.0 }
 0x5fb   :  { %v4068_v55 = vld [vmem:[#allocation2 + $0x170] ss:$2 sm:$0xff]  ;;  %v4100_v51 = vld [vmem:[#allocation2 + $0x171] ss:$2 sm:$0xff]  ;;  %v2912_v30 = vadd.f32 %v9345_v34, %v2481_v27 }
 0x5fc   :  { %v4136_v28 = vmax.f32 %v4068_v55, %v4100_v51  ;;  %3966 = vst.msk [vmem:[#allocation2 + $0x180] sm:$0xff] %vm3917_vm3, %v3901_v8  ;;  %v10647_v27 = vld [vmem:[#allocation28_spill] sm:$0xff] }
 0x5fd   :  { %v3683_v41 = vpop.f32.mrf.mxu0  ;;  %v3342_v34 = vadd.f32 %v9349_v1, %v2912_v30 }
 0x5fe   :  { %v4152_v59 = vmax.f32 %v4120_v31, %v4136_v28  ;;  %v3770_v53 = vadd.f32 %v3683_v41, %v3340_v58  ;;  %v10644_v41 = vld [vmem:[#allocation41_spill] sm:$0xff] }
 0x600   :  { %4210 = vst.msk [vmem:[#allocation3 + $0xe1] sm:$0xff] %vm3917_vm3, %v4152_v59  ;;  %v3838_v42 = vadd.f32 %v9725_v32, %v3770_v53  ;;  %v2913_v59 = vadd.f32 %v10644_v41, %v2482_v61  ;;  %v10650_v41 = vld [vmem:[#allocation20_spill] sm:$0xff] }
 0x602   :  { %v3902_v7 = vmax.f32 %v3838_v42, 0.0  ;;  %v10645_v42 = vld [vmem:[#allocation42_spill] sm:$0xff] }
 0x604   :  { %3967 = vst.msk [vmem:[#allocation2 + $0x188] sm:$0xff] %vm3917_vm3, %v3902_v7  ;;  %v3343_v7 = vadd.f32 %v10645_v42, %v2913_v59  ;;  %v10651_v59 = vld [vmem:[#allocation29_spill] sm:$0xff] }
 0x605   :  { %v3686_v44 = vpop.f32.mrf.mxu0 }
 0x606   :  { %v3771_v9 = vadd.f32 %v3686_v44, %v3341_v21  ;;  %v2483_v21 = vadd.f32 %v10647_v27, %v10646_v54 }
 0x607   :  { %v9870_v48 = vld [vmem:[#allocation3 + $0xe1] sm:$0xff] }
 0x608   :  { %v9872_v8 = vld [vmem:[#allocation3 + $0xe0] sm:$0xff]  ;;  %v3839_v55 = vadd.f32 %v9725_v32, %v3771_v9  ;;  %v10648_v9 = vld [vmem:[#allocation43_spill] sm:$0xff] }
 0x609   :  { %v9874_v37 = vld [vmem:[#allocation3 + $0xe2] sm:$0xff]  ;;  %v2914_v2 = vadd.f32 %v10648_v9, %v2483_v21 }
 0x60a   :  { %v3903_v58 = vmax.f32 %v3839_v55, 0.0  ;;  %v10652_v21 = vld [vmem:[#allocation45_spill] sm:$0xff] }
 0x60b   :  { %v4006_v55 = vld [vmem:[#allocation2 + $0x180] ss:$2 sm:$0xff] }
 0x60c   :  { %3968 = vst.msk [vmem:[#allocation2 + $0x190] sm:$0xff] %vm3917_vm3, %v3903_v58  ;;  %v4038_v58 = vld [vmem:[#allocation2 + $0x181] ss:$2 sm:$0xff] }
 0x60d   :  { %v3688_v31 = vpop.f32.mrf.mxu0  ;;  %v4121_v42 = vmax.f32 %v4006_v55, %v4038_v58  ;;  %v9908_v55 = vpop.f32.mrf.mxu2 }
 0x60e   :  { %v3772_v28 = vadd.f32 %v3688_v31, %v3342_v34  ;;  %v10649_v31 = vld [vmem:[#allocation44_spill] sm:$0xff] }
 0x610   :  { %v3840_v53 = vadd.f32 %v9725_v32, %v3772_v28  ;;  %v3344_v28 = vadd.f32 %v10649_v31, %v2914_v2  ;;  %v10655_v31 = vld [vmem:[#allocation46_spill] sm:$0xff] }
 0x612   :  { %v3904_v52 = vmax.f32 %v3840_v53, 0.0  ;;  %v2484_v53 = vadd.f32 %v10651_v59, %v10650_v41  ;;  %v9905_v41 = vpop.f32.mrf.mxu1 }
 0x614   :  { %3969 = vst.msk [vmem:[#allocation2 + $0x198] sm:$0xff] %vm3917_vm3, %v3904_v52 }
 0x615   :  { %v3691_v1 = vpop.f32.mrf.mxu0 }
 0x616   :  { %v3773_v44 = vadd.f32 %v3691_v1, %v3343_v7  ;;  %v2915_v1 = vadd.f32 %v10652_v21, %v2484_v53 }
 0x618   :  { %v3841_v30 = vadd.f32 %v9725_v32, %v3773_v44  ;;  %v3345_v63 = vadd.f32 %v10655_v31, %v2915_v1  ;;  %v10661_v1 = vld [vmem:[#allocation22_spill] sm:$0xff] }
 0x61a   :  { %v3905_v34 = vmax.f32 %v3841_v30, 0.0  ;;  %v10653_v30 = vld [vmem:[#allocation21_spill] sm:$0xff] }
 0x61b   :  { %v4070_v16 = vld [vmem:[#allocation2 + $0x190] ss:$2 sm:$0xff]  ;;  %v4102_v61 = vld [vmem:[#allocation2 + $0x191] ss:$2 sm:$0xff]  ;;  %v2485_v2 = vadd.f32 %v10654_v39, %v10653_v30 }
 0x61c   :  { %v4137_v54 = vmax.f32 %v4070_v16, %v4102_v61  ;;  %3970 = vst.msk [vmem:[#allocation2 + $0x1a0] sm:$0xff] %vm3917_vm3, %v3905_v34  ;;  %v10656_v16 = vld [vmem:[#allocation47_spill] sm:$0xff] }
 0x61d   :  { %v3693_v52 = vpop.f32.mrf.mxu0  ;;  %v2916_v61 = vadd.f32 %v10656_v16, %v2485_v2 }
 0x61e   :  { %v4153_v7 = vmax.f32 %v4121_v42, %v4137_v54  ;;  %v3774_v27 = vadd.f32 %v3693_v52, %v3344_v28  ;;  %v9911_v28 = vpop.f32.mrf.mxu3 }
 0x620   :  { %4211 = vst.msk [vmem:[#allocation3 + $0xf1] sm:$0xff] %vm3917_vm3, %v4153_v7  ;;  %v3842_v44 = vadd.f32 %v9725_v32, %v3774_v27  ;;  %v10660_v27 = vld [vmem:[#allocation48_spill] sm:$0xff] }
 0x621   :  { %v3346_v21 = vadd.f32 %v10660_v27, %v2916_v61  ;;  %v10665_v27 = vld [vmem:[#allocation23_spill] sm:$0xff] }
 0x622   :  { %v3906_v9 = vmax.f32 %v3842_v44, 0.0  ;;  %v10662_v44 = vld [vmem:[#allocation49_spill] sm:$0xff] }
 0x624   :  { %3971 = vst.msk [vmem:[#allocation2 + $0x1a8] sm:$0xff] %vm3917_vm3, %v3906_v9  ;;  %v2486_v9 = vadd.f32 %v10662_v44, %v10661_v1  ;;  %v2487_v1 = vadd.f32 %v10666_v6, %v10665_v27 }
 0x625   :  { %v3696_v58 = vpop.f32.mrf.mxu0 }
 0x626   :  { %v3775_v34 = vadd.f32 %v3696_v58, %v3345_v63 }
 0x627   :  { %v9913_v59 = vld [vmem:[#allocation3 + $0xf1] sm:$0xff]  ;;  %v4323_v30 = vpop.f32.mrf.mxu1 }
 0x628   :  { %v9915_v53 = vld [vmem:[#allocation3 + $0xf0] sm:$0xff]  ;;  %v3843_v39 = vadd.f32 %v9725_v32, %v3775_v34  ;;  %v9922_v54 = vpack.c.bf16 %v9913_v59, %v9870_v48 }
 0x629   :  { %v9917_v42 = vld [vmem:[#allocation3 + $0xf2] sm:$0xff]  ;;  %v9926_v52 = vpack.c.bf16 %v9915_v53, %v9872_v8 }
 0x62a   :  { %10657 = vst [vmem:[#allocation32_spill] sm:$0xff] %v9922_v54  ;;  %v9930_v63 = vpack.c.bf16 %v9917_v42, %v9874_v37  ;;  %v3907_v7 = vmax.f32 %v3843_v39, 0.0  ;;  %6909 = vmatmul.msk.bf16.gmra.mxu1 %vm3917_vm3, %v9922_v54  ;;  %v10663_v39 = vld [vmem:[#allocation50_spill] sm:$0xff] }
 0x62b   :  { %10658 = vst [vmem:[#allocation14_spill] sm:$0xff] %v9926_v52  ;;  %6917 = vmatmul.msk.bf16.gmra.mxu2 %vm3917_vm3, %v9926_v52  ;;  %v2917_v51 = vadd.f32 %v10663_v39, %v2486_v9  ;;  %v4040_v9 = vld [vmem:[#allocation2 + $0x1a1] ss:$2 sm:$0xff] }
 0x62c   :  { %10659 = vst [vmem:[#allocation31_spill] sm:$0xff] %v9930_v63  ;;  %6926 = vmatmul.msk.bf16.gmra.mxu3 %vm3917_vm3, %v9930_v63 }
 0x62d   :  { %3972 = vst.msk [vmem:[#allocation2 + $0x1b0] sm:$0xff] %vm3917_vm3, %v3907_v7  ;;  %v3698_v2 = vpop.f32.mrf.mxu0  ;;  %v3347_v61 = vadd.f32 %v10664_v57, %v2917_v51 }
 0x62e   :  { %v4399_v31 = vpop.f32.mrf.mxu2  ;;  %v3776_v58 = vadd.f32 %v3698_v2, %v3346_v21  ;;  %v2918_v21 = vadd.f32 %v9447_v40, %v2487_v1  ;;  %v4008_v2 = vld [vmem:[#allocation2 + $0x1a0] ss:$2 sm:$0xff] }
 0x62f   :  { %v4400_v34 = vadd.f32 %v4399_v31, %v4323_v30  ;;  %v4501_v16 = vpop.f32.mrf.mxu3  ;;  %v4122_v51 = vmax.f32 %v4008_v2, %v4040_v9 }
 0x630   :  { %v3844_v54 = vadd.f32 %v9725_v32, %v3776_v58 }
 0x631   :  { %v9944_v52 = vadd.f32 %v4501_v16, %v4400_v34  ;;  %v10667_v16 = vld [vmem:[#allocation24_spill] sm:$0xff] }
 0x632   :  { %v3908_v63 = vmax.f32 %v3844_v54, 0.0  ;;  %v3348_v54 = vadd.f32 %v9457_v23, %v2918_v21  ;;  %v2488_v57 = vadd.f32 %v9469_v18, %v10667_v16 }
 0x634   :  { %3973 = vst.msk [vmem:[#allocation2 + $0x1b8] sm:$0xff] %vm3917_vm3, %v3908_v63  ;;  %v2919_v40 = vadd.f32 %v9471_v43, %v2488_v57 }
 0x635   :  { %v3701_v7 = vpop.f32.mrf.mxu0 }
 0x636   :  { %v3777_v44 = vadd.f32 %v3701_v7, %v3347_v61  ;;  %v10668_v7 = vld [vmem:[#allocation25_spill] sm:$0xff] }
 0x637   :  { %v2489_v23 = vadd.f32 %v9479_v56, %v10668_v7 }
 0x638   :  { %v3845_v30 = vadd.f32 %v9725_v32, %v3777_v44  ;;  %v3349_v44 = vadd.f32 %v9474_v0, %v2919_v40 }
 0x63a   :  { %v3909_v31 = vmax.f32 %v3845_v30, 0.0  ;;  %v2920_v30 = vadd.f32 %v9482_v33, %v2489_v23 }
 0x63b   :  { %v4072_v58 = vld [vmem:[#allocation2 + $0x1b0] ss:$2 sm:$0xff]  ;;  %v4104_v34 = vld [vmem:[#allocation2 + $0x1b1] ss:$2 sm:$0xff] }
 0x63c   :  { %v4138_v6 = vmax.f32 %v4072_v58, %v4104_v34  ;;  %3974 = vst.msk [vmem:[#allocation2 + $0x1c0] sm:$0xff] %vm3917_vm3, %v3909_v31  ;;  %v3350_v33 = vadd.f32 %v9485_v46, %v2920_v30 }
 0x63d   :  { %v3703_v63 = vpop.f32.mrf.mxu0 }
 0x63e   :  { %v4154_v39 = vmax.f32 %v4122_v51, %v4138_v6  ;;  %v3778_v61 = vadd.f32 %v3703_v63, %v3348_v54  ;;  %v10669_v54 = vld [vmem:[#allocation26_spill] sm:$0xff] }
 0x63f   :  { %v2490_v16 = vadd.f32 %v9496_v14, %v10669_v54 }
 0x640   :  { %4212 = vst.msk [vmem:[#allocation3 + $0x101] sm:$0xff] %vm3917_vm3, %v4154_v39  ;;  %v3846_v27 = vadd.f32 %v9725_v32, %v3778_v61  ;;  %v10670_v61 = vld [vmem:[#allocation59_spill] sm:$0xff] }
 0x641   :  { %v2921_v6 = vadd.f32 %v9499_v22, %v2490_v16  ;;  %v10675_v16 = vld [vmem:[#allocation38_spill] sm:$0xff] }
 0x642   :  { %v3910_v1 = vmax.f32 %v3846_v27, 0.0  ;;  %v10671_v27 = vld [vmem:[#allocation27_spill] sm:$0xff] }
 0x643   :  { %v3351_v40 = vadd.f32 %v10670_v61, %v2921_v6 }
 0x644   :  { %3975 = vst.msk [vmem:[#allocation2 + $0x1c8] sm:$0xff] %vm3917_vm3, %v3910_v1  ;;  %v10672_v1 = vld [vmem:[#allocation60_spill] sm:$0xff] }
 0x645   :  { %v3706_v18 = vpop.f32.mrf.mxu0  ;;  %v2491_v7 = vadd.f32 %v10672_v1, %v10671_v27  ;;  %v6964_v1 = vld [vmem:[%s10493_s3 + $0x1c] sm:$0xf] }
 0x646   :  { %v3779_v21 = vadd.f32 %v3706_v18, %v3349_v44  ;;  %v10673_v44 = vld [vmem:[#allocation61_spill] sm:$0xff] }
 0x647   :  { %v9964_v2 = vld [vmem:[#allocation3 + $0x101] sm:$0xff]  ;;  %v2922_v14 = vadd.f32 %v10673_v44, %v2491_v7  ;;  %v5061_v7 = vsel %vm4290_vm2, %v6964_v1, 0 }
 0x648   :  { %v9966_v9 = vld [vmem:[#allocation3 + $0x100] sm:$0xff]  ;;  %v3847_v31 = vadd.f32 %v9725_v32, %v3779_v21  ;;  %5070 = vmatpush.bf16.msra.mxu2 %v5061_v7  ;;  %v10681_v7 = vld [vmem:[#allocation66_spill] sm:$0xff] }
 0x649   :  { %v9968_v43 = vld [vmem:[#allocation3 + $0x102] sm:$0xff] }
 0x64a   :  { %v3911_v34 = vmax.f32 %v3847_v31, 0.0 }
 0x64b   :  { %v4010_v21 = vld [vmem:[#allocation2 + $0x1c0] ss:$2 sm:$0xff]  ;;  %v4042_v30 = vld [vmem:[#allocation2 + $0x1c1] ss:$2 sm:$0xff] }
 0x64c   :  { %3976 = vst.msk [vmem:[#allocation2 + $0x1d0] sm:$0xff] %vm3917_vm3, %v3911_v34 }
 0x64d   :  { %v3708_v57 = vpop.f32.mrf.mxu0 }
 0x64e   :  { %v3780_v51 = vadd.f32 %v3708_v57, %v3350_v33  ;;  %v10674_v33 = vld [vmem:[#allocation62_spill] sm:$0xff]  ;;  %v2492_v57 = vadd.f32 %v9524_v19, %v10675_v16  ;;  %v6973_v19 = vld [vmem:[%s10493_s3 + $0x20] sm:$0xf] }
 0x64f   :  { %v3352_v54 = vadd.f32 %v10674_v33, %v2922_v14  ;;  %v10676_v14 = vld [vmem:[#allocation39_spill] sm:$0xff]  ;;  %v10679_v16 = vld [vmem:[#allocation65_spill] sm:$0xff] }
 0x650   :  { %v3848_v63 = vadd.f32 %v9725_v32, %v3780_v51  ;;  %v4123_v51 = vmax.f32 %v4010_v21, %v4042_v30  ;;  %v10678_v30 = vld [vmem:[#allocation63_spill] sm:$0xff] }
 0x652   :  { %v3912_v39 = vmax.f32 %v3848_v63, 0.0 }
 0x654   :  { %3977 = vst.msk [vmem:[#allocation2 + $0x1d8] sm:$0xff] %vm3917_vm3, %v3912_v39 }
 0x655   :  { %v3711_v46 = vpop.f32.mrf.mxu0 }
 0x656   :  { %v3781_v23 = vadd.f32 %v3711_v46, %v3351_v40  ;;  %v2923_v40 = vadd.f32 %v9526_v10, %v2492_v57  ;;  %v5179_v46 = vsel %vm4290_vm2, %v6973_v19, 0  ;;  %v6955_v10 = vld [vmem:[%s10493_s3 + $0x18] sm:$0xf] }
 0x657   :  { %5188 = vmatpush.bf16.msra.mxu3 %v5179_v46  ;;  %v4943_v44 = vsel %vm4290_vm2, %v6955_v10, 0 }
 0x658   :  { %v3849_v18 = vadd.f32 %v9725_v32, %v3781_v23  ;;  %4952 = vmatpush.bf16.msrb.mxu1 %v4943_v44 }
 0x65a   :  { %v3913_v31 = vmax.f32 %v3849_v18, 0.0  ;;  %v10677_v18 = vld [vmem:[#allocation64_spill] sm:$0xff] }
 0x65b   :  { %v4074_v22 = vld [vmem:[#allocation2 + $0x1d0] ss:$2 sm:$0xff]  ;;  %v4106_v34 = vld [vmem:[#allocation2 + $0x1d1] ss:$2 sm:$0xff]  ;;  %v2493_v21 = vadd.f32 %v10677_v18, %v10676_v14 }
 0x65c   :  { %v4139_v6 = vmax.f32 %v4074_v22, %v4106_v34  ;;  %3978 = vst.msk [vmem:[#allocation2 + $0x1e0] sm:$0xff] %vm3917_vm3, %v3913_v31  ;;  %v3353_v31 = vadd.f32 %v10678_v30, %v2923_v40  ;;  %v10011_v22 = vpop.f32.mrf.mxu1  ;;  %v10014_v34 = vpop.f32.mrf.mxu2 }
 0x65d   :  { %v3713_v63 = vpop.f32.mrf.mxu0  ;;  %v2924_v57 = vadd.f32 %v10679_v16, %v2493_v21  ;;  %v4655_v16 = vld [vmem:[#allocation3 + $0x11] sm:$0xff] }
 0x65e   :  { %v4155_v39 = vmax.f32 %v4123_v51, %v4139_v6  ;;  %v3782_v61 = vadd.f32 %v3713_v63, %v3352_v54  ;;  %v10017_v51 = vpop.f32.mrf.mxu3 }
 0x65f   :  { %10680 = vst [vmem:[#allocation12_spill] sm:$0xff] %v10017_v51  ;;  %v3354_v46 = vadd.f32 %v10681_v7, %v2924_v57  ;;  %v7198_v57 = vld [vmem:[#allocation3 + $0x21] sm:$0xff] }
 0x660   :  { %4213 = vst.msk [vmem:[#allocation3 + $0x111] sm:$0xff] %vm3917_vm3, %v4155_v39  ;;  %v3850_v27 = vadd.f32 %v9725_v32, %v3782_v61  ;;  %v4671_v7 = vpack.c.bf16 %v7198_v57, %v4655_v16  ;;  %v7199_v51 = vld [vmem:[#allocation3 + $0x22] sm:$0xff]  ;;  %v10682_v57 = vpack.c.bf16 %v9586_v62, %v9548_v5 }
 0x662   :  { %v3914_v23 = vmax.f32 %v3850_v27, 0.0 }
 0x664   :  { %3979 = vst.msk [vmem:[#allocation2 + $0x1e8] sm:$0xff] %vm3917_vm3, %v3914_v23 }
 0x665   :  { %v3716_v33 = vpop.f32.mrf.mxu0 }
 0x666   :  { %v3783_v54 = vadd.f32 %v3716_v33, %v3353_v31 }
 0x667   :  { %v10019_v6 = vld [vmem:[#allocation3 + $0x111] sm:$0xff]  ;;  %v4328_v10 = vpop.f32.mrf.mxu1 }
 0x668   :  { %v10021_v63 = vld [vmem:[#allocation3 + $0x110] sm:$0xff]  ;;  %v3851_v61 = vadd.f32 %v9725_v32, %v3783_v54  ;;  %v10028_v40 = vpack.c.bf16 %v10019_v6, %v9964_v2 }
 0x669   :  { %v10023_v39 = vld [vmem:[#allocation3 + $0x112] sm:$0xff]  ;;  %v10032_v27 = vpack.c.bf16 %v10021_v63, %v9966_v9 }
 0x66a   :  { %v10036_v1 = vpack.c.bf16 %v10023_v39, %v9968_v43  ;;  %v3915_v19 = vmax.f32 %v3851_v61, 0.0  ;;  %6910 = vmatmul.msk.bf16.gmra.mxu1 %vm3917_vm3, %v10028_v40  ;;  %v4537_v54 = vld [vmem:[#allocation3 + $0x10] sm:$0xff]  ;;  %v7197_v61 = vld [vmem:[#allocation3 + $0x20] sm:$0xff] }
 0x66b   :  { %6918 = vmatmul.msk.bf16.gmra.mxu2 %vm3917_vm3, %v10032_v27  ;;  %v4553_v56 = vpack.c.bf16 %v7197_v61, %v4537_v54  ;;  %v4012_v0 = vld [vmem:[#allocation2 + $0x1e0] ss:$2 sm:$0xff]  ;;  %v4044_v58 = vld [vmem:[#allocation2 + $0x1e1] ss:$2 sm:$0xff] }
 0x66c   :  { %6927 = vmatmul.msk.bf16.gmra.mxu3 %vm3917_vm3, %v10036_v1  ;;  %3980 = vst.msk [vmem:[#allocation2 + $0x1f0] sm:$0xff] %vm3917_vm3, %v3915_v19  ;;  %v4773_v19 = vld [vmem:[#allocation3 + $0x12] sm:$0xff]  ;;  %v7203_v54 = vld [vmem:[#allocation3 + $0x41] sm:$0xff] }
 0x66d   :  { %v3718_v23 = vpop.f32.mrf.mxu0  ;;  %v7205_v61 = vld [vmem:[#allocation3 + $0x42] sm:$0xff] }
 0x66e   :  { %v4404_v44 = vpop.f32.mrf.mxu2  ;;  %v3784_v14 = vadd.f32 %v3718_v23, %v3354_v46  ;;  %v4789_v46 = vpack.c.bf16 %v7199_v51, %v4773_v19  ;;  %v4124_v23 = vmax.f32 %v4012_v0, %v4044_v58  ;;  %v7204_v51 = vld [vmem:[#allocation3 + $0x32] sm:$0xff] }
 0x66f   :  { %v4405_v18 = vadd.f32 %v4404_v44, %v4328_v10  ;;  %v4506_v21 = vpop.f32.mrf.mxu3  ;;  %v10057_v58 = vld [vmem:[#allocation3 + $0x51] sm:$0xff]  ;;  %v10070_v19 = vpop.f32.mrf.mxu1 }
 0x670   :  { %v3852_v30 = vadd.f32 %v9725_v32, %v3784_v14  ;;  %v4673_v0 = vpack.c.bf16 %v9625_v11, %v10057_v58  ;;  %v10078_v11 = vld [vmem:[#allocation3 + $0x82] sm:$0xff] }
 0x671   :  { %v10047_v31 = vadd.f32 %v4506_v21, %v4405_v18  ;;  %v7200_v18 = vld [vmem:[#allocation3 + $0x30] sm:$0xff]  ;;  %v7201_v21 = vld [vmem:[#allocation3 + $0x40] sm:$0xff] }
 0x672   :  { %v3916_v33 = vmax.f32 %v3852_v30, 0.0  ;;  %v4554_v30 = vpack.c.bf16 %v7201_v21, %v7200_v18 }
 0x674   :  { %3981 = vst.msk [vmem:[#allocation2 + $0x1f8] sm:$0xff] %vm3917_vm3, %v3916_v33  ;;  %v7202_v33 = vld [vmem:[#allocation3 + $0x31] sm:$0xff] }
 0x675   :  { %v4672_v16 = vpack.c.bf16 %v7203_v54, %v7202_v33 }
 0x677   :  { %v10080_v5 = vpop.f32.mrf.mxu3 }
 0x67a   :  { %6929 = vmatmul.msk.bf16.vlgmr.msra.gmra.mxu1 %vm3917_vm3, %v4553_v56  ;;  %v4790_v56 = vpack.c.bf16 %v7205_v61, %v7204_v51 }
 0x67b   :  { %6938 = vmatmul.msk.bf16.vlgmr.msrb.gmra.mxu2 %vm3917_vm3, %v4671_v7  ;;  %v4076_v32 = vld [vmem:[#allocation2 + $0x1f0] ss:$2 sm:$0xff]  ;;  %v4108_v10 = vld [vmem:[#allocation2 + $0x1f1] ss:$2 sm:$0xff]  ;;  %v10683_v7 = vpack.c.bf16 %v9588_v15, %v9550_v24  ;;  %v4792_v15 = vpack.c.bf16 %v10078_v11, %v9633_v50  ;;  %v10686_v50 = vpack.c.bf16 %v9762_v17, %v9710_v47  ;;  %v10690_v47 = vpack.c.bf16 %v9966_v9, %v9915_v53 }
 0x67c   :  { %6947 = vmatmul.msk.bf16.vlgmr.msrb.gmra.mxu3 %vm3917_vm3, %v4789_v46  ;;  %v4140_v44 = vmax.f32 %v4076_v32, %v4108_v10  ;;  %v10072_v46 = vpop.f32.mrf.mxu2  ;;  %v10074_v32 = vld [vmem:[#allocation3 + $0x80] sm:$0xff] }
 0x67d   :  { %v10076_v10 = vld [vmem:[#allocation3 + $0x81] sm:$0xff]  ;;  %v4556_v62 = vpack.c.bf16 %v10074_v32, %v9631_v49  ;;  %v10684_v49 = vpack.c.bf16 %v9760_v20, %v9708_v26  ;;  %v10688_v26 = vpack.c.bf16 %v9870_v48, %v9817_v25  ;;  %v10692_v20 = vpack.c.bf16 %v9968_v43, %v9917_v42 }
 0x67e   :  { %v4156_v14 = vmax.f32 %v4124_v23, %v4140_v44  ;;  %v4674_v24 = vpack.c.bf16 %v10076_v10, %v9629_v12  ;;  %v10685_v12 = vpack.c.bf16 %v9758_v4, %v9706_v35  ;;  %v10689_v35 = vpack.c.bf16 %v9874_v37, %v9821_v36 }
 0x67f   :  { %v10691_v4 = vpack.c.bf16 %v9964_v2, %v9913_v59 }
 0x680   :  { %4214 = vst.msk [vmem:[#allocation3 + $0x121] sm:$0xff] %vm3917_vm3, %v4156_v14 }
 0x687   :  { %v10135_v36 = vld [vmem:[#allocation3 + $0x121] sm:$0xff] }
 0x688   :  { %v4678_v53 = vpack.c.bf16 %v10135_v36, %v10019_v6 }
 0x68a   :  { %6930 = vmatmul.msk.bf16.gmra.mxu1 %vm3917_vm3, %v4554_v30  ;;  %v10687_v30 = vpack.c.bf16 %v9872_v8, %v9819_v38  ;;  %v10133_v38 = vld [vmem:[#allocation3 + $0x120] sm:$0xff] }
 0x68b   :  { %6939 = vmatmul.msk.bf16.gmra.mxu2 %vm3917_vm3, %v4672_v16  ;;  %v10139_v8 = vld [vmem:[#allocation3 + $0x122] sm:$0xff]  ;;  %v4560_v59 = vpack.c.bf16 %v10133_v38, %v10021_v63 }
 0x68c   :  { %6948 = vmatmul.msk.bf16.gmra.mxu3 %vm3917_vm3, %v4790_v56  ;;  %v4796_v42 = vpack.c.bf16 %v10139_v8, %v10023_v39  ;;  %v10693_v56 = vld [vmem:[#allocation67_spill] sm:$0xff] }
 0x69a   :  { %6931 = vmatmul.msk.bf16.gmra.mxu1 %vm3917_vm3, %v10682_v57  ;;  %v10695_v57 = vld [vmem:[#allocation52_spill] sm:$0xff] }
 0x69b   :  { %6940 = vmatmul.msk.bf16.gmra.mxu2 %vm3917_vm3, %v4673_v0  ;;  %v10694_v0 = vld [vmem:[#allocation56_spill] sm:$0xff] }
 0x69c   :  { %6949 = vmatmul.msk.bf16.gmra.mxu3 %vm3917_vm3, %v10683_v7  ;;  %v10696_v7 = vpack.c.bf16 %v10694_v0, %v10695_v57  ;;  %v5130_v0 = vld [vmem:[#allocation3 + $0x42] sm:$0xff] }
 0x6a7   :  { %v4333_v23 = vpop.f32.mrf.mxu1 }
 0x6aa   :  { %6932 = vmatmul.msk.bf16.gmra.mxu1 %vm3917_vm3, %v4556_v62  ;;  %v10697_v62 = vld [vmem:[#allocation57_spill] sm:$0xff] }
 0x6ab   :  { %6941 = vmatmul.msk.bf16.gmra.mxu2 %vm3917_vm3, %v4674_v24  ;;  %v10698_v24 = vld [vmem:[#allocation53_spill] sm:$0xff] }
 0x6ac   :  { %6950 = vmatmul.msk.bf16.gmra.mxu3 %vm3917_vm3, %v4792_v15  ;;  %v10699_v15 = vpack.c.bf16 %v10697_v62, %v10698_v24  ;;  %v10707_v62 = vld [vmem:[#allocation10_spill] sm:$0xff]  ;;  %v10708_v24 = vld [vmem:[#allocation72_spill] sm:$0xff] }
 0x6ae   :  { %v4409_v44 = vpop.f32.mrf.mxu2 }
 0x6af   :  { %v4410_v14 = vadd.f32 %v4409_v44, %v4333_v23  ;;  %v4511_v18 = vpop.f32.mrf.mxu3  ;;  %v10129_v17 = vpop.f32.mrf.mxu1  ;;  %v10700_v23 = vld [vmem:[#allocation58_spill] sm:$0xff] }
 0x6b0   :  { %v10701_v44 = vld [vmem:[#allocation54_spill] sm:$0xff] }
 0x6b1   :  { %v10091_v21 = vadd.f32 %v4511_v18, %v4410_v14  ;;  %v10702_v14 = vpack.c.bf16 %v10700_v23, %v10701_v44 }
 0x6b6   :  { %v10131_v25 = vpop.f32.mrf.mxu2 }
 0x6b7   :  { %v10137_v48 = vpop.f32.mrf.mxu3 }
 0x6ba   :  { %6933 = vmatmul.msk.bf16.gmra.mxu1 %vm3917_vm3, %v10684_v49  ;;  %v10703_v49 = vld [vmem:[#allocation68_spill] sm:$0xff] }
 0x6bb   :  { %6942 = vmatmul.msk.bf16.gmra.mxu2 %vm3917_vm3, %v10685_v12  ;;  %v10704_v12 = vld [vmem:[#allocation69_spill] sm:$0xff] }
 0x6bc   :  { %6951 = vmatmul.msk.bf16.gmra.mxu3 %vm3917_vm3, %v10686_v50  ;;  %v4382_v50 = vadd.f32 %v10704_v12, %v10703_v49  ;;  %v10709_v49 = vld [vmem:[#allocation11_spill] sm:$0xff] }
 0x6ca   :  { %6934 = vmatmul.msk.bf16.gmra.mxu1 %vm3917_vm3, %v10687_v30 }
 0x6cb   :  { %6943 = vmatmul.msk.bf16.gmra.mxu2 %vm3917_vm3, %v10688_v26 }
 0x6cc   :  { %6952 = vmatmul.msk.bf16.gmra.mxu3 %vm3917_vm3, %v10689_v35 }
 0x6da   :  { %6935 = vmatmul.msk.bf16.gmra.mxu1 %vm3917_vm3, %v10690_v47 }
 0x6db   :  { %6944 = vmatmul.msk.bf16.gmra.mxu2 %vm3917_vm3, %v10691_v4  ;;  %v10705_v4 = vld [vmem:[#allocation70_spill] sm:$0xff] }
 0x6dc   :  { %6953 = vmatmul.msk.bf16.gmra.mxu3 %vm3917_vm3, %v10692_v20  ;;  %v4522_v20 = vadd.f32 %v10705_v4, %v4382_v50 }
 0x6e7   :  { %v4338_v37 = vpop.f32.mrf.mxu1 }
 0x6ea   :  { %6936 = vmatmul.msk.bf16.gmra.mxu1 %vm3917_vm3, %v4560_v59 }
 0x6eb   :  { %6945 = vmatmul.msk.bf16.gmra.mxu2 %vm3917_vm3, %v4678_v53  ;;  %v4895_v53 = vld [vmem:[#allocation3 + $0x50] sm:$0xff] }
 0x6ec   :  { %6954 = vmatmul.msk.bf16.gmra.mxu3 %vm3917_vm3, %v4796_v42 }
 0x6ee   :  { %v4414_v2 = vpop.f32.mrf.mxu2 }
 0x6ef   :  { %v4415_v9 = vadd.f32 %v4414_v2, %v4338_v37  ;;  %v4516_v43 = vpop.f32.mrf.mxu3  ;;  %v4340_v33 = vpop.f32.mrf.mxu1 }
 0x6f1   :  { %v10150_v54 = vadd.f32 %v4516_v43, %v4415_v9  ;;  %v5131_v9 = vld [vmem:[#allocation3 + $0x52] sm:$0xff] }
 0x6f2   :  { %v5145_v57 = vpack.c.bf16 %v5131_v9, %v5130_v0 }
 0x6f6   :  { %v4416_v16 = vpop.f32.mrf.mxu2 }
 0x6f7   :  { %v4417_v63 = vadd.f32 %v4416_v16, %v4340_v33  ;;  %v4518_v51 = vpop.f32.mrf.mxu3  ;;  %v4599_v61 = vpop.f32.mrf.mxu1  ;;  %v4894_v33 = vld [vmem:[#allocation3 + $0x40] sm:$0xff] }
 0x6f8   :  { %v4639_v39 = vadd.f32 %v4599_v61, %v10693_v56  ;;  %v5012_v16 = vld [vmem:[#allocation3 + $0x41] sm:$0xff]  ;;  %v4909_v56 = vpack.c.bf16 %v4895_v53, %v4894_v33 }
 0x6f9   :  { %v10152_v6 = vadd.f32 %v4518_v51, %v4417_v63  ;;  %v10706_v51 = vld [vmem:[#allocation71_spill] sm:$0xff]  ;;  %v5014_v53 = vld [vmem:[#allocation3 + $0x61] sm:$0xff] }
 0x6fa   :  { %6956 = vmatmul.msk.bf16.vlgmr.msrb.gmra.mxu1 %vm3917_vm3, %v10696_v7 }
 0x6fb   :  { %6965 = vmatmul.msk.bf16.vlgmr.msra.gmra.mxu2 %vm3917_vm3, %v10699_v15  ;;  %v4387_v15 = vadd.f32 %v10708_v24, %v10707_v62 }
 0x6fc   :  { %6974 = vmatmul.msk.bf16.vlgmr.msra.gmra.mxu3 %vm3917_vm3, %v10702_v14 }
 0x6fd   :  { %v4524_v12 = vadd.f32 %v10709_v49, %v4387_v15 }
 0x6fe   :  { %v4717_v18 = vpop.f32.mrf.mxu2 }
 0x6ff   :  { %v4757_v30 = vadd.f32 %v4717_v18, %v4639_v39  ;;  %v4835_v26 = vpop.f32.mrf.mxu3  ;;  %v4601_v35 = vpop.f32.mrf.mxu1  ;;  %v5027_v39 = vpack.c.bf16 %v10057_v58, %v5012_v16  ;;  %v5132_v16 = vld [vmem:[#allocation3 + $0x62] sm:$0xff] }
 0x700   :  { %v4640_v37 = vadd.f32 %v4601_v35, %v4522_v20  ;;  %v5133_v20 = vld [vmem:[#allocation3 + $0x72] sm:$0xff] }
 0x701   :  { %v10169_v47 = vadd.f32 %v4835_v26, %v4757_v30  ;;  %v4897_v30 = vld [vmem:[#allocation3 + $0x70] sm:$0xff] }
 0x702   :  { %v5015_v26 = vld [vmem:[#allocation3 + $0x71] sm:$0xff] }
 0x703   :  { %v5028_v33 = vpack.c.bf16 %v5015_v26, %v5014_v53 }
 0x706   :  { %v4719_v59 = vpop.f32.mrf.mxu2 }
 0x707   :  { %v4758_v42 = vadd.f32 %v4719_v59, %v4640_v37  ;;  %v4837_v2 = vpop.f32.mrf.mxu3  ;;  %v4604_v43 = vpop.f32.mrf.mxu1  ;;  %v4896_v59 = vld [vmem:[#allocation3 + $0x60] sm:$0xff] }
 0x708   :  { %v4641_v61 = vadd.f32 %v4604_v43, %v10706_v51  ;;  %v4910_v43 = vpack.c.bf16 %v4897_v30, %v4896_v59  ;;  %v5146_v51 = vpack.c.bf16 %v5133_v20, %v5132_v16 }
 0x709   :  { %v10172_v63 = vadd.f32 %v4837_v2, %v4758_v42  ;;  %v10710_v2 = vld [vmem:[#allocation13_spill] sm:$0xff] }
 0x70a   :  { %6957 = vmatmul.msk.bf16.gmra.mxu1 %vm3917_vm3, %v4909_v56  ;;  %v4392_v56 = vadd.f32 %v9811_v13, %v9808_v45 }
 0x70b   :  { %6966 = vmatmul.msk.bf16.gmra.mxu2 %vm3917_vm3, %v5027_v39 }
 0x70c   :  { %6975 = vmatmul.msk.bf16.gmra.mxu3 %vm3917_vm3, %v5145_v57  ;;  %v4526_v62 = vadd.f32 %v9815_v3, %v4392_v56 }
 0x70e   :  { %v4722_v7 = vpop.f32.mrf.mxu2 }
 0x70f   :  { %v4759_v23 = vadd.f32 %v4722_v7, %v4641_v61  ;;  %v4840_v44 = vpop.f32.mrf.mxu3  ;;  %v4606_v14 = vpop.f32.mrf.mxu1 }
 0x710   :  { %v4642_v58 = vadd.f32 %v4606_v14, %v4524_v12  ;;  %v5135_v12 = vld [vmem:[#allocation3 + $0x92] sm:$0xff] }
 0x711   :  { %v10181_v18 = vadd.f32 %v4840_v44, %v4759_v23  ;;  %v4899_v23 = vld [vmem:[#allocation3 + $0x90] sm:$0xff]  ;;  %v5147_v26 = vpack.c.bf16 %v5135_v12, %v10078_v11 }
 0x712   :  { %v5017_v44 = vld [vmem:[#allocation3 + $0x91] sm:$0xff]  ;;  %v4911_v45 = vpack.c.bf16 %v4899_v23, %v10074_v32 }
 0x713   :  { %v5029_v13 = vpack.c.bf16 %v5017_v44, %v10076_v10  ;;  %v7158_v12 = vld [vmem:[%s10495_s5 + $0x10] sm:$0xff] }
 0x714   :  { %5497 = vmatpush.bf16.msrb.mxu3 %v7158_v12 }
 0x716   :  { %v4724_v50 = vpop.f32.mrf.mxu2 }
 0x717   :  { %v4760_v35 = vadd.f32 %v4724_v50, %v4642_v58  ;;  %v4842_v4 = vpop.f32.mrf.mxu3  ;;  %v4609_v37 = vpop.f32.mrf.mxu1 }
 0x718   :  { %v4643_v9 = vadd.f32 %v4609_v37, %v10710_v2 }
 0x719   :  { %v10184_v42 = vadd.f32 %v4842_v4, %v4760_v35  ;;  %v4397_v35 = vadd.f32 %v9908_v55, %v9905_v41  ;;  %v10711_v41 = vld [vmem:[#allocation9_spill] sm:$0xff] }
 0x71a   :  { %6958 = vmatmul.msk.bf16.gmra.mxu1 %vm3917_vm3, %v4910_v43  ;;  %v10712_v55 = vld [vmem:[#allocation33_spill] sm:$0xff] }
 0x71b   :  { %6967 = vmatmul.msk.bf16.gmra.mxu2 %vm3917_vm3, %v5028_v33  ;;  %v4528_v32 = vadd.f32 %v9911_v28, %v4397_v35 }
 0x71c   :  { %6976 = vmatmul.msk.bf16.gmra.mxu3 %vm3917_vm3, %v5146_v51 }
 0x71e   :  { %v4727_v61 = vpop.f32.mrf.mxu2 }
 0x71f   :  { %v4761_v39 = vadd.f32 %v4727_v61, %v4643_v9  ;;  %v4845_v0 = vpop.f32.mrf.mxu3  ;;  %v4611_v57 = vpop.f32.mrf.mxu1 }
 0x720   :  { %v4644_v24 = vadd.f32 %v4611_v57, %v4526_v62  ;;  %v10714_v57 = vld [vmem:[#allocation32_spill] sm:$0xff]  ;;  %v10715_v62 = vld [vmem:[#allocation31_spill] sm:$0xff] }
 0x721   :  { %v10192_v7 = vadd.f32 %v4845_v0, %v4761_v39  ;;  %v10713_v0 = vld [vmem:[#allocation14_spill] sm:$0xff] }
 0x726   :  { %v4729_v15 = vpop.f32.mrf.mxu2 }
 0x727   :  { %v4762_v14 = vadd.f32 %v4729_v15, %v4644_v24  ;;  %v4847_v49 = vpop.f32.mrf.mxu3  ;;  %v4614_v58 = vpop.f32.mrf.mxu1  ;;  %v7157_v24 = vld [vmem:[%s10495_s5 + $0x8] sm:$0xff] }
 0x728   :  { %v4645_v30 = vadd.f32 %v4614_v58, %v9850_v60  ;;  %5432 = vmatpush.bf16.msra.mxu1 %v7157_v24 }
 0x729   :  { %v10195_v50 = vadd.f32 %v4847_v49, %v4762_v14  ;;  %v7156_v49 = vld [vmem:[%s10495_s5] sm:$0xff] }
 0x72a   :  { %6959 = vmatmul.msk.bf16.gmra.mxu1 %vm3917_vm3, %v4911_v45  ;;  %5461 = vmatpush.bf16.msrb.mxu2 %v7156_v49 }
 0x72b   :  { %6968 = vmatmul.msk.bf16.gmra.mxu2 %vm3917_vm3, %v5029_v13 }
 0x72c   :  { %6977 = vmatmul.msk.bf16.gmra.mxu3 %vm3917_vm3, %v5147_v26 }
 0x72e   :  { %v4732_v3 = vpop.f32.mrf.mxu2 }
 0x72f   :  { %v4763_v4 = vadd.f32 %v4732_v3, %v4645_v30  ;;  %v4850_v20 = vpop.f32.mrf.mxu3  ;;  %v4616_v37 = vpop.f32.mrf.mxu1 }
 0x730   :  { %v4646_v10 = vadd.f32 %v4616_v37, %v4528_v32  ;;  %v4907_v32 = vld [vmem:[#allocation3 + $0x130] sm:$0xff] }
 0x731   :  { %v10206_v60 = vadd.f32 %v4850_v20, %v4763_v4 }
 0x736   :  { %v4734_v59 = vpop.f32.mrf.mxu2 }
 0x737   :  { %v4764_v11 = vadd.f32 %v4734_v59, %v4646_v10  ;;  %v4852_v53 = vpop.f32.mrf.mxu3  ;;  %v4619_v2 = vpop.f32.mrf.mxu1 }
 0x738   :  { %v4647_v43 = vadd.f32 %v4619_v2, %v9944_v52 }
 0x739   :  { %v10209_v9 = vadd.f32 %v4852_v53, %v4764_v11  ;;  %v4915_v11 = vpack.c.bf16 %v4907_v32, %v10133_v38 }
 0x73a   :  { %6960 = vmatmul.msk.bf16.gmra.mxu1 %vm3917_vm3, %v9831_v29 }
 0x73b   :  { %6969 = vmatmul.msk.bf16.gmra.mxu2 %vm3917_vm3, %v10711_v41 }
 0x73c   :  { %6978 = vmatmul.msk.bf16.gmra.mxu3 %vm3917_vm3, %v10712_v55 }
 0x73e   :  { %v4737_v33 = vpop.f32.mrf.mxu2 }
 0x73f   :  { %v4765_v28 = vadd.f32 %v4737_v33, %v4647_v43  ;;  %v4855_v16 = vpop.f32.mrf.mxu3  ;;  %v10218_v51 = vpop.f32.mrf.mxu1 }
 0x741   :  { %v10220_v61 = vadd.f32 %v4855_v16, %v4765_v28 }
 0x746   :  { %v10222_v56 = vpop.f32.mrf.mxu2 }
 0x747   :  { %v10224_v39 = vpop.f32.mrf.mxu3  ;;  %v4624_v52 = vpop.f32.mrf.mxu1 }
 0x748   :  { %v4649_v29 = vadd.f32 %v4624_v52, %v10047_v31 }
 0x74a   :  { %6961 = vmatmul.msk.bf16.gmra.mxu1 %vm3917_vm3, %v10713_v0 }
 0x74b   :  { %6970 = vmatmul.msk.bf16.gmra.mxu2 %vm3917_vm3, %v10714_v57 }
 0x74c   :  { %6979 = vmatmul.msk.bf16.gmra.mxu3 %vm3917_vm3, %v10715_v62 }
 0x74e   :  { %v4742_v15 = vpop.f32.mrf.mxu2 }
 0x74f   :  { %v4767_v23 = vadd.f32 %v4742_v15, %v4649_v29  ;;  %v4860_v44 = vpop.f32.mrf.mxu3  ;;  %v10236_v14 = vpop.f32.mrf.mxu1  ;;  %v10284_v29 = vld [vmem:[%s10494_s4] ss:$0 sm:$0xff] }
 0x751   :  { %v10238_v31 = vadd.f32 %v4860_v44, %v4767_v23 }
 0x756   :  { %v10246_v58 = vpop.f32.mrf.mxu2 }
 0x757   :  { %v10248_v30 = vpop.f32.mrf.mxu3  ;;  %v4629_v45 = vpop.f32.mrf.mxu1 }
 0x758   :  { %v4651_v13 = vadd.f32 %v4629_v45, %v10091_v21  ;;  %v5025_v21 = vld [vmem:[#allocation3 + $0x131] sm:$0xff] }
 0x75a   :  { %6962 = vmatmul.msk.bf16.gmra.mxu1 %vm3917_vm3, %v10032_v27  ;;  %v5143_v27 = vld [vmem:[#allocation3 + $0x132] sm:$0xff] }
 0x75b   :  { %6971 = vmatmul.msk.bf16.gmra.mxu2 %vm3917_vm3, %v10028_v40  ;;  %v5151_v53 = vpack.c.bf16 %v5143_v27, %v10139_v8 }
 0x75c   :  { %6980 = vmatmul.msk.bf16.gmra.mxu3 %vm3917_vm3, %v10036_v1  ;;  %v5033_v1 = vpack.c.bf16 %v5025_v21, %v10135_v36 }
 0x75e   :  { %v4747_v26 = vpop.f32.mrf.mxu2 }
 0x75f   :  { %v4769_v3 = vadd.f32 %v4747_v26, %v4651_v13  ;;  %v4865_v35 = vpop.f32.mrf.mxu3  ;;  %v10257_v4 = vpop.f32.mrf.mxu1 }
 0x761   :  { %v10259_v20 = vadd.f32 %v4865_v35, %v4769_v3 }
 0x766   :  { %v10261_v37 = vpop.f32.mrf.mxu2 }
 0x767   :  { %v10263_v10 = vpop.f32.mrf.mxu3  ;;  %v4634_v59 = vpop.f32.mrf.mxu1 }
 0x768   :  { %v4653_v40 = vadd.f32 %v4634_v59, %v10150_v54 }
 0x76a   :  { %6963 = vmatmul.msk.bf16.gmra.mxu1 %vm3917_vm3, %v4915_v11 }
 0x76b   :  { %6972 = vmatmul.msk.bf16.gmra.mxu2 %vm3917_vm3, %v5033_v1 }
 0x76c   :  { %6981 = vmatmul.msk.bf16.gmra.mxu3 %vm3917_vm3, %v5151_v53 }
 0x76e   :  { %v4752_v2 = vpop.f32.mrf.mxu2 }
 0x76f   :  { %v4771_v43 = vadd.f32 %v4752_v2, %v4653_v40  ;;  %v4870_v41 = vpop.f32.mrf.mxu3  ;;  %v10272_v55 = vpop.f32.mrf.mxu1 }
 0x771   :  { %v10274_v33 = vadd.f32 %v4870_v41, %v4771_v43 }
 0x776   :  { %v10276_v54 = vpop.f32.mrf.mxu2 }
 0x777   :  { %v10278_v38 = vpop.f32.mrf.mxu3  ;;  %v4954_v36 = vpop.f32.mrf.mxu1 }
 0x778   :  { %v4994_v8 = vadd.f32 %v4954_v36, %v10169_v47 }
 0x77e   :  { %v5072_v28 = vpop.f32.mrf.mxu2 }
 0x77f   :  { %v5112_v16 = vadd.f32 %v5072_v28, %v4994_v8  ;;  %v5190_v52 = vpop.f32.mrf.mxu3  ;;  %v4956_v0 = vpop.f32.mrf.mxu1 }
 0x780   :  { %v4995_v15 = vadd.f32 %v4956_v0, %v10172_v63 }
 0x781   :  { %v5230_v57 = vadd.f32 %v5190_v52, %v5112_v16 }
 0x783   :  { %v5250_v62 = vadd.f32 %v10284_v29, %v5230_v57 }
 0x785   :  { %v5266_v24 = vmax.f32 %v5250_v62, 0.0 }
 0x786   :  { %v5074_v23 = vpop.f32.mrf.mxu2 }
 0x787   :  { %5283 = vst.msk [vmem:[#allocation4] sm:$0xff] %vm5282_vm5, %v5266_v24  ;;  %v5113_v47 = vadd.f32 %v5074_v23, %v4995_v15  ;;  %v5192_v44 = vpop.f32.mrf.mxu3  ;;  %v4959_v49 = vpop.f32.mrf.mxu1 }
 0x788   :  { %v4996_v26 = vadd.f32 %v4959_v49, %v10181_v18 }
 0x789   :  { %v5231_v12 = vadd.f32 %v5192_v44, %v5113_v47 }
 0x78b   :  { %v5251_v45 = vadd.f32 %v10284_v29, %v5231_v12 }
 0x78d   :  { %v5267_v13 = vmax.f32 %v5251_v45, 0.0 }
 0x78e   :  { %v5077_v3 = vpop.f32.mrf.mxu2  ;;  %v5299_v59 = vld [vmem:[#allocation4] ss:$2 sm:$0xf]  ;;  %v5315_v40 = vld [vmem:[#allocation4 + $0x1] ss:$2 sm:$0xf] }
 0x78f   :  { %5284 = vst.msk [vmem:[#allocation4 + $0x8] sm:$0xff] %vm5282_vm5, %v5267_v13  ;;  %v5114_v35 = vadd.f32 %v5077_v3, %v4996_v26  ;;  %v5195_v32 = vpop.f32.mrf.mxu3  ;;  %v4961_v21 = vpop.f32.mrf.mxu1  ;;  %v5362_v41 = vmax.f32 %v5299_v59, %v5315_v40 }
 0x790   :  { %v4997_v1 = vadd.f32 %v4961_v21, %v10184_v42 }
 0x791   :  { %v5232_v27 = vadd.f32 %v5195_v32, %v5114_v35 }
 0x793   :  { %v5252_v63 = vadd.f32 %v10284_v29, %v5232_v27 }
 0x795   :  { %v5268_v11 = vmax.f32 %v5252_v63, 0.0 }
 0x796   :  { %v5331_v53 = vld [vmem:[#allocation4 + $0x8] ss:$2 sm:$0xf]  ;;  %v5347_v2 = vld [vmem:[#allocation4 + $0x9] ss:$2 sm:$0xf]  ;;  %v5079_v43 = vpop.f32.mrf.mxu2 }
 0x797   :  { %v5370_v36 = vmax.f32 %v5331_v53, %v5347_v2  ;;  %5285 = vst.msk [vmem:[#allocation4 + $0x10] sm:$0xff] %vm5282_vm5, %v5268_v11  ;;  %v5115_v18 = vadd.f32 %v5079_v43, %v4997_v1  ;;  %v5197_v8 = vpop.f32.mrf.mxu3  ;;  %v4964_v28 = vpop.f32.mrf.mxu1 }
 0x798   :  { %v4998_v42 = vadd.f32 %v4964_v28, %v10192_v7 }
 0x799   :  { %v5378_v16 = vmax.f32 %v5362_v41, %v5370_v36  ;;  %v5233_v52 = vadd.f32 %v5197_v8, %v5115_v18 }
 0x79b   :  { %5387 = vst.msk [vmem:[#allocation5] sm:$0xf] %vm5386_vm6, %v5378_v16  ;;  %v5253_v0 = vadd.f32 %v10284_v29, %v5233_v52 }
 0x79d   :  { %v5269_v57 = vmax.f32 %v5253_v0, 0.0 }
 0x79e   :  { %v5082_v62 = vpop.f32.mrf.mxu2  ;;  %v5301_v49 = vld [vmem:[#allocation4 + $0x10] ss:$2 sm:$0xf]  ;;  %v5317_v12 = vld [vmem:[#allocation4 + $0x11] ss:$2 sm:$0xf] }
 0x79f   :  { %5286 = vst.msk [vmem:[#allocation4 + $0x18] sm:$0xff] %vm5282_vm5, %v5269_v57  ;;  %v5116_v24 = vadd.f32 %v5082_v62, %v4998_v42  ;;  %v5200_v15 = vpop.f32.mrf.mxu3  ;;  %v4966_v23 = vpop.f32.mrf.mxu1  ;;  %v5363_v32 = vmax.f32 %v5301_v49, %v5317_v12  ;;  %v10716_v12 = vld [vmem:[#allocation12_spill] sm:$0xff] }
 0x7a0   :  { %v4999_v13 = vadd.f32 %v4966_v23, %v10195_v50 }
 0x7a1   :  { %v5234_v47 = vadd.f32 %v5200_v15, %v5116_v24 }
 0x7a3   :  { %v5254_v44 = vadd.f32 %v10284_v29, %v5234_v47 }
 0x7a5   :  { %v5270_v45 = vmax.f32 %v5254_v44, 0.0 }
 0x7a6   :  { %v5333_v26 = vld [vmem:[#allocation4 + $0x18] ss:$2 sm:$0xf]  ;;  %v5349_v3 = vld [vmem:[#allocation4 + $0x19] ss:$2 sm:$0xf]  ;;  %v5084_v35 = vpop.f32.mrf.mxu2 }
 0x7a7   :  { %v5371_v21 = vmax.f32 %v5333_v26, %v5349_v3  ;;  %5287 = vst.msk [vmem:[#allocation4 + $0x20] sm:$0xff] %vm5282_vm5, %v5270_v45  ;;  %v5117_v7 = vadd.f32 %v5084_v35, %v4999_v13  ;;  %v5202_v27 = vpop.f32.mrf.mxu3  ;;  %v4969_v63 = vpop.f32.mrf.mxu1 }
 0x7a8   :  { %v5000_v53 = vadd.f32 %v4969_v63, %v10206_v60  ;;  %v4402_v60 = vadd.f32 %v10014_v34, %v10011_v22 }
 0x7a9   :  { %v5379_v59 = vmax.f32 %v5363_v32, %v5371_v21  ;;  %v5235_v40 = vadd.f32 %v5202_v27, %v5117_v7 }
 0x7aa   :  { %v4530_v45 = vadd.f32 %v10716_v12, %v4402_v60 }
 0x7ab   :  { %5388 = vst.msk [vmem:[#allocation5 + $0x4] sm:$0xf] %vm5386_vm6, %v5379_v59  ;;  %v5255_v11 = vadd.f32 %v10284_v29, %v5235_v40 }
 0x7ac   :  { %v4648_v13 = vadd.f32 %v10218_v51, %v4530_v45 }
 0x7ad   :  { %v5271_v1 = vmax.f32 %v5255_v11, 0.0 }
 0x7ae   :  { %v5087_v50 = vpop.f32.mrf.mxu2  ;;  %v5303_v8 = vld [vmem:[#allocation4 + $0x20] ss:$2 sm:$0xf]  ;;  %v5319_v28 = vld [vmem:[#allocation4 + $0x21] ss:$2 sm:$0xf]  ;;  %v4766_v3 = vadd.f32 %v10222_v56, %v4648_v13  ;;  %v4407_v56 = vadd.f32 %v10072_v46, %v10070_v19 }
 0x7af   :  { %5288 = vst.msk [vmem:[#allocation4 + $0x28] sm:$0xff] %vm5282_vm5, %v5271_v1  ;;  %v5118_v2 = vadd.f32 %v5087_v50, %v5000_v53  ;;  %v5205_v43 = vpop.f32.mrf.mxu3  ;;  %v4971_v41 = vpop.f32.mrf.mxu1  ;;  %v5364_v62 = vmax.f32 %v5303_v8, %v5319_v28 }
 0x7b0   :  { %v5001_v52 = vadd.f32 %v4971_v41, %v10209_v9  ;;  %v4884_v27 = vadd.f32 %v10224_v39, %v4766_v3  ;;  %v4532_v8 = vadd.f32 %v10080_v5, %v4407_v56 }
 0x7b1   :  { %v5236_v36 = vadd.f32 %v5205_v43, %v5118_v2 }
 0x7b3   :  { %v5256_v18 = vadd.f32 %v10284_v29, %v5236_v36 }
 0x7b5   :  { %v5272_v16 = vmax.f32 %v5256_v18, 0.0 }
 0x7b6   :  { %v5335_v0 = vld [vmem:[#allocation4 + $0x28] ss:$2 sm:$0xf]  ;;  %v5351_v57 = vld [vmem:[#allocation4 + $0x29] ss:$2 sm:$0xf]  ;;  %v5089_v42 = vpop.f32.mrf.mxu2 }
 0x7b7   :  { %v5372_v24 = vmax.f32 %v5335_v0, %v5351_v57  ;;  %5289 = vst.msk [vmem:[#allocation4 + $0x30] sm:$0xff] %vm5282_vm5, %v5272_v16  ;;  %v5119_v15 = vadd.f32 %v5089_v42, %v5001_v52  ;;  %v5207_v23 = vpop.f32.mrf.mxu3  ;;  %v4974_v47 = vpop.f32.mrf.mxu1  ;;  %v4650_v16 = vadd.f32 %v10236_v14, %v4532_v8 }
 0x7b8   :  { %v5002_v22 = vadd.f32 %v4974_v47, %v10220_v61 }
 0x7b9   :  { %v5380_v44 = vmax.f32 %v5364_v62, %v5372_v24  ;;  %v5237_v49 = vadd.f32 %v5207_v23, %v5119_v15  ;;  %v4768_v0 = vadd.f32 %v10246_v58, %v4650_v16 }
 0x7bb   :  { %5389 = vst.msk [vmem:[#allocation5 + $0x8] sm:$0xf] %vm5386_vm6, %v5380_v44  ;;  %v5257_v9 = vadd.f32 %v10284_v29, %v5237_v49  ;;  %v4886_v5 = vadd.f32 %v10248_v30, %v4768_v0 }
 0x7bd   :  { %v5273_v26 = vmax.f32 %v5257_v9, 0.0 }
 0x7be   :  { %v5092_v34 = vpop.f32.mrf.mxu2  ;;  %v5305_v59 = vld [vmem:[#allocation4 + $0x30] ss:$2 sm:$0xf]  ;;  %v5321_v40 = vld [vmem:[#allocation4 + $0x31] ss:$2 sm:$0xf] }
 0x7bf   :  { %5290 = vst.msk [vmem:[#allocation4 + $0x38] sm:$0xff] %vm5282_vm5, %v5273_v26  ;;  %v5120_v35 = vadd.f32 %v5092_v34, %v5002_v22  ;;  %v5210_v32 = vpop.f32.mrf.mxu3  ;;  %v4976_v21 = vpop.f32.mrf.mxu1  ;;  %v5365_v50 = vmax.f32 %v5305_v59, %v5321_v40  ;;  %v7160_v59 = vld [vmem:[%s10495_s5 + $0x20] sm:$0xff] }
 0x7c0   :  { %v5003_v51 = vadd.f32 %v4976_v21, %v4884_v27  ;;  %5572 = vmatpush.bf16.msra.mxu2 %v7160_v59 }
 0x7c1   :  { %v5238_v7 = vadd.f32 %v5210_v32, %v5120_v35 }
 0x7c3   :  { %v5258_v63 = vadd.f32 %v10284_v29, %v5238_v7 }
 0x7c5   :  { %v5274_v11 = vmax.f32 %v5258_v63, 0.0  ;;  %v5401_v63 = vld [vmem:[#allocation5 + $0x1] sm:$0x1] }
 0x7c6   :  { %v5337_v1 = vld [vmem:[#allocation4 + $0x38] ss:$2 sm:$0xf]  ;;  %v5353_v53 = vld [vmem:[#allocation4 + $0x39] ss:$2 sm:$0xf]  ;;  %v5094_v61 = vpop.f32.mrf.mxu2 }
 0x7c7   :  { %v5373_v2 = vmax.f32 %v5337_v1, %v5353_v53  ;;  %5291 = vst.msk [vmem:[#allocation4 + $0x40] sm:$0xff] %vm5282_vm5, %v5274_v11  ;;  %v5121_v43 = vadd.f32 %v5094_v61, %v5003_v51  ;;  %v5212_v41 = vpop.f32.mrf.mxu3  ;;  %v4979_v36 = vpop.f32.mrf.mxu1  ;;  %v5467_v51 = vld [vmem:[#allocation5 + $0x2] sm:$0x1]  ;;  %v5403_v53 = vpack.c.bf16 %v5401_v63, %v5401_v63 }
 0x7c8   :  { %v5004_v19 = vadd.f32 %v4979_v36, %v10238_v31  ;;  %v4412_v31 = vadd.f32 %v10131_v25, %v10129_v17  ;;  %v7159_v17 = vld [vmem:[%s10495_s5 + $0x18] sm:$0xff] }
 0x7c9   :  { %v5381_v39 = vmax.f32 %v5365_v50, %v5373_v2  ;;  %v5239_v18 = vadd.f32 %v5212_v41, %v5121_v43  ;;  %5534 = vmatpush.bf16.msrb.mxu1 %v7159_v17  ;;  %v7162_v17 = vld [vmem:[%s10495_s5 + $0x30] sm:$0xff] }
 0x7ca   :  { %v4534_v34 = vadd.f32 %v10137_v48, %v4412_v31 }
 0x7cb   :  { %5390 = vst.msk [vmem:[#allocation5 + $0xc] sm:$0xf] %vm5386_vm6, %v5381_v39  ;;  %v5259_v28 = vadd.f32 %v10284_v29, %v5239_v18 }
 0x7cc   :  { %v4652_v25 = vadd.f32 %v10257_v4, %v4534_v34  ;;  %v7161_v4 = vld [vmem:[%s10495_s5 + $0x28] sm:$0xff] }
 0x7cd   :  { %v5275_v52 = vmax.f32 %v5259_v28, 0.0  ;;  %5609 = vmatpush.bf16.msra.mxu3 %v7161_v4  ;;  %v5469_v28 = vpack.c.bf16 %v5467_v51, %v5467_v51 }
 0x7ce   :  { %v5097_v46 = vpop.f32.mrf.mxu2  ;;  %v5307_v15 = vld [vmem:[#allocation4 + $0x40] ss:$2 sm:$0xf]  ;;  %v5323_v23 = vld [vmem:[#allocation4 + $0x41] ss:$2 sm:$0xf]  ;;  %v4770_v21 = vadd.f32 %v10261_v37, %v4652_v25 }
 0x7cf   :  { %5292 = vst.msk [vmem:[#allocation4 + $0x48] sm:$0xff] %vm5282_vm5, %v5275_v52  ;;  %v5122_v57 = vadd.f32 %v5097_v46, %v5004_v19  ;;  %v5215_v42 = vpop.f32.mrf.mxu3  ;;  %v4981_v60 = vpop.f32.mrf.mxu1  ;;  %v5366_v12 = vmax.f32 %v5307_v15, %v5323_v23  ;;  %v7163_v25 = vld [vmem:[%s10495_s5 + $0x38] sm:$0xff] }
 0x7d0   :  { %v5005_v14 = vadd.f32 %v4981_v60, %v4886_v5  ;;  %v4888_v37 = vadd.f32 %v10263_v10, %v4770_v21  ;;  %v5410_v60 = vunpack.c.l.b16 %v5403_v53 }
 0x7d1   :  { %v5240_v62 = vadd.f32 %v5215_v42, %v5122_v57 }
 0x7d3   :  { %v5260_v24 = vadd.f32 %v10284_v29, %v5240_v62 }
 0x7d5   :  { %v5276_v47 = vmax.f32 %v5260_v24, 0.0 }
 0x7d6   :  { %v5339_v44 = vld [vmem:[#allocation4 + $0x48] ss:$2 sm:$0xf]  ;;  %v5355_v49 = vld [vmem:[#allocation4 + $0x49] ss:$2 sm:$0xf]  ;;  %v5099_v58 = vpop.f32.mrf.mxu2 }
 0x7d7   :  { %v5374_v45 = vmax.f32 %v5339_v44, %v5355_v49  ;;  %5293 = vst.msk [vmem:[#allocation4 + $0x50] sm:$0xff] %vm5282_vm5, %v5276_v47  ;;  %v5123_v9 = vadd.f32 %v5099_v58, %v5005_v14  ;;  %v5217_v13 = vpop.f32.mrf.mxu3  ;;  %v4984_v26 = vpop.f32.mrf.mxu1  ;;  %v5476_v44 = vunpack.c.l.b16 %v5469_v28 }
 0x7d8   :  { %v5006_v32 = vadd.f32 %v4984_v26, %v10259_v20  ;;  %v5395_v20 = vld [vmem:[#allocation5] sm:$0x1] }
 0x7d9   :  { %v5382_v30 = vmax.f32 %v5366_v12, %v5374_v45  ;;  %v5241_v22 = vadd.f32 %v5217_v13, %v5123_v9  ;;  %v5397_v8 = vpack.c.bf16 %v5395_v20, %v5395_v20 }
 0x7db   :  { %5391 = vst.msk [vmem:[#allocation5 + $0x10] sm:$0xf] %vm5386_vm6, %v5382_v30  ;;  %v5261_v3 = vadd.f32 %v10284_v29, %v5241_v22  ;;  %v5440_v31 = vunpack.c.l.b16 %v5397_v8 }
 0x7dd   :  { %v5277_v35 = vmax.f32 %v5261_v3, 0.0 }
 0x7de   :  { %v5102_v7 = vpop.f32.mrf.mxu2  ;;  %v5309_v50 = vld [vmem:[#allocation4 + $0x50] ss:$2 sm:$0xf]  ;;  %v5325_v2 = vld [vmem:[#allocation4 + $0x51] ss:$2 sm:$0xf] }
 0x7df   :  { %5294 = vst.msk [vmem:[#allocation4 + $0x58] sm:$0xff] %vm5282_vm5, %v5277_v35  ;;  %v5124_v48 = vadd.f32 %v5102_v7, %v5006_v32  ;;  %v5220_v27 = vpop.f32.mrf.mxu3  ;;  %v4986_v40 = vpop.f32.mrf.mxu1  ;;  %v5367_v10 = vmax.f32 %v5309_v50, %v5325_v2  ;;  %v7164_v35 = vld [vmem:[%s10495_s5 + $0x40] sm:$0xff]  ;;  %v4654_v32 = vadd.f32 %v10272_v55, %v10152_v6 }
 0x7e0   :  { %v5007_v18 = vadd.f32 %v4986_v40, %v4888_v37  ;;  %v5579_v6 = vld [vmem:[#allocation5 + $0x5] sm:$0x1] }
 0x7e1   :  { %v5242_v11 = vadd.f32 %v5220_v27, %v5124_v48  ;;  %v5504_v48 = vld [vmem:[#allocation5 + $0x3] sm:$0x1]  ;;  %v4772_v59 = vadd.f32 %v10276_v54, %v4654_v32 }
 0x7e2   :  { %v5402_v1 = vld [vmem:[#allocation5 + $0x11] sm:$0x1]  ;;  %v5396_v61 = vld [vmem:[#allocation5 + $0x10] sm:$0x1]  ;;  %v5468_v56 = vld [vmem:[#allocation5 + $0x12] sm:$0x1]  ;;  %v5506_v55 = vpack.c.bf16 %v5504_v48, %v5504_v48 }
 0x7e3   :  { %v5262_v43 = vadd.f32 %v10284_v29, %v5242_v11  ;;  %v5404_v41 = vpack.c.bf16 %v5402_v1, %v5402_v1  ;;  %v5398_v36 = vpack.c.bf16 %v5396_v61, %v5396_v61  ;;  %v5470_v39 = vpack.c.bf16 %v5468_v56, %v5468_v56  ;;  %v5505_v47 = vld [vmem:[#allocation5 + $0x13] sm:$0x1]  ;;  %v5542_v11 = vld [vmem:[#allocation5 + $0x4] sm:$0x1] }
 0x7e4   :  { %v5507_v30 = vpack.c.bf16 %v5505_v47, %v5505_v47  ;;  %v5544_v1 = vpack.c.bf16 %v5542_v11, %v5542_v11  ;;  %v5581_v61 = vpack.c.bf16 %v5579_v6, %v5579_v6  ;;  %v4890_v56 = vadd.f32 %v10278_v38, %v4772_v59 }
 0x7e5   :  { %v5278_v16 = vmax.f32 %v5262_v43, 0.0  ;;  %v5411_v52 = vunpack.c.l.b16 %v5404_v41  ;;  %v5441_v19 = vunpack.c.l.b16 %v5398_v36  ;;  %v5477_v46 = vunpack.c.l.b16 %v5470_v39 }
 0x7e6   :  { %v5341_v0 = vld [vmem:[#allocation4 + $0x58] ss:$2 sm:$0xf]  ;;  %v5357_v57 = vld [vmem:[#allocation4 + $0x59] ss:$2 sm:$0xf]  ;;  %v5104_v42 = vpop.f32.mrf.mxu2  ;;  %v5514_v63 = vunpack.c.l.b16 %v5507_v30  ;;  %v5513_v36 = vunpack.c.l.b16 %v5506_v55 }
 0x7e7   :  { %v5375_v62 = vmax.f32 %v5341_v0, %v5357_v57  ;;  %5295 = vst.msk [vmem:[#allocation4 + $0x60] sm:$0xff] %vm5282_vm5, %v5278_v16  ;;  %v5125_v5 = vadd.f32 %v5104_v42, %v5007_v18  ;;  %v5222_v24 = vpop.f32.mrf.mxu3  ;;  %v5412_v15 = vrot.slane %v5411_v52, 7  ;;  %v5442_v23 = vrot.slane %v5441_v19, 7  ;;  %v4989_v14 = vpop.f32.mrf.mxu1  ;;  %v7167_v30 = vld [vmem:[%s10495_s5 + $0x58] sm:$0xff] }
 0x7e8   :  { %v5478_v49 = vrot.slane %v5477_v46, 7  ;;  %v5008_v7 = vadd.f32 %v4989_v14, %v10274_v33  ;;  %v5515_v51 = vrot.slane %v5514_v63, 7  ;;  %v5551_v0 = vunpack.c.l.b16 %v5544_v1 }
 0x7e9   :  { %v5383_v58 = vmax.f32 %v5367_v10, %v5375_v62  ;;  %v5243_v12 = vadd.f32 %v5222_v24, %v5125_v5  ;;  %v5414_v45 = vsel %vm5413_vm7, %v5412_v15, %v5410_v60  ;;  %v5443_v13 = vsel %vm5413_vm7, %v5442_v23, %v5440_v31 }
 0x7ea   :  { %v5415_v9 = vpack.c.b16 %v5414_v45, %v5414_v45  ;;  %v5479_v26 = vsel %vm5413_vm7, %v5478_v49, %v5476_v44  ;;  %v5444_v34 = vpack.c.b16 %v5443_v13, %v5443_v13  ;;  %v5516_v10 = vsel %vm5413_vm7, %v5515_v51, %v5513_v36  ;;  %v7166_v45 = vld [vmem:[%s10495_s5 + $0x50] sm:$0xff] }
 0x7eb   :  { %5392 = vst.msk [vmem:[#allocation5 + $0x14] sm:$0xf] %vm5386_vm6, %v5383_v58  ;;  %v5263_v22 = vadd.f32 %v10284_v29, %v5243_v12  ;;  %v5480_v3 = vpack.c.b16 %v5479_v26, %v5479_v26  ;;  %v5588_v57 = vunpack.c.l.b16 %v5581_v61  ;;  %v5517_v44 = vpack.c.b16 %v5516_v10, %v5516_v10  ;;  %v7165_v12 = vld [vmem:[%s10495_s5 + $0x48] sm:$0xff] }
 0x7ec   :  { %6988 = vmatmul.msk.bf16.vlgmr.msra.gmra.mxu1 %vm5282_vm5, %v5415_v9  ;;  %6993 = vmatmul.msk.bf16.vlgmr.msrb.gmra.mxu2 %vm5282_vm5, %v5444_v34  ;;  %v5616_v34 = vld [vmem:[#allocation5 + $0x6] sm:$0x1] }
 0x7ed   :  { %v5279_v21 = vmax.f32 %v5263_v22, 0.0  ;;  %7000 = vmatmul.msk.bf16.vlgmr.msrb.gmra.mxu3 %vm5282_vm5, %v5480_v3  ;;  %5646 = vmatpush.bf16.msra.mxu1 %v7162_v17 }
 0x7ee   :  { %v5107_v27 = vpop.f32.mrf.mxu2  ;;  %5683 = vmatpush.bf16.msrb.mxu2 %v7163_v25  ;;  %5721 = vmatpush.bf16.msrb.mxu3 %v7164_v35  ;;  %v5311_v50 = vld [vmem:[#allocation4 + $0x60] ss:$2 sm:$0xf]  ;;  %v5327_v2 = vld [vmem:[#allocation4 + $0x61] ss:$2 sm:$0xf]  ;;  %v5618_v35 = vpack.c.bf16 %v5616_v34, %v5616_v34 }
 0x7ef   :  { %5296 = vst.msk [vmem:[#allocation4 + $0x68] sm:$0xff] %vm5282_vm5, %v5279_v21  ;;  %v5126_v4 = vadd.f32 %v5107_v27, %v5008_v7  ;;  %v5225_v40 = vpop.f32.mrf.mxu3  ;;  %v4991_v20 = vpop.f32.mrf.mxu1  ;;  %v5368_v16 = vmax.f32 %v5311_v50, %v5327_v2  ;;  %v5691_v25 = vld [vmem:[#allocation5 + $0x8] sm:$0x1] }
 0x7f0   :  { %v5009_v18 = vadd.f32 %v4991_v20, %v4890_v56  ;;  %v5693_v7 = vpack.c.bf16 %v5691_v25, %v5691_v25 }
 0x7f1   :  { %v5244_v33 = vadd.f32 %v5225_v40, %v5126_v4  ;;  %v5625_v40 = vunpack.c.l.b16 %v5618_v35  ;;  %v5877_v35 = vld [vmem:[#allocation5 + $0xd] sm:$0x1] }
 0x7f2   :  { %v5543_v37 = vld [vmem:[#allocation5 + $0x14] sm:$0x1]  ;;  %v5580_v53 = vld [vmem:[#allocation5 + $0x15] sm:$0x1]  ;;  %v5617_v24 = vld [vmem:[#allocation5 + $0x16] sm:$0x1]  ;;  %v5700_v20 = vunpack.c.l.b16 %v5693_v7 }
 0x7f3   :  { %v5264_v54 = vadd.f32 %v10284_v29, %v5244_v33  ;;  %v5545_v43 = vpack.c.bf16 %v5543_v37, %v5543_v37  ;;  %v5582_v41 = vpack.c.bf16 %v5580_v53, %v5580_v53  ;;  %v5654_v15 = vld [vmem:[#allocation5 + $0x17] sm:$0x1]  ;;  %v5619_v13 = vpack.c.bf16 %v5617_v24, %v5617_v24 }
 0x7f4   :  { %v5656_v26 = vpack.c.bf16 %v5654_v15, %v5654_v15 }
 0x7f5   :  { %v5280_v39 = vmax.f32 %v5264_v54, 0.0  ;;  %v5552_v8 = vunpack.c.l.b16 %v5545_v43  ;;  %v5589_v28 = vunpack.c.l.b16 %v5582_v41  ;;  %v5626_v3 = vunpack.c.l.b16 %v5619_v13 }
 0x7f6   :  { %v5343_v52 = vld [vmem:[#allocation4 + $0x68] ss:$2 sm:$0xf]  ;;  %v5359_v19 = vld [vmem:[#allocation4 + $0x69] ss:$2 sm:$0xf]  ;;  %v5109_v46 = vpop.f32.mrf.mxu2  ;;  %v5663_v17 = vunpack.c.l.b16 %v5656_v26 }
 0x7f7   :  { %v5376_v38 = vmax.f32 %v5343_v52, %v5359_v19  ;;  %5297 = vst.msk [vmem:[#allocation4 + $0x70] sm:$0xff] %vm5282_vm5, %v5280_v39  ;;  %v5127_v42 = vadd.f32 %v5109_v46, %v5009_v18  ;;  %v5553_v60 = vrot.slane %v5552_v8, 7  ;;  %v5590_v62 = vrot.slane %v5589_v28, 7  ;;  %v5227_v5 = vpop.f32.mrf.mxu3  ;;  %v7168_v39 = vld [vmem:[%s10495_s5 + $0x60] sm:$0xff]  ;;  %v7169_v18 = vld [vmem:[%s10495_s5 + $0x68] sm:$0xff]  ;;  %v7171_v26 = vld [vmem:[%s10495_s5 + $0x78] sm:$0xff] }
 0x7f8   :  { %v5627_v48 = vrot.slane %v5626_v3, 7  ;;  %v5664_v27 = vrot.slane %v5663_v17, 7  ;;  %v5728_v46 = vld [vmem:[#allocation5 + $0x9] sm:$0x1]  ;;  %v5840_v17 = vld [vmem:[#allocation5 + $0xc] sm:$0x1] }
 0x7f9   :  { %v5384_v23 = vmax.f32 %v5368_v16, %v5376_v38  ;;  %v5245_v47 = vadd.f32 %v5227_v5, %v5127_v42  ;;  %v5554_v14 = vsel %vm5413_vm7, %v5553_v60, %v5551_v0  ;;  %v5591_v31 = vsel %vm5413_vm7, %v5590_v62, %v5588_v57  ;;  %v7170_v16 = vld [vmem:[%s10495_s5 + $0x70] sm:$0xff]  ;;  %v5765_v0 = vld [vmem:[#allocation5 + $0xa] sm:$0x1]  ;;  %v5802_v57 = vld [vmem:[#allocation5 + $0xb] sm:$0x1] }
 0x7fa   :  { %v5555_v49 = vpack.c.b16 %v5554_v14, %v5554_v14  ;;  %v5592_v58 = vpack.c.b16 %v5591_v31, %v5591_v31  ;;  %v5628_v1 = vsel %vm5413_vm7, %v5627_v48, %v5625_v40  ;;  %v5730_v60 = vpack.c.bf16 %v5728_v46, %v5728_v46 }
 0x7fb   :  { %5393 = vst.msk [vmem:[#allocation5 + $0x18] sm:$0xf] %vm5386_vm6, %v5384_v23  ;;  %v5265_v9 = vadd.f32 %v10284_v29, %v5245_v47  ;;  %v5653_v29 = vld [vmem:[#allocation5 + $0x7] sm:$0x1]  ;;  %v5629_v41 = vpack.c.b16 %v5628_v1, %v5628_v1  ;;  %v5767_v62 = vpack.c.bf16 %v5765_v0, %v5765_v0  ;;  %v5804_v5 = vpack.c.bf16 %v5802_v57, %v5802_v57 }
 0x7fc   :  { %7007 = vmatmul.msk.bf16.vlgmr.msrb.gmra.mxu1 %vm5282_vm5, %v5517_v44  ;;  %7014 = vmatmul.msk.bf16.vlgmr.msra.gmra.mxu2 %vm5282_vm5, %v5555_v49  ;;  %v5655_v32 = vpack.c.bf16 %v5653_v29, %v5653_v29  ;;  %v5737_v47 = vunpack.c.l.b16 %v5730_v60  ;;  %v5842_v48 = vpack.c.bf16 %v5840_v17, %v5840_v17 }
 0x7fd   :  { %v5281_v22 = vmax.f32 %v5265_v9, 0.0  ;;  %7021 = vmatmul.msk.bf16.vlgmr.msra.gmra.mxu3 %vm5282_vm5, %v5592_v58  ;;  %5758 = vmatpush.bf16.msrb.mxu1 %v7165_v12  ;;  %v5774_v14 = vunpack.c.l.b16 %v5767_v62  ;;  %v5811_v31 = vunpack.c.l.b16 %v5804_v5  ;;  %v7178_v62 = vld [vmem:[%s10497_s7 + $0x30] sm:$0xff] }
 0x7fe   :  { %5795 = vmatpush.bf16.msra.mxu2 %v7166_v45  ;;  %5832 = vmatpush.bf16.msra.mxu3 %v7167_v30  ;;  %v5313_v59 = vld [vmem:[#allocation4 + $0x70] ss:$2 sm:$0xf]  ;;  %v5329_v4 = vld [vmem:[#allocation4 + $0x71] ss:$2 sm:$0xf]  ;;  %v5662_v33 = vunpack.c.l.b16 %v5655_v32 }
 0x7ff   :  { %5298 = vst.msk [vmem:[#allocation4 + $0x78] sm:$0xff] %vm5282_vm5, %v5281_v22  ;;  %v5369_v51 = vmax.f32 %v5313_v59, %v5329_v4  ;;  %v5914_v32 = vld [vmem:[#allocation5 + $0xe] sm:$0x1] }
 0x800   :  { %v5665_v61 = vsel %vm5413_vm7, %v5664_v27, %v5662_v33  ;;  %v5879_v27 = vpack.c.bf16 %v5877_v35, %v5877_v35  ;;  %v7187_v35 = vld [vmem:[%s10499_s9 + $0x38] sm:$0xff] }
 0x801   :  { %v5666_v8 = vpack.c.b16 %v5665_v61, %v5665_v61 }
 0x802   :  { %v5692_v21 = vld [vmem:[#allocation5 + $0x18] sm:$0x1]  ;;  %v5729_v56 = vld [vmem:[#allocation5 + $0x19] sm:$0x1]  ;;  %v5766_v54 = vld [vmem:[#allocation5 + $0x1a] sm:$0x1] }
 0x803   :  { %v5694_v63 = vpack.c.bf16 %v5692_v21, %v5692_v21  ;;  %v5803_v43 = vld [vmem:[#allocation5 + $0x1b] sm:$0x1]  ;;  %v5731_v28 = vpack.c.bf16 %v5729_v56, %v5729_v56  ;;  %v5768_v52 = vpack.c.bf16 %v5766_v54, %v5766_v54 }
 0x804   :  { %v5805_v19 = vpack.c.bf16 %v5803_v43, %v5803_v43 }
 0x805   :  { %v5701_v11 = vunpack.c.l.b16 %v5694_v63  ;;  %v5738_v10 = vunpack.c.l.b16 %v5731_v28  ;;  %v5775_v38 = vunpack.c.l.b16 %v5768_v52  ;;  %v5916_v63 = vpack.c.bf16 %v5914_v32, %v5914_v32 }
 0x806   :  { %v5345_v6 = vld [vmem:[#allocation4 + $0x78] ss:$2 sm:$0xf]  ;;  %v5361_v55 = vld [vmem:[#allocation4 + $0x79] ss:$2 sm:$0xf]  ;;  %v5812_v42 = vunpack.c.l.b16 %v5805_v19 }
 0x807   :  { %v5377_v37 = vmax.f32 %v5345_v6, %v5361_v55  ;;  %v5702_v53 = vrot.slane %v5701_v11, 7  ;;  %v5739_v24 = vrot.slane %v5738_v10, 7  ;;  %v5776_v15 = vrot.slane %v5775_v38, 7  ;;  %v7179_v38 = vld [vmem:[%s10497_s7 + $0x38] sm:$0xff] }
 0x808   :  { %v5813_v23 = vrot.slane %v5812_v42, 7  ;;  %v5849_v11 = vunpack.c.l.b16 %v5842_v48  ;;  %v5886_v6 = vunpack.c.l.b16 %v5879_v27  ;;  %v5923_v55 = vunpack.c.l.b16 %v5916_v63  ;;  %v7185_v63 = vld [vmem:[%s10499_s9 + $0x28] sm:$0xff] }
 0x809   :  { %v5385_v50 = vmax.f32 %v5369_v51, %v5377_v37  ;;  %v5703_v2 = vsel %vm5413_vm7, %v5702_v53, %v5700_v20  ;;  %v5740_v44 = vsel %vm5413_vm7, %v5739_v24, %v5737_v47  ;;  %v5777_v49 = vsel %vm5413_vm7, %v5776_v15, %v5774_v14  ;;  %v7177_v24 = vld [vmem:[%s10497_s7 + $0x28] sm:$0xff]  ;;  %v7176_v14 = vld [vmem:[%s10497_s7 + $0x20] sm:$0xff] }
 0x80a   :  { %v5704_v36 = vpack.c.b16 %v5703_v2, %v5703_v2  ;;  %v5814_v58 = vsel %vm5413_vm7, %v5813_v23, %v5811_v31  ;;  %v5741_v13 = vpack.c.b16 %v5740_v44, %v5740_v44  ;;  %v5778_v30 = vpack.c.b16 %v5777_v49, %v5777_v49  ;;  %v7175_v44 = vld [vmem:[%s10497_s7 + $0x18] sm:$0xff] }
 0x80b   :  { %5394 = vst.msk [vmem:[#allocation5 + $0x1c] sm:$0xf] %vm5386_vm6, %v5385_v50  ;;  %v5815_v22 = vpack.c.b16 %v5814_v58, %v5814_v58  ;;  %v5951_v50 = vld [vmem:[#allocation5 + $0xf] sm:$0x1] }
 0x80c   :  { %7028 = vmatmul.msk.bf16.vlgmr.msra.gmra.mxu1 %vm5282_vm5, %v5629_v41  ;;  %7035 = vmatmul.msk.bf16.vlgmr.msrb.gmra.mxu2 %vm5282_vm5, %v5666_v8  ;;  %v5953_v54 = vpack.c.bf16 %v5951_v50, %v5951_v50 }
 0x80d   :  { %7042 = vmatmul.msk.bf16.vlgmr.msrb.gmra.mxu3 %vm5282_vm5, %v5704_v36  ;;  %5870 = vmatpush.bf16.msra.mxu1 %v7168_v39 }
 0x80e   :  { %5907 = vmatpush.bf16.msrb.mxu2 %v7169_v18  ;;  %5944 = vmatpush.bf16.msrb.mxu3 %v7170_v16  ;;  %v5960_v41 = vunpack.c.l.b16 %v5953_v54 }
 0x812   :  { %v5841_v12 = vld [vmem:[#allocation5 + $0x1c] sm:$0x1]  ;;  %v5878_v45 = vld [vmem:[#allocation5 + $0x1d] sm:$0x1]  ;;  %v5915_v9 = vld [vmem:[#allocation5 + $0x1e] sm:$0x1] }
 0x813   :  { %v5843_v34 = vpack.c.bf16 %v5841_v12, %v5841_v12  ;;  %v5880_v3 = vpack.c.bf16 %v5878_v45, %v5878_v45  ;;  %v5917_v29 = vpack.c.bf16 %v5915_v9, %v5915_v9  ;;  %v5952_v37 = vld [vmem:[#allocation5 + $0x1f] sm:$0x1]  ;;  %v7174_v9 = vld [vmem:[%s10497_s7 + $0x10] sm:$0xff] }
 0x814   :  { %v5954_v56 = vpack.c.bf16 %v5952_v37, %v5952_v37 }
 0x815   :  { %v5850_v25 = vunpack.c.l.b16 %v5843_v34  ;;  %v5887_v21 = vunpack.c.l.b16 %v5880_v3  ;;  %v5924_v7 = vunpack.c.l.b16 %v5917_v29  ;;  %v7173_v3 = vld [vmem:[%s10497_s7 + $0x8] sm:$0xff] }
 0x816   :  { %v5961_v2 = vunpack.c.l.b16 %v5954_v56 }
 0x817   :  { %v5851_v59 = vrot.slane %v5850_v25, 7  ;;  %v5888_v4 = vrot.slane %v5887_v21, 7  ;;  %v5925_v40 = vrot.slane %v5924_v7, 7  ;;  %v7172_v25 = vld [vmem:[%s10497_s7] sm:$0xff]  ;;  %v7186_v21 = vld [vmem:[%s10499_s9 + $0x30] sm:$0xff] }
 0x818   :  { %v5962_v43 = vrot.slane %v5961_v2, 7  ;;  %v7193_v2 = vld [vmem:[%s10496_s6] ss:$0 sm:$0xff] }
 0x819   :  { %v5852_v33 = vsel %vm5413_vm7, %v5851_v59, %v5849_v11  ;;  %v5889_v20 = vsel %vm5413_vm7, %v5888_v4, %v5886_v6  ;;  %v5926_v51 = vsel %vm5413_vm7, %v5925_v40, %v5923_v55  ;;  %v7184_v11 = vld [vmem:[%s10499_s9 + $0x20] sm:$0xff] }
 0x81a   :  { %v5853_v1 = vpack.c.b16 %v5852_v33, %v5852_v33  ;;  %v5890_v53 = vpack.c.b16 %v5889_v20, %v5889_v20  ;;  %v5927_v61 = vpack.c.b16 %v5926_v51, %v5926_v51  ;;  %v5963_v36 = vsel %vm5413_vm7, %v5962_v43, %v5960_v41  ;;  %v7183_v20 = vld [vmem:[%s10499_s9 + $0x18] sm:$0xff] }
 0x81b   :  { %v5964_v39 = vpack.c.b16 %v5963_v36, %v5963_v36 }
 0x81c   :  { %7049 = vmatmul.msk.bf16.vlgmr.msrb.gmra.mxu1 %vm5282_vm5, %v5741_v13  ;;  %7056 = vmatmul.msk.bf16.vlgmr.msra.gmra.mxu2 %vm5282_vm5, %v5778_v30 }
 0x81d   :  { %7063 = vmatmul.msk.bf16.vlgmr.msra.gmra.mxu3 %vm5282_vm5, %v5815_v22  ;;  %5981 = vmatpush.bf16.msrb.mxu1 %v7171_v26 }
 0x81e   :  { %6063 = vmatpush.bf16.msra.mxu2 %v7179_v38  ;;  %6146 = vmatpush.bf16.msra.mxu3 %v7187_v35 }
 0x822   :  { %6064 = vmatpush.bf16.msra.mxu2 %v7178_v62  ;;  %6147 = vmatpush.bf16.msra.mxu3 %v7186_v21 }
 0x826   :  { %6065 = vmatpush.bf16.msra.mxu2 %v7177_v24  ;;  %6148 = vmatpush.bf16.msra.mxu3 %v7185_v63 }
 0x82a   :  { %6066 = vmatpush.bf16.msra.mxu2 %v7176_v14  ;;  %6149 = vmatpush.bf16.msra.mxu3 %v7184_v11 }
 0x82c   :  { %7070 = vmatmul.msk.bf16.vlgmr.msra.gmra.mxu1 %vm5282_vm5, %v5853_v1  ;;  %7077 = vmatmul.msk.bf16.vlgmr.msrb.gmra.mxu2 %vm5282_vm5, %v5890_v53  ;;  %v7182_v53 = vld [vmem:[%s10499_s9 + $0x10] sm:$0xff] }
 0x82d   :  { %7084 = vmatmul.msk.bf16.vlgmr.msrb.gmra.mxu3 %vm5282_vm5, %v5927_v61 }
 0x82e   :  { %6067 = vmatpush.bf16.msra.mxu2 %v7175_v44  ;;  %6150 = vmatpush.bf16.msra.mxu3 %v7183_v20 }
 0x832   :  { %6068 = vmatpush.bf16.msra.mxu2 %v7174_v9  ;;  %6151 = vmatpush.bf16.msra.mxu3 %v7182_v53 }
 0x836   :  { %6069 = vmatpush.bf16.msra.mxu2 %v7173_v3 }
 0x83a   :  { %6070 = vmatpush.bf16.msra.mxu2 %v7172_v25 }
 0x83c   :  { %7091 = vmatmul.msk.bf16.vlgmr.msrb.gmra.mxu1 %vm5282_vm5, %v5964_v39 }
 0x869   :  { %v5434_v18 = vpop.f32.mrf.mxu1 }
 0x86f   :  { %v5463_v8 = vpop.f32.mrf.mxu2 }
 0x870   :  { %v5499_v28 = vpop.f32.mrf.mxu3  ;;  %v5464_v31 = vadd.f32 %v5463_v8, %v5434_v18  ;;  %v7181_v8 = vld [vmem:[%s10499_s9 + $0x8] sm:$0xff] }
 0x871   :  { %v5436_v16 = vpop.f32.mrf.mxu1  ;;  %6152 = vmatpush.bf16.msra.mxu3 %v7181_v8 }
 0x872   :  { %v5503_v49 = vadd.f32 %v5499_v28, %v5464_v31  ;;  %v7180_v28 = vld [vmem:[%s10499_s9] sm:$0xff]  ;;  %s6167_s9 = sshll.u32 %s10501_s11, 4  ;;  %s6168_s9 = int_to_ptr.hbm [resolvable:$true] %s6167_s9 }
 0x873   :  { %v7194_v16 = vld [vmem:[%s10498_s8] ss:$0 sm:$0xff] }
 0x875   :  { %6153 = vmatpush.bf16.msra.mxu3 %v7180_v28 }
 0x877   :  { %v5465_v52 = vpop.f32.mrf.mxu2 }
 0x878   :  { %v5501_v19 = vpop.f32.mrf.mxu3 }
 0x879   :  { %v5536_v46 = vpop.f32.mrf.mxu1 }
 0x87a   :  { %v5540_v13 = vadd.f32 %v5536_v46, %v5503_v49 }
 0x87f   :  { %v5574_v10 = vpop.f32.mrf.mxu2 }
 0x880   :  { %v5611_v0 = vpop.f32.mrf.mxu3  ;;  %v5578_v26 = vadd.f32 %v5574_v10, %v5540_v13 }
 0x881   :  { %v5538_v57 = vpop.f32.mrf.mxu1 }
 0x882   :  { %v5615_v30 = vadd.f32 %v5611_v0, %v5578_v26  ;;  %v7195_v57 = vld [vmem:[%s10500_s10] ss:$0 sm:$0xff] }
 0x887   :  { %v5576_v42 = vpop.f32.mrf.mxu2 }
 0x888   :  { %v5613_v60 = vpop.f32.mrf.mxu3 }
 0x889   :  { %v5648_v5 = vpop.f32.mrf.mxu1 }
 0x88a   :  { %v5652_v17 = vadd.f32 %v5648_v5, %v5615_v30 }
 0x88f   :  { %v5685_v15 = vpop.f32.mrf.mxu2 }
 0x890   :  { %v5723_v23 = vpop.f32.mrf.mxu3  ;;  %v5689_v32 = vadd.f32 %v5685_v15, %v5652_v17 }
 0x891   :  { %v5650_v47 = vpop.f32.mrf.mxu1 }
 0x892   :  { %v5727_v7 = vadd.f32 %v5723_v23, %v5689_v32 }
 0x897   :  { %v5687_v58 = vpop.f32.mrf.mxu2 }
 0x898   :  { %v5725_v12 = vpop.f32.mrf.mxu3 }
 0x899   :  { %v5760_v45 = vpop.f32.mrf.mxu1 }
 0x89a   :  { %v5764_v4 = vadd.f32 %v5760_v45, %v5727_v7 }
 0x89f   :  { %v5797_v22 = vpop.f32.mrf.mxu2 }
 0x8a0   :  { %v5834_v34 = vpop.f32.mrf.mxu3  ;;  %v5801_v40 = vadd.f32 %v5797_v22, %v5764_v4 }
 0x8a1   :  { %v5762_v29 = vpop.f32.mrf.mxu1 }
 0x8a2   :  { %v5838_v6 = vadd.f32 %v5834_v34, %v5801_v40 }
 0x8a7   :  { %v5799_v48 = vpop.f32.mrf.mxu2 }
 0x8a8   :  { %v5836_v27 = vpop.f32.mrf.mxu3 }
 0x8a9   :  { %v5872_v59 = vpop.f32.mrf.mxu1 }
 0x8aa   :  { %v5876_v37 = vadd.f32 %v5872_v59, %v5838_v6 }
 0x8af   :  { %v5909_v55 = vpop.f32.mrf.mxu2 }
 0x8b0   :  { %v5946_v33 = vpop.f32.mrf.mxu3  ;;  %v5913_v1 = vadd.f32 %v5909_v55, %v5876_v37 }
 0x8b1   :  { %v5874_v51 = vpop.f32.mrf.mxu1 }
 0x8b2   :  { %v5950_v61 = vadd.f32 %v5946_v33, %v5913_v1 }
 0x8b7   :  { %v5911_v56 = vpop.f32.mrf.mxu2 }
 0x8b8   :  { %v5948_v50 = vpop.f32.mrf.mxu3 }
 0x8b9   :  { %v5983_v54 = vpop.f32.mrf.mxu1 }
 0x8ba   :  { %v5987_v43 = vadd.f32 %v5983_v54, %v5950_v61 }
 0x8bc   :  { %v5992_v41 = vadd.f32 %v7193_v2, %v5987_v43 }
 0x8be   :  { %v5993_v36 = vmax.f32 %v5992_v41, 0.0 }
 0x8c0   :  { %v5994_v39 = vpack.c.bf16 %v5993_v36, %v5993_v36 }
 0x8c1   :  { %v5985_v18 = vpop.f32.mrf.mxu1 }
 0x8c2   :  { %6071 = vmatmul.bf16.vlgmr.msra.gmra.mxu2 %v5994_v39 }
 0x945   :  { %v6072_v52 = vpop.f32.mrf.mxu2 }
 0x946   :  { %v6073_v19 = vadd.f32 %v7194_v16, %v6072_v52 }
 0x948   :  { %v6076_v46 = vmax.f32 %v6073_v19, 0.0 }
 0x94a   :  { %v6077_v10 = vpack.c.bf16 %v6076_v46, %v6076_v46 }
 0x94c   :  { %6154 = vmatmul.bf16.vlgmr.msra.gmra.mxu3 %v6077_v10 }
 0x94d   :  { %v6074_v0 = vpop.f32.mrf.mxu2 }
 0x9cf   :  { %v6155_v38 = vpop.f32.mrf.mxu3 }
 0x9d0   :  { %v6156_v42 = vadd.f32 %v7195_v57, %v6155_v38 }
 0x9d2   :  { %6159 = vst [vmem:[#allocation6] sm:$0x3] %v6156_v42 }
 0x9d3   :  { %6170 = dma.vmem_to_hbm [thread:$0]  %s6166_s24, 32, %s6168_s9, [#allocation7]  }
 0x9d7   :  { %v6157_v60 = vpop.f32.mrf.mxu3 }
 0x9d8   :  { %7230 = dma.done.wait [#allocation7], 32  }
 0x9d9   :  { %7231 = vsyncadd [#allocation7], 4294967264 }
 0x9da   :  { %6175 = vsyncpa [#allocation7], 1 }

</bundles_post_ra>
